<compile_context>
chip_gen: v7x
topology: tpu7x:2x2x1
jax: 0.10.0
libtpu: 0.0.40
codegen_flags: <defaults>
</compile_context>

<pallas_src>
import functools
import math

import jax
import jax.numpy as jnp
import numpy as np
from jax.experimental import pallas as pl
from jax.experimental.pallas import tpu as pltpu


def _round_up(x, m):
    return ((x + m - 1) // m) * m


# Fused-kernel resident set: ~6.1 MB of bf16 unrolled conv matrices + <0.3 MB
# biases/input/output/in-kernel activations (<= ~13 MB even if every operand
# were double-buffered).  24 MiB leaves ~2x headroom and stays below every
# generation's physical VMEM (v5e/v6e 128 MiB, v7x 64 MiB per TensorCore).
_COMPILER_PARAMS = pltpu.CompilerParams(vmem_limit_bytes=24 * 1024 * 1024)


# ----------------------------------------------------------------------------
# The single fused Pallas kernel
# ----------------------------------------------------------------------------

def _fused_resnet_kernel(has_down, num_taps, tap_w, *refs):
    """Whole resnet18-style forward in one VMEM-resident kernel.

    refs = [x,
            w_stempool, b_stempool,
            (w1, b1, w2, b2[, wd, bd]) for each of the 8 BasicBlocks,
            w_fc, b_fc,
            out]

    Every conv+BN has been unrolled at prep time into a dense bf16
    (H*W*Cin, OH*OW*Cout) matrix (BN scale folded into its columns), so the
    network is a chain of small MXU dots with f32 bias/ReLU/residual epilogues
    on activations that never leave VMEM/vregs.  The stem matrix emits all 9
    maxpool taps side by side (128-aligned column groups); the global average
    pool is folded into the fc weight.
    """
    x_ref, out_ref = refs[0], refs[-1]
    w = refs[1:-1]
    pos = 0

    def take():
        nonlocal pos
        r = w[pos]
        pos += 1
        return r[...]

    # --- Stem 7x7/s2 conv + BN + ReLU + 3x3/s2 maxpool: one dot + 9-way max.
    # (relu(max(taps)) == max(relu(taps)); out-of-bounds pool taps have zero
    #  weight columns and zero bias, which never win the max post-ReLU.)
    z = jnp.dot(x_ref[...], take(), preferred_element_type=jnp.float32) + take()
    act = z[:, 0:tap_w]
    for t in range(1, num_taps):
        act = jnp.maximum(act, z[:, t * tap_w:(t + 1) * tap_w])
    act = jnp.maximum(act, 0.0)                       # (MP, 256) f32

    # --- 8 BasicBlocks: conv1 -> conv2 (+ identity or 1x1-downsample shortcut).
    for hd in has_down:
        a16 = act.astype(jnp.bfloat16)
        h = jnp.maximum(
            jnp.dot(a16, take(), preferred_element_type=jnp.float32) + take(),
            0.0)
        y = jnp.dot(h.astype(jnp.bfloat16), take(),
                    preferred_element_type=jnp.float32) + take()
        if hd:
            y = y + jnp.dot(a16, take(), preferred_element_type=jnp.float32) + take()
        else:
            y = y + act
        act = jnp.maximum(y, 0.0)

    # --- fc head (global average pool already folded into the weight).
    assert pos == len(w) - 2, (pos, len(w))
    out_ref[...] = (jnp.dot(act.astype(jnp.bfloat16), take(),
                            preferred_element_type=jnp.float32) + take())


# ----------------------------------------------------------------------------
# One-time prep: unroll conv+BN into dense matrices (host-side numpy)
# ----------------------------------------------------------------------------

def _conv_bn_matrix(p, h, w, stride, pad, eps=1e-5):
    """PyTorch conv (Cout,Cin,KH,KW) + BN -> dense (H*W*Cin, OH*OW*Cout) matrix
    acting on NHWC-flattened activations, plus (1, OH*OW*Cout) f32 bias.
    BN scale is folded into the matrix columns; zero padding is encoded by the
    absent (zero) entries."""
    wt = np.asarray(p["w"], np.float32)
    scale = np.asarray(p["gamma"], np.float32) / np.sqrt(
        np.asarray(p["var"], np.float32) + eps)
    bias = (np.asarray(p["beta"], np.float32)
            - np.asarray(p["mean"], np.float32) * scale)
    cout, cin, kh, kw = wt.shape
    oh = (h + 2 * pad - kh) // stride + 1
    ow = (w + 2 * pad - kw) // stride + 1
    ws = wt * scale[:, None, None, None]
    mat = np.zeros((h * w * cin, oh * ow * cout), np.float32)
    for oy in range(oh):
        for ox in range(ow):
            col = (oy * ow + ox) * cout
            for ky in range(kh):
                iy = oy * stride - pad + ky
                if not (0 <= iy < h):
                    continue
                for kx in range(kw):
                    ix = ox * stride - pad + kx
                    if not (0 <= ix < w):
                        continue
                    row = (iy * w + ix) * cin
                    mat[row:row + cin, col:col + cout] += ws[:, :, ky, kx].T
    b = np.tile(bias, oh * ow)[None, :]
    return mat, b, oh, ow, cout


def _stem_pool_matrix(p, h, w):
    """Fuse the stem 7x7/s2/p3 conv+BN with the 3x3/s2/p1 maxpool: for each of
    the 9 pool taps, gather the stem conv matrix columns at the tap's strided
    output positions (zero columns + zero bias for out-of-bounds taps)."""
    mat, b, oh, ow, cout = _conv_bn_matrix(p, h, w, stride=2, pad=3)
    ph = (oh + 2 - 3) // 2 + 1
    pw = (ow + 2 - 3) // 2 + 1
    tap_w = ph * pw * cout
    taps_w, taps_b = [], []
    for dy in range(3):
        for dx in range(3):
            wt = np.zeros((mat.shape[0], tap_w), np.float32)
            bt = np.zeros((1, tap_w), np.float32)
            for py in range(ph):
                iy = 2 * py - 1 + dy
                if not (0 <= iy < oh):
                    continue
                for px in range(pw):
                    ix = 2 * px - 1 + dx
                    if not (0 <= ix < ow):
                        continue
                    dst = (py * pw + px) * cout
                    src = (iy * ow + ix) * cout
                    wt[:, dst:dst + cout] = mat[:, src:src + cout]
                    bt[0, dst:dst + cout] = b[0, src:src + cout]
            taps_w.append(wt)
            taps_b.append(bt)
    return (np.concatenate(taps_w, axis=1), np.concatenate(taps_b, axis=1),
            ph, pw, cout, tap_w)


def prepare_params(raw, img_hw):
    """One-time inference prep: unroll convs, fold BN, fuse stem+maxpool,
    fold avgpool into fc, cast weights to bf16, pad fc output to 128 lanes."""
    def bf16(a):
        return jnp.asarray(a, jnp.bfloat16)

    def f32(a):
        return jnp.asarray(a, jnp.float32)

    weights = []

    w_sp, b_sp, h, w, c, tap_w = _stem_pool_matrix(raw["stem"], img_hw, img_hw)
    weights += [bf16(w_sp), f32(b_sp)]

    has_down = []
    for si, stage in enumerate(raw["stages"]):
        for bi, blk in enumerate(stage):
            stride = 2 if (si > 0 and bi == 0) else 1
            m1, b1, oh, ow, _ = _conv_bn_matrix(blk["conv1"], h, w, stride, 1)
            m2, b2, _, _, c2 = _conv_bn_matrix(blk["conv2"], oh, ow, 1, 1)
            weights += [bf16(m1), f32(b1), bf16(m2), f32(b2)]
            if "down" in blk:
                md, bd, _, _, _ = _conv_bn_matrix(blk["down"], h, w, stride, 0)
                weights += [bf16(md), f32(bd)]
                has_down.append(True)
            else:
                has_down.append(False)
            h, w, c = oh, ow, c2

    # fc head with the global average pool folded into the weight
    # (logits = mean_over_spatial(act) @ fcw.T + fcb, expressed on the
    #  flattened (H*W*C) activation), output padded lane-dense to 128*k.
    fcw = np.asarray(raw["fc"]["w"], np.float32)          # (num_classes, C)
    fcb = np.asarray(raw["fc"]["b"], np.float32)
    nc = fcw.shape[0]
    ncp = _round_up(nc, 128)
    hw = h * w
    w_eff = np.zeros((hw * c, ncp), np.float32)
    for pidx in range(hw):
        w_eff[pidx * c:(pidx + 1) * c, :nc] = fcw.T / hw
    b_eff = np.zeros((1, ncp), np.float32)
    b_eff[0, :nc] = fcb
    weights += [bf16(w_eff), f32(b_eff)]

    return {"weights": tuple(weights), "has_down": tuple(has_down),
            "num_taps": 9, "tap_w": tap_w, "n_out": ncp}


# ----------------------------------------------------------------------------
# Deterministic parameter init (PyTorch layout)
# ----------------------------------------------------------------------------

def _conv_params(key, cout, cin, kh, kw):
    fan_in = cin * kh * kw
    w = jax.random.normal(key, (cout, cin, kh, kw), jnp.float32) / math.sqrt(fan_in)
    return {"w": w,
            "gamma": jnp.ones((cout,), jnp.float32),
            "beta": jnp.zeros((cout,), jnp.float32),
            "mean": jnp.zeros((cout,), jnp.float32),
            "var": jnp.ones((cout,), jnp.float32)}


def init_params(key, in_chans=4, widths=(16, 32, 64, 128), num_classes=1000):
    keys = iter(jax.random.split(key, 64))
    params = {"stem": _conv_params(next(keys), widths[0], in_chans, 7, 7)}
    stages = []
    cin = widths[0]
    for si, cout in enumerate(widths):
        blocks = []
        for bi in range(2):
            stride = 2 if (si > 0 and bi == 0) else 1
            blk = {"conv1": _conv_params(next(keys), cout, cin, 3, 3),
                   "conv2": _conv_params(next(keys), cout, cout, 3, 3)}
            if stride != 1 or cin != cout:
                blk["down"] = _conv_params(next(keys), cout, cin, 1, 1)
            blocks.append(blk)
            cin = cout
        stages.append(blocks)
    params["stages"] = stages
    in_features = widths[-1]
    params["fc"] = {"w": jax.random.normal(next(keys), (num_classes, in_features),
                                           jnp.float32) / math.sqrt(in_features),
                    "b": jnp.zeros((num_classes,), jnp.float32)}
    return params


# ----------------------------------------------------------------------------
# Forward wrapper: one transpose/flatten/pad in XLA, then one pallas_call
# ----------------------------------------------------------------------------

def build_forward(prepped, num_classes):
    kernel = functools.partial(_fused_resnet_kernel, prepped["has_down"],
                               prepped["num_taps"], prepped["tap_w"])
    n_out = prepped["n_out"]

    @jax.jit
    def forward(x_nchw, weights):
        n, c, h, wdt = x_nchw.shape
        # NCHW -> NHWC-flattened rows; pad M once to a multiple of 16 (bf16
        # sublane packing); both HBM-visible tensors are lane-dense (1024).
        x = jnp.transpose(x_nchw, (0, 2, 3, 1)).reshape(n, h * wdt * c)
        mp = _round_up(n, 16)
        xp = jnp.zeros((mp, h * wdt * c), jnp.bfloat16).at[:n].set(
            x.astype(jnp.bfloat16))
        out = pl.pallas_call(
            kernel,
            out_shape=jax.ShapeDtypeStruct((mp, n_out), jnp.float32),
            compiler_params=_COMPILER_PARAMS,
        )(xp, *weights)
        return out[:n, :num_classes]

    return forward


if __name__ == "__main__":
    key = jax.random.PRNGKey(0)
    pkey, xkey = jax.random.split(key)

    CHANNELS = 4          # config.CHANNELS
    NUM_CLASSES = 1000    # timm resnet18 default head
    IMG = 16

    raw = init_params(pkey, in_chans=CHANNELS, num_classes=NUM_CLASSES)
    prepped = prepare_params(raw, img_hw=IMG)     # one-time unroll/fold/bf16
    x = jax.random.normal(xkey, (2, CHANNELS, IMG, IMG), jnp.float32)  # NCHW

    forward = build_forward(prepped, NUM_CLASSES)
    logits = forward(x, prepped["weights"])
    logits = jax.block_until_ready(logits)

    assert logits.shape == (2, NUM_CLASSES), logits.shape
    assert logits.dtype == jnp.float32
    assert bool(jnp.all(jnp.isfinite(logits)))

    print("KERNEL_OK")
</pallas_src>

<mosaic_0001>
module attributes {stable_mosaic.version = 11 : i64} {
  func.func @_fused_resnet_kernel(%arg0: memref<16x1024xbf16, #tpu.memory_space<vmem>>, %arg1: memref<1024x2304xbf16, #tpu.memory_space<vmem>>, %arg2: memref<1x2304xf32, #tpu.memory_space<vmem>>, %arg3: memref<256x256xbf16, #tpu.memory_space<vmem>>, %arg4: memref<1x256xf32, #tpu.memory_space<vmem>>, %arg5: memref<256x256xbf16, #tpu.memory_space<vmem>>, %arg6: memref<1x256xf32, #tpu.memory_space<vmem>>, %arg7: memref<256x256xbf16, #tpu.memory_space<vmem>>, %arg8: memref<1x256xf32, #tpu.memory_space<vmem>>, %arg9: memref<256x256xbf16, #tpu.memory_space<vmem>>, %arg10: memref<1x256xf32, #tpu.memory_space<vmem>>, %arg11: memref<256x128xbf16, #tpu.memory_space<vmem>>, %arg12: memref<1x128xf32, #tpu.memory_space<vmem>>, %arg13: memref<128x128xbf16, #tpu.memory_space<vmem>>, %arg14: memref<1x128xf32, #tpu.memory_space<vmem>>, %arg15: memref<256x128xbf16, #tpu.memory_space<vmem>>, %arg16: memref<1x128xf32, #tpu.memory_space<vmem>>, %arg17: memref<128x128xbf16, #tpu.memory_space<vmem>>, %arg18: memref<1x128xf32, #tpu.memory_space<vmem>>, %arg19: memref<128x128xbf16, #tpu.memory_space<vmem>>, %arg20: memref<1x128xf32, #tpu.memory_space<vmem>>, %arg21: memref<128x64xbf16, #tpu.memory_space<vmem>>, %arg22: memref<1x64xf32, #tpu.memory_space<vmem>>, %arg23: memref<64x64xbf16, #tpu.memory_space<vmem>>, %arg24: memref<1x64xf32, #tpu.memory_space<vmem>>, %arg25: memref<128x64xbf16, #tpu.memory_space<vmem>>, %arg26: memref<1x64xf32, #tpu.memory_space<vmem>>, %arg27: memref<64x64xbf16, #tpu.memory_space<vmem>>, %arg28: memref<1x64xf32, #tpu.memory_space<vmem>>, %arg29: memref<64x64xbf16, #tpu.memory_space<vmem>>, %arg30: memref<1x64xf32, #tpu.memory_space<vmem>>, %arg31: memref<64x128xbf16, #tpu.memory_space<vmem>>, %arg32: memref<1x128xf32, #tpu.memory_space<vmem>>, %arg33: memref<128x128xbf16, #tpu.memory_space<vmem>>, %arg34: memref<1x128xf32, #tpu.memory_space<vmem>>, %arg35: memref<64x128xbf16, #tpu.memory_space<vmem>>, %arg36: memref<1x128xf32, #tpu.memory_space<vmem>>, %arg37: memref<128x128xbf16, #tpu.memory_space<vmem>>, %arg38: memref<1x128xf32, #tpu.memory_space<vmem>>, %arg39: memref<128x128xbf16, #tpu.memory_space<vmem>>, %arg40: memref<1x128xf32, #tpu.memory_space<vmem>>, %arg41: memref<128x1024xbf16, #tpu.memory_space<vmem>>, %arg42: memref<1x1024xf32, #tpu.memory_space<vmem>>, %arg43: memref<16x1024xf32, #tpu.memory_space<vmem>>) attributes {dimension_semantics = [], scalar_prefetch = 0 : i64, scratch_operands = 0 : i64, tpu.core_type = #tpu.core_type<tc>} {
    %c0 = arith.constant 0 : index
    %c0_0 = arith.constant 0 : index
    %0 = vector.load %arg0[%c0, %c0_0] : memref<16x1024xbf16, #tpu.memory_space<vmem>>, vector<16x1024xbf16>
    %c0_1 = arith.constant 0 : index
    %c0_2 = arith.constant 0 : index
    %1 = vector.load %arg1[%c0_1, %c0_2] : memref<1024x2304xbf16, #tpu.memory_space<vmem>>, vector<1024x2304xbf16>
    %cst = arith.constant dense<0.000000e+00> : vector<16x2304xf32>
    %2 = tpu.matmul %0, %1, %cst {dimension_numbers = #tpu.dot_dimension_numbers<[1], [0], [0], [1], [0, 0, 1, 1], [], []>} : vector<16x1024xbf16>, vector<1024x2304xbf16>, vector<16x2304xf32> -> vector<16x2304xf32>
    %c0_3 = arith.constant 0 : index
    %c0_4 = arith.constant 0 : index
    %3 = vector.load %arg2[%c0_3, %c0_4] : memref<1x2304xf32, #tpu.memory_space<vmem>>, vector<1x2304xf32>
    %4 = vector.broadcast %3 : vector<1x2304xf32> to vector<16x2304xf32>
    %5 = arith.addf %2, %4 : vector<16x2304xf32>
    %6 = vector.extract_strided_slice %5 {offsets = [0, 0], sizes = [16, 256], strides = [1, 1]} : vector<16x2304xf32> to vector<16x256xf32>
    %7 = vector.extract_strided_slice %5 {offsets = [0, 256], sizes = [16, 256], strides = [1, 1]} : vector<16x2304xf32> to vector<16x256xf32>
    %8 = arith.maximumf %6, %7 : vector<16x256xf32>
    %9 = vector.extract_strided_slice %5 {offsets = [0, 512], sizes = [16, 256], strides = [1, 1]} : vector<16x2304xf32> to vector<16x256xf32>
    %10 = arith.maximumf %8, %9 : vector<16x256xf32>
    %11 = vector.extract_strided_slice %5 {offsets = [0, 768], sizes = [16, 256], strides = [1, 1]} : vector<16x2304xf32> to vector<16x256xf32>
    %12 = arith.maximumf %10, %11 : vector<16x256xf32>
    %13 = vector.extract_strided_slice %5 {offsets = [0, 1024], sizes = [16, 256], strides = [1, 1]} : vector<16x2304xf32> to vector<16x256xf32>
    %14 = arith.maximumf %12, %13 : vector<16x256xf32>
    %15 = vector.extract_strided_slice %5 {offsets = [0, 1280], sizes = [16, 256], strides = [1, 1]} : vector<16x2304xf32> to vector<16x256xf32>
    %16 = arith.maximumf %14, %15 : vector<16x256xf32>
    %17 = vector.extract_strided_slice %5 {offsets = [0, 1536], sizes = [16, 256], strides = [1, 1]} : vector<16x2304xf32> to vector<16x256xf32>
    %18 = arith.maximumf %16, %17 : vector<16x256xf32>
    %19 = vector.extract_strided_slice %5 {offsets = [0, 1792], sizes = [16, 256], strides = [1, 1]} : vector<16x2304xf32> to vector<16x256xf32>
    %20 = arith.maximumf %18, %19 : vector<16x256xf32>
    %21 = vector.extract_strided_slice %5 {offsets = [0, 2048], sizes = [16, 256], strides = [1, 1]} : vector<16x2304xf32> to vector<16x256xf32>
    %22 = arith.maximumf %20, %21 : vector<16x256xf32>
    %cst_5 = arith.constant 0.000000e+00 : f32
    %23 = vector.broadcast %cst_5 : f32 to vector<16x256xf32>
    %24 = arith.maximumf %22, %23 : vector<16x256xf32>
    %25 = arith.truncf %24 : vector<16x256xf32> to vector<16x256xbf16>
    %c0_6 = arith.constant 0 : index
    %c0_7 = arith.constant 0 : index
    %26 = vector.load %arg3[%c0_6, %c0_7] : memref<256x256xbf16, #tpu.memory_space<vmem>>, vector<256x256xbf16>
    %cst_8 = arith.constant dense<0.000000e+00> : vector<16x256xf32>
    %27 = tpu.matmul %25, %26, %cst_8 {dimension_numbers = #tpu.dot_dimension_numbers<[1], [0], [0], [1], [0, 0, 1, 1], [], []>} : vector<16x256xbf16>, vector<256x256xbf16>, vector<16x256xf32> -> vector<16x256xf32>
    %c0_9 = arith.constant 0 : index
    %c0_10 = arith.constant 0 : index
    %28 = vector.load %arg4[%c0_9, %c0_10] : memref<1x256xf32, #tpu.memory_space<vmem>>, vector<1x256xf32>
    %29 = vector.broadcast %28 : vector<1x256xf32> to vector<16x256xf32>
    %30 = arith.addf %27, %29 : vector<16x256xf32>
    %cst_11 = arith.constant 0.000000e+00 : f32
    %31 = vector.broadcast %cst_11 : f32 to vector<16x256xf32>
    %32 = arith.maximumf %30, %31 : vector<16x256xf32>
    %33 = arith.truncf %32 : vector<16x256xf32> to vector<16x256xbf16>
    %c0_12 = arith.constant 0 : index
    %c0_13 = arith.constant 0 : index
    %34 = vector.load %arg5[%c0_12, %c0_13] : memref<256x256xbf16, #tpu.memory_space<vmem>>, vector<256x256xbf16>
    %cst_14 = arith.constant dense<0.000000e+00> : vector<16x256xf32>
    %35 = tpu.matmul %33, %34, %cst_14 {dimension_numbers = #tpu.dot_dimension_numbers<[1], [0], [0], [1], [0, 0, 1, 1], [], []>} : vector<16x256xbf16>, vector<256x256xbf16>, vector<16x256xf32> -> vector<16x256xf32>
    %c0_15 = arith.constant 0 : index
    %c0_16 = arith.constant 0 : index
    %36 = vector.load %arg6[%c0_15, %c0_16] : memref<1x256xf32, #tpu.memory_space<vmem>>, vector<1x256xf32>
    %37 = vector.broadcast %36 : vector<1x256xf32> to vector<16x256xf32>
    %38 = arith.addf %35, %37 : vector<16x256xf32>
    %39 = arith.addf %38, %24 : vector<16x256xf32>
    %cst_17 = arith.constant 0.000000e+00 : f32
    %40 = vector.broadcast %cst_17 : f32 to vector<16x256xf32>
    %41 = arith.maximumf %39, %40 : vector<16x256xf32>
    %42 = arith.truncf %41 : vector<16x256xf32> to vector<16x256xbf16>
    %c0_18 = arith.constant 0 : index
    %c0_19 = arith.constant 0 : index
    %43 = vector.load %arg7[%c0_18, %c0_19] : memref<256x256xbf16, #tpu.memory_space<vmem>>, vector<256x256xbf16>
    %cst_20 = arith.constant dense<0.000000e+00> : vector<16x256xf32>
    %44 = tpu.matmul %42, %43, %cst_20 {dimension_numbers = #tpu.dot_dimension_numbers<[1], [0], [0], [1], [0, 0, 1, 1], [], []>} : vector<16x256xbf16>, vector<256x256xbf16>, vector<16x256xf32> -> vector<16x256xf32>
    %c0_21 = arith.constant 0 : index
    %c0_22 = arith.constant 0 : index
    %45 = vector.load %arg8[%c0_21, %c0_22] : memref<1x256xf32, #tpu.memory_space<vmem>>, vector<1x256xf32>
    %46 = vector.broadcast %45 : vector<1x256xf32> to vector<16x256xf32>
    %47 = arith.addf %44, %46 : vector<16x256xf32>
    %cst_23 = arith.constant 0.000000e+00 : f32
    %48 = vector.broadcast %cst_23 : f32 to vector<16x256xf32>
    %49 = arith.maximumf %47, %48 : vector<16x256xf32>
    %50 = arith.truncf %49 : vector<16x256xf32> to vector<16x256xbf16>
    %c0_24 = arith.constant 0 : index
    %c0_25 = arith.constant 0 : index
    %51 = vector.load %arg9[%c0_24, %c0_25] : memref<256x256xbf16, #tpu.memory_space<vmem>>, vector<256x256xbf16>
    %cst_26 = arith.constant dense<0.000000e+00> : vector<16x256xf32>
    %52 = tpu.matmul %50, %51, %cst_26 {dimension_numbers = #tpu.dot_dimension_numbers<[1], [0], [0], [1], [0, 0, 1, 1], [], []>} : vector<16x256xbf16>, vector<256x256xbf16>, vector<16x256xf32> -> vector<16x256xf32>
    %c0_27 = arith.constant 0 : index
    %c0_28 = arith.constant 0 : index
    %53 = vector.load %arg10[%c0_27, %c0_28] : memref<1x256xf32, #tpu.memory_space<vmem>>, vector<1x256xf32>
    %54 = vector.broadcast %53 : vector<1x256xf32> to vector<16x256xf32>
    %55 = arith.addf %52, %54 : vector<16x256xf32>
    %56 = arith.addf %55, %41 : vector<16x256xf32>
    %cst_29 = arith.constant 0.000000e+00 : f32
    %57 = vector.broadcast %cst_29 : f32 to vector<16x256xf32>
    %58 = arith.maximumf %56, %57 : vector<16x256xf32>
    %59 = arith.truncf %58 : vector<16x256xf32> to vector<16x256xbf16>
    %c0_30 = arith.constant 0 : index
    %c0_31 = arith.constant 0 : index
    %60 = vector.load %arg11[%c0_30, %c0_31] : memref<256x128xbf16, #tpu.memory_space<vmem>>, vector<256x128xbf16>
    %cst_32 = arith.constant dense<0.000000e+00> : vector<16x128xf32>
    %61 = tpu.matmul %59, %60, %cst_32 {dimension_numbers = #tpu.dot_dimension_numbers<[1], [0], [0], [1], [0, 0, 1, 1], [], []>} : vector<16x256xbf16>, vector<256x128xbf16>, vector<16x128xf32> -> vector<16x128xf32>
    %c0_33 = arith.constant 0 : index
    %c0_34 = arith.constant 0 : index
    %62 = vector.load %arg12[%c0_33, %c0_34] : memref<1x128xf32, #tpu.memory_space<vmem>>, vector<1x128xf32>
    %63 = vector.broadcast %62 : vector<1x128xf32> to vector<16x128xf32>
    %64 = arith.addf %61, %63 : vector<16x128xf32>
    %cst_35 = arith.constant 0.000000e+00 : f32
    %65 = vector.broadcast %cst_35 : f32 to vector<16x128xf32>
    %66 = arith.maximumf %64, %65 : vector<16x128xf32>
    %67 = arith.truncf %66 : vector<16x128xf32> to vector<16x128xbf16>
    %c0_36 = arith.constant 0 : index
    %c0_37 = arith.constant 0 : index
    %68 = vector.load %arg13[%c0_36, %c0_37] : memref<128x128xbf16, #tpu.memory_space<vmem>>, vector<128x128xbf16>
    %cst_38 = arith.constant dense<0.000000e+00> : vector<16x128xf32>
    %69 = tpu.matmul %67, %68, %cst_38 {dimension_numbers = #tpu.dot_dimension_numbers<[1], [0], [0], [1], [0, 0, 1, 1], [], []>} : vector<16x128xbf16>, vector<128x128xbf16>, vector<16x128xf32> -> vector<16x128xf32>
    %c0_39 = arith.constant 0 : index
    %c0_40 = arith.constant 0 : index
    %70 = vector.load %arg14[%c0_39, %c0_40] : memref<1x128xf32, #tpu.memory_space<vmem>>, vector<1x128xf32>
    %71 = vector.broadcast %70 : vector<1x128xf32> to vector<16x128xf32>
    %72 = arith.addf %69, %71 : vector<16x128xf32>
    %c0_41 = arith.constant 0 : index
    %c0_42 = arith.constant 0 : index
    %73 = vector.load %arg15[%c0_41, %c0_42] : memref<256x128xbf16, #tpu.memory_space<vmem>>, vector<256x128xbf16>
    %cst_43 = arith.constant dense<0.000000e+00> : vector<16x128xf32>
    %74 = tpu.matmul %59, %73, %cst_43 {dimension_numbers = #tpu.dot_dimension_numbers<[1], [0], [0], [1], [0, 0, 1, 1], [], []>} : vector<16x256xbf16>, vector<256x128xbf16>, vector<16x128xf32> -> vector<16x128xf32>
    %75 = arith.addf %72, %74 : vector<16x128xf32>
    %c0_44 = arith.constant 0 : index
    %c0_45 = arith.constant 0 : index
    %76 = vector.load %arg16[%c0_44, %c0_45] : memref<1x128xf32, #tpu.memory_space<vmem>>, vector<1x128xf32>
    %77 = vector.broadcast %76 : vector<1x128xf32> to vector<16x128xf32>
    %78 = arith.addf %75, %77 : vector<16x128xf32>
    %cst_46 = arith.constant 0.000000e+00 : f32
    %79 = vector.broadcast %cst_46 : f32 to vector<16x128xf32>
    %80 = arith.maximumf %78, %79 : vector<16x128xf32>
    %81 = arith.truncf %80 : vector<16x128xf32> to vector<16x128xbf16>
    %c0_47 = arith.constant 0 : index
    %c0_48 = arith.constant 0 : index
    %82 = vector.load %arg17[%c0_47, %c0_48] : memref<128x128xbf16, #tpu.memory_space<vmem>>, vector<128x128xbf16>
    %cst_49 = arith.constant dense<0.000000e+00> : vector<16x128xf32>
    %83 = tpu.matmul %81, %82, %cst_49 {dimension_numbers = #tpu.dot_dimension_numbers<[1], [0], [0], [1], [0, 0, 1, 1], [], []>} : vector<16x128xbf16>, vector<128x128xbf16>, vector<16x128xf32> -> vector<16x128xf32>
    %c0_50 = arith.constant 0 : index
    %c0_51 = arith.constant 0 : index
    %84 = vector.load %arg18[%c0_50, %c0_51] : memref<1x128xf32, #tpu.memory_space<vmem>>, vector<1x128xf32>
    %85 = vector.broadcast %84 : vector<1x128xf32> to vector<16x128xf32>
    %86 = arith.addf %83, %85 : vector<16x128xf32>
    %cst_52 = arith.constant 0.000000e+00 : f32
    %87 = vector.broadcast %cst_52 : f32 to vector<16x128xf32>
    %88 = arith.maximumf %86, %87 : vector<16x128xf32>
    %89 = arith.truncf %88 : vector<16x128xf32> to vector<16x128xbf16>
    %c0_53 = arith.constant 0 : index
    %c0_54 = arith.constant 0 : index
    %90 = vector.load %arg19[%c0_53, %c0_54] : memref<128x128xbf16, #tpu.memory_space<vmem>>, vector<128x128xbf16>
    %cst_55 = arith.constant dense<0.000000e+00> : vector<16x128xf32>
    %91 = tpu.matmul %89, %90, %cst_55 {dimension_numbers = #tpu.dot_dimension_numbers<[1], [0], [0], [1], [0, 0, 1, 1], [], []>} : vector<16x128xbf16>, vector<128x128xbf16>, vector<16x128xf32> -> vector<16x128xf32>
    %c0_56 = arith.constant 0 : index
    %c0_57 = arith.constant 0 : index
    %92 = vector.load %arg20[%c0_56, %c0_57] : memref<1x128xf32, #tpu.memory_space<vmem>>, vector<1x128xf32>
    %93 = vector.broadcast %92 : vector<1x128xf32> to vector<16x128xf32>
    %94 = arith.addf %91, %93 : vector<16x128xf32>
    %95 = arith.addf %94, %80 : vector<16x128xf32>
    %cst_58 = arith.constant 0.000000e+00 : f32
    %96 = vector.broadcast %cst_58 : f32 to vector<16x128xf32>
    %97 = arith.maximumf %95, %96 : vector<16x128xf32>
    %98 = arith.truncf %97 : vector<16x128xf32> to vector<16x128xbf16>
    %c0_59 = arith.constant 0 : index
    %c0_60 = arith.constant 0 : index
    %99 = vector.load %arg21[%c0_59, %c0_60] : memref<128x64xbf16, #tpu.memory_space<vmem>>, vector<128x64xbf16>
    %cst_61 = arith.constant dense<0.000000e+00> : vector<16x64xf32>
    %100 = tpu.matmul %98, %99, %cst_61 {dimension_numbers = #tpu.dot_dimension_numbers<[1], [0], [0], [1], [0, 0, 1, 1], [], []>} : vector<16x128xbf16>, vector<128x64xbf16>, vector<16x64xf32> -> vector<16x64xf32>
    %c0_62 = arith.constant 0 : index
    %c0_63 = arith.constant 0 : index
    %101 = vector.load %arg22[%c0_62, %c0_63] : memref<1x64xf32, #tpu.memory_space<vmem>>, vector<1x64xf32>
    %102 = vector.broadcast %101 : vector<1x64xf32> to vector<16x64xf32>
    %103 = arith.addf %100, %102 : vector<16x64xf32>
    %cst_64 = arith.constant 0.000000e+00 : f32
    %104 = vector.broadcast %cst_64 : f32 to vector<16x64xf32>
    %105 = arith.maximumf %103, %104 : vector<16x64xf32>
    %106 = arith.truncf %105 : vector<16x64xf32> to vector<16x64xbf16>
    %c0_65 = arith.constant 0 : index
    %c0_66 = arith.constant 0 : index
    %107 = vector.load %arg23[%c0_65, %c0_66] : memref<64x64xbf16, #tpu.memory_space<vmem>>, vector<64x64xbf16>
    %cst_67 = arith.constant dense<0.000000e+00> : vector<16x64xf32>
    %108 = tpu.matmul %106, %107, %cst_67 {dimension_numbers = #tpu.dot_dimension_numbers<[1], [0], [0], [1], [0, 0, 1, 1], [], []>} : vector<16x64xbf16>, vector<64x64xbf16>, vector<16x64xf32> -> vector<16x64xf32>
    %c0_68 = arith.constant 0 : index
    %c0_69 = arith.constant 0 : index
    %109 = vector.load %arg24[%c0_68, %c0_69] : memref<1x64xf32, #tpu.memory_space<vmem>>, vector<1x64xf32>
    %110 = vector.broadcast %109 : vector<1x64xf32> to vector<16x64xf32>
    %111 = arith.addf %108, %110 : vector<16x64xf32>
    %c0_70 = arith.constant 0 : index
    %c0_71 = arith.constant 0 : index
    %112 = vector.load %arg25[%c0_70, %c0_71] : memref<128x64xbf16, #tpu.memory_space<vmem>>, vector<128x64xbf16>
    %cst_72 = arith.constant dense<0.000000e+00> : vector<16x64xf32>
    %113 = tpu.matmul %98, %112, %cst_72 {dimension_numbers = #tpu.dot_dimension_numbers<[1], [0], [0], [1], [0, 0, 1, 1], [], []>} : vector<16x128xbf16>, vector<128x64xbf16>, vector<16x64xf32> -> vector<16x64xf32>
    %114 = arith.addf %111, %113 : vector<16x64xf32>
    %c0_73 = arith.constant 0 : index
    %c0_74 = arith.constant 0 : index
    %115 = vector.load %arg26[%c0_73, %c0_74] : memref<1x64xf32, #tpu.memory_space<vmem>>, vector<1x64xf32>
    %116 = vector.broadcast %115 : vector<1x64xf32> to vector<16x64xf32>
    %117 = arith.addf %114, %116 : vector<16x64xf32>
    %cst_75 = arith.constant 0.000000e+00 : f32
    %118 = vector.broadcast %cst_75 : f32 to vector<16x64xf32>
    %119 = arith.maximumf %117, %118 : vector<16x64xf32>
    %120 = arith.truncf %119 : vector<16x64xf32> to vector<16x64xbf16>
    %c0_76 = arith.constant 0 : index
    %c0_77 = arith.constant 0 : index
    %121 = vector.load %arg27[%c0_76, %c0_77] : memref<64x64xbf16, #tpu.memory_space<vmem>>, vector<64x64xbf16>
    %cst_78 = arith.constant dense<0.000000e+00> : vector<16x64xf32>
    %122 = tpu.matmul %120, %121, %cst_78 {dimension_numbers = #tpu.dot_dimension_numbers<[1], [0], [0], [1], [0, 0, 1, 1], [], []>} : vector<16x64xbf16>, vector<64x64xbf16>, vector<16x64xf32> -> vector<16x64xf32>
    %c0_79 = arith.constant 0 : index
    %c0_80 = arith.constant 0 : index
    %123 = vector.load %arg28[%c0_79, %c0_80] : memref<1x64xf32, #tpu.memory_space<vmem>>, vector<1x64xf32>
    %124 = vector.broadcast %123 : vector<1x64xf32> to vector<16x64xf32>
    %125 = arith.addf %122, %124 : vector<16x64xf32>
    %cst_81 = arith.constant 0.000000e+00 : f32
    %126 = vector.broadcast %cst_81 : f32 to vector<16x64xf32>
    %127 = arith.maximumf %125, %126 : vector<16x64xf32>
    %128 = arith.truncf %127 : vector<16x64xf32> to vector<16x64xbf16>
    %c0_82 = arith.constant 0 : index
    %c0_83 = arith.constant 0 : index
    %129 = vector.load %arg29[%c0_82, %c0_83] : memref<64x64xbf16, #tpu.memory_space<vmem>>, vector<64x64xbf16>
    %cst_84 = arith.constant dense<0.000000e+00> : vector<16x64xf32>
    %130 = tpu.matmul %128, %129, %cst_84 {dimension_numbers = #tpu.dot_dimension_numbers<[1], [0], [0], [1], [0, 0, 1, 1], [], []>} : vector<16x64xbf16>, vector<64x64xbf16>, vector<16x64xf32> -> vector<16x64xf32>
    %c0_85 = arith.constant 0 : index
    %c0_86 = arith.constant 0 : index
    %131 = vector.load %arg30[%c0_85, %c0_86] : memref<1x64xf32, #tpu.memory_space<vmem>>, vector<1x64xf32>
    %132 = vector.broadcast %131 : vector<1x64xf32> to vector<16x64xf32>
    %133 = arith.addf %130, %132 : vector<16x64xf32>
    %134 = arith.addf %133, %119 : vector<16x64xf32>
    %cst_87 = arith.constant 0.000000e+00 : f32
    %135 = vector.broadcast %cst_87 : f32 to vector<16x64xf32>
    %136 = arith.maximumf %134, %135 : vector<16x64xf32>
    %137 = arith.truncf %136 : vector<16x64xf32> to vector<16x64xbf16>
    %c0_88 = arith.constant 0 : index
    %c0_89 = arith.constant 0 : index
    %138 = vector.load %arg31[%c0_88, %c0_89] : memref<64x128xbf16, #tpu.memory_space<vmem>>, vector<64x128xbf16>
    %cst_90 = arith.constant dense<0.000000e+00> : vector<16x128xf32>
    %139 = tpu.matmul %137, %138, %cst_90 {dimension_numbers = #tpu.dot_dimension_numbers<[1], [0], [0], [1], [0, 0, 1, 1], [], []>} : vector<16x64xbf16>, vector<64x128xbf16>, vector<16x128xf32> -> vector<16x128xf32>
    %c0_91 = arith.constant 0 : index
    %c0_92 = arith.constant 0 : index
    %140 = vector.load %arg32[%c0_91, %c0_92] : memref<1x128xf32, #tpu.memory_space<vmem>>, vector<1x128xf32>
    %141 = vector.broadcast %140 : vector<1x128xf32> to vector<16x128xf32>
    %142 = arith.addf %139, %141 : vector<16x128xf32>
    %cst_93 = arith.constant 0.000000e+00 : f32
    %143 = vector.broadcast %cst_93 : f32 to vector<16x128xf32>
    %144 = arith.maximumf %142, %143 : vector<16x128xf32>
    %145 = arith.truncf %144 : vector<16x128xf32> to vector<16x128xbf16>
    %c0_94 = arith.constant 0 : index
    %c0_95 = arith.constant 0 : index
    %146 = vector.load %arg33[%c0_94, %c0_95] : memref<128x128xbf16, #tpu.memory_space<vmem>>, vector<128x128xbf16>
    %cst_96 = arith.constant dense<0.000000e+00> : vector<16x128xf32>
    %147 = tpu.matmul %145, %146, %cst_96 {dimension_numbers = #tpu.dot_dimension_numbers<[1], [0], [0], [1], [0, 0, 1, 1], [], []>} : vector<16x128xbf16>, vector<128x128xbf16>, vector<16x128xf32> -> vector<16x128xf32>
    %c0_97 = arith.constant 0 : index
    %c0_98 = arith.constant 0 : index
    %148 = vector.load %arg34[%c0_97, %c0_98] : memref<1x128xf32, #tpu.memory_space<vmem>>, vector<1x128xf32>
    %149 = vector.broadcast %148 : vector<1x128xf32> to vector<16x128xf32>
    %150 = arith.addf %147, %149 : vector<16x128xf32>
    %c0_99 = arith.constant 0 : index
    %c0_100 = arith.constant 0 : index
    %151 = vector.load %arg35[%c0_99, %c0_100] : memref<64x128xbf16, #tpu.memory_space<vmem>>, vector<64x128xbf16>
    %cst_101 = arith.constant dense<0.000000e+00> : vector<16x128xf32>
    %152 = tpu.matmul %137, %151, %cst_101 {dimension_numbers = #tpu.dot_dimension_numbers<[1], [0], [0], [1], [0, 0, 1, 1], [], []>} : vector<16x64xbf16>, vector<64x128xbf16>, vector<16x128xf32> -> vector<16x128xf32>
    %153 = arith.addf %150, %152 : vector<16x128xf32>
    %c0_102 = arith.constant 0 : index
    %c0_103 = arith.constant 0 : index
    %154 = vector.load %arg36[%c0_102, %c0_103] : memref<1x128xf32, #tpu.memory_space<vmem>>, vector<1x128xf32>
    %155 = vector.broadcast %154 : vector<1x128xf32> to vector<16x128xf32>
    %156 = arith.addf %153, %155 : vector<16x128xf32>
    %cst_104 = arith.constant 0.000000e+00 : f32
    %157 = vector.broadcast %cst_104 : f32 to vector<16x128xf32>
    %158 = arith.maximumf %156, %157 : vector<16x128xf32>
    %159 = arith.truncf %158 : vector<16x128xf32> to vector<16x128xbf16>
    %c0_105 = arith.constant 0 : index
    %c0_106 = arith.constant 0 : index
    %160 = vector.load %arg37[%c0_105, %c0_106] : memref<128x128xbf16, #tpu.memory_space<vmem>>, vector<128x128xbf16>
    %cst_107 = arith.constant dense<0.000000e+00> : vector<16x128xf32>
    %161 = tpu.matmul %159, %160, %cst_107 {dimension_numbers = #tpu.dot_dimension_numbers<[1], [0], [0], [1], [0, 0, 1, 1], [], []>} : vector<16x128xbf16>, vector<128x128xbf16>, vector<16x128xf32> -> vector<16x128xf32>
    %c0_108 = arith.constant 0 : index
    %c0_109 = arith.constant 0 : index
    %162 = vector.load %arg38[%c0_108, %c0_109] : memref<1x128xf32, #tpu.memory_space<vmem>>, vector<1x128xf32>
    %163 = vector.broadcast %162 : vector<1x128xf32> to vector<16x128xf32>
    %164 = arith.addf %161, %163 : vector<16x128xf32>
    %cst_110 = arith.constant 0.000000e+00 : f32
    %165 = vector.broadcast %cst_110 : f32 to vector<16x128xf32>
    %166 = arith.maximumf %164, %165 : vector<16x128xf32>
    %167 = arith.truncf %166 : vector<16x128xf32> to vector<16x128xbf16>
    %c0_111 = arith.constant 0 : index
    %c0_112 = arith.constant 0 : index
    %168 = vector.load %arg39[%c0_111, %c0_112] : memref<128x128xbf16, #tpu.memory_space<vmem>>, vector<128x128xbf16>
    %cst_113 = arith.constant dense<0.000000e+00> : vector<16x128xf32>
    %169 = tpu.matmul %167, %168, %cst_113 {dimension_numbers = #tpu.dot_dimension_numbers<[1], [0], [0], [1], [0, 0, 1, 1], [], []>} : vector<16x128xbf16>, vector<128x128xbf16>, vector<16x128xf32> -> vector<16x128xf32>
    %c0_114 = arith.constant 0 : index
    %c0_115 = arith.constant 0 : index
    %170 = vector.load %arg40[%c0_114, %c0_115] : memref<1x128xf32, #tpu.memory_space<vmem>>, vector<1x128xf32>
    %171 = vector.broadcast %170 : vector<1x128xf32> to vector<16x128xf32>
    %172 = arith.addf %169, %171 : vector<16x128xf32>
    %173 = arith.addf %172, %158 : vector<16x128xf32>
    %cst_116 = arith.constant 0.000000e+00 : f32
    %174 = vector.broadcast %cst_116 : f32 to vector<16x128xf32>
    %175 = arith.maximumf %173, %174 : vector<16x128xf32>
    %176 = arith.truncf %175 : vector<16x128xf32> to vector<16x128xbf16>
    %c0_117 = arith.constant 0 : index
    %c0_118 = arith.constant 0 : index
    %177 = vector.load %arg41[%c0_117, %c0_118] : memref<128x1024xbf16, #tpu.memory_space<vmem>>, vector<128x1024xbf16>
    %cst_119 = arith.constant dense<0.000000e+00> : vector<16x1024xf32>
    %178 = tpu.matmul %176, %177, %cst_119 {dimension_numbers = #tpu.dot_dimension_numbers<[1], [0], [0], [1], [0, 0, 1, 1], [], []>} : vector<16x128xbf16>, vector<128x1024xbf16>, vector<16x1024xf32> -> vector<16x1024xf32>
    %c0_120 = arith.constant 0 : index
    %c0_121 = arith.constant 0 : index
    %179 = vector.load %arg42[%c0_120, %c0_121] : memref<1x1024xf32, #tpu.memory_space<vmem>>, vector<1x1024xf32>
    %180 = vector.broadcast %179 : vector<1x1024xf32> to vector<16x1024xf32>
    %181 = arith.addf %178, %180 : vector<16x1024xf32>
    %c0_122 = arith.constant 0 : index
    %c0_123 = arith.constant 0 : index
    %182 = vector.load %arg43[%c0_122, %c0_123] : memref<16x1024xf32, #tpu.memory_space<vmem>>, vector<16x1024xf32>
    tpu.vector_store %arg43[%c0_122, %c0_123], %181 {strides = array<i32>} : memref<16x1024xf32, #tpu.memory_space<vmem>>, vector<16x1024xf32>,
    return
  }
}

</mosaic_0001>

<bundles_post_ra>
// kernel: forward.1
= control target key start
LH: loop header
LB: loop body
LE: loop exit
PB: predicated region body
PF: predicated region fallthrough
CT: control target
= control target key end

     0   :  { %s17783_s6 = smov 1   ;;  %s17784_s10 = smov 2   ;;  %s18899_s0 = inlined_call_operand.smem [shape: u32[44], index: -1, kind: input, shape index: {}] }
   0x1   :  { %s17885_s5 = sld [smem:[%s18899_s0]]   ;;  %s17785_s14 = smov 3  }
   0x2   :  { %s17890_s9 = sld [smem:[%s18899_s0 + %s17783_s6]]   ;;  %s17786_s18 = smov 4  }
   0x3   :  { %s17895_s13 = sld [smem:[%s18899_s0 + %s17784_s10]]   ;;  %s17787_s22 = smov 5  }
   0x4   :  { %s17900_s17 = sld [smem:[%s18899_s0 + %s17785_s14]]   ;;  %s17788_s26 = smov 6  }
   0x5   :  { %s17905_s21 = sld [smem:[%s18899_s0 + %s17786_s18]]   ;;  %s17789_s30 = smov 7  }
   0x6   :  { %s17910_s25 = sld [smem:[%s18899_s0 + %s17787_s22]]   ;;  %s17790_s4 = smov 8  }
   0x7   :  { %18926 = sst [smem:[#allocation84_spill]] %s17885_s5  ;;  %s17791_s10 = smov 9  }
   0x8   :  { %18927 = sst [smem:[#allocation85_spill]] %s17890_s9  ;;  %s17792_s15 = smov 10  }
   0x9   :  { %s17915_s29 = sld [smem:[%s18899_s0 + %s17788_s26]]   ;;  %s17793_s20 = smov 11  }
   0xa   :  { %18928 = sst [smem:[#allocation86_spill]] %s17900_s17  ;;  %s17794_s26 = smov 12  }
   0xb   :  { %s17920_s3 = sld [smem:[%s18899_s0 + %s17789_s30]]   ;;  %s17795_s1 = smov 13  }
   0xc   :  { %18929 = sst [smem:[#allocation87_spill]] %s17910_s25  ;;  %s17796_s7 = smov 14  }
   0xd   :  { %s17925_s8 = sld [smem:[%s18899_s0 + %s17790_s4]]   ;;  %s17798_s22 = smov 16  }
   0xe   :  { %s17930_s14 = sld [smem:[%s18899_s0 + %s17791_s10]]   ;;  %s17799_s28 = smov 17  }
   0xf   :  { %s17935_s19 = sld [smem:[%s18899_s0 + %s17792_s15]]   ;;  %s17797_s15 = smov 15  }
  0x10   :  { %s17940_s24 = sld [smem:[%s18899_s0 + %s17793_s20]]  }
  0x11   :  { %18930 = sst [smem:[#allocation88_spill]] %s17920_s3 }
  0x12   :  { %s17945_s30 = sld [smem:[%s18899_s0 + %s17794_s26]]  }
  0x13   :  { %s17950_s6 = sld [smem:[%s18899_s0 + %s17795_s1]]  }
  0x14   :  { %18931 = sst [smem:[#allocation89_spill]] %s17930_s14 }
  0x15   :  { %s17955_s12 = sld [smem:[%s18899_s0 + %s17796_s7]]   ;;  %s17800_s7 = smov 18  }
  0x16   :  { %18932 = sst [smem:[#allocation90_spill]] %s17940_s24 }
  0x17   :  { %s17960_s20 = sld [smem:[%s18899_s0 + %s17797_s15]]   ;;  %s17801_s15 = smov 19  }
  0x18   :  { %s17965_s27 = sld [smem:[%s18899_s0 + %s17798_s22]]   ;;  %s17802_s22 = smov 20  }
  0x19   :  { %18933 = sst [smem:[#allocation91_spill]] %s17950_s6 }
  0x1a   :  { %s17970_s4 = sld [smem:[%s18899_s0 + %s17799_s28]]   ;;  %s17803_s28 = smov 21  }
  0x1b   :  { %s17975_s5 = sld [smem:[%s18899_s0 + %s17800_s7]]   ;;  %s17804_s7 = smov 22  }
  0x1c   :  { %s17985_s6 = sld [smem:[%s18899_s0 + %s17802_s22]]   ;;  %s17806_s22 = smov 24  }
  0x1d   :  { %18934 = sst [smem:[#allocation92_spill]] %s17960_s20 }
  0x1e   :  { %s17980_s20 = sld [smem:[%s18899_s0 + %s17801_s15]]   ;;  %s17805_s15 = smov 23  }
  0x1f   :  { %s17995_s24 = sld [smem:[%s18899_s0 + %s17804_s7]]   ;;  %s17808_s7 = smov 26  }
  0x20   :  { %18935 = sst [smem:[#allocation93_spill]] %s17970_s4 }
  0x21   :  { %s17990_s4 = sld [smem:[%s18899_s0 + %s17803_s28]]   ;;  %s17807_s28 = smov 25  }
  0x22   :  { %s18005_s14 = sld [smem:[%s18899_s0 + %s17806_s22]]   ;;  %s17810_s22 = smov 28  }
  0x24   :  { %18936 = sst [smem:[#allocation94_spill]] %s17980_s20 }
  0x25   :  { %18938 = sst [smem:[#allocation96_spill]] %s17995_s24 }
  0x26   :  { %s18000_s20 = sld [smem:[%s18899_s0 + %s17805_s15]]   ;;  %s17809_s15 = smov 27  }
  0x27   :  { %18937 = sst [smem:[#allocation95_spill]] %s17990_s4 }
  0x28   :  { %18939 = sst [smem:[#allocation97_spill]] %s18005_s14 }
  0x29   :  { %s18010_s4 = sld [smem:[%s18899_s0 + %s17807_s28]]   ;;  %s17811_s28 = smov 29  }
  0x2a   :  { %s18015_s24 = sld [smem:[%s18899_s0 + %s17808_s7]]   ;;  %s17812_s7 = smov 30  }
  0x2b   :  { %s18020_s3 = sld [smem:[%s18899_s0 + %s17809_s15]]   ;;  %s17813_s15 = smov 31  }
  0x2c   :  { %s18025_s14 = sld [smem:[%s18899_s0 + %s17810_s22]]   ;;  %s17814_s22 = smov 32  }
  0x2d   :  { %s18035_s25 = sld [smem:[%s18899_s0 + %s17812_s7]]   ;;  %s17816_s7 = smov 34  }
  0x2e   :  { %s18045_s17 = sld [smem:[%s18899_s0 + %s17814_s22]]   ;;  %s17818_s22 = smov 36  }
  0x2f   :  { %18940 = sst [smem:[#allocation98_spill]] %s18010_s4 }
  0x30   :  { %s18030_s4 = sld [smem:[%s18899_s0 + %s17811_s28]]   ;;  %s17815_s28 = smov 33  }
  0x31   :  { %18941 = sst [smem:[#allocation99_spill]] %s18020_s3 }
  0x32   :  { %s18040_s3 = sld [smem:[%s18899_s0 + %s17813_s15]]   ;;  %s17817_s15 = smov 35  }
  0x33   :  { %s18055_s9 = sld [smem:[%s18899_s0 + %s17816_s7]]   ;;  %s17820_s7 = smov 38  }
  0x34   :  { %18944 = sst [smem:[#allocation102_spill]] %s18045_s17 }
  0x35   :  { %s18065_s17 = sld [smem:[%s18899_s0 + %s17818_s22]]   ;;  %s17822_s22 = smov 40  }
  0x36   :  { %18942 = sst [smem:[#allocation100_spill]] %s18030_s4 }
  0x37   :  { %s18050_s4 = sld [smem:[%s18899_s0 + %s17815_s28]]   ;;  %s17819_s28 = smov 37  }
  0x38   :  { %18943 = sst [smem:[#allocation101_spill]] %s18040_s3 }
  0x39   :  { %18946 = sst [smem:[#allocation104_spill]] %s18055_s9 }
  0x3a   :  { %s18060_s3 = sld [smem:[%s18899_s0 + %s17817_s15]]   ;;  %s17821_s15 = smov 39  }
  0x3b   :  { %18948 = sst [smem:[#allocation106_spill]] %s18065_s17 }
  0x3c   :  { %s18075_s9 = sld [smem:[%s18899_s0 + %s17820_s7]]   ;;  %s17824_s7 = smov 42  }
  0x3d   :  { %18945 = sst [smem:[#allocation103_spill]] %s18050_s4 }
  0x3e   :  { %s18070_s4 = sld [smem:[%s18899_s0 + %s17819_s28]]   ;;  %s17823_s28 = smov 41  }
  0x3f   :  { %s18085_s17 = sld [smem:[%s18899_s0 + %s17822_s22]]  }
  0x40   :  { %18947 = sst [smem:[#allocation105_spill]] %s18060_s3 }
  0x41   :  { %s18080_s3 = sld [smem:[%s18899_s0 + %s17821_s15]]   ;;  %s17825_s15 = smov 43  }
  0x42   :  { %18950 = sst [smem:[#allocation108_spill]] %s18075_s9 }
  0x43   :  { %s18095_s9 = sld [smem:[%s18899_s0 + %s17824_s7]]  }
  0x44   :  { %18949 = sst [smem:[#allocation107_spill]] %s18070_s4 }
  0x45   :  { %s18090_s4 = sld [smem:[%s18899_s0 + %s17823_s28]]  }
  0x47   :  { %18951 = sst [smem:[#allocation109_spill]] %s18080_s3 }
  0x48   :  { %s18100_s3 = sld [smem:[%s18899_s0 + %s17825_s15]]  }
  0x49   :  { %92 = vsyncpa [#allocation3], 0 }
  0x4a   :  { %93 = vsyncpa [#allocation5], 0 }
  0x4b   :  { %94 = vsyncpa [#allocation8], 0 }
  0x4c   :  { %95 = vsyncpa [#allocation11], 0 }
  0x4d   :  { %96 = vsyncpa [#allocation14], 0 }
  0x4e   :  { %97 = vsyncpa [#allocation17], 0 }
  0x4f   :  { %98 = vsyncpa [#allocation20], 0 }
  0x50   :  { %99 = vsyncpa [#allocation23], 0 }
  0x51   :  { %100 = vsyncpa [#allocation26], 0 }
  0x52   :  { %101 = vsyncpa [#allocation29], 0 }
  0x53   :  { %102 = vsyncpa [#allocation32], 0 }
  0x54   :  { %103 = vsyncpa [#allocation35], 0 }
  0x55   :  { %104 = vsyncpa [#allocation38], 0 }
  0x56   :  { %105 = vsyncpa [#allocation41], 0 }
  0x57   :  { %106 = vsyncpa [#allocation44], 0 }
  0x58   :  { %107 = vsyncpa [#allocation47], 0 }
  0x59   :  { %108 = vsyncpa [#allocation50], 0 }
  0x5a   :  { %109 = vsyncpa [#allocation53], 0 }
  0x5b   :  { %110 = vsyncpa [#allocation56], 0 }
  0x5c   :  { %111 = vsyncpa [#allocation59], 0 }
  0x5d   :  { %112 = vsyncpa [#allocation62], 0  ;;  %s17826_s0 = smov [#allocation4]   ;;  %s17827_s23 = smov [#allocation7]  }
  0x5e   :  { %s133_s22 = sshll.u32 %s17826_s0, 4  ;;  %s155_s26 = sshll.u32 %s17827_s23, 4  ;;  %s134_s22 = int_to_ptr.vmem [resolvable:$true] %s133_s22  ;;  %s156_s26 = int_to_ptr.vmem [resolvable:$true] %s155_s26 }
  0x5f   :  { %s16861_s28 = scalar_lea.hbm %s17895_s13, 288 }
  0x60   :  { %p16862_p0 = scmp.ne.s32.totalorder %s17895_s13, %s16861_s28  ;;  %p16865_p1 = scmp.lt.u32.totalorder %s16861_s28, %s17895_s13 }
  0x62   :  { %p16867_p2 = pnand %p16865_p1, %p16862_p0 }
  0x64   :  { %16870 = shalt.err (!%p16867_p2)
}
  0x65   :  { %s16871_s1 = scalar_lea.vmem %s134_s22, 288  ;;  %p16876_p4 = scmp.lt.s32.totalorder %s134_s22, %s134_s22 }
  0x66   :  { %p16872_p3 = scmp.ne.s32.totalorder %s134_s22, %s16871_s1  ;;  %p16877_p5 = scmp.lt.s32.totalorder %s16871_s1, %s16871_s1 }
  0x68   :  { %p16878_p6 = por %p16877_p5, %p16876_p4 }
  0x6a   :  { %p16879_p7 = pnand %p16878_p6, %p16872_p3 }
  0x6c   :  { %16882 = shalt.err (!%p16879_p7)
}
  0x6d   :  { %136 = dma.hbm_to_vmem [thread:$0]  %s17895_s13, 288, %s134_s22, [#allocation5]  }
  0x6e   :  { %s16883_s2 = scalar_lea.hbm %s17905_s21, 32 }
  0x6f   :  { %p16884_p8 = scmp.ne.s32.totalorder %s17905_s21, %s16883_s2  ;;  %p16887_p9 = scmp.lt.u32.totalorder %s16883_s2, %s17905_s21 }
  0x71   :  { %p16889_p10 = pnand %p16887_p9, %p16884_p8 }
  0x73   :  { %16892 = shalt.err (!%p16889_p10)
}
  0x74   :  { %s16893_s7 = scalar_lea.vmem %s156_s26, 32  ;;  %p16898_p12 = scmp.lt.s32.totalorder %s156_s26, %s156_s26 }
  0x75   :  { %p16894_p11 = scmp.ne.s32.totalorder %s156_s26, %s16893_s7  ;;  %p16899_p13 = scmp.lt.s32.totalorder %s16893_s7, %s16893_s7 }
  0x77   :  { %p16900_p0 = por %p16899_p13, %p16898_p12 }
  0x79   :  { %p16901_p1 = pnand %p16900_p0, %p16894_p11 }
  0x7b   :  { %16904 = shalt.err (!%p16901_p1)
}
  0x7c   :  { %158 = dma.hbm_to_vmem [thread:$0]  %s17905_s21, 32, %s156_s26, [#allocation8]  }
  0x7d   :  { %s17828_s10 = smov [#allocation10]   ;;  %s17829_s13 = smov [#allocation13]  }
  0x7e   :  { %s177_s11 = sshll.u32 %s17828_s10, 4  ;;  %s199_s15 = sshll.u32 %s17829_s13, 4  ;;  %s178_s11 = int_to_ptr.vmem [resolvable:$true] %s177_s11  ;;  %s200_s15 = int_to_ptr.vmem [resolvable:$true] %s199_s15 }
  0x7f   :  { %s16905_s16 = scalar_lea.hbm %s17915_s29, 32 }
  0x80   :  { %p16906_p2 = scmp.ne.s32.totalorder %s17915_s29, %s16905_s16  ;;  %p16909_p3 = scmp.lt.u32.totalorder %s16905_s16, %s17915_s29 }
  0x82   :  { %p16911_p4 = pnand %p16909_p3, %p16906_p2 }
  0x84   :  { %16914 = shalt.err (!%p16911_p4)
}
  0x85   :  { %s16915_s18 = scalar_lea.vmem %s178_s11, 32  ;;  %p16920_p6 = scmp.lt.s32.totalorder %s178_s11, %s178_s11 }
  0x86   :  { %p16916_p5 = scmp.ne.s32.totalorder %s178_s11, %s16915_s18  ;;  %p16921_p7 = scmp.lt.s32.totalorder %s16915_s18, %s16915_s18 }
  0x88   :  { %p16922_p8 = por %p16921_p7, %p16920_p6 }
  0x8a   :  { %p16923_p9 = pnand %p16922_p8, %p16916_p5 }
  0x8c   :  { %16926 = shalt.err (!%p16923_p9)
}
  0x8d   :  { %180 = dma.hbm_to_vmem [thread:$0]  %s17915_s29, 32, %s178_s11, [#allocation11]  }
  0x8e   :  { %s16927_s21 = scalar_lea.hbm %s17925_s8, 32 }
  0x8f   :  { %p16928_p10 = scmp.ne.s32.totalorder %s17925_s8, %s16927_s21  ;;  %p16931_p11 = scmp.lt.u32.totalorder %s16927_s21, %s17925_s8 }
  0x91   :  { %p16933_p12 = pnand %p16931_p11, %p16928_p10 }
  0x93   :  { %16936 = shalt.err (!%p16933_p12)
}
  0x94   :  { %s16937_s0 = scalar_lea.vmem %s200_s15, 32  ;;  %p16942_p0 = scmp.lt.s32.totalorder %s200_s15, %s200_s15 }
  0x95   :  { %p16938_p13 = scmp.ne.s32.totalorder %s200_s15, %s16937_s0  ;;  %p16943_p1 = scmp.lt.s32.totalorder %s16937_s0, %s16937_s0 }
  0x97   :  { %p16944_p2 = por %p16943_p1, %p16942_p0 }
  0x99   :  { %p16945_p3 = pnand %p16944_p2, %p16938_p13 }
  0x9b   :  { %16948 = shalt.err (!%p16945_p3)
}
  0x9c   :  { %202 = dma.hbm_to_vmem [thread:$0]  %s17925_s8, 32, %s200_s15, [#allocation14]  }
  0x9d   :  { %s17830_s22 = smov [#allocation16]   ;;  %s17831_s29 = smov [#allocation19]  }
  0x9e   :  { %s221_s23 = sshll.u32 %s17830_s22, 4  ;;  %s243_s26 = sshll.u32 %s17831_s29, 4  ;;  %s222_s23 = int_to_ptr.vmem [resolvable:$true] %s221_s23  ;;  %s244_s26 = int_to_ptr.vmem [resolvable:$true] %s243_s26 }
  0x9f   :  { %s16949_s28 = scalar_lea.hbm %s17935_s19, 32 }
  0xa0   :  { %p16950_p4 = scmp.ne.s32.totalorder %s17935_s19, %s16949_s28  ;;  %p16953_p5 = scmp.lt.u32.totalorder %s16949_s28, %s17935_s19 }
  0xa2   :  { %p16955_p6 = pnand %p16953_p5, %p16950_p4 }
  0xa4   :  { %16958 = shalt.err (!%p16955_p6)
}
  0xa5   :  { %s16959_s1 = scalar_lea.vmem %s222_s23, 32  ;;  %p16964_p8 = scmp.lt.s32.totalorder %s222_s23, %s222_s23 }
  0xa6   :  { %p16960_p7 = scmp.ne.s32.totalorder %s222_s23, %s16959_s1  ;;  %p16965_p9 = scmp.lt.s32.totalorder %s16959_s1, %s16959_s1 }
  0xa8   :  { %p16966_p10 = por %p16965_p9, %p16964_p8 }
  0xaa   :  { %p16967_p11 = pnand %p16966_p10, %p16960_p7 }
  0xac   :  { %16970 = shalt.err (!%p16967_p11)
}
  0xad   :  { %224 = dma.hbm_to_vmem [thread:$0]  %s17935_s19, 32, %s222_s23, [#allocation17]  }
  0xae   :  { %s16971_s8 = scalar_lea.hbm %s17945_s30, 16 }
  0xaf   :  { %p16972_p12 = scmp.ne.s32.totalorder %s17945_s30, %s16971_s8  ;;  %p16975_p13 = scmp.lt.u32.totalorder %s16971_s8, %s17945_s30 }
  0xb1   :  { %p16977_p0 = pnand %p16975_p13, %p16972_p12 }
  0xb3   :  { %16980 = shalt.err (!%p16977_p0)
}
  0xb4   :  { %s16981_s2 = scalar_lea.vmem %s244_s26, 16  ;;  %s16985_s7 = scalar_lea.vmem %s244_s26, 32 }
  0xb5   :  { %p16982_p1 = scmp.ne.s32.totalorder %s244_s26, %s16981_s2  ;;  %p16986_p2 = scmp.lt.s32.totalorder %s244_s26, %s244_s26 }
  0xb6   :  { %p16987_p3 = scmp.lt.s32.totalorder %s16985_s7, %s16981_s2 }
  0xb8   :  { %p16988_p4 = por %p16987_p3, %p16986_p2 }
  0xba   :  { %p16989_p5 = pnand %p16988_p4, %p16982_p1 }
  0xbc   :  { %16992 = shalt.err (!%p16989_p5)
}
  0xbd   :  { %246 = dma.hbm_to_vmem [thread:$0]  %s17945_s30, 16, %s244_s26, [#allocation20]  }
  0xbe   :  { %s17832_s10 = smov [#allocation22]   ;;  %s17833_s11 = smov [#allocation25]  }
  0xbf   :  { %s265_s19 = sshll.u32 %s17832_s10, 4  ;;  %s287_s13 = sshll.u32 %s17833_s11, 4  ;;  %s266_s19 = int_to_ptr.vmem [resolvable:$true] %s265_s19  ;;  %s288_s13 = int_to_ptr.vmem [resolvable:$true] %s287_s13 }
  0xc0   :  { %s16993_s15 = scalar_lea.hbm %s17955_s12, 16 }
  0xc1   :  { %p16994_p6 = scmp.ne.s32.totalorder %s17955_s12, %s16993_s15  ;;  %p16997_p7 = scmp.lt.u32.totalorder %s16993_s15, %s17955_s12 }
  0xc3   :  { %p16999_p8 = pnand %p16997_p7, %p16994_p6 }
  0xc5   :  { %17002 = shalt.err (!%p16999_p8)
}
  0xc6   :  { %s17003_s16 = scalar_lea.vmem %s266_s19, 16  ;;  %s17007_s18 = scalar_lea.vmem %s266_s19, 32 }
  0xc7   :  { %p17004_p9 = scmp.ne.s32.totalorder %s266_s19, %s17003_s16  ;;  %p17008_p10 = scmp.lt.s32.totalorder %s266_s19, %s266_s19 }
  0xc8   :  { %p17009_p11 = scmp.lt.s32.totalorder %s17007_s18, %s17003_s16 }
  0xca   :  { %p17010_p12 = por %p17009_p11, %p17008_p10 }
  0xcc   :  { %p17011_p13 = pnand %p17010_p12, %p17004_p9 }
  0xce   :  { %17014 = shalt.err (!%p17011_p13)
}
  0xcf   :  { %268 = dma.hbm_to_vmem [thread:$0]  %s17955_s12, 16, %s266_s19, [#allocation23]  }
  0xd0   :  { %s17015_s30 = scalar_lea.hbm %s17965_s27, 16 }
  0xd1   :  { %p17016_p0 = scmp.ne.s32.totalorder %s17965_s27, %s17015_s30  ;;  %p17019_p1 = scmp.lt.u32.totalorder %s17015_s30, %s17965_s27 }
  0xd3   :  { %p17021_p2 = pnand %p17019_p1, %p17016_p0 }
  0xd5   :  { %17024 = shalt.err (!%p17021_p2)
}
  0xd6   :  { %s17025_s21 = scalar_lea.vmem %s288_s13, 16  ;;  %s17029_s0 = scalar_lea.vmem %s288_s13, 32 }
  0xd7   :  { %p17026_p3 = scmp.ne.s32.totalorder %s288_s13, %s17025_s21  ;;  %p17030_p4 = scmp.lt.s32.totalorder %s288_s13, %s288_s13 }
  0xd8   :  { %p17031_p5 = scmp.lt.s32.totalorder %s17029_s0, %s17025_s21 }
  0xda   :  { %p17032_p6 = por %p17031_p5, %p17030_p4 }
  0xdc   :  { %p17033_p7 = pnand %p17032_p6, %p17026_p3 }
  0xde   :  { %17036 = shalt.err (!%p17033_p7)
}
  0xdf   :  { %290 = dma.hbm_to_vmem [thread:$0]  %s17965_s27, 16, %s288_s13, [#allocation26]  }
  0xe0   :  { %s17834_s22 = smov [#allocation28]   ;;  %s17835_s23 = smov [#allocation31]  }
  0xe1   :  { %s309_s12 = sshll.u32 %s17834_s22, 4  ;;  %s331_s29 = sshll.u32 %s17835_s23, 4  ;;  %s310_s12 = int_to_ptr.vmem [resolvable:$true] %s309_s12  ;;  %s332_s29 = int_to_ptr.vmem [resolvable:$true] %s331_s29 }
  0xe2   :  { %s17037_s26 = scalar_lea.hbm %s17975_s5, 16 }
  0xe3   :  { %p17038_p8 = scmp.ne.s32.totalorder %s17975_s5, %s17037_s26  ;;  %p17041_p9 = scmp.lt.u32.totalorder %s17037_s26, %s17975_s5 }
  0xe5   :  { %p17043_p10 = pnand %p17041_p9, %p17038_p8 }
  0xe7   :  { %17046 = shalt.err (!%p17043_p10)
}
  0xe8   :  { %s17047_s28 = scalar_lea.vmem %s310_s12, 16  ;;  %s17051_s1 = scalar_lea.vmem %s310_s12, 32 }
  0xe9   :  { %p17048_p11 = scmp.ne.s32.totalorder %s310_s12, %s17047_s28  ;;  %p17052_p12 = scmp.lt.s32.totalorder %s310_s12, %s310_s12 }
  0xea   :  { %p17053_p13 = scmp.lt.s32.totalorder %s17051_s1, %s17047_s28 }
  0xec   :  { %p17054_p0 = por %p17053_p13, %p17052_p12 }
  0xee   :  { %p17055_p1 = pnand %p17054_p0, %p17048_p11 }
  0xf0   :  { %17058 = shalt.err (!%p17055_p1)
}
  0xf1   :  { %312 = dma.hbm_to_vmem [thread:$0]  %s17975_s5, 16, %s310_s12, [#allocation29]  }
  0xf2   :  { %s17059_s27 = scalar_lea.hbm %s17985_s6, 16 }
  0xf3   :  { %p17060_p2 = scmp.ne.s32.totalorder %s17985_s6, %s17059_s27  ;;  %p17063_p3 = scmp.lt.u32.totalorder %s17059_s27, %s17985_s6 }
  0xf5   :  { %p17065_p4 = pnand %p17063_p3, %p17060_p2 }
  0xf7   :  { %17068 = shalt.err (!%p17065_p4)
}
  0xf8   :  { %s17069_s8 = scalar_lea.vmem %s332_s29, 16  ;;  %s17073_s2 = scalar_lea.vmem %s332_s29, 32 }
  0xf9   :  { %p17070_p5 = scmp.ne.s32.totalorder %s332_s29, %s17069_s8  ;;  %p17074_p6 = scmp.lt.s32.totalorder %s332_s29, %s332_s29 }
  0xfa   :  { %p17075_p7 = scmp.lt.s32.totalorder %s17073_s2, %s17069_s8 }
  0xfc   :  { %p17076_p8 = por %p17075_p7, %p17074_p6 }
  0xfe   :  { %p17077_p9 = pnand %p17076_p8, %p17070_p5 }
 0x100   :  { %17080 = shalt.err (!%p17077_p9)
}
 0x101   :  { %334 = dma.hbm_to_vmem [thread:$0]  %s17985_s6, 16, %s332_s29, [#allocation32]  }
 0x102   :  { %s17836_s7 = smov [#allocation34]   ;;  %s17837_s10 = smov [#allocation37]  }
 0x103   :  { %s352_s5 = sshll.u32 %s17836_s7, 4  ;;  %s377_s19 = sshll.u32 %s17837_s10, 4  ;;  %s353_s5 = int_to_ptr.vmem [resolvable:$true] %s352_s5  ;;  %s18142_s19 = int_to_ptr.vmem [resolvable:$true] %s377_s19 }
 0x104   :  { %s17081_s11 = scalar_lea.hbm %s18000_s20, 512 }
 0x105   :  { %p17082_p10 = scmp.ne.s32.totalorder %s18000_s20, %s17081_s11  ;;  %p17085_p11 = scmp.lt.u32.totalorder %s17081_s11, %s18000_s20 }
 0x107   :  { %p17087_p12 = pnand %p17085_p11, %p17082_p10 }
 0x109   :  { %17090 = shalt.err (!%p17087_p12)
}
 0x10a   :  { %s17091_s13 = scalar_lea.vmem %s353_s5, 512  ;;  %p17096_p0 = scmp.lt.s32.totalorder %s353_s5, %s353_s5 }
 0x10b   :  { %p17092_p13 = scmp.ne.s32.totalorder %s353_s5, %s17091_s13  ;;  %p17097_p1 = scmp.lt.s32.totalorder %s17091_s13, %s17091_s13 }
 0x10d   :  { %p17098_p2 = por %p17097_p1, %p17096_p0 }
 0x10f   :  { %p17099_p3 = pnand %p17098_p2, %p17092_p13 }
 0x111   :  { %17102 = shalt.err (!%p17099_p3)
}
 0x112   :  { %s17838_s6 = smov 64   ;;  %s17839_s15 = smov 4  }
 0x113   :  { %358 = dma.hbm_to_vmem [thread:$0]  %s18000_s20, 512, %s353_s5, [#allocation35], %s17838_s6, %s17838_s6, %s17839_s15  }
 0x114   :  { %s17103_s16 = scalar_lea.hbm %s18015_s24, 16 }
 0x115   :  { %p17104_p4 = scmp.ne.s32.totalorder %s18015_s24, %s17103_s16  ;;  %p17107_p5 = scmp.lt.u32.totalorder %s17103_s16, %s18015_s24 }
 0x117   :  { %p17109_p6 = pnand %p17107_p5, %p17104_p4 }
 0x119   :  { %17112 = shalt.err (!%p17109_p6)
}
 0x11a   :  { %s17113_s18 = scalar_lea.vmem %s18142_s19, 16  ;;  %s17117_s30 = scalar_lea.vmem %s18142_s19, 32 }
 0x11b   :  { %p17114_p7 = scmp.ne.s32.totalorder %s18142_s19, %s17113_s18  ;;  %p17118_p8 = scmp.lt.s32.totalorder %s18142_s19, %s18142_s19 }
 0x11c   :  { %p17119_p9 = scmp.lt.s32.totalorder %s17117_s30, %s17113_s18 }
 0x11e   :  { %p17120_p10 = por %p17119_p9, %p17118_p8 }
 0x120   :  { %p17121_p11 = pnand %p17120_p10, %p17114_p7 }
 0x122   :  { %17124 = shalt.err (!%p17121_p11)
}
 0x123   :  { %380 = dma.hbm_to_vmem [thread:$0]  %s18015_s24, 16, %s18142_s19, [#allocation38]  }
 0x124   :  { %s17840_s20 = smov [#allocation40]   ;;  %s17841_s0 = smov [#allocation43]  }
 0x125   :  { %s399_s21 = sshll.u32 %s17840_s20, 4  ;;  %s421_s22 = sshll.u32 %s17841_s0, 4  ;;  %s400_s21 = int_to_ptr.vmem [resolvable:$true] %s399_s21  ;;  %s422_s22 = int_to_ptr.vmem [resolvable:$true] %s421_s22 }
 0x126   :  { %s17125_s12 = scalar_lea.hbm %s18025_s14, 16 }
 0x127   :  { %p17126_p12 = scmp.ne.s32.totalorder %s18025_s14, %s17125_s12  ;;  %p17129_p13 = scmp.lt.u32.totalorder %s17125_s12, %s18025_s14 }
 0x129   :  { %p17131_p0 = pnand %p17129_p13, %p17126_p12 }
 0x12b   :  { %17134 = shalt.err (!%p17131_p0)
}
 0x12c   :  { %s17135_s23 = scalar_lea.vmem %s400_s21, 16  ;;  %s17139_s29 = scalar_lea.vmem %s400_s21, 32 }
 0x12d   :  { %p17136_p1 = scmp.ne.s32.totalorder %s400_s21, %s17135_s23  ;;  %p17140_p2 = scmp.lt.s32.totalorder %s400_s21, %s400_s21 }
 0x12e   :  { %p17141_p3 = scmp.lt.s32.totalorder %s17139_s29, %s17135_s23 }
 0x130   :  { %p17142_p4 = por %p17141_p3, %p17140_p2 }
 0x132   :  { %p17143_p5 = pnand %p17142_p4, %p17136_p1 }
 0x134   :  { %17146 = shalt.err (!%p17143_p5)
}
 0x135   :  { %402 = dma.hbm_to_vmem [thread:$0]  %s18025_s14, 16, %s400_s21, [#allocation41]  }
 0x136   :  { %s17147_s24 = scalar_lea.hbm %s18035_s25, 16 }
 0x137   :  { %p17148_p6 = scmp.ne.s32.totalorder %s18035_s25, %s17147_s24  ;;  %p17151_p7 = scmp.lt.u32.totalorder %s17147_s24, %s18035_s25 }
 0x139   :  { %p17153_p8 = pnand %p17151_p7, %p17148_p6 }
 0x13b   :  { %17156 = shalt.err (!%p17153_p8)
}
 0x13c   :  { %s17157_s26 = scalar_lea.vmem %s422_s22, 16  ;;  %s17161_s28 = scalar_lea.vmem %s422_s22, 32 }
 0x13d   :  { %p17158_p9 = scmp.ne.s32.totalorder %s422_s22, %s17157_s26  ;;  %p17162_p10 = scmp.lt.s32.totalorder %s422_s22, %s422_s22 }
 0x13e   :  { %p17163_p11 = scmp.lt.s32.totalorder %s17161_s28, %s17157_s26 }
 0x140   :  { %p17164_p12 = por %p17163_p11, %p17162_p10 }
 0x142   :  { %p17165_p13 = pnand %p17164_p12, %p17158_p9 }
 0x144   :  { %17168 = shalt.err (!%p17165_p13)
}
 0x145   :  { %s18952_s1 = sld [smem:[#allocation102_spill]]  ;;  %s17842_s27 = smov [#allocation46]  }
 0x146   :  { %424 = dma.hbm_to_vmem [thread:$0]  %s18035_s25, 16, %s422_s22, [#allocation44]  }
 0x147   :  { %s443_s14 = sshll.u32 %s17842_s27, 4  ;;  %s17843_s8 = smov [#allocation49]   ;;  %s444_s14 = int_to_ptr.vmem [resolvable:$true] %s443_s14 }
 0x148   :  { %s465_s2 = sshll.u32 %s17843_s8, 4  ;;  %s466_s2 = int_to_ptr.vmem [resolvable:$true] %s465_s2 }
 0x14b   :  { %s17169_s7 = scalar_lea.hbm %s18952_s1, 16 }
 0x14c   :  { %p17170_p0 = scmp.ne.s32.totalorder %s18952_s1, %s17169_s7  ;;  %p17173_p1 = scmp.lt.u32.totalorder %s17169_s7, %s18952_s1 }
 0x14e   :  { %p17175_p2 = pnand %p17173_p1, %p17170_p0 }
 0x150   :  { %17178 = shalt.err (!%p17175_p2)
}
 0x151   :  { %s17179_s5 = scalar_lea.vmem %s444_s14, 16  ;;  %s17183_s10 = scalar_lea.vmem %s444_s14, 32 }
 0x152   :  { %p17180_p3 = scmp.ne.s32.totalorder %s444_s14, %s17179_s5  ;;  %p17184_p4 = scmp.lt.s32.totalorder %s444_s14, %s444_s14 }
 0x153   :  { %p17185_p5 = scmp.lt.s32.totalorder %s17183_s10, %s17179_s5 }
 0x155   :  { %p17186_p6 = por %p17185_p5, %p17184_p4 }
 0x157   :  { %p17187_p7 = pnand %p17186_p6, %p17180_p3 }
 0x159   :  { %17190 = shalt.err (!%p17187_p7)
}
 0x15a   :  { %s18953_s25 = sld [smem:[#allocation104_spill]] }
 0x15b   :  { %446 = dma.hbm_to_vmem [thread:$0]  %s18952_s1, 16, %s444_s14, [#allocation47]  }
 0x160   :  { %s17191_s19 = scalar_lea.hbm %s18953_s25, 16 }
 0x161   :  { %p17192_p8 = scmp.ne.s32.totalorder %s18953_s25, %s17191_s19  ;;  %p17195_p9 = scmp.lt.u32.totalorder %s17191_s19, %s18953_s25 }
 0x163   :  { %p17197_p10 = pnand %p17195_p9, %p17192_p8 }
 0x165   :  { %17200 = shalt.err (!%p17197_p10)
}
 0x166   :  { %s17201_s11 = scalar_lea.vmem %s466_s2, 16  ;;  %s17205_s13 = scalar_lea.vmem %s466_s2, 32 }
 0x167   :  { %p17202_p11 = scmp.ne.s32.totalorder %s466_s2, %s17201_s11  ;;  %p17206_p12 = scmp.lt.s32.totalorder %s466_s2, %s466_s2 }
 0x168   :  { %p17207_p13 = scmp.lt.s32.totalorder %s17205_s13, %s17201_s11 }
 0x16a   :  { %p17208_p0 = por %p17207_p13, %p17206_p12 }
 0x16c   :  { %p17209_p1 = pnand %p17208_p0, %p17202_p11 }
 0x16e   :  { %17212 = shalt.err (!%p17209_p1)
}
 0x16f   :  { %s18954_s16 = sld [smem:[#allocation106_spill]]  ;;  %s17844_s18 = smov [#allocation52]  }
 0x170   :  { %468 = dma.hbm_to_vmem [thread:$0]  %s18953_s25, 16, %s466_s2, [#allocation50]  }
 0x171   :  { %s487_s30 = sshll.u32 %s17844_s18, 4  ;;  %s17845_s20 = smov [#allocation55]   ;;  %s488_s30 = int_to_ptr.vmem [resolvable:$true] %s487_s30 }
 0x172   :  { %s509_s21 = sshll.u32 %s17845_s20, 4  ;;  %s510_s21 = int_to_ptr.vmem [resolvable:$true] %s509_s21 }
 0x175   :  { %s17213_s0 = scalar_lea.hbm %s18954_s16, 16 }
 0x176   :  { %p17214_p2 = scmp.ne.s32.totalorder %s18954_s16, %s17213_s0  ;;  %p17217_p3 = scmp.lt.u32.totalorder %s17213_s0, %s18954_s16 }
 0x178   :  { %p17219_p4 = pnand %p17217_p3, %p17214_p2 }
 0x17a   :  { %17222 = shalt.err (!%p17219_p4)
}
 0x17b   :  { %s17223_s22 = scalar_lea.vmem %s488_s30, 16  ;;  %s17227_s12 = scalar_lea.vmem %s488_s30, 32 }
 0x17c   :  { %p17224_p5 = scmp.ne.s32.totalorder %s488_s30, %s17223_s22  ;;  %p17228_p6 = scmp.lt.s32.totalorder %s488_s30, %s488_s30 }
 0x17d   :  { %p17229_p7 = scmp.lt.s32.totalorder %s17227_s12, %s17223_s22 }
 0x17f   :  { %p17230_p8 = por %p17229_p7, %p17228_p6 }
 0x181   :  { %p17231_p9 = pnand %p17230_p8, %p17224_p5 }
 0x183   :  { %17234 = shalt.err (!%p17231_p9)
}
 0x184   :  { %s18955_s23 = sld [smem:[#allocation108_spill]] }
 0x185   :  { %490 = dma.hbm_to_vmem [thread:$0]  %s18954_s16, 16, %s488_s30, [#allocation53]  }
 0x18a   :  { %s17235_s29 = scalar_lea.hbm %s18955_s23, 16 }
 0x18b   :  { %p17236_p10 = scmp.ne.s32.totalorder %s18955_s23, %s17235_s29  ;;  %p17239_p11 = scmp.lt.u32.totalorder %s17235_s29, %s18955_s23 }
 0x18d   :  { %p17241_p12 = pnand %p17239_p11, %p17236_p10 }
 0x18f   :  { %17244 = shalt.err (!%p17241_p12)
}
 0x190   :  { %s17245_s24 = scalar_lea.vmem %s510_s21, 16  ;;  %s17249_s26 = scalar_lea.vmem %s510_s21, 32 }
 0x191   :  { %p17246_p13 = scmp.ne.s32.totalorder %s510_s21, %s17245_s24  ;;  %p17250_p0 = scmp.lt.s32.totalorder %s510_s21, %s510_s21 }
 0x192   :  { %p17251_p1 = scmp.lt.s32.totalorder %s17249_s26, %s17245_s24 }
 0x194   :  { %p17252_p2 = por %p17251_p1, %p17250_p0 }
 0x196   :  { %p17253_p3 = pnand %p17252_p2, %p17246_p13 }
 0x198   :  { %17256 = shalt.err (!%p17253_p3)
}
 0x199   :  { %512 = dma.hbm_to_vmem [thread:$0]  %s18955_s23, 16, %s510_s21, [#allocation56]  }
 0x19a   :  { %s17846_s28 = smov [#allocation58]   ;;  %s17847_s27 = smov [#allocation2]  }
 0x19b   :  { %s531_s1 = sshll.u32 %s17846_s28, 4  ;;  %s120_s14 = sshll.u32 %s17847_s27, 4  ;;  %s532_s1 = int_to_ptr.vmem [resolvable:$true] %s531_s1  ;;  %s18185_s14 = int_to_ptr.vmem [resolvable:$true] %s120_s14 }
 0x19c   :  { %s17257_s8 = scalar_lea.hbm %s18085_s17, 16 }
 0x19d   :  { %p17258_p4 = scmp.ne.s32.totalorder %s18085_s17, %s17257_s8  ;;  %p17261_p5 = scmp.lt.u32.totalorder %s17257_s8, %s18085_s17 }
 0x19f   :  { %p17263_p6 = pnand %p17261_p5, %p17258_p4 }
 0x1a1   :  { %17266 = shalt.err (!%p17263_p6)
}
 0x1a2   :  { %s17267_s2 = scalar_lea.vmem %s532_s1, 16  ;;  %s17271_s7 = scalar_lea.vmem %s532_s1, 32 }
 0x1a3   :  { %p17268_p7 = scmp.ne.s32.totalorder %s532_s1, %s17267_s2  ;;  %p17272_p8 = scmp.lt.s32.totalorder %s532_s1, %s532_s1 }
 0x1a4   :  { %p17273_p9 = scmp.lt.s32.totalorder %s17271_s7, %s17267_s2 }
 0x1a6   :  { %p17274_p10 = por %p17273_p9, %p17272_p8 }
 0x1a8   :  { %p17275_p11 = pnand %p17274_p10, %p17268_p7 }
 0x1aa   :  { %17278 = shalt.err (!%p17275_p11)
}
 0x1ab   :  { %s18956_s5 = sld [smem:[#allocation85_spill]] }
 0x1ac   :  { %534 = dma.hbm_to_vmem [thread:$0]  %s18085_s17, 16, %s532_s1, [#allocation59]  }
 0x1b1   :  { %s17279_s10 = scalar_lea.hbm %s18956_s5, 147456 }
 0x1b2   :  { %p17280_p12 = scmp.ne.s32.totalorder %s18956_s5, %s17279_s10  ;;  %p17283_p13 = scmp.lt.u32.totalorder %s17279_s10, %s18956_s5 }
 0x1b4   :  { %p17285_p0 = pnand %p17283_p13, %p17280_p12 }
 0x1b6   :  { %17288 = shalt.err (!%p17285_p0)
}
 0x1b7   :  { %s17289_s25 = scalar_lea.vmem %s18185_s14, 147456  ;;  %p17294_p2 = scmp.lt.s32.totalorder %s18185_s14, %s18185_s14 }
 0x1b8   :  { %p17290_p1 = scmp.ne.s32.totalorder %s18185_s14, %s17289_s25  ;;  %p17295_p3 = scmp.lt.s32.totalorder %s17289_s25, %s17289_s25 }
 0x1ba   :  { %p17296_p4 = por %p17295_p3, %p17294_p2 }
 0x1bc   :  { %p17297_p5 = pnand %p17296_p4, %p17290_p1 }
 0x1be   :  { %17300 = shalt.err (!%p17297_p5)
}
 0x1bf   :  { %s17848_s19 = smov 1152   ;;  %s18957_s17 = sld [smem:[#allocation86_spill]] }
 0x1c0   :  { %s17849_s11 = smov 72   ;;  %s17850_s13 = smov [#allocation6]  }
 0x1c1   :  { %126 = dma.hbm_to_vmem [thread:$0]  %s18956_s5, 147456, %s18185_s14, [#allocation3], %s17848_s19, %s17848_s19, %s17849_s11  }
 0x1c2   :  { %s142_s16 = sshll.u32 %s17850_s13, 4  ;;  %s143_s16 = int_to_ptr.vmem [resolvable:$true] %s142_s16 }
 0x1c5   :  { %s17301_s18 = scalar_lea.hbm %s18957_s17, 4096 }
 0x1c6   :  { %p17302_p6 = scmp.ne.s32.totalorder %s18957_s17, %s17301_s18  ;;  %p17305_p7 = scmp.lt.u32.totalorder %s17301_s18, %s18957_s17 }
 0x1c8   :  { %p17307_p8 = pnand %p17305_p7, %p17302_p6 }
 0x1ca   :  { %17310 = shalt.err (!%p17307_p8)
}
 0x1cb   :  { %s17311_s30 = scalar_lea.vmem %s143_s16, 4096  ;;  %p17316_p10 = scmp.lt.s32.totalorder %s143_s16, %s143_s16 }
 0x1cc   :  { %p17312_p9 = scmp.ne.s32.totalorder %s143_s16, %s17311_s30  ;;  %p17317_p11 = scmp.lt.s32.totalorder %s17311_s30, %s17311_s30 }
 0x1ce   :  { %p17318_p12 = por %p17317_p11, %p17316_p10 }
 0x1d0   :  { %p17319_p13 = pnand %p17318_p12, %p17312_p9 }
 0x1d2   :  { %17322 = shalt.err (!%p17319_p13)
}
 0x1d3   :  { %s17851_s20 = smov 128   ;;  %s18958_s21 = sld [smem:[#allocation87_spill]] }
 0x1d4   :  { %s17852_s0 = smov 8   ;;  %s17853_s22 = smov [#allocation9]  }
 0x1d5   :  { %148 = dma.hbm_to_vmem [thread:$0]  %s18957_s17, 4096, %s143_s16, [#allocation5], %s17851_s20, %s17851_s20, %s17852_s0  }
 0x1d6   :  { %s164_s12 = sshll.u32 %s17853_s22, 4  ;;  %s17854_s23 = smov [#allocation12]   ;;  %s165_s12 = int_to_ptr.vmem [resolvable:$true] %s164_s12 }
 0x1d7   :  { %s186_s29 = sshll.u32 %s17854_s23, 4  ;;  %s187_s29 = int_to_ptr.vmem [resolvable:$true] %s186_s29 }
 0x1d9   :  { %s17323_s24 = scalar_lea.hbm %s18958_s21, 4096 }
 0x1da   :  { %p17324_p0 = scmp.ne.s32.totalorder %s18958_s21, %s17323_s24  ;;  %p17327_p1 = scmp.lt.u32.totalorder %s17323_s24, %s18958_s21 }
 0x1dc   :  { %p17329_p2 = pnand %p17327_p1, %p17324_p0 }
 0x1de   :  { %17332 = shalt.err (!%p17329_p2)
}
 0x1df   :  { %s17333_s26 = scalar_lea.vmem %s165_s12, 4096  ;;  %p17338_p4 = scmp.lt.s32.totalorder %s165_s12, %s165_s12 }
 0x1e0   :  { %p17334_p3 = scmp.ne.s32.totalorder %s165_s12, %s17333_s26  ;;  %p17339_p5 = scmp.lt.s32.totalorder %s17333_s26, %s17333_s26 }
 0x1e2   :  { %p17340_p6 = por %p17339_p5, %p17338_p4 }
 0x1e4   :  { %p17341_p7 = pnand %p17340_p6, %p17334_p3 }
 0x1e6   :  { %17344 = shalt.err (!%p17341_p7)
}
 0x1e7   :  { %s18959_s28 = sld [smem:[#allocation88_spill]] }
 0x1e8   :  { %170 = dma.hbm_to_vmem [thread:$0]  %s18958_s21, 4096, %s165_s12, [#allocation8], %s17851_s20, %s17851_s20, %s17852_s0  }
 0x1ed   :  { %s17345_s1 = scalar_lea.hbm %s18959_s28, 4096 }
 0x1ee   :  { %p17346_p8 = scmp.ne.s32.totalorder %s18959_s28, %s17345_s1  ;;  %p17349_p9 = scmp.lt.u32.totalorder %s17345_s1, %s18959_s28 }
 0x1f0   :  { %p17351_p10 = pnand %p17349_p9, %p17346_p8 }
 0x1f2   :  { %17354 = shalt.err (!%p17351_p10)
}
 0x1f3   :  { %s17355_s27 = scalar_lea.vmem %s187_s29, 4096  ;;  %p17360_p12 = scmp.lt.s32.totalorder %s187_s29, %s187_s29 }
 0x1f4   :  { %p17356_p11 = scmp.ne.s32.totalorder %s187_s29, %s17355_s27  ;;  %p17361_p13 = scmp.lt.s32.totalorder %s17355_s27, %s17355_s27 }
 0x1f6   :  { %p17362_p0 = por %p17361_p13, %p17360_p12 }
 0x1f8   :  { %p17363_p1 = pnand %p17362_p0, %p17356_p11 }
 0x1fa   :  { %17366 = shalt.err (!%p17363_p1)
}
 0x1fb   :  { %s18960_s14 = sld [smem:[#allocation89_spill]]  ;;  %s17855_s8 = smov [#allocation15]  }
 0x1fc   :  { %192 = dma.hbm_to_vmem [thread:$0]  %s18959_s28, 4096, %s187_s29, [#allocation11], %s17851_s20, %s17851_s20, %s17852_s0  }
 0x1fd   :  { %s208_s2 = sshll.u32 %s17855_s8, 4  ;;  %s17856_s7 = smov [#allocation18]   ;;  %s209_s2 = int_to_ptr.vmem [resolvable:$true] %s208_s2 }
 0x1fe   :  { %s230_s5 = sshll.u32 %s17856_s7, 4  ;;  %s231_s5 = int_to_ptr.vmem [resolvable:$true] %s230_s5 }
 0x201   :  { %s17367_s10 = scalar_lea.hbm %s18960_s14, 4096 }
 0x202   :  { %p17368_p2 = scmp.ne.s32.totalorder %s18960_s14, %s17367_s10  ;;  %p17371_p3 = scmp.lt.u32.totalorder %s17367_s10, %s18960_s14 }
 0x204   :  { %p17373_p4 = pnand %p17371_p3, %p17368_p2 }
 0x206   :  { %17376 = shalt.err (!%p17373_p4)
}
 0x207   :  { %s17377_s25 = scalar_lea.vmem %s209_s2, 4096  ;;  %p17382_p6 = scmp.lt.s32.totalorder %s209_s2, %s209_s2 }
 0x208   :  { %p17378_p5 = scmp.ne.s32.totalorder %s209_s2, %s17377_s25  ;;  %p17383_p7 = scmp.lt.s32.totalorder %s17377_s25, %s17377_s25 }
 0x20a   :  { %p17384_p8 = por %p17383_p7, %p17382_p6 }
 0x20c   :  { %p17385_p9 = pnand %p17384_p8, %p17378_p5 }
 0x20e   :  { %17388 = shalt.err (!%p17385_p9)
}
 0x20f   :  { %s18961_s19 = sld [smem:[#allocation90_spill]] }
 0x210   :  { %214 = dma.hbm_to_vmem [thread:$0]  %s18960_s14, 4096, %s209_s2, [#allocation14], %s17851_s20, %s17851_s20, %s17852_s0  }
 0x215   :  { %s17389_s17 = scalar_lea.hbm %s18961_s19, 2048 }
 0x216   :  { %p17390_p10 = scmp.ne.s32.totalorder %s18961_s19, %s17389_s17  ;;  %p17393_p11 = scmp.lt.u32.totalorder %s17389_s17, %s18961_s19 }
 0x218   :  { %p17395_p12 = pnand %p17393_p11, %p17390_p10 }
 0x21a   :  { %17398 = shalt.err (!%p17395_p12)
}
 0x21b   :  { %s17399_s11 = scalar_lea.vmem %s231_s5, 2048  ;;  %p17404_p0 = scmp.lt.s32.totalorder %s231_s5, %s231_s5 }
 0x21c   :  { %p17400_p13 = scmp.ne.s32.totalorder %s231_s5, %s17399_s11  ;;  %p17405_p1 = scmp.lt.s32.totalorder %s17399_s11, %s17399_s11 }
 0x21e   :  { %p17406_p2 = por %p17405_p1, %p17404_p0 }
 0x220   :  { %p17407_p3 = pnand %p17406_p2, %p17400_p13 }
 0x222   :  { %17410 = shalt.err (!%p17407_p3)
}
 0x223   :  { %s18962_s13 = sld [smem:[#allocation91_spill]]  ;;  %s17857_s16 = smov [#allocation21]  }
 0x224   :  { %236 = dma.hbm_to_vmem [thread:$0]  %s18961_s19, 2048, %s231_s5, [#allocation17], %s17838_s6, %s17838_s6, %s17839_s15  }
 0x225   :  { %s252_s18 = sshll.u32 %s17857_s16, 4  ;;  %s17858_s30 = smov [#allocation24]   ;;  %s253_s18 = int_to_ptr.vmem [resolvable:$true] %s252_s18 }
 0x226   :  { %s274_s20 = sshll.u32 %s17858_s30, 4  ;;  %s275_s20 = int_to_ptr.vmem [resolvable:$true] %s274_s20 }
 0x229   :  { %s17411_s21 = scalar_lea.hbm %s18962_s13, 1024 }
 0x22a   :  { %p17412_p4 = scmp.ne.s32.totalorder %s18962_s13, %s17411_s21  ;;  %p17415_p5 = scmp.lt.u32.totalorder %s17411_s21, %s18962_s13 }
 0x22c   :  { %p17417_p6 = pnand %p17415_p5, %p17412_p4 }
 0x22e   :  { %17420 = shalt.err (!%p17417_p6)
}
 0x22f   :  { %s17421_s0 = scalar_lea.vmem %s253_s18, 1024  ;;  %p17426_p8 = scmp.lt.s32.totalorder %s253_s18, %s253_s18 }
 0x230   :  { %p17422_p7 = scmp.ne.s32.totalorder %s253_s18, %s17421_s0  ;;  %p17427_p9 = scmp.lt.s32.totalorder %s17421_s0, %s17421_s0 }
 0x232   :  { %p17428_p10 = por %p17427_p9, %p17426_p8 }
 0x234   :  { %p17429_p11 = pnand %p17428_p10, %p17422_p7 }
 0x236   :  { %17432 = shalt.err (!%p17429_p11)
}
 0x237   :  { %s18963_s22 = sld [smem:[#allocation92_spill]] }
 0x238   :  { %258 = dma.hbm_to_vmem [thread:$0]  %s18962_s13, 1024, %s253_s18, [#allocation20], %s17838_s6, %s17838_s6, %s17839_s15  }
 0x23d   :  { %s17433_s12 = scalar_lea.hbm %s18963_s22, 2048 }
 0x23e   :  { %p17434_p12 = scmp.ne.s32.totalorder %s18963_s22, %s17433_s12  ;;  %p17437_p13 = scmp.lt.u32.totalorder %s17433_s12, %s18963_s22 }
 0x240   :  { %p17439_p0 = pnand %p17437_p13, %p17434_p12 }
 0x242   :  { %17442 = shalt.err (!%p17439_p0)
}
 0x243   :  { %s17443_s23 = scalar_lea.vmem %s275_s20, 2048  ;;  %p17448_p2 = scmp.lt.s32.totalorder %s275_s20, %s275_s20 }
 0x244   :  { %p17444_p1 = scmp.ne.s32.totalorder %s275_s20, %s17443_s23  ;;  %p17449_p3 = scmp.lt.s32.totalorder %s17443_s23, %s17443_s23 }
 0x246   :  { %p17450_p4 = por %p17449_p3, %p17448_p2 }
 0x248   :  { %p17451_p5 = pnand %p17450_p4, %p17444_p1 }
 0x24a   :  { %17454 = shalt.err (!%p17451_p5)
}
 0x24b   :  { %s18964_s29 = sld [smem:[#allocation93_spill]]  ;;  %s17859_s24 = smov [#allocation27]  }
 0x24c   :  { %280 = dma.hbm_to_vmem [thread:$0]  %s18963_s22, 2048, %s275_s20, [#allocation23], %s17838_s6, %s17838_s6, %s17839_s15  }
 0x24d   :  { %s296_s26 = sshll.u32 %s17859_s24, 4  ;;  %s17860_s28 = smov [#allocation30]   ;;  %s297_s26 = int_to_ptr.vmem [resolvable:$true] %s296_s26 }
 0x24e   :  { %s318_s1 = sshll.u32 %s17860_s28, 4  ;;  %s319_s1 = int_to_ptr.vmem [resolvable:$true] %s318_s1 }
 0x251   :  { %s17455_s27 = scalar_lea.hbm %s18964_s29, 1024 }
 0x252   :  { %p17456_p6 = scmp.ne.s32.totalorder %s18964_s29, %s17455_s27  ;;  %p17459_p7 = scmp.lt.u32.totalorder %s17455_s27, %s18964_s29 }
 0x254   :  { %p17461_p8 = pnand %p17459_p7, %p17456_p6 }
 0x256   :  { %17464 = shalt.err (!%p17461_p8)
}
 0x257   :  { %s17465_s14 = scalar_lea.vmem %s297_s26, 1024  ;;  %p17470_p10 = scmp.lt.s32.totalorder %s297_s26, %s297_s26 }
 0x258   :  { %p17466_p9 = scmp.ne.s32.totalorder %s297_s26, %s17465_s14  ;;  %p17471_p11 = scmp.lt.s32.totalorder %s17465_s14, %s17465_s14 }
 0x25a   :  { %p17472_p12 = por %p17471_p11, %p17470_p10 }
 0x25c   :  { %p17473_p13 = pnand %p17472_p12, %p17466_p9 }
 0x25e   :  { %17476 = shalt.err (!%p17473_p13)
}
 0x25f   :  { %s18965_s8 = sld [smem:[#allocation94_spill]] }
 0x260   :  { %302 = dma.hbm_to_vmem [thread:$0]  %s18964_s29, 1024, %s297_s26, [#allocation26], %s17838_s6, %s17838_s6, %s17839_s15  }
 0x265   :  { %s17477_s2 = scalar_lea.hbm %s18965_s8, 1024 }
 0x266   :  { %p17478_p0 = scmp.ne.s32.totalorder %s18965_s8, %s17477_s2  ;;  %p17481_p1 = scmp.lt.u32.totalorder %s17477_s2, %s18965_s8 }
 0x268   :  { %p17483_p2 = pnand %p17481_p1, %p17478_p0 }
 0x26a   :  { %17486 = shalt.err (!%p17483_p2)
}
 0x26b   :  { %s17487_s7 = scalar_lea.vmem %s319_s1, 1024  ;;  %p17492_p4 = scmp.lt.s32.totalorder %s319_s1, %s319_s1 }
 0x26c   :  { %p17488_p3 = scmp.ne.s32.totalorder %s319_s1, %s17487_s7  ;;  %p17493_p5 = scmp.lt.s32.totalorder %s17487_s7, %s17487_s7 }
 0x26e   :  { %p17494_p6 = por %p17493_p5, %p17492_p4 }
 0x270   :  { %p17495_p7 = pnand %p17494_p6, %p17488_p3 }
 0x272   :  { %17498 = shalt.err (!%p17495_p7)
}
 0x273   :  { %s18966_s5 = sld [smem:[#allocation96_spill]]  ;;  %s17861_s10 = smov [#allocation33]  }
 0x274   :  { %324 = dma.hbm_to_vmem [thread:$0]  %s18965_s8, 1024, %s319_s1, [#allocation29], %s17838_s6, %s17838_s6, %s17839_s15  }
 0x275   :  { %s343_s25 = sshll.u32 %s17861_s10, 4  ;;  %s17862_s19 = smov [#allocation36]   ;;  %s344_s25 = int_to_ptr.vmem [resolvable:$true] %s343_s25 }
 0x276   :  { %s365_s17 = sshll.u32 %s17862_s19, 4  ;;  %s366_s17 = int_to_ptr.vmem [resolvable:$true] %s365_s17 }
 0x279   :  { %s17499_s11 = scalar_lea.hbm %s18966_s5, 16 }
 0x27a   :  { %p17500_p8 = scmp.ne.s32.totalorder %s18966_s5, %s17499_s11  ;;  %p17503_p9 = scmp.lt.u32.totalorder %s17499_s11, %s18966_s5 }
 0x27c   :  { %p17505_p10 = pnand %p17503_p9, %p17500_p8 }
 0x27e   :  { %17508 = shalt.err (!%p17505_p10)
}
 0x27f   :  { %s17509_s13 = scalar_lea.vmem %s344_s25, 16  ;;  %s17513_s16 = scalar_lea.vmem %s344_s25, 32 }
 0x280   :  { %p17510_p11 = scmp.ne.s32.totalorder %s344_s25, %s17509_s13  ;;  %p17514_p12 = scmp.lt.s32.totalorder %s344_s25, %s344_s25 }
 0x281   :  { %p17515_p13 = scmp.lt.s32.totalorder %s17513_s16, %s17509_s13 }
 0x283   :  { %p17516_p0 = por %p17515_p13, %p17514_p12 }
 0x285   :  { %p17517_p1 = pnand %p17516_p0, %p17510_p11 }
 0x287   :  { %17520 = shalt.err (!%p17517_p1)
}
 0x288   :  { %s18967_s18 = sld [smem:[#allocation97_spill]] }
 0x289   :  { %346 = dma.hbm_to_vmem [thread:$0]  %s18966_s5, 16, %s344_s25, [#allocation32]  }
 0x28e   :  { %s17521_s30 = scalar_lea.hbm %s18967_s18, 16 }
 0x28f   :  { %p17522_p2 = scmp.ne.s32.totalorder %s18967_s18, %s17521_s30  ;;  %p17525_p3 = scmp.lt.u32.totalorder %s17521_s30, %s18967_s18 }
 0x291   :  { %p17527_p4 = pnand %p17525_p3, %p17522_p2 }
 0x293   :  { %17530 = shalt.err (!%p17527_p4)
}
 0x294   :  { %s17531_s20 = scalar_lea.vmem %s366_s17, 16  ;;  %s17535_s21 = scalar_lea.vmem %s366_s17, 32 }
 0x295   :  { %p17532_p5 = scmp.ne.s32.totalorder %s366_s17, %s17531_s20  ;;  %p17536_p6 = scmp.lt.s32.totalorder %s366_s17, %s366_s17 }
 0x296   :  { %p17537_p7 = scmp.lt.s32.totalorder %s17535_s21, %s17531_s20 }
 0x298   :  { %p17538_p8 = por %p17537_p7, %p17536_p6 }
 0x29a   :  { %p17539_p9 = pnand %p17538_p8, %p17532_p5 }
 0x29c   :  { %17542 = shalt.err (!%p17539_p9)
}
 0x29d   :  { %s18968_s0 = sld [smem:[#allocation99_spill]]  ;;  %s17863_s22 = smov [#allocation39]  }
 0x29e   :  { %368 = dma.hbm_to_vmem [thread:$0]  %s18967_s18, 16, %s366_s17, [#allocation35]  }
 0x29f   :  { %s386_s12 = sshll.u32 %s17863_s22, 4  ;;  %s17864_s23 = smov [#allocation42]   ;;  %s387_s12 = int_to_ptr.vmem [resolvable:$true] %s386_s12 }
 0x2a0   :  { %s408_s29 = sshll.u32 %s17864_s23, 4  ;;  %s409_s29 = int_to_ptr.vmem [resolvable:$true] %s408_s29 }
 0x2a3   :  { %s17543_s24 = scalar_lea.hbm %s18968_s0, 512 }
 0x2a4   :  { %p17544_p10 = scmp.ne.s32.totalorder %s18968_s0, %s17543_s24  ;;  %p17547_p11 = scmp.lt.u32.totalorder %s17543_s24, %s18968_s0 }
 0x2a6   :  { %p17549_p12 = pnand %p17547_p11, %p17544_p10 }
 0x2a8   :  { %17552 = shalt.err (!%p17549_p12)
}
 0x2a9   :  { %s17553_s26 = scalar_lea.vmem %s387_s12, 512  ;;  %p17558_p0 = scmp.lt.s32.totalorder %s387_s12, %s387_s12 }
 0x2aa   :  { %p17554_p13 = scmp.ne.s32.totalorder %s387_s12, %s17553_s26  ;;  %p17559_p1 = scmp.lt.s32.totalorder %s17553_s26, %s17553_s26 }
 0x2ac   :  { %p17560_p2 = por %p17559_p1, %p17558_p0 }
 0x2ae   :  { %p17561_p3 = pnand %p17560_p2, %p17554_p13 }
 0x2b0   :  { %17564 = shalt.err (!%p17561_p3)
}
 0x2b1   :  { %s18969_s28 = sld [smem:[#allocation100_spill]] }
 0x2b2   :  { %392 = dma.hbm_to_vmem [thread:$0]  %s18968_s0, 512, %s387_s12, [#allocation38], %s17838_s6, %s17838_s6, %s17839_s15  }
 0x2b7   :  { %s17565_s1 = scalar_lea.hbm %s18969_s28, 512 }
 0x2b8   :  { %p17566_p4 = scmp.ne.s32.totalorder %s18969_s28, %s17565_s1  ;;  %p17569_p5 = scmp.lt.u32.totalorder %s17565_s1, %s18969_s28 }
 0x2ba   :  { %p17571_p6 = pnand %p17569_p5, %p17566_p4 }
 0x2bc   :  { %17574 = shalt.err (!%p17571_p6)
}
 0x2bd   :  { %s17575_s27 = scalar_lea.vmem %s409_s29, 512  ;;  %p17580_p8 = scmp.lt.s32.totalorder %s409_s29, %s409_s29 }
 0x2be   :  { %p17576_p7 = scmp.ne.s32.totalorder %s409_s29, %s17575_s27  ;;  %p17581_p9 = scmp.lt.s32.totalorder %s17575_s27, %s17575_s27 }
 0x2c0   :  { %p17582_p10 = por %p17581_p9, %p17580_p8 }
 0x2c2   :  { %p17583_p11 = pnand %p17582_p10, %p17576_p7 }
 0x2c4   :  { %17586 = shalt.err (!%p17583_p11)
}
 0x2c5   :  { %s18970_s14 = sld [smem:[#allocation101_spill]]  ;;  %s17865_s8 = smov [#allocation45]  }
 0x2c6   :  { %414 = dma.hbm_to_vmem [thread:$0]  %s18969_s28, 512, %s409_s29, [#allocation41], %s17838_s6, %s17838_s6, %s17839_s15  }
 0x2c7   :  { %s430_s2 = sshll.u32 %s17865_s8, 4  ;;  %s17866_s7 = smov [#allocation48]   ;;  %s431_s2 = int_to_ptr.vmem [resolvable:$true] %s430_s2 }
 0x2c8   :  { %s452_s5 = sshll.u32 %s17866_s7, 4  ;;  %s453_s5 = int_to_ptr.vmem [resolvable:$true] %s452_s5 }
 0x2cb   :  { %s17587_s10 = scalar_lea.hbm %s18970_s14, 512 }
 0x2cc   :  { %p17588_p12 = scmp.ne.s32.totalorder %s18970_s14, %s17587_s10  ;;  %p17591_p13 = scmp.lt.u32.totalorder %s17587_s10, %s18970_s14 }
 0x2ce   :  { %p17593_p0 = pnand %p17591_p13, %p17588_p12 }
 0x2d0   :  { %17596 = shalt.err (!%p17593_p0)
}
 0x2d1   :  { %s17597_s25 = scalar_lea.vmem %s431_s2, 512  ;;  %p17602_p2 = scmp.lt.s32.totalorder %s431_s2, %s431_s2 }
 0x2d2   :  { %p17598_p1 = scmp.ne.s32.totalorder %s431_s2, %s17597_s25  ;;  %p17603_p3 = scmp.lt.s32.totalorder %s17597_s25, %s17597_s25 }
 0x2d4   :  { %p17604_p4 = por %p17603_p3, %p17602_p2 }
 0x2d6   :  { %p17605_p5 = pnand %p17604_p4, %p17598_p1 }
 0x2d8   :  { %17608 = shalt.err (!%p17605_p5)
}
 0x2d9   :  { %s18971_s19 = sld [smem:[#allocation103_spill]] }
 0x2da   :  { %436 = dma.hbm_to_vmem [thread:$0]  %s18970_s14, 512, %s431_s2, [#allocation44], %s17838_s6, %s17838_s6, %s17839_s15  }
 0x2df   :  { %s17609_s17 = scalar_lea.hbm %s18971_s19, 1024 }
 0x2e0   :  { %p17610_p6 = scmp.ne.s32.totalorder %s18971_s19, %s17609_s17  ;;  %p17613_p7 = scmp.lt.u32.totalorder %s17609_s17, %s18971_s19 }
 0x2e2   :  { %p17615_p8 = pnand %p17613_p7, %p17610_p6 }
 0x2e4   :  { %17618 = shalt.err (!%p17615_p8)
}
 0x2e5   :  { %s17619_s11 = scalar_lea.vmem %s453_s5, 1024  ;;  %p17624_p10 = scmp.lt.s32.totalorder %s453_s5, %s453_s5 }
 0x2e6   :  { %p17620_p9 = scmp.ne.s32.totalorder %s453_s5, %s17619_s11  ;;  %p17625_p11 = scmp.lt.s32.totalorder %s17619_s11, %s17619_s11 }
 0x2e8   :  { %p17626_p12 = por %p17625_p11, %p17624_p10 }
 0x2ea   :  { %p17627_p13 = pnand %p17626_p12, %p17620_p9 }
 0x2ec   :  { %17630 = shalt.err (!%p17627_p13)
}
 0x2ed   :  { %s18972_s13 = sld [smem:[#allocation105_spill]]  ;;  %s17867_s16 = smov [#allocation51]  }
 0x2ee   :  { %458 = dma.hbm_to_vmem [thread:$0]  %s18971_s19, 1024, %s453_s5, [#allocation47], %s17838_s6, %s17838_s6, %s17839_s15  }
 0x2ef   :  { %s474_s18 = sshll.u32 %s17867_s16, 4  ;;  %s17868_s30 = smov [#allocation54]   ;;  %s475_s18 = int_to_ptr.vmem [resolvable:$true] %s474_s18 }
 0x2f0   :  { %s496_s20 = sshll.u32 %s17868_s30, 4  ;;  %s497_s20 = int_to_ptr.vmem [resolvable:$true] %s496_s20 }
 0x2f3   :  { %s17631_s21 = scalar_lea.hbm %s18972_s13, 512 }
 0x2f4   :  { %p17632_p0 = scmp.ne.s32.totalorder %s18972_s13, %s17631_s21  ;;  %p17635_p1 = scmp.lt.u32.totalorder %s17631_s21, %s18972_s13 }
 0x2f6   :  { %p17637_p2 = pnand %p17635_p1, %p17632_p0 }
 0x2f8   :  { %17640 = shalt.err (!%p17637_p2)
}
 0x2f9   :  { %s17641_s0 = scalar_lea.vmem %s475_s18, 512  ;;  %p17646_p4 = scmp.lt.s32.totalorder %s475_s18, %s475_s18 }
 0x2fa   :  { %p17642_p3 = scmp.ne.s32.totalorder %s475_s18, %s17641_s0  ;;  %p17647_p5 = scmp.lt.s32.totalorder %s17641_s0, %s17641_s0 }
 0x2fc   :  { %p17648_p6 = por %p17647_p5, %p17646_p4 }
 0x2fe   :  { %p17649_p7 = pnand %p17648_p6, %p17642_p3 }
 0x300   :  { %17652 = shalt.err (!%p17649_p7)
}
 0x301   :  { %s18973_s22 = sld [smem:[#allocation107_spill]] }
 0x302   :  { %480 = dma.hbm_to_vmem [thread:$0]  %s18972_s13, 512, %s475_s18, [#allocation50], %s17838_s6, %s17838_s6, %s17839_s15  }
 0x307   :  { %s17653_s12 = scalar_lea.hbm %s18973_s22, 1024 }
 0x308   :  { %p17654_p8 = scmp.ne.s32.totalorder %s18973_s22, %s17653_s12  ;;  %p17657_p9 = scmp.lt.u32.totalorder %s17653_s12, %s18973_s22 }
 0x30a   :  { %p17659_p10 = pnand %p17657_p9, %p17654_p8 }
 0x30c   :  { %17662 = shalt.err (!%p17659_p10)
}
 0x30d   :  { %s17663_s23 = scalar_lea.vmem %s497_s20, 1024  ;;  %p17668_p12 = scmp.lt.s32.totalorder %s497_s20, %s497_s20 }
 0x30e   :  { %p17664_p11 = scmp.ne.s32.totalorder %s497_s20, %s17663_s23  ;;  %p17669_p13 = scmp.lt.s32.totalorder %s17663_s23, %s17663_s23 }
 0x310   :  { %p17670_p0 = por %p17669_p13, %p17668_p12 }
 0x312   :  { %p17671_p1 = pnand %p17670_p0, %p17664_p11 }
 0x314   :  { %17674 = shalt.err (!%p17671_p1)
}
 0x315   :  { %s18974_s29 = sld [smem:[#allocation109_spill]]  ;;  %s17869_s24 = smov [#allocation57]  }
 0x316   :  { %502 = dma.hbm_to_vmem [thread:$0]  %s18973_s22, 1024, %s497_s20, [#allocation53], %s17838_s6, %s17838_s6, %s17839_s15  }
 0x317   :  { %s518_s26 = sshll.u32 %s17869_s24, 4  ;;  %s17870_s28 = smov [#allocation60]   ;;  %s519_s26 = int_to_ptr.vmem [resolvable:$true] %s518_s26 }
 0x318   :  { %s540_s1 = sshll.u32 %s17870_s28, 4  ;;  %s541_s1 = int_to_ptr.vmem [resolvable:$true] %s540_s1 }
 0x31b   :  { %s17675_s27 = scalar_lea.hbm %s18974_s29, 1024 }
 0x31c   :  { %p17676_p2 = scmp.ne.s32.totalorder %s18974_s29, %s17675_s27  ;;  %p17679_p3 = scmp.lt.u32.totalorder %s17675_s27, %s18974_s29 }
 0x31e   :  { %p17681_p4 = pnand %p17679_p3, %p17676_p2 }
 0x320   :  { %17684 = shalt.err (!%p17681_p4)
}
 0x321   :  { %s17685_s14 = scalar_lea.vmem %s519_s26, 1024  ;;  %p17690_p6 = scmp.lt.s32.totalorder %s519_s26, %s519_s26 }
 0x322   :  { %p17686_p5 = scmp.ne.s32.totalorder %s519_s26, %s17685_s14  ;;  %p17691_p7 = scmp.lt.s32.totalorder %s17685_s14, %s17685_s14 }
 0x324   :  { %p17692_p8 = por %p17691_p7, %p17690_p6 }
 0x326   :  { %p17693_p9 = pnand %p17692_p8, %p17686_p5 }
 0x328   :  { %17696 = shalt.err (!%p17693_p9)
}
 0x329   :  { %524 = dma.hbm_to_vmem [thread:$0]  %s18974_s29, 1024, %s519_s26, [#allocation56], %s17838_s6, %s17838_s6, %s17839_s15  }
 0x32a   :  { %s17697_s8 = scalar_lea.hbm %s18090_s4, 8192 }
 0x32b   :  { %p17698_p10 = scmp.ne.s32.totalorder %s18090_s4, %s17697_s8  ;;  %p17701_p11 = scmp.lt.u32.totalorder %s17697_s8, %s18090_s4 }
 0x32d   :  { %p17703_p12 = pnand %p17701_p11, %p17698_p10 }
 0x32f   :  { %17706 = shalt.err (!%p17703_p12)
}
 0x330   :  { %s17707_s2 = scalar_lea.vmem %s541_s1, 8192  ;;  %p17712_p0 = scmp.lt.s32.totalorder %s541_s1, %s541_s1 }
 0x331   :  { %p17708_p13 = scmp.ne.s32.totalorder %s541_s1, %s17707_s2  ;;  %p17713_p1 = scmp.lt.s32.totalorder %s17707_s2, %s17707_s2 }
 0x333   :  { %p17714_p2 = por %p17713_p1, %p17712_p0 }
 0x335   :  { %p17715_p3 = pnand %p17714_p2, %p17708_p13 }
 0x337   :  { %17718 = shalt.err (!%p17715_p3)
}
 0x338   :  { %s17871_s7 = smov 512   ;;  %s17872_s5 = smov 32  }
 0x339   :  { %546 = dma.hbm_to_vmem [thread:$0]  %s18090_s4, 8192, %s541_s1, [#allocation59], %s17871_s7, %s17871_s7, %s17872_s5  }
 0x33a   :  { %s17873_s6 = smov [#allocation61]   ;;  %s17719_s10 = scalar_lea.hbm %s18095_s9, 128 }
 0x33b   :  { %s553_s15 = sshll.u32 %s17873_s6, 4  ;;  %p17720_p4 = scmp.ne.s32.totalorder %s18095_s9, %s17719_s10  ;;  %s554_s15 = int_to_ptr.vmem [resolvable:$true] %s553_s15 }
 0x33c   :  { %p17723_p5 = scmp.lt.u32.totalorder %s17719_s10, %s18095_s9 }
 0x33e   :  { %p17725_p6 = pnand %p17723_p5, %p17720_p4 }
 0x340   :  { %17728 = shalt.err (!%p17725_p6)
}
 0x341   :  { %s17729_s25 = scalar_lea.vmem %s554_s15, 128  ;;  %p17734_p8 = scmp.lt.s32.totalorder %s554_s15, %s554_s15 }
 0x342   :  { %p17730_p7 = scmp.ne.s32.totalorder %s554_s15, %s17729_s25  ;;  %p17735_p9 = scmp.lt.s32.totalorder %s17729_s25, %s17729_s25 }
 0x344   :  { %p17736_p10 = por %p17735_p9, %p17734_p8 }
 0x346   :  { %p17737_p11 = pnand %p17736_p10, %p17730_p7 }
 0x348   :  { %17740 = shalt.err (!%p17737_p11)
}
 0x349   :  { %556 = dma.hbm_to_vmem [thread:$0]  %s18095_s9, 128, %s554_s15, [#allocation62]  }
 0x34a   :  { %17741 = dma.done.wait [#allocation3], 147456  }
 0x34b   :  { %17742 = vsyncadd [#allocation3], 4294819840 }
 0x34c   :  { %17743 = dma.done.wait [#allocation5], 4384  }
 0x34d   :  { %17744 = vsyncadd [#allocation5], 4294962912 }
 0x34e   :  { %17745 = dma.done.wait [#allocation8], 4128  }
 0x34f   :  { %17746 = vsyncadd [#allocation8], 4294963168 }
 0x350   :  { %17747 = dma.done.wait [#allocation11], 4128  }
 0x351   :  { %17748 = vsyncadd [#allocation11], 4294963168 }
 0x352   :  { %17749 = dma.done.wait [#allocation14], 4128  }
 0x353   :  { %17750 = vsyncadd [#allocation14], 4294963168 }
 0x354   :  { %17751 = dma.done.wait [#allocation17], 2080  }
 0x355   :  { %17752 = vsyncadd [#allocation17], 4294965216 }
 0x356   :  { %17753 = dma.done.wait [#allocation20], 1040  }
 0x357   :  { %17754 = vsyncadd [#allocation20], 4294966256 }
 0x358   :  { %17755 = dma.done.wait [#allocation23], 2064  }
 0x359   :  { %17756 = vsyncadd [#allocation23], 4294965232 }
 0x35a   :  { %17757 = dma.done.wait [#allocation26], 1040  }
 0x35b   :  { %17758 = vsyncadd [#allocation26], 4294966256 }
 0x35c   :  { %17759 = dma.done.wait [#allocation29], 1040  }
 0x35d   :  { %17760 = vsyncadd [#allocation29], 4294966256 }
 0x35e   :  { %17761 = dma.done.wait [#allocation32], 32  }
 0x35f   :  { %17762 = vsyncadd [#allocation32], 4294967264 }
 0x360   :  { %17763 = dma.done.wait [#allocation35], 528  }
 0x361   :  { %17764 = vsyncadd [#allocation35], 4294966768 }
 0x362   :  { %17765 = dma.done.wait [#allocation38], 528  }
 0x363   :  { %17766 = vsyncadd [#allocation38], 4294966768 }
 0x364   :  { %17767 = dma.done.wait [#allocation41], 528  }
 0x365   :  { %17768 = vsyncadd [#allocation41], 4294966768 }
 0x366   :  { %17769 = dma.done.wait [#allocation44], 528  }
 0x367   :  { %17770 = vsyncadd [#allocation44], 4294966768 }
 0x368   :  { %17771 = dma.done.wait [#allocation47], 1040  }
 0x369   :  { %17772 = vsyncadd [#allocation47], 4294966256 }
 0x36a   :  { %17773 = dma.done.wait [#allocation50], 528  }
 0x36b   :  { %17774 = vsyncadd [#allocation50], 4294966768 }
 0x36c   :  { %17775 = dma.done.wait [#allocation53], 1040  }
 0x36d   :  { %17776 = vsyncadd [#allocation53], 4294966256 }
 0x36e   :  { %17777 = dma.done.wait [#allocation56], 1040  }
 0x36f   :  { %17778 = vsyncadd [#allocation56], 4294966256 }
 0x370   :  { %17779 = dma.done.wait [#allocation59], 8208  }
 0x371   :  { %17780 = vsyncadd [#allocation59], 4294959088 }
 0x372   :  { %17781 = dma.done.wait [#allocation62], 128  }
 0x373   :  { %17782 = vsyncadd [#allocation62], 4294967168  ;;  %v14824_v0 = vld [vmem:[#allocation2 + $0x4] ss:$72 sps:$4 sm:$0xff]   ;;  %v14828_v2 = vld [vmem:[#allocation2] ss:$72 sps:$4 sm:$0xff]  }
 0x374   :  { %v14826_v1 = vld [vmem:[#allocation2 + $0xc] ss:$72 sps:$4 sm:$0xff]   ;;  %7734 = vmatprep.subr.bf16.mxu0 %v14824_v0  ;;  %v14829_v3 = vld [vmem:[#allocation2 + $0x8] ss:$72 sps:$4 sm:$0xff]   ;;  %v14832_v5 = vld [vmem:[#allocation2 + $0x9c] ss:$72 sps:$4 sm:$0xff]  }
 0x375   :  { %7906 = vmatprep.subr.bf16.mxu1 %v14826_v1  ;;  %v14830_v4 = vld [vmem:[#allocation2 + $0x94] ss:$72 sps:$4 sm:$0xff]   ;;  %7735 = vmatpush1.bf16.msra.mxu0 %v14828_v2  ;;  %v14834_v6 = vld [vmem:[#allocation2 + $0x90] ss:$72 sps:$4 sm:$0xff]   ;;  %v14836_v8 = vld [vmem:[#allocation2 + $0x124] ss:$72 sps:$4 sm:$0xff]  }
 0x376   :  { %7907 = vmatpush1.bf16.msra.mxu1 %v14829_v3  ;;  %7736 = vmatprep.subr.bf16.mxu0 %v14830_v4  ;;  %v14835_v7 = vld [vmem:[#allocation2 + $0x98] ss:$72 sps:$4 sm:$0xff]   ;;  %v14838_v9 = vld [vmem:[#allocation2 + $0x12c] ss:$72 sps:$4 sm:$0xff]   ;;  %v14841_v11 = vld [vmem:[#allocation2 + $0x128] ss:$72 sps:$4 sm:$0xff]  }
 0x377   :  { %7908 = vmatprep.subr.bf16.mxu1 %v14832_v5  ;;  %v14840_v10 = vld [vmem:[#allocation2 + $0x120] ss:$72 sps:$4 sm:$0xff]   ;;  %v14842_v12 = vld [vmem:[#allocation2 + $0x1b4] ss:$72 sps:$4 sm:$0xff]   ;;  %v14846_v14 = vld [vmem:[#allocation2 + $0x1b0] ss:$72 sps:$4 sm:$0xff]  }
 0x378   :  { %v14844_v13 = vld [vmem:[#allocation2 + $0x1bc] ss:$72 sps:$4 sm:$0xff]   ;;  %v14847_v15 = vld [vmem:[#allocation2 + $0x1b8] ss:$72 sps:$4 sm:$0xff]   ;;  %v14850_v17 = vld [vmem:[#allocation2 + $0x24c] ss:$72 sps:$4 sm:$0xff]  }
 0x379   :  { %7737 = vmatpush1.bf16.msra.mxu0 %v14834_v6  ;;  %v14848_v16 = vld [vmem:[#allocation2 + $0x244] ss:$72 sps:$4 sm:$0xff]   ;;  %v14852_v18 = vld [vmem:[#allocation2 + $0x240] ss:$72 sps:$4 sm:$0xff]   ;;  %v14854_v20 = vld [vmem:[#allocation2 + $0x2d4] ss:$72 sps:$4 sm:$0xff]  }
 0x37a   :  { %7909 = vmatpush1.bf16.msra.mxu1 %v14835_v7  ;;  %7738 = vmatprep.subr.bf16.mxu0 %v14836_v8  ;;  %v14853_v19 = vld [vmem:[#allocation2 + $0x248] ss:$72 sps:$4 sm:$0xff]   ;;  %v14856_v21 = vld [vmem:[#allocation2 + $0x2dc] ss:$72 sps:$4 sm:$0xff]   ;;  %v14859_v23 = vld [vmem:[#allocation2 + $0x2d8] ss:$72 sps:$4 sm:$0xff]  }
 0x37b   :  { %7910 = vmatprep.subr.bf16.mxu1 %v14838_v9  ;;  %v14858_v22 = vld [vmem:[#allocation2 + $0x2d0] ss:$72 sps:$4 sm:$0xff]   ;;  %v14860_v24 = vld [vmem:[#allocation2 + $0x364] ss:$72 sps:$4 sm:$0xff]   ;;  %v14864_v26 = vld [vmem:[#allocation2 + $0x360] ss:$72 sps:$4 sm:$0xff]  }
 0x37c   :  { %v14862_v25 = vld [vmem:[#allocation2 + $0x36c] ss:$72 sps:$4 sm:$0xff]   ;;  %v14865_v27 = vld [vmem:[#allocation2 + $0x368] ss:$72 sps:$4 sm:$0xff]   ;;  %v14868_v29 = vld [vmem:[#allocation2 + $0x3fc] ss:$72 sps:$4 sm:$0xff]  }
 0x37d   :  { %7739 = vmatpush1.bf16.msra.mxu0 %v14840_v10  ;;  %v14866_v28 = vld [vmem:[#allocation2 + $0x3f4] ss:$72 sps:$4 sm:$0xff]   ;;  %v14870_v30 = vld [vmem:[#allocation2 + $0x3f0] ss:$72 sps:$4 sm:$0xff]   ;;  %v14872_v32 = vld [vmem:[#allocation2 + $0x484] ss:$72 sps:$4 sm:$0xff]  }
 0x37e   :  { %7911 = vmatpush1.bf16.msra.mxu1 %v14841_v11  ;;  %7740 = vmatprep.subr.bf16.mxu0 %v14842_v12  ;;  %v14871_v31 = vld [vmem:[#allocation2 + $0x3f8] ss:$72 sps:$4 sm:$0xff]   ;;  %v14874_v33 = vld [vmem:[#allocation2 + $0x48c] ss:$72 sps:$4 sm:$0xff]   ;;  %v14877_v35 = vld [vmem:[#allocation2 + $0x488] ss:$72 sps:$4 sm:$0xff]  }
 0x37f   :  { %7912 = vmatprep.subr.bf16.mxu1 %v14844_v13  ;;  %v14876_v34 = vld [vmem:[#allocation2 + $0x480] ss:$72 sps:$4 sm:$0xff]   ;;  %v14878_v36 = vld [vmem:[#allocation2 + $0x514] ss:$72 sps:$4 sm:$0xff]   ;;  %v14882_v38 = vld [vmem:[#allocation2 + $0x510] ss:$72 sps:$4 sm:$0xff]  }
 0x380   :  { %v14880_v37 = vld [vmem:[#allocation2 + $0x51c] ss:$72 sps:$4 sm:$0xff]   ;;  %s18975_s9 = sld [smem:[#allocation84_spill]]  ;;  %v14883_v39 = vld [vmem:[#allocation2 + $0x518] ss:$72 sps:$4 sm:$0xff]   ;;  %vm17875_vm0 = vmmov 0  }
 0x381   :  { %7741 = vmatpush1.bf16.msra.mxu0 %v14846_v14  ;;  %v14884_v40 = vld [vmem:[#allocation2 + $0x5a4] ss:$72 sps:$4 sm:$0xff]   ;;  %v14888_v42 = vld [vmem:[#allocation2 + $0x5a0] ss:$72 sps:$4 sm:$0xff]   ;;  %v14890_v44 = vld [vmem:[#allocation2 + $0x634] ss:$72 sps:$4 sm:$0xff]  }
 0x382   :  { %7913 = vmatpush1.bf16.msra.mxu1 %v14847_v15  ;;  %7742 = vmatprep.subr.bf16.mxu0 %v14848_v16  ;;  %v14886_v41 = vld [vmem:[#allocation2 + $0x5ac] ss:$72 sps:$4 sm:$0xff]   ;;  %v14889_v43 = vld [vmem:[#allocation2 + $0x5a8] ss:$72 sps:$4 sm:$0xff]   ;;  %v14892_v45 = vld [vmem:[#allocation2 + $0x63c] ss:$72 sps:$4 sm:$0xff]  }
 0x383   :  { %7914 = vmatprep.subr.bf16.mxu1 %v14850_v17  ;;  %v14894_v48 = vld [vmem:[#allocation2 + $0x630] ss:$72 sps:$4 sm:$0xff]   ;;  %v14896_v51 = vld [vmem:[#allocation2 + $0x6c4] ss:$72 sps:$4 sm:$0xff]   ;;  %v14900_v53 = vld [vmem:[#allocation2 + $0x6c0] ss:$72 sps:$4 sm:$0xff]  }
 0x384   :  { %v14895_v49 = vld [vmem:[#allocation2 + $0x638] ss:$72 sps:$4 sm:$0xff]   ;;  %v14898_v52 = vld [vmem:[#allocation2 + $0x6cc] ss:$72 sps:$4 sm:$0xff]   ;;  %v14901_v54 = vld [vmem:[#allocation2 + $0x6c8] ss:$72 sps:$4 sm:$0xff]  }
 0x385   :  { %7743 = vmatpush1.bf16.msra.mxu0 %v14852_v18  ;;  %v14902_v55 = vld [vmem:[#allocation2 + $0x754] ss:$72 sps:$4 sm:$0xff]   ;;  %v14906_v57 = vld [vmem:[#allocation2 + $0x750] ss:$72 sps:$4 sm:$0xff]   ;;  %v14908_v59 = vld [vmem:[#allocation2 + $0x7e4] ss:$72 sps:$4 sm:$0xff]  }
 0x386   :  { %7915 = vmatpush1.bf16.msra.mxu1 %v14853_v19  ;;  %7744 = vmatprep.subr.bf16.mxu0 %v14854_v20  ;;  %v678_v46 = vld [vmem:[%s18975_s9] sm:$0xff]  ;;  %v14910_v60 = vld [vmem:[#allocation2 + $0x7ec] ss:$72 sps:$4 sm:$0xff]   ;;  %v14913_v62 = vld [vmem:[#allocation2 + $0x7e8] ss:$72 sps:$4 sm:$0xff]   ;;  %s18976_s4 = sld [smem:[#allocation95_spill]] }
 0x387   :  { %7916 = vmatprep.subr.bf16.mxu1 %v14856_v21  ;;  %v682_v47 = vld [vmem:[%s18975_s9 + $0x20] sm:$0xff]  ;;  %v14914_v63 = vld [vmem:[#allocation2 + $0x874] ss:$72 sps:$4 sm:$0xff]   ;;  %v14918_v1 = vld [vmem:[#allocation2 + $0x870] ss:$72 sps:$4 sm:$0xff]   ;;  %s18977_s19 = sld [smem:[#allocation98_spill]] }
 0x388   :  { %v18330_v50 = vcombine.high %v678_v46, %v682_v47  ;;  %v14904_v56 = vld [vmem:[#allocation2 + $0x75c] ss:$72 sps:$4 sm:$0xff]   ;;  %v14907_v58 = vld [vmem:[#allocation2 + $0x758] ss:$72 sps:$4 sm:$0xff]   ;;  %v14925_v4 = vld [vmem:[#allocation2 + $0x90c] ss:$72 sps:$4 sm:$0xff]   ;;  %v18334_v5 = vcombine.low %v678_v46, %v682_v47 }
 0x389   :  { %7745 = vmatpush1.bf16.msra.mxu0 %v14858_v22  ;;  %v14912_v61 = vld [vmem:[#allocation2 + $0x7e0] ss:$72 sps:$4 sm:$0xff]   ;;  %v14916_v0 = vld [vmem:[#allocation2 + $0x87c] ss:$72 sps:$4 sm:$0xff]   ;;  %v14926_v10 = vld [vmem:[#allocation2 + $0x990] ss:$72 sps:$4 sm:$0xff]  }
 0x38a   :  { %7917 = vmatpush1.bf16.msra.mxu1 %v14859_v23  ;;  %7746 = vmatprep.subr.bf16.mxu0 %v14860_v24  ;;  %v14919_v2 = vld [vmem:[#allocation2 + $0x878] ss:$72 sps:$4 sm:$0xff]   ;;  %v14922_v3 = vld [vmem:[#allocation2 + $0x904] ss:$72 sps:$4 sm:$0xff]   ;;  %v14923_v7 = vld [vmem:[#allocation2 + $0x908] ss:$72 sps:$4 sm:$0xff]  }
 0x38b   :  { %7918 = vmatprep.subr.bf16.mxu1 %v14862_v25  ;;  %7766 = vmatprep.mubr.bf16.mxu0 %v18330_v50  ;;  %v14920_v6 = vld [vmem:[#allocation2 + $0x900] ss:$72 sps:$4 sm:$0xff]   ;;  %v14928_v8 = vld [vmem:[#allocation2 + $0x994] ss:$72 sps:$4 sm:$0xff]   ;;  %v14934_v12 = vld [vmem:[#allocation2 + $0xa24] ss:$72 sps:$4 sm:$0xff]  }
 0x38c   :  { %7938 = vmatprep.mubr.bf16.mxu1 %v18330_v50  ;;  %v14931_v9 = vld [vmem:[#allocation2 + $0x99c] ss:$72 sps:$4 sm:$0xff]   ;;  %v14929_v11 = vld [vmem:[#allocation2 + $0x998] ss:$72 sps:$4 sm:$0xff]   ;;  %v14937_v13 = vld [vmem:[#allocation2 + $0xa2c] ss:$72 sps:$4 sm:$0xff]  }
 0x38d   :  { %7747 = vmatpush1.bf16.msra.mxu0 %v14864_v26  ;;  %v14932_v14 = vld [vmem:[#allocation2 + $0xa20] ss:$72 sps:$4 sm:$0xff]   ;;  %v14940_v16 = vld [vmem:[#allocation2 + $0xab4] ss:$72 sps:$4 sm:$0xff]   ;;  %v14938_v18 = vld [vmem:[#allocation2 + $0xab0] ss:$72 sps:$4 sm:$0xff]  }
 0x38e   :  { %7919 = vmatpush1.bf16.msra.mxu1 %v14865_v27  ;;  %7748 = vmatprep.subr.bf16.mxu0 %v14866_v28  ;;  %v14935_v15 = vld [vmem:[#allocation2 + $0xa28] ss:$72 sps:$4 sm:$0xff]   ;;  %v14943_v17 = vld [vmem:[#allocation2 + $0xabc] ss:$72 sps:$4 sm:$0xff]   ;;  %v14941_v19 = vld [vmem:[#allocation2 + $0xab8] ss:$72 sps:$4 sm:$0xff]  }
 0x38f   :  { %7920 = vmatprep.subr.bf16.mxu1 %v14868_v29  ;;  %v14946_v20 = vld [vmem:[#allocation2 + $0xb44] ss:$72 sps:$4 sm:$0xff]   ;;  %v14944_v22 = vld [vmem:[#allocation2 + $0xb40] ss:$72 sps:$4 sm:$0xff]   ;;  %v14952_v24 = vld [vmem:[#allocation2 + $0xbd4] ss:$72 sps:$4 sm:$0xff]  }
 0x390   :  { %v14949_v21 = vld [vmem:[#allocation2 + $0xb4c] ss:$72 sps:$4 sm:$0xff]   ;;  %v14947_v23 = vld [vmem:[#allocation2 + $0xb48] ss:$72 sps:$4 sm:$0xff]   ;;  %v14955_v25 = vld [vmem:[#allocation2 + $0xbdc] ss:$72 sps:$4 sm:$0xff]  }
 0x391   :  { %7749 = vmatpush1.bf16.msra.mxu0 %v14870_v30  ;;  %v14950_v26 = vld [vmem:[#allocation2 + $0xbd0] ss:$72 sps:$4 sm:$0xff]   ;;  %v14958_v28 = vld [vmem:[#allocation2 + $0xc64] ss:$72 sps:$4 sm:$0xff]   ;;  %vm11200_vm1 = vcmask 523264  }
 0x392   :  { %7921 = vmatpush1.bf16.msra.mxu1 %v14871_v31  ;;  %7750 = vmatprep.subr.bf16.mxu0 %v14872_v32  ;;  %v14953_v27 = vld [vmem:[#allocation2 + $0xbd8] ss:$72 sps:$4 sm:$0xff]   ;;  %v14961_v29 = vld [vmem:[#allocation2 + $0xc6c] ss:$72 sps:$4 sm:$0xff]  }
 0x393   :  { %7922 = vmatprep.subr.bf16.mxu1 %v14874_v33  ;;  %v18339_v30 = vld [vmem:[%s18975_s9 + $0x8] sm:$0xff]  ;;  %v14977_v46 = vld [vmem:[#allocation2 + $0xe18] ss:$72 sps:$4 sm:$0xff]  }
 0x394   :  { %v18342_v31 = vld [vmem:[%s18975_s9 + $0x28] sm:$0xff] }
 0x395   :  { %7751 = vmatpush1.bf16.msra.mxu0 %v14876_v34  ;;  %v14956_v32 = vld [vmem:[#allocation2 + $0xc60] ss:$72 sps:$4 sm:$0xff]   ;;  %v18346_v34 = vcombine.high %v18339_v30, %v18342_v31  ;;  %v14982_v47 = vld [vmem:[#allocation2 + $0xea4] ss:$72 sps:$4 sm:$0xff]  }
 0x396   :  { %7923 = vmatpush1.bf16.msra.mxu1 %v14877_v35  ;;  %7752 = vmatprep.subr.bf16.mxu0 %v14878_v36  ;;  %v14959_v33 = vld [vmem:[#allocation2 + $0xc68] ss:$72 sps:$4 sm:$0xff]   ;;  %v14964_v35 = vld [vmem:[#allocation2 + $0xcf4] ss:$72 sps:$4 sm:$0xff]  }
 0x397   :  { %7924 = vmatprep.subr.bf16.mxu1 %v14880_v37  ;;  %v14967_v36 = vld [vmem:[#allocation2 + $0xcfc] ss:$72 sps:$4 sm:$0xff]   ;;  %v14962_v37 = vld [vmem:[#allocation2 + $0xcf0] ss:$72 sps:$4 sm:$0xff]  }
 0x399   :  { %7753 = vmatpush1.bf16.msra.mxu0 %v14882_v38  ;;  %v14965_v38 = vld [vmem:[#allocation2 + $0xcf8] ss:$72 sps:$4 sm:$0xff]  }
 0x39a   :  { %7925 = vmatpush1.bf16.msra.mxu1 %v14883_v39  ;;  %7754 = vmatprep.subr.bf16.mxu0 %v14884_v40  ;;  %v14970_v39 = vld [vmem:[#allocation2 + $0xd84] ss:$72 sps:$4 sm:$0xff]  }
 0x39b   :  { %7926 = vmatprep.subr.bf16.mxu1 %v14886_v41  ;;  %v14973_v40 = vld [vmem:[#allocation2 + $0xd8c] ss:$72 sps:$4 sm:$0xff]   ;;  %v14968_v41 = vld [vmem:[#allocation2 + $0xd80] ss:$72 sps:$4 sm:$0xff]  }
 0x39d   :  { %7755 = vmatpush1.bf16.msra.mxu0 %v14888_v42  ;;  %v14971_v42 = vld [vmem:[#allocation2 + $0xd88] ss:$72 sps:$4 sm:$0xff]  }
 0x39e   :  { %7927 = vmatpush1.bf16.msra.mxu1 %v14889_v43  ;;  %7756 = vmatprep.subr.bf16.mxu0 %v14890_v44  ;;  %v14976_v43 = vld [vmem:[#allocation2 + $0xe14] ss:$72 sps:$4 sm:$0xff]  }
 0x39f   :  { %7928 = vmatprep.subr.bf16.mxu1 %v14892_v45  ;;  %v14979_v44 = vld [vmem:[#allocation2 + $0xe1c] ss:$72 sps:$4 sm:$0xff]   ;;  %v14974_v45 = vld [vmem:[#allocation2 + $0xe10] ss:$72 sps:$4 sm:$0xff]  }
 0x3a1   :  { %7757 = vmatpush1.bf16.msra.mxu0 %v14894_v48  ;;  %v14985_v48 = vld [vmem:[#allocation2 + $0xeac] ss:$72 sps:$4 sm:$0xff]  }
 0x3a2   :  { %7929 = vmatpush1.bf16.msra.mxu1 %v14895_v49  ;;  %7758 = vmatprep.subr.bf16.mxu0 %v14896_v51  ;;  %v14980_v49 = vld [vmem:[#allocation2 + $0xea0] ss:$72 sps:$4 sm:$0xff]  }
 0x3a3   :  { %7930 = vmatprep.subr.bf16.mxu1 %v14898_v52  ;;  %v14983_v51 = vld [vmem:[#allocation2 + $0xea8] ss:$72 sps:$4 sm:$0xff]   ;;  %v14988_v52 = vld [vmem:[#allocation2 + $0xf34] ss:$72 sps:$4 sm:$0xff]  }
 0x3a5   :  { %7759 = vmatpush1.bf16.msra.mxu0 %v14900_v53  ;;  %v14991_v53 = vld [vmem:[#allocation2 + $0xf3c] ss:$72 sps:$4 sm:$0xff]  }
 0x3a6   :  { %7931 = vmatpush1.bf16.msra.mxu1 %v14901_v54  ;;  %7760 = vmatprep.subr.bf16.mxu0 %v14902_v55  ;;  %v14986_v54 = vld [vmem:[#allocation2 + $0xf30] ss:$72 sps:$4 sm:$0xff]  }
 0x3a7   :  { %7932 = vmatprep.subr.bf16.mxu1 %v14904_v56  ;;  %v14989_v55 = vld [vmem:[#allocation2 + $0xf38] ss:$72 sps:$4 sm:$0xff]   ;;  %v14994_v56 = vld [vmem:[#allocation2 + $0xfc4] ss:$72 sps:$4 sm:$0xff]  }
 0x3a9   :  { %7761 = vmatpush1.bf16.msra.mxu0 %v14906_v57  ;;  %v14997_v57 = vld [vmem:[#allocation2 + $0xfcc] ss:$72 sps:$4 sm:$0xff]  }
 0x3aa   :  { %7933 = vmatpush1.bf16.msra.mxu1 %v14907_v58  ;;  %7762 = vmatprep.subr.bf16.mxu0 %v14908_v59  ;;  %v14992_v58 = vld [vmem:[#allocation2 + $0xfc0] ss:$72 sps:$4 sm:$0xff]  }
 0x3ab   :  { %7934 = vmatprep.subr.bf16.mxu1 %v14910_v60  ;;  %v14995_v59 = vld [vmem:[#allocation2 + $0xfc8] ss:$72 sps:$4 sm:$0xff]   ;;  %v15000_v60 = vld [vmem:[#allocation2 + $0x1054] ss:$72 sps:$4 sm:$0xff]  }
 0x3ad   :  { %7763 = vmatpush1.bf16.msra.mxu0 %v14912_v61  ;;  %v15003_v61 = vld [vmem:[#allocation2 + $0x105c] ss:$72 sps:$4 sm:$0xff]  }
 0x3ae   :  { %7935 = vmatpush1.bf16.msra.mxu1 %v14913_v62  ;;  %7764 = vmatprep.subr.bf16.mxu0 %v14914_v63  ;;  %v14998_v62 = vld [vmem:[#allocation2 + $0x1050] ss:$72 sps:$4 sm:$0xff]  }
 0x3af   :  { %7936 = vmatprep.subr.bf16.mxu1 %v14916_v0  ;;  %v15001_v63 = vld [vmem:[#allocation2 + $0x1058] ss:$72 sps:$4 sm:$0xff]   ;;  %v15006_v0 = vld [vmem:[#allocation2 + $0x10e4] ss:$72 sps:$4 sm:$0xff]  }
 0x3b1   :  { %7765 = vmatpush1.bf16.msra.mxu0 %v14918_v1  ;;  %v15009_v1 = vld [vmem:[#allocation2 + $0x10ec] ss:$72 sps:$4 sm:$0xff]  }
 0x3b2   :  { %7937 = vmatpush1.bf16.msra.mxu1 %v14919_v2  ;;  %7777 = vmatprep.subr.bf16.mxu0 %v14922_v3  ;;  %v15004_v2 = vld [vmem:[#allocation2 + $0x10e0] ss:$72 sps:$4 sm:$0xff]  }
 0x3b3   :  { %7949 = vmatprep.subr.bf16.mxu1 %v14925_v4  ;;  %v15007_v3 = vld [vmem:[#allocation2 + $0x10e8] ss:$72 sps:$4 sm:$0xff]   ;;  %v15012_v4 = vld [vmem:[#allocation2 + $0x1174] ss:$72 sps:$4 sm:$0xff]  }
 0x3b4   :  { %7767 = vmatmul.mubr.bf16.vlgmr.msra.gmra.mrb[0].mxu0 %v18334_v5 }
 0x3b5   :  { %7939 = vmatmul.mubr.bf16.vlgmr.msra.gmra.mrb[0].mxu1 %v18334_v5  ;;  %7778 = vmatpush1.bf16.msra.mxu0 %v14920_v6  ;;  %v15015_v6 = vld [vmem:[#allocation2 + $0x117c] ss:$72 sps:$4 sm:$0xff]  }
 0x3b6   :  { %7950 = vmatpush1.bf16.msra.mxu1 %v14923_v7  ;;  %7779 = vmatprep.subr.bf16.mxu0 %v14928_v8  ;;  %v15010_v7 = vld [vmem:[#allocation2 + $0x1170] ss:$72 sps:$4 sm:$0xff]  }
 0x3b7   :  { %7951 = vmatprep.subr.bf16.mxu1 %v14931_v9  ;;  %7809 = vmatprep.mubr.bf16.mxu0 %v18346_v34  ;;  %v15013_v8 = vld [vmem:[#allocation2 + $0x1178] ss:$72 sps:$4 sm:$0xff]   ;;  %v15018_v9 = vld [vmem:[#allocation2 + $0x1204] ss:$72 sps:$4 sm:$0xff]  }
 0x3b8   :  { %7981 = vmatprep.mubr.bf16.mxu1 %v18346_v34 }
 0x3b9   :  { %7780 = vmatpush1.bf16.msra.mxu0 %v14926_v10  ;;  %v15021_v10 = vld [vmem:[#allocation2 + $0x120c] ss:$72 sps:$4 sm:$0xff]  }
 0x3ba   :  { %7952 = vmatpush1.bf16.msra.mxu1 %v14929_v11  ;;  %7781 = vmatprep.subr.bf16.mxu0 %v14934_v12  ;;  %v15016_v11 = vld [vmem:[#allocation2 + $0x1200] ss:$72 sps:$4 sm:$0xff]  }
 0x3bb   :  { %7953 = vmatprep.subr.bf16.mxu1 %v14937_v13  ;;  %v15019_v12 = vld [vmem:[#allocation2 + $0x1208] ss:$72 sps:$4 sm:$0xff]   ;;  %v18352_v13 = vcombine.low %v18339_v30, %v18342_v31  ;;  %v15045_v30 = vld [vmem:[#allocation2 + $0x144c] ss:$72 sps:$4 sm:$0xff]  }
 0x3bc   :  { %v15040_v31 = vld [vmem:[#allocation2 + $0x1440] ss:$72 sps:$4 sm:$0xff]  }
 0x3bd   :  { %7782 = vmatpush1.bf16.msra.mxu0 %v14932_v14  ;;  %v15024_v14 = vld [vmem:[#allocation2 + $0x1294] ss:$72 sps:$4 sm:$0xff]  }
 0x3be   :  { %7954 = vmatpush1.bf16.msra.mxu1 %v14935_v15  ;;  %7783 = vmatprep.subr.bf16.mxu0 %v14940_v16  ;;  %v15027_v15 = vld [vmem:[#allocation2 + $0x129c] ss:$72 sps:$4 sm:$0xff]   ;;  %v18355_v16 = vld [vmem:[%s18975_s9 + $0x10] sm:$0xff] }
 0x3bf   :  { %7955 = vmatprep.subr.bf16.mxu1 %v14943_v17  ;;  %v18358_v17 = vld [vmem:[%s18975_s9 + $0x30] sm:$0xff] }
 0x3c1   :  { %7784 = vmatpush1.bf16.msra.mxu0 %v14938_v18  ;;  %v18362_v18 = vcombine.high %v18355_v16, %v18358_v17 }
 0x3c2   :  { %7956 = vmatpush1.bf16.msra.mxu1 %v14941_v19  ;;  %7785 = vmatprep.subr.bf16.mxu0 %v14946_v20  ;;  %v15022_v19 = vld [vmem:[#allocation2 + $0x1290] ss:$72 sps:$4 sm:$0xff]  }
 0x3c3   :  { %7957 = vmatprep.subr.bf16.mxu1 %v14949_v21  ;;  %v15025_v20 = vld [vmem:[#allocation2 + $0x1298] ss:$72 sps:$4 sm:$0xff]   ;;  %v15030_v21 = vld [vmem:[#allocation2 + $0x1324] ss:$72 sps:$4 sm:$0xff]  }
 0x3c5   :  { %7786 = vmatpush1.bf16.msra.mxu0 %v14944_v22  ;;  %v15033_v22 = vld [vmem:[#allocation2 + $0x132c] ss:$72 sps:$4 sm:$0xff]  }
 0x3c6   :  { %7958 = vmatpush1.bf16.msra.mxu1 %v14947_v23  ;;  %7787 = vmatprep.subr.bf16.mxu0 %v14952_v24  ;;  %v15028_v23 = vld [vmem:[#allocation2 + $0x1320] ss:$72 sps:$4 sm:$0xff]  }
 0x3c7   :  { %7959 = vmatprep.subr.bf16.mxu1 %v14955_v25  ;;  %v15031_v24 = vld [vmem:[#allocation2 + $0x1328] ss:$72 sps:$4 sm:$0xff]   ;;  %v15036_v25 = vld [vmem:[#allocation2 + $0x13b4] ss:$72 sps:$4 sm:$0xff]  }
 0x3c9   :  { %7788 = vmatpush1.bf16.msra.mxu0 %v14950_v26  ;;  %v15039_v26 = vld [vmem:[#allocation2 + $0x13bc] ss:$72 sps:$4 sm:$0xff]  }
 0x3ca   :  { %7960 = vmatpush1.bf16.msra.mxu1 %v14953_v27  ;;  %7789 = vmatprep.subr.bf16.mxu0 %v14958_v28  ;;  %v15034_v27 = vld [vmem:[#allocation2 + $0x13b0] ss:$72 sps:$4 sm:$0xff]  }
 0x3cb   :  { %7961 = vmatprep.subr.bf16.mxu1 %v14961_v29  ;;  %v15037_v28 = vld [vmem:[#allocation2 + $0x13b8] ss:$72 sps:$4 sm:$0xff]   ;;  %v15042_v29 = vld [vmem:[#allocation2 + $0x1444] ss:$72 sps:$4 sm:$0xff]  }
 0x3cd   :  { %7790 = vmatpush1.bf16.msra.mxu0 %v14956_v32  ;;  %v15043_v32 = vld [vmem:[#allocation2 + $0x1448] ss:$72 sps:$4 sm:$0xff]  }
 0x3ce   :  { %7962 = vmatpush1.bf16.msra.mxu1 %v14959_v33  ;;  %7791 = vmatprep.subr.bf16.mxu0 %v14964_v35  ;;  %v15048_v33 = vld [vmem:[#allocation2 + $0x14d4] ss:$72 sps:$4 sm:$0xff]  }
 0x3cf   :  { %7963 = vmatprep.subr.bf16.mxu1 %v14967_v36  ;;  %v15051_v35 = vld [vmem:[#allocation2 + $0x14dc] ss:$72 sps:$4 sm:$0xff]   ;;  %v15046_v36 = vld [vmem:[#allocation2 + $0x14d0] ss:$72 sps:$4 sm:$0xff]  }
 0x3d1   :  { %7792 = vmatpush1.bf16.msra.mxu0 %v14962_v37  ;;  %v15049_v37 = vld [vmem:[#allocation2 + $0x14d8] ss:$72 sps:$4 sm:$0xff]  }
 0x3d2   :  { %7964 = vmatpush1.bf16.msra.mxu1 %v14965_v38  ;;  %7793 = vmatprep.subr.bf16.mxu0 %v14970_v39  ;;  %v15054_v38 = vld [vmem:[#allocation2 + $0x1564] ss:$72 sps:$4 sm:$0xff]  }
 0x3d3   :  { %7965 = vmatprep.subr.bf16.mxu1 %v14973_v40  ;;  %v15057_v39 = vld [vmem:[#allocation2 + $0x156c] ss:$72 sps:$4 sm:$0xff]   ;;  %v15052_v40 = vld [vmem:[#allocation2 + $0x1560] ss:$72 sps:$4 sm:$0xff]  }
 0x3d5   :  { %7794 = vmatpush1.bf16.msra.mxu0 %v14968_v41  ;;  %v15055_v41 = vld [vmem:[#allocation2 + $0x1568] ss:$72 sps:$4 sm:$0xff]  }
 0x3d6   :  { %7966 = vmatpush1.bf16.msra.mxu1 %v14971_v42  ;;  %7795 = vmatprep.subr.bf16.mxu0 %v14976_v43  ;;  %v15060_v42 = vld [vmem:[#allocation2 + $0x15f4] ss:$72 sps:$4 sm:$0xff]  }
 0x3d7   :  { %7967 = vmatprep.subr.bf16.mxu1 %v14979_v44  ;;  %v15063_v43 = vld [vmem:[#allocation2 + $0x15fc] ss:$72 sps:$4 sm:$0xff]   ;;  %v15058_v44 = vld [vmem:[#allocation2 + $0x15f0] ss:$72 sps:$4 sm:$0xff]  }
 0x3d9   :  { %7796 = vmatpush1.bf16.msra.mxu0 %v14974_v45  ;;  %v15061_v45 = vld [vmem:[#allocation2 + $0x15f8] ss:$72 sps:$4 sm:$0xff]  }
 0x3da   :  { %7968 = vmatpush1.bf16.msra.mxu1 %v14977_v46  ;;  %7797 = vmatprep.subr.bf16.mxu0 %v14982_v47  ;;  %v15066_v46 = vld [vmem:[#allocation2 + $0x1684] ss:$72 sps:$4 sm:$0xff]  }
 0x3db   :  { %7969 = vmatprep.subr.bf16.mxu1 %v14985_v48  ;;  %v15069_v47 = vld [vmem:[#allocation2 + $0x168c] ss:$72 sps:$4 sm:$0xff]   ;;  %v15064_v48 = vld [vmem:[#allocation2 + $0x1680] ss:$72 sps:$4 sm:$0xff]  }
 0x3dd   :  { %7798 = vmatpush1.bf16.msra.mxu0 %v14980_v49  ;;  %v15067_v49 = vld [vmem:[#allocation2 + $0x1688] ss:$72 sps:$4 sm:$0xff]  }
 0x3de   :  { %7970 = vmatpush1.bf16.msra.mxu1 %v14983_v51  ;;  %7799 = vmatprep.subr.bf16.mxu0 %v14988_v52  ;;  %v15072_v51 = vld [vmem:[#allocation2 + $0x1714] ss:$72 sps:$4 sm:$0xff]  }
 0x3df   :  { %7971 = vmatprep.subr.bf16.mxu1 %v14991_v53  ;;  %v15075_v52 = vld [vmem:[#allocation2 + $0x171c] ss:$72 sps:$4 sm:$0xff]   ;;  %v15070_v53 = vld [vmem:[#allocation2 + $0x1710] ss:$72 sps:$4 sm:$0xff]  }
 0x3e1   :  { %7800 = vmatpush1.bf16.msra.mxu0 %v14986_v54  ;;  %v15073_v54 = vld [vmem:[#allocation2 + $0x1718] ss:$72 sps:$4 sm:$0xff]  }
 0x3e2   :  { %7972 = vmatpush1.bf16.msra.mxu1 %v14989_v55  ;;  %7801 = vmatprep.subr.bf16.mxu0 %v14994_v56  ;;  %v15078_v55 = vld [vmem:[#allocation2 + $0x17a4] ss:$72 sps:$4 sm:$0xff]  }
 0x3e3   :  { %7973 = vmatprep.subr.bf16.mxu1 %v14997_v57  ;;  %v15081_v56 = vld [vmem:[#allocation2 + $0x17ac] ss:$72 sps:$4 sm:$0xff]   ;;  %v15076_v57 = vld [vmem:[#allocation2 + $0x17a0] ss:$72 sps:$4 sm:$0xff]  }
 0x3e5   :  { %7802 = vmatpush1.bf16.msra.mxu0 %v14992_v58  ;;  %v15079_v58 = vld [vmem:[#allocation2 + $0x17a8] ss:$72 sps:$4 sm:$0xff]  }
 0x3e6   :  { %7974 = vmatpush1.bf16.msra.mxu1 %v14995_v59  ;;  %7803 = vmatprep.subr.bf16.mxu0 %v15000_v60  ;;  %v15084_v59 = vld [vmem:[#allocation2 + $0x1834] ss:$72 sps:$4 sm:$0xff]  }
 0x3e7   :  { %7975 = vmatprep.subr.bf16.mxu1 %v15003_v61  ;;  %v15087_v60 = vld [vmem:[#allocation2 + $0x183c] ss:$72 sps:$4 sm:$0xff]   ;;  %v15082_v61 = vld [vmem:[#allocation2 + $0x1830] ss:$72 sps:$4 sm:$0xff]  }
 0x3e9   :  { %7804 = vmatpush1.bf16.msra.mxu0 %v14998_v62  ;;  %v15085_v62 = vld [vmem:[#allocation2 + $0x1838] ss:$72 sps:$4 sm:$0xff]  }
 0x3ea   :  { %7976 = vmatpush1.bf16.msra.mxu1 %v15001_v63  ;;  %7805 = vmatprep.subr.bf16.mxu0 %v15006_v0  ;;  %v15090_v63 = vld [vmem:[#allocation2 + $0x18c4] ss:$72 sps:$4 sm:$0xff]  }
 0x3eb   :  { %7977 = vmatprep.subr.bf16.mxu1 %v15009_v1  ;;  %v15093_v0 = vld [vmem:[#allocation2 + $0x18cc] ss:$72 sps:$4 sm:$0xff]   ;;  %v15088_v1 = vld [vmem:[#allocation2 + $0x18c0] ss:$72 sps:$4 sm:$0xff]  }
 0x3ed   :  { %7806 = vmatpush1.bf16.msra.mxu0 %v15004_v2  ;;  %v15091_v2 = vld [vmem:[#allocation2 + $0x18c8] ss:$72 sps:$4 sm:$0xff]  }
 0x3ee   :  { %7978 = vmatpush1.bf16.msra.mxu1 %v15007_v3  ;;  %7807 = vmatprep.subr.bf16.mxu0 %v15012_v4  ;;  %v15096_v3 = vld [vmem:[#allocation2 + $0x1954] ss:$72 sps:$4 sm:$0xff]  }
 0x3ef   :  { %7979 = vmatprep.subr.bf16.mxu1 %v15015_v6  ;;  %v15099_v4 = vld [vmem:[#allocation2 + $0x195c] ss:$72 sps:$4 sm:$0xff]   ;;  %v15094_v6 = vld [vmem:[#allocation2 + $0x1950] ss:$72 sps:$4 sm:$0xff]  }
 0x3f1   :  { %7808 = vmatpush1.bf16.msra.mxu0 %v15010_v7  ;;  %v15097_v7 = vld [vmem:[#allocation2 + $0x1958] ss:$72 sps:$4 sm:$0xff]  }
 0x3f2   :  { %7980 = vmatpush1.bf16.msra.mxu1 %v15013_v8  ;;  %7820 = vmatprep.subr.bf16.mxu0 %v15018_v9  ;;  %v15102_v8 = vld [vmem:[#allocation2 + $0x19e4] ss:$72 sps:$4 sm:$0xff]  }
 0x3f3   :  { %7992 = vmatprep.subr.bf16.mxu1 %v15021_v10  ;;  %v15105_v9 = vld [vmem:[#allocation2 + $0x19ec] ss:$72 sps:$4 sm:$0xff]   ;;  %v15100_v10 = vld [vmem:[#allocation2 + $0x19e0] ss:$72 sps:$4 sm:$0xff]  }
 0x3f4   :  { %7810 = vmatmul.mubr.bf16.vlgmr.msra.gmra.mrb[0].mxu0 %v18352_v13 }
 0x3f5   :  { %7982 = vmatmul.mubr.bf16.vlgmr.msra.gmra.mrb[0].mxu1 %v18352_v13  ;;  %7821 = vmatpush1.bf16.msra.mxu0 %v15016_v11  ;;  %v15103_v11 = vld [vmem:[#allocation2 + $0x19e8] ss:$72 sps:$4 sm:$0xff]  }
 0x3f6   :  { %7993 = vmatpush1.bf16.msra.mxu1 %v15019_v12  ;;  %7822 = vmatprep.subr.bf16.mxu0 %v15024_v14  ;;  %v15108_v12 = vld [vmem:[#allocation2 + $0x1a74] ss:$72 sps:$4 sm:$0xff]  }
 0x3f7   :  { %7994 = vmatprep.subr.bf16.mxu1 %v15027_v15  ;;  %7852 = vmatprep.mubr.bf16.mxu0 %v18362_v18  ;;  %v15111_v14 = vld [vmem:[#allocation2 + $0x1a7c] ss:$72 sps:$4 sm:$0xff]   ;;  %v15106_v15 = vld [vmem:[#allocation2 + $0x1a70] ss:$72 sps:$4 sm:$0xff]  }
 0x3f8   :  { %8024 = vmatprep.mubr.bf16.mxu1 %v18362_v18 }
 0x3f9   :  { %7823 = vmatpush1.bf16.msra.mxu0 %v15022_v19  ;;  %v15109_v19 = vld [vmem:[#allocation2 + $0x1a78] ss:$72 sps:$4 sm:$0xff]  }
 0x3fa   :  { %7995 = vmatpush1.bf16.msra.mxu1 %v15025_v20  ;;  %7824 = vmatprep.subr.bf16.mxu0 %v15030_v21  ;;  %v15114_v20 = vld [vmem:[#allocation2 + $0x1b04] ss:$72 sps:$4 sm:$0xff]  }
 0x3fb   :  { %7996 = vmatprep.subr.bf16.mxu1 %v15033_v22  ;;  %v15117_v21 = vld [vmem:[#allocation2 + $0x1b0c] ss:$72 sps:$4 sm:$0xff]   ;;  %v15112_v22 = vld [vmem:[#allocation2 + $0x1b00] ss:$72 sps:$4 sm:$0xff]  }
 0x3fd   :  { %7825 = vmatpush1.bf16.msra.mxu0 %v15028_v23  ;;  %v15115_v23 = vld [vmem:[#allocation2 + $0x1b08] ss:$72 sps:$4 sm:$0xff]  }
 0x3fe   :  { %7997 = vmatpush1.bf16.msra.mxu1 %v15031_v24  ;;  %7826 = vmatprep.subr.bf16.mxu0 %v15036_v25  ;;  %v18370_v24 = vcombine.low %v18355_v16, %v18358_v17  ;;  %v18373_v25 = vld [vmem:[%s18975_s9 + $0x18] sm:$0xff] }
 0x3ff   :  { %7998 = vmatprep.subr.bf16.mxu1 %v15039_v26  ;;  %v18376_v26 = vld [vmem:[%s18975_s9 + $0x38] sm:$0xff] }
 0x400   :  { %v15118_v16 = vld [vmem:[#allocation2 + $0x1b90] ss:$72 sps:$4 sm:$0xff]  }
 0x401   :  { %7827 = vmatpush1.bf16.msra.mxu0 %v15034_v27  ;;  %v15120_v27 = vld [vmem:[#allocation2 + $0x1b94] ss:$72 sps:$4 sm:$0xff]   ;;  %v15121_v17 = vld [vmem:[#allocation2 + $0x1b98] ss:$72 sps:$4 sm:$0xff]  }
 0x402   :  { %7999 = vmatpush1.bf16.msra.mxu1 %v15037_v28  ;;  %7828 = vmatprep.subr.bf16.mxu0 %v15042_v29  ;;  %v15123_v28 = vld [vmem:[#allocation2 + $0x1b9c] ss:$72 sps:$4 sm:$0xff]   ;;  %v18380_v29 = vcombine.high %v18373_v25, %v18376_v26 }
 0x403   :  { %8000 = vmatprep.subr.bf16.mxu1 %v15045_v30  ;;  %v15126_v30 = vld [vmem:[#allocation2 + $0x1c24] ss:$72 sps:$4 sm:$0xff]  }
 0x405   :  { %7829 = vmatpush1.bf16.msra.mxu0 %v15040_v31  ;;  %v15129_v31 = vld [vmem:[#allocation2 + $0x1c2c] ss:$72 sps:$4 sm:$0xff]  }
 0x406   :  { %8001 = vmatpush1.bf16.msra.mxu1 %v15043_v32  ;;  %7830 = vmatprep.subr.bf16.mxu0 %v15048_v33  ;;  %v15124_v32 = vld [vmem:[#allocation2 + $0x1c20] ss:$72 sps:$4 sm:$0xff]  }
 0x407   :  { %8002 = vmatprep.subr.bf16.mxu1 %v15051_v35  ;;  %v15127_v33 = vld [vmem:[#allocation2 + $0x1c28] ss:$72 sps:$4 sm:$0xff]   ;;  %v15132_v35 = vld [vmem:[#allocation2 + $0x1cb4] ss:$72 sps:$4 sm:$0xff]  }
 0x409   :  { %7831 = vmatpush1.bf16.msra.mxu0 %v15046_v36  ;;  %v15135_v36 = vld [vmem:[#allocation2 + $0x1cbc] ss:$72 sps:$4 sm:$0xff]  }
 0x40a   :  { %8003 = vmatpush1.bf16.msra.mxu1 %v15049_v37  ;;  %7832 = vmatprep.subr.bf16.mxu0 %v15054_v38  ;;  %v15130_v37 = vld [vmem:[#allocation2 + $0x1cb0] ss:$72 sps:$4 sm:$0xff]  }
 0x40b   :  { %8004 = vmatprep.subr.bf16.mxu1 %v15057_v39  ;;  %v15133_v38 = vld [vmem:[#allocation2 + $0x1cb8] ss:$72 sps:$4 sm:$0xff]   ;;  %v15138_v39 = vld [vmem:[#allocation2 + $0x1d44] ss:$72 sps:$4 sm:$0xff]  }
 0x40d   :  { %7833 = vmatpush1.bf16.msra.mxu0 %v15052_v40  ;;  %v15141_v40 = vld [vmem:[#allocation2 + $0x1d4c] ss:$72 sps:$4 sm:$0xff]  }
 0x40e   :  { %8005 = vmatpush1.bf16.msra.mxu1 %v15055_v41  ;;  %7834 = vmatprep.subr.bf16.mxu0 %v15060_v42  ;;  %v15136_v41 = vld [vmem:[#allocation2 + $0x1d40] ss:$72 sps:$4 sm:$0xff]  }
 0x40f   :  { %8006 = vmatprep.subr.bf16.mxu1 %v15063_v43  ;;  %v15139_v42 = vld [vmem:[#allocation2 + $0x1d48] ss:$72 sps:$4 sm:$0xff]   ;;  %v15144_v43 = vld [vmem:[#allocation2 + $0x1dd4] ss:$72 sps:$4 sm:$0xff]  }
 0x411   :  { %7835 = vmatpush1.bf16.msra.mxu0 %v15058_v44  ;;  %v15147_v44 = vld [vmem:[#allocation2 + $0x1ddc] ss:$72 sps:$4 sm:$0xff]  }
 0x412   :  { %8007 = vmatpush1.bf16.msra.mxu1 %v15061_v45  ;;  %7836 = vmatprep.subr.bf16.mxu0 %v15066_v46  ;;  %v15142_v45 = vld [vmem:[#allocation2 + $0x1dd0] ss:$72 sps:$4 sm:$0xff]  }
 0x413   :  { %8008 = vmatprep.subr.bf16.mxu1 %v15069_v47  ;;  %v15145_v46 = vld [vmem:[#allocation2 + $0x1dd8] ss:$72 sps:$4 sm:$0xff]   ;;  %v15150_v47 = vld [vmem:[#allocation2 + $0x1e64] ss:$72 sps:$4 sm:$0xff]  }
 0x415   :  { %7837 = vmatpush1.bf16.msra.mxu0 %v15064_v48  ;;  %v15153_v48 = vld [vmem:[#allocation2 + $0x1e6c] ss:$72 sps:$4 sm:$0xff]  }
 0x416   :  { %8009 = vmatpush1.bf16.msra.mxu1 %v15067_v49  ;;  %7838 = vmatprep.subr.bf16.mxu0 %v15072_v51  ;;  %v15148_v49 = vld [vmem:[#allocation2 + $0x1e60] ss:$72 sps:$4 sm:$0xff]  }
 0x417   :  { %8010 = vmatprep.subr.bf16.mxu1 %v15075_v52  ;;  %v15151_v51 = vld [vmem:[#allocation2 + $0x1e68] ss:$72 sps:$4 sm:$0xff]   ;;  %v15156_v52 = vld [vmem:[#allocation2 + $0x1ef4] ss:$72 sps:$4 sm:$0xff]  }
 0x419   :  { %7839 = vmatpush1.bf16.msra.mxu0 %v15070_v53  ;;  %v15159_v53 = vld [vmem:[#allocation2 + $0x1efc] ss:$72 sps:$4 sm:$0xff]  }
 0x41a   :  { %8011 = vmatpush1.bf16.msra.mxu1 %v15073_v54  ;;  %7840 = vmatprep.subr.bf16.mxu0 %v15078_v55  ;;  %v15154_v54 = vld [vmem:[#allocation2 + $0x1ef0] ss:$72 sps:$4 sm:$0xff]  }
 0x41b   :  { %8012 = vmatprep.subr.bf16.mxu1 %v15081_v56  ;;  %v15157_v55 = vld [vmem:[#allocation2 + $0x1ef8] ss:$72 sps:$4 sm:$0xff]   ;;  %v15162_v56 = vld [vmem:[#allocation2 + $0x1f84] ss:$72 sps:$4 sm:$0xff]  }
 0x41d   :  { %7841 = vmatpush1.bf16.msra.mxu0 %v15076_v57  ;;  %v15165_v57 = vld [vmem:[#allocation2 + $0x1f8c] ss:$72 sps:$4 sm:$0xff]  }
 0x41e   :  { %8013 = vmatpush1.bf16.msra.mxu1 %v15079_v58  ;;  %7842 = vmatprep.subr.bf16.mxu0 %v15084_v59  ;;  %v15160_v58 = vld [vmem:[#allocation2 + $0x1f80] ss:$72 sps:$4 sm:$0xff]  }
 0x41f   :  { %8014 = vmatprep.subr.bf16.mxu1 %v15087_v60  ;;  %v15163_v59 = vld [vmem:[#allocation2 + $0x1f88] ss:$72 sps:$4 sm:$0xff]   ;;  %v15168_v60 = vld [vmem:[#allocation2 + $0x2014] ss:$72 sps:$4 sm:$0xff]  }
 0x421   :  { %7843 = vmatpush1.bf16.msra.mxu0 %v15082_v61  ;;  %v15171_v61 = vld [vmem:[#allocation2 + $0x201c] ss:$72 sps:$4 sm:$0xff]  }
 0x422   :  { %8015 = vmatpush1.bf16.msra.mxu1 %v15085_v62  ;;  %7844 = vmatprep.subr.bf16.mxu0 %v15090_v63  ;;  %v15166_v62 = vld [vmem:[#allocation2 + $0x2010] ss:$72 sps:$4 sm:$0xff]  }
 0x423   :  { %8016 = vmatprep.subr.bf16.mxu1 %v15093_v0  ;;  %v15169_v63 = vld [vmem:[#allocation2 + $0x2018] ss:$72 sps:$4 sm:$0xff]   ;;  %v15174_v0 = vld [vmem:[#allocation2 + $0x20a4] ss:$72 sps:$4 sm:$0xff]  }
 0x425   :  { %7845 = vmatpush1.bf16.msra.mxu0 %v15088_v1  ;;  %v15177_v1 = vld [vmem:[#allocation2 + $0x20ac] ss:$72 sps:$4 sm:$0xff]  }
 0x426   :  { %8017 = vmatpush1.bf16.msra.mxu1 %v15091_v2  ;;  %7846 = vmatprep.subr.bf16.mxu0 %v15096_v3  ;;  %v15172_v2 = vld [vmem:[#allocation2 + $0x20a0] ss:$72 sps:$4 sm:$0xff]  }
 0x427   :  { %8018 = vmatprep.subr.bf16.mxu1 %v15099_v4  ;;  %v15175_v3 = vld [vmem:[#allocation2 + $0x20a8] ss:$72 sps:$4 sm:$0xff]   ;;  %v15180_v4 = vld [vmem:[#allocation2 + $0x2134] ss:$72 sps:$4 sm:$0xff]  }
 0x429   :  { %7847 = vmatpush1.bf16.msra.mxu0 %v15094_v6  ;;  %v15183_v6 = vld [vmem:[#allocation2 + $0x213c] ss:$72 sps:$4 sm:$0xff]  }
 0x42a   :  { %8019 = vmatpush1.bf16.msra.mxu1 %v15097_v7  ;;  %7848 = vmatprep.subr.bf16.mxu0 %v15102_v8  ;;  %v15178_v7 = vld [vmem:[#allocation2 + $0x2130] ss:$72 sps:$4 sm:$0xff]  }
 0x42b   :  { %8020 = vmatprep.subr.bf16.mxu1 %v15105_v9  ;;  %v15181_v8 = vld [vmem:[#allocation2 + $0x2138] ss:$72 sps:$4 sm:$0xff]   ;;  %v15186_v9 = vld [vmem:[#allocation2 + $0x21c4] ss:$72 sps:$4 sm:$0xff]  }
 0x42d   :  { %7849 = vmatpush1.bf16.msra.mxu0 %v15100_v10  ;;  %v15189_v10 = vld [vmem:[#allocation2 + $0x21cc] ss:$72 sps:$4 sm:$0xff]  }
 0x42e   :  { %8021 = vmatpush1.bf16.msra.mxu1 %v15103_v11  ;;  %7850 = vmatprep.subr.bf16.mxu0 %v15108_v12  ;;  %v15184_v11 = vld [vmem:[#allocation2 + $0x21c0] ss:$72 sps:$4 sm:$0xff]  }
 0x42f   :  { %8022 = vmatprep.subr.bf16.mxu1 %v15111_v14  ;;  %v15187_v12 = vld [vmem:[#allocation2 + $0x21c8] ss:$72 sps:$4 sm:$0xff]   ;;  %v15192_v14 = vld [vmem:[#allocation2 + $0x2254] ss:$72 sps:$4 sm:$0xff]  }
 0x431   :  { %7851 = vmatpush1.bf16.msra.mxu0 %v15106_v15  ;;  %v15195_v15 = vld [vmem:[#allocation2 + $0x225c] ss:$72 sps:$4 sm:$0xff]  }
 0x432   :  { %8023 = vmatpush1.bf16.msra.mxu1 %v15109_v19  ;;  %7863 = vmatprep.subr.bf16.mxu0 %v15114_v20  ;;  %v15190_v19 = vld [vmem:[#allocation2 + $0x2250] ss:$72 sps:$4 sm:$0xff]  }
 0x433   :  { %8035 = vmatprep.subr.bf16.mxu1 %v15117_v21  ;;  %v15193_v20 = vld [vmem:[#allocation2 + $0x2258] ss:$72 sps:$4 sm:$0xff]   ;;  %v15198_v21 = vld [vmem:[#allocation2 + $0x22e4] ss:$72 sps:$4 sm:$0xff]  }
 0x434   :  { %7853 = vmatmul.mubr.bf16.vlgmr.msra.gmra.mrb[0].mxu0 %v18370_v24 }
 0x435   :  { %8025 = vmatmul.mubr.bf16.vlgmr.msra.gmra.mrb[0].mxu1 %v18370_v24  ;;  %7864 = vmatpush1.bf16.msra.mxu0 %v15112_v22  ;;  %v15201_v22 = vld [vmem:[#allocation2 + $0x22ec] ss:$72 sps:$4 sm:$0xff]  }
 0x436   :  { %8036 = vmatpush1.bf16.msra.mxu1 %v15115_v23  ;;  %7865 = vmatprep.subr.bf16.mxu0 %v15120_v27  ;;  %v15196_v23 = vld [vmem:[#allocation2 + $0x22e0] ss:$72 sps:$4 sm:$0xff]  }
 0x437   :  { %8037 = vmatprep.subr.bf16.mxu1 %v15123_v28  ;;  %7895 = vmatprep.mubr.bf16.mxu0 %v18380_v29  ;;  %v15199_v27 = vld [vmem:[#allocation2 + $0x22e8] ss:$72 sps:$4 sm:$0xff]   ;;  %v15204_v28 = vld [vmem:[#allocation2 + $0x2374] ss:$72 sps:$4 sm:$0xff]  }
 0x438   :  { %8067 = vmatprep.mubr.bf16.mxu1 %v18380_v29 }
 0x439   :  { %7866 = vmatpush1.bf16.msra.mxu0 %v15118_v16  ;;  %v15207_v16 = vld [vmem:[#allocation2 + $0x237c] ss:$72 sps:$4 sm:$0xff]  }
 0x43a   :  { %8038 = vmatpush1.bf16.msra.mxu1 %v15121_v17  ;;  %7867 = vmatprep.subr.bf16.mxu0 %v15126_v30  ;;  %v15202_v17 = vld [vmem:[#allocation2 + $0x2370] ss:$72 sps:$4 sm:$0xff]  }
 0x43b   :  { %8039 = vmatprep.subr.bf16.mxu1 %v15129_v31  ;;  %v15205_v30 = vld [vmem:[#allocation2 + $0x2378] ss:$72 sps:$4 sm:$0xff]   ;;  %v15210_v31 = vld [vmem:[#allocation2 + $0x14] ss:$72 sps:$4 sm:$0xff]  }
 0x43d   :  { %7868 = vmatpush1.bf16.msra.mxu0 %v15124_v32  ;;  %v15213_v32 = vld [vmem:[#allocation2 + $0x1c] ss:$72 sps:$4 sm:$0xff]  }
 0x43e   :  { %8040 = vmatpush1.bf16.msra.mxu1 %v15127_v33  ;;  %7869 = vmatprep.subr.bf16.mxu0 %v15132_v35  ;;  %v18388_v33 = vcombine.low %v18373_v25, %v18376_v26  ;;  %v15208_v35 = vld [vmem:[#allocation2 + $0x10] ss:$72 sps:$4 sm:$0xff]   ;;  %v15225_v25 = vld [vmem:[#allocation2 + $0x13c] ss:$72 sps:$4 sm:$0xff]  }
 0x43f   :  { %8041 = vmatprep.subr.bf16.mxu1 %v15135_v36  ;;  %v15211_v36 = vld [vmem:[#allocation2 + $0x18] ss:$72 sps:$4 sm:$0xff]  }
 0x440   :  { %v15220_v26 = vld [vmem:[#allocation2 + $0x130] ss:$72 sps:$4 sm:$0xff]  }
 0x441   :  { %7870 = vmatpush1.bf16.msra.mxu0 %v15130_v37  ;;  %v15216_v37 = vld [vmem:[#allocation2 + $0xa4] ss:$72 sps:$4 sm:$0xff]  }
 0x442   :  { %8042 = vmatpush1.bf16.msra.mxu1 %v15133_v38  ;;  %7871 = vmatprep.subr.bf16.mxu0 %v15138_v39  ;;  %v15219_v38 = vld [vmem:[#allocation2 + $0xac] ss:$72 sps:$4 sm:$0xff]   ;;  %v15214_v39 = vld [vmem:[#allocation2 + $0xa0] ss:$72 sps:$4 sm:$0xff]  }
 0x443   :  { %8043 = vmatprep.subr.bf16.mxu1 %v15141_v40  ;;  %v15217_v40 = vld [vmem:[#allocation2 + $0xa8] ss:$72 sps:$4 sm:$0xff]  }
 0x445   :  { %7872 = vmatpush1.bf16.msra.mxu0 %v15136_v41  ;;  %v15222_v41 = vld [vmem:[#allocation2 + $0x134] ss:$72 sps:$4 sm:$0xff]  }
 0x446   :  { %8044 = vmatpush1.bf16.msra.mxu1 %v15139_v42  ;;  %7873 = vmatprep.subr.bf16.mxu0 %v15144_v43  ;;  %v15223_v42 = vld [vmem:[#allocation2 + $0x138] ss:$72 sps:$4 sm:$0xff]   ;;  %v15228_v43 = vld [vmem:[#allocation2 + $0x1c4] ss:$72 sps:$4 sm:$0xff]  }
 0x447   :  { %8045 = vmatprep.subr.bf16.mxu1 %v15147_v44  ;;  %v15231_v44 = vld [vmem:[#allocation2 + $0x1cc] ss:$72 sps:$4 sm:$0xff]  }
 0x449   :  { %7874 = vmatpush1.bf16.msra.mxu0 %v15142_v45  ;;  %v15226_v45 = vld [vmem:[#allocation2 + $0x1c0] ss:$72 sps:$4 sm:$0xff]  }
 0x44a   :  { %8046 = vmatpush1.bf16.msra.mxu1 %v15145_v46  ;;  %7875 = vmatprep.subr.bf16.mxu0 %v15150_v47  ;;  %v15229_v46 = vld [vmem:[#allocation2 + $0x1c8] ss:$72 sps:$4 sm:$0xff]   ;;  %v15234_v47 = vld [vmem:[#allocation2 + $0x254] ss:$72 sps:$4 sm:$0xff]  }
 0x44b   :  { %8047 = vmatprep.subr.bf16.mxu1 %v15153_v48  ;;  %v15237_v48 = vld [vmem:[#allocation2 + $0x25c] ss:$72 sps:$4 sm:$0xff]  }
 0x44d   :  { %7876 = vmatpush1.bf16.msra.mxu0 %v15148_v49  ;;  %v15232_v49 = vld [vmem:[#allocation2 + $0x250] ss:$72 sps:$4 sm:$0xff]  }
 0x44e   :  { %8048 = vmatpush1.bf16.msra.mxu1 %v15151_v51  ;;  %7877 = vmatprep.subr.bf16.mxu0 %v15156_v52  ;;  %v15235_v51 = vld [vmem:[#allocation2 + $0x258] ss:$72 sps:$4 sm:$0xff]   ;;  %v15240_v52 = vld [vmem:[#allocation2 + $0x2e4] ss:$72 sps:$4 sm:$0xff]  }
 0x44f   :  { %8049 = vmatprep.subr.bf16.mxu1 %v15159_v53  ;;  %v15243_v53 = vld [vmem:[#allocation2 + $0x2ec] ss:$72 sps:$4 sm:$0xff]  }
 0x451   :  { %7878 = vmatpush1.bf16.msra.mxu0 %v15154_v54  ;;  %v15238_v54 = vld [vmem:[#allocation2 + $0x2e0] ss:$72 sps:$4 sm:$0xff]  }
 0x452   :  { %8050 = vmatpush1.bf16.msra.mxu1 %v15157_v55  ;;  %7879 = vmatprep.subr.bf16.mxu0 %v15162_v56  ;;  %v15241_v55 = vld [vmem:[#allocation2 + $0x2e8] ss:$72 sps:$4 sm:$0xff]   ;;  %v15246_v56 = vld [vmem:[#allocation2 + $0x374] ss:$72 sps:$4 sm:$0xff]  }
 0x453   :  { %8051 = vmatprep.subr.bf16.mxu1 %v15165_v57  ;;  %v15249_v57 = vld [vmem:[#allocation2 + $0x37c] ss:$72 sps:$4 sm:$0xff]  }
 0x455   :  { %7880 = vmatpush1.bf16.msra.mxu0 %v15160_v58  ;;  %v15244_v58 = vld [vmem:[#allocation2 + $0x370] ss:$72 sps:$4 sm:$0xff]  }
 0x456   :  { %8052 = vmatpush1.bf16.msra.mxu1 %v15163_v59  ;;  %7881 = vmatprep.subr.bf16.mxu0 %v15168_v60  ;;  %v15247_v59 = vld [vmem:[#allocation2 + $0x378] ss:$72 sps:$4 sm:$0xff]   ;;  %v15252_v60 = vld [vmem:[#allocation2 + $0x404] ss:$72 sps:$4 sm:$0xff]  }
 0x457   :  { %8053 = vmatprep.subr.bf16.mxu1 %v15171_v61  ;;  %v15255_v61 = vld [vmem:[#allocation2 + $0x40c] ss:$72 sps:$4 sm:$0xff]  }
 0x459   :  { %7882 = vmatpush1.bf16.msra.mxu0 %v15166_v62  ;;  %v15250_v62 = vld [vmem:[#allocation2 + $0x400] ss:$72 sps:$4 sm:$0xff]  }
 0x45a   :  { %8054 = vmatpush1.bf16.msra.mxu1 %v15169_v63  ;;  %7883 = vmatprep.subr.bf16.mxu0 %v15174_v0  ;;  %v15253_v63 = vld [vmem:[#allocation2 + $0x408] ss:$72 sps:$4 sm:$0xff]   ;;  %v15258_v0 = vld [vmem:[#allocation2 + $0x494] ss:$72 sps:$4 sm:$0xff]  }
 0x45b   :  { %8055 = vmatprep.subr.bf16.mxu1 %v15177_v1  ;;  %v15261_v1 = vld [vmem:[#allocation2 + $0x49c] ss:$72 sps:$4 sm:$0xff]  }
 0x45d   :  { %7884 = vmatpush1.bf16.msra.mxu0 %v15172_v2  ;;  %v15256_v2 = vld [vmem:[#allocation2 + $0x490] ss:$72 sps:$4 sm:$0xff]  }
 0x45e   :  { %8056 = vmatpush1.bf16.msra.mxu1 %v15175_v3  ;;  %7885 = vmatprep.subr.bf16.mxu0 %v15180_v4  ;;  %v15259_v3 = vld [vmem:[#allocation2 + $0x498] ss:$72 sps:$4 sm:$0xff]   ;;  %v15264_v4 = vld [vmem:[#allocation2 + $0x524] ss:$72 sps:$4 sm:$0xff]  }
 0x45f   :  { %8057 = vmatprep.subr.bf16.mxu1 %v15183_v6  ;;  %v15267_v6 = vld [vmem:[#allocation2 + $0x52c] ss:$72 sps:$4 sm:$0xff]  }
 0x461   :  { %7886 = vmatpush1.bf16.msra.mxu0 %v15178_v7  ;;  %v15262_v7 = vld [vmem:[#allocation2 + $0x520] ss:$72 sps:$4 sm:$0xff]  }
 0x462   :  { %8058 = vmatpush1.bf16.msra.mxu1 %v15181_v8  ;;  %7887 = vmatprep.subr.bf16.mxu0 %v15186_v9  ;;  %v15265_v8 = vld [vmem:[#allocation2 + $0x528] ss:$72 sps:$4 sm:$0xff]   ;;  %v15270_v9 = vld [vmem:[#allocation2 + $0x5b4] ss:$72 sps:$4 sm:$0xff]  }
 0x463   :  { %8059 = vmatprep.subr.bf16.mxu1 %v15189_v10  ;;  %v15273_v10 = vld [vmem:[#allocation2 + $0x5bc] ss:$72 sps:$4 sm:$0xff]  }
 0x465   :  { %7888 = vmatpush1.bf16.msra.mxu0 %v15184_v11  ;;  %v15268_v11 = vld [vmem:[#allocation2 + $0x5b0] ss:$72 sps:$4 sm:$0xff]  }
 0x466   :  { %8060 = vmatpush1.bf16.msra.mxu1 %v15187_v12  ;;  %7889 = vmatprep.subr.bf16.mxu0 %v15192_v14  ;;  %v15271_v12 = vld [vmem:[#allocation2 + $0x5b8] ss:$72 sps:$4 sm:$0xff]   ;;  %v15276_v14 = vld [vmem:[#allocation2 + $0x644] ss:$72 sps:$4 sm:$0xff]  }
 0x467   :  { %8061 = vmatprep.subr.bf16.mxu1 %v15195_v15  ;;  %v15279_v15 = vld [vmem:[#allocation2 + $0x64c] ss:$72 sps:$4 sm:$0xff]  }
 0x469   :  { %7890 = vmatpush1.bf16.msra.mxu0 %v15190_v19  ;;  %v15274_v19 = vld [vmem:[#allocation2 + $0x640] ss:$72 sps:$4 sm:$0xff]  }
 0x46a   :  { %8062 = vmatpush1.bf16.msra.mxu1 %v15193_v20  ;;  %7891 = vmatprep.subr.bf16.mxu0 %v15198_v21  ;;  %v15277_v20 = vld [vmem:[#allocation2 + $0x648] ss:$72 sps:$4 sm:$0xff]   ;;  %v15282_v21 = vld [vmem:[#allocation2 + $0x6d4] ss:$72 sps:$4 sm:$0xff]  }
 0x46b   :  { %8063 = vmatprep.subr.bf16.mxu1 %v15201_v22  ;;  %v15285_v22 = vld [vmem:[#allocation2 + $0x6dc] ss:$72 sps:$4 sm:$0xff]  }
 0x46d   :  { %7892 = vmatpush1.bf16.msra.mxu0 %v15196_v23  ;;  %v15280_v23 = vld [vmem:[#allocation2 + $0x6d0] ss:$72 sps:$4 sm:$0xff]  }
 0x46e   :  { %8064 = vmatpush1.bf16.msra.mxu1 %v15199_v27  ;;  %7893 = vmatprep.subr.bf16.mxu0 %v15204_v28  ;;  %v15283_v27 = vld [vmem:[#allocation2 + $0x6d8] ss:$72 sps:$4 sm:$0xff]   ;;  %v15288_v28 = vld [vmem:[#allocation2 + $0x764] ss:$72 sps:$4 sm:$0xff]  }
 0x46f   :  { %8065 = vmatprep.subr.bf16.mxu1 %v15207_v16  ;;  %v15291_v16 = vld [vmem:[#allocation2 + $0x76c] ss:$72 sps:$4 sm:$0xff]  }
 0x471   :  { %7894 = vmatpush1.bf16.msra.mxu0 %v15202_v17  ;;  %v15286_v17 = vld [vmem:[#allocation2 + $0x760] ss:$72 sps:$4 sm:$0xff]  }
 0x472   :  { %8066 = vmatpush1.bf16.msra.mxu1 %v15205_v30  ;;  %8078 = vmatprep.subr.bf16.mxu0 %v15210_v31  ;;  %v15289_v30 = vld [vmem:[#allocation2 + $0x768] ss:$72 sps:$4 sm:$0xff]   ;;  %v15294_v31 = vld [vmem:[#allocation2 + $0x7f4] ss:$72 sps:$4 sm:$0xff]  }
 0x473   :  { %8250 = vmatprep.subr.bf16.mxu1 %v15213_v32  ;;  %v15297_v32 = vld [vmem:[#allocation2 + $0x7fc] ss:$72 sps:$4 sm:$0xff]  }
 0x474   :  { %7896 = vmatmul.mubr.bf16.vlgmr.msra.gmra.mrb[0].mxu0 %v18388_v33 }
 0x475   :  { %8068 = vmatmul.mubr.bf16.vlgmr.msra.gmra.mrb[0].mxu1 %v18388_v33  ;;  %8079 = vmatpush1.bf16.msra.mxu0 %v15208_v35  ;;  %v15292_v35 = vld [vmem:[#allocation2 + $0x7f0] ss:$72 sps:$4 sm:$0xff]  }
 0x476   :  { %8251 = vmatpush1.bf16.msra.mxu1 %v15211_v36  ;;  %8080 = vmatprep.subr.bf16.mxu0 %v15216_v37  ;;  %v15295_v36 = vld [vmem:[#allocation2 + $0x7f8] ss:$72 sps:$4 sm:$0xff]   ;;  %v15300_v37 = vld [vmem:[#allocation2 + $0x884] ss:$72 sps:$4 sm:$0xff]  }
 0x477   :  { %8252 = vmatprep.subr.bf16.mxu1 %v15219_v38  ;;  %8110 = vmatprep.mubr.bf16.mxu0 %v18330_v50  ;;  %v15303_v38 = vld [vmem:[#allocation2 + $0x88c] ss:$72 sps:$4 sm:$0xff]  }
 0x478   :  { %8282 = vmatprep.mubr.bf16.mxu1 %v18330_v50 }
 0x479   :  { %8081 = vmatpush1.bf16.msra.mxu0 %v15214_v39  ;;  %v15298_v39 = vld [vmem:[#allocation2 + $0x880] ss:$72 sps:$4 sm:$0xff]  }
 0x47a   :  { %8253 = vmatpush1.bf16.msra.mxu1 %v15217_v40  ;;  %8082 = vmatprep.subr.bf16.mxu0 %v15222_v41  ;;  %v15301_v40 = vld [vmem:[#allocation2 + $0x888] ss:$72 sps:$4 sm:$0xff]   ;;  %v15306_v41 = vld [vmem:[#allocation2 + $0x914] ss:$72 sps:$4 sm:$0xff]  }
 0x47b   :  { %8254 = vmatprep.subr.bf16.mxu1 %v15225_v25  ;;  %v15309_v25 = vld [vmem:[#allocation2 + $0x91c] ss:$72 sps:$4 sm:$0xff]  }
 0x47d   :  { %8083 = vmatpush1.bf16.msra.mxu0 %v15220_v26  ;;  %v15304_v26 = vld [vmem:[#allocation2 + $0x910] ss:$72 sps:$4 sm:$0xff]  }
 0x47e   :  { %8255 = vmatpush1.bf16.msra.mxu1 %v15223_v42  ;;  %8084 = vmatprep.subr.bf16.mxu0 %v15228_v43  ;;  %v15307_v42 = vld [vmem:[#allocation2 + $0x918] ss:$72 sps:$4 sm:$0xff]   ;;  %v15312_v43 = vld [vmem:[#allocation2 + $0x9a4] ss:$72 sps:$4 sm:$0xff]  }
 0x47f   :  { %8256 = vmatprep.subr.bf16.mxu1 %v15231_v44  ;;  %v15315_v44 = vld [vmem:[#allocation2 + $0x9ac] ss:$72 sps:$4 sm:$0xff]  }
 0x481   :  { %8085 = vmatpush1.bf16.msra.mxu0 %v15226_v45  ;;  %v15310_v45 = vld [vmem:[#allocation2 + $0x9a0] ss:$72 sps:$4 sm:$0xff]  }
 0x482   :  { %8257 = vmatpush1.bf16.msra.mxu1 %v15229_v46  ;;  %8086 = vmatprep.subr.bf16.mxu0 %v15234_v47  ;;  %v15313_v46 = vld [vmem:[#allocation2 + $0x9a8] ss:$72 sps:$4 sm:$0xff]   ;;  %v15318_v47 = vld [vmem:[#allocation2 + $0xa34] ss:$72 sps:$4 sm:$0xff]  }
 0x483   :  { %8258 = vmatprep.subr.bf16.mxu1 %v15237_v48  ;;  %v15321_v48 = vld [vmem:[#allocation2 + $0xa3c] ss:$72 sps:$4 sm:$0xff]  }
 0x485   :  { %8087 = vmatpush1.bf16.msra.mxu0 %v15232_v49  ;;  %v15316_v49 = vld [vmem:[#allocation2 + $0xa30] ss:$72 sps:$4 sm:$0xff]  }
 0x486   :  { %8259 = vmatpush1.bf16.msra.mxu1 %v15235_v51  ;;  %8088 = vmatprep.subr.bf16.mxu0 %v15240_v52  ;;  %v15319_v51 = vld [vmem:[#allocation2 + $0xa38] ss:$72 sps:$4 sm:$0xff]   ;;  %v15324_v52 = vld [vmem:[#allocation2 + $0xac4] ss:$72 sps:$4 sm:$0xff]  }
 0x487   :  { %8260 = vmatprep.subr.bf16.mxu1 %v15243_v53  ;;  %v15327_v53 = vld [vmem:[#allocation2 + $0xacc] ss:$72 sps:$4 sm:$0xff]  }
 0x489   :  { %8089 = vmatpush1.bf16.msra.mxu0 %v15238_v54  ;;  %v15322_v54 = vld [vmem:[#allocation2 + $0xac0] ss:$72 sps:$4 sm:$0xff]  }
 0x48a   :  { %8261 = vmatpush1.bf16.msra.mxu1 %v15241_v55  ;;  %8090 = vmatprep.subr.bf16.mxu0 %v15246_v56  ;;  %v15325_v55 = vld [vmem:[#allocation2 + $0xac8] ss:$72 sps:$4 sm:$0xff]   ;;  %v15330_v56 = vld [vmem:[#allocation2 + $0xb54] ss:$72 sps:$4 sm:$0xff]  }
 0x48b   :  { %8262 = vmatprep.subr.bf16.mxu1 %v15249_v57  ;;  %v15333_v57 = vld [vmem:[#allocation2 + $0xb5c] ss:$72 sps:$4 sm:$0xff]  }
 0x48d   :  { %8091 = vmatpush1.bf16.msra.mxu0 %v15244_v58  ;;  %v15328_v58 = vld [vmem:[#allocation2 + $0xb50] ss:$72 sps:$4 sm:$0xff]  }
 0x48e   :  { %8263 = vmatpush1.bf16.msra.mxu1 %v15247_v59  ;;  %8092 = vmatprep.subr.bf16.mxu0 %v15252_v60  ;;  %v15331_v59 = vld [vmem:[#allocation2 + $0xb58] ss:$72 sps:$4 sm:$0xff]   ;;  %v15336_v60 = vld [vmem:[#allocation2 + $0xbe4] ss:$72 sps:$4 sm:$0xff]  }
 0x48f   :  { %8264 = vmatprep.subr.bf16.mxu1 %v15255_v61  ;;  %v15339_v61 = vld [vmem:[#allocation2 + $0xbec] ss:$72 sps:$4 sm:$0xff]  }
 0x491   :  { %8093 = vmatpush1.bf16.msra.mxu0 %v15250_v62  ;;  %v15334_v62 = vld [vmem:[#allocation2 + $0xbe0] ss:$72 sps:$4 sm:$0xff]  }
 0x492   :  { %8265 = vmatpush1.bf16.msra.mxu1 %v15253_v63  ;;  %8094 = vmatprep.subr.bf16.mxu0 %v15258_v0  ;;  %v15337_v63 = vld [vmem:[#allocation2 + $0xbe8] ss:$72 sps:$4 sm:$0xff]   ;;  %v15342_v0 = vld [vmem:[#allocation2 + $0xc74] ss:$72 sps:$4 sm:$0xff]  }
 0x493   :  { %8266 = vmatprep.subr.bf16.mxu1 %v15261_v1  ;;  %v15345_v1 = vld [vmem:[#allocation2 + $0xc7c] ss:$72 sps:$4 sm:$0xff]  }
 0x495   :  { %8095 = vmatpush1.bf16.msra.mxu0 %v15256_v2  ;;  %v15340_v2 = vld [vmem:[#allocation2 + $0xc70] ss:$72 sps:$4 sm:$0xff]  }
 0x496   :  { %8267 = vmatpush1.bf16.msra.mxu1 %v15259_v3  ;;  %8096 = vmatprep.subr.bf16.mxu0 %v15264_v4  ;;  %v15343_v3 = vld [vmem:[#allocation2 + $0xc78] ss:$72 sps:$4 sm:$0xff]   ;;  %v15348_v4 = vld [vmem:[#allocation2 + $0xd04] ss:$72 sps:$4 sm:$0xff]  }
 0x497   :  { %8268 = vmatprep.subr.bf16.mxu1 %v15267_v6  ;;  %v15351_v6 = vld [vmem:[#allocation2 + $0xd0c] ss:$72 sps:$4 sm:$0xff]  }
 0x499   :  { %8097 = vmatpush1.bf16.msra.mxu0 %v15262_v7  ;;  %v15346_v7 = vld [vmem:[#allocation2 + $0xd00] ss:$72 sps:$4 sm:$0xff]  }
 0x49a   :  { %8269 = vmatpush1.bf16.msra.mxu1 %v15265_v8  ;;  %8098 = vmatprep.subr.bf16.mxu0 %v15270_v9  ;;  %v15349_v8 = vld [vmem:[#allocation2 + $0xd08] ss:$72 sps:$4 sm:$0xff]   ;;  %v15354_v9 = vld [vmem:[#allocation2 + $0xd94] ss:$72 sps:$4 sm:$0xff]  }
 0x49b   :  { %8270 = vmatprep.subr.bf16.mxu1 %v15273_v10  ;;  %v15357_v10 = vld [vmem:[#allocation2 + $0xd9c] ss:$72 sps:$4 sm:$0xff]  }
 0x49d   :  { %8099 = vmatpush1.bf16.msra.mxu0 %v15268_v11  ;;  %v15352_v11 = vld [vmem:[#allocation2 + $0xd90] ss:$72 sps:$4 sm:$0xff]  }
 0x49e   :  { %8271 = vmatpush1.bf16.msra.mxu1 %v15271_v12  ;;  %8100 = vmatprep.subr.bf16.mxu0 %v15276_v14  ;;  %v15355_v12 = vld [vmem:[#allocation2 + $0xd98] ss:$72 sps:$4 sm:$0xff]   ;;  %v15360_v14 = vld [vmem:[#allocation2 + $0xe24] ss:$72 sps:$4 sm:$0xff]  }
 0x49f   :  { %8272 = vmatprep.subr.bf16.mxu1 %v15279_v15  ;;  %v15363_v15 = vld [vmem:[#allocation2 + $0xe2c] ss:$72 sps:$4 sm:$0xff]  }
 0x4a1   :  { %8101 = vmatpush1.bf16.msra.mxu0 %v15274_v19  ;;  %v15358_v19 = vld [vmem:[#allocation2 + $0xe20] ss:$72 sps:$4 sm:$0xff]  }
 0x4a2   :  { %8273 = vmatpush1.bf16.msra.mxu1 %v15277_v20  ;;  %8102 = vmatprep.subr.bf16.mxu0 %v15282_v21  ;;  %v15361_v20 = vld [vmem:[#allocation2 + $0xe28] ss:$72 sps:$4 sm:$0xff]   ;;  %v15366_v21 = vld [vmem:[#allocation2 + $0xeb4] ss:$72 sps:$4 sm:$0xff]  }
 0x4a3   :  { %8274 = vmatprep.subr.bf16.mxu1 %v15285_v22  ;;  %v15369_v22 = vld [vmem:[#allocation2 + $0xebc] ss:$72 sps:$4 sm:$0xff]  }
 0x4a5   :  { %8103 = vmatpush1.bf16.msra.mxu0 %v15280_v23  ;;  %v15364_v23 = vld [vmem:[#allocation2 + $0xeb0] ss:$72 sps:$4 sm:$0xff]  }
 0x4a6   :  { %8275 = vmatpush1.bf16.msra.mxu1 %v15283_v27  ;;  %8104 = vmatprep.subr.bf16.mxu0 %v15288_v28  ;;  %v15367_v27 = vld [vmem:[#allocation2 + $0xeb8] ss:$72 sps:$4 sm:$0xff]   ;;  %v15372_v28 = vld [vmem:[#allocation2 + $0xf44] ss:$72 sps:$4 sm:$0xff]  }
 0x4a7   :  { %8276 = vmatprep.subr.bf16.mxu1 %v15291_v16  ;;  %v15375_v16 = vld [vmem:[#allocation2 + $0xf4c] ss:$72 sps:$4 sm:$0xff]  }
 0x4a9   :  { %8105 = vmatpush1.bf16.msra.mxu0 %v15286_v17  ;;  %v15370_v17 = vld [vmem:[#allocation2 + $0xf40] ss:$72 sps:$4 sm:$0xff]  }
 0x4aa   :  { %8277 = vmatpush1.bf16.msra.mxu1 %v15289_v30  ;;  %8106 = vmatprep.subr.bf16.mxu0 %v15294_v31  ;;  %v15373_v30 = vld [vmem:[#allocation2 + $0xf48] ss:$72 sps:$4 sm:$0xff]   ;;  %v15378_v31 = vld [vmem:[#allocation2 + $0xfd4] ss:$72 sps:$4 sm:$0xff]  }
 0x4ab   :  { %8278 = vmatprep.subr.bf16.mxu1 %v15297_v32  ;;  %v15381_v32 = vld [vmem:[#allocation2 + $0xfdc] ss:$72 sps:$4 sm:$0xff]  }
 0x4ad   :  { %8107 = vmatpush1.bf16.msra.mxu0 %v15292_v35  ;;  %v15376_v35 = vld [vmem:[#allocation2 + $0xfd0] ss:$72 sps:$4 sm:$0xff]  }
 0x4ae   :  { %8279 = vmatpush1.bf16.msra.mxu1 %v15295_v36  ;;  %8108 = vmatprep.subr.bf16.mxu0 %v15300_v37  ;;  %v15379_v36 = vld [vmem:[#allocation2 + $0xfd8] ss:$72 sps:$4 sm:$0xff]   ;;  %v15384_v37 = vld [vmem:[#allocation2 + $0x1064] ss:$72 sps:$4 sm:$0xff]  }
 0x4af   :  { %8280 = vmatprep.subr.bf16.mxu1 %v15303_v38  ;;  %v15387_v38 = vld [vmem:[#allocation2 + $0x106c] ss:$72 sps:$4 sm:$0xff]  }
 0x4b1   :  { %8109 = vmatpush1.bf16.msra.mxu0 %v15298_v39  ;;  %v15382_v39 = vld [vmem:[#allocation2 + $0x1060] ss:$72 sps:$4 sm:$0xff]  }
 0x4b2   :  { %8281 = vmatpush1.bf16.msra.mxu1 %v15301_v40  ;;  %8121 = vmatprep.subr.bf16.mxu0 %v15306_v41  ;;  %v15385_v40 = vld [vmem:[#allocation2 + $0x1068] ss:$72 sps:$4 sm:$0xff]   ;;  %v15390_v41 = vld [vmem:[#allocation2 + $0x10f4] ss:$72 sps:$4 sm:$0xff]  }
 0x4b3   :  { %8293 = vmatprep.subr.bf16.mxu1 %v15309_v25  ;;  %v15393_v25 = vld [vmem:[#allocation2 + $0x10fc] ss:$72 sps:$4 sm:$0xff]  }
 0x4b4   :  { %8111 = vmatmul.mubr.bf16.vlgmr.msra.gmra.mrb[4].mxu0 %v18334_v5 }
 0x4b5   :  { %8283 = vmatmul.mubr.bf16.vlgmr.msra.gmra.mrb[4].mxu1 %v18334_v5  ;;  %8122 = vmatpush1.bf16.msra.mxu0 %v15304_v26  ;;  %v15388_v26 = vld [vmem:[#allocation2 + $0x10f0] ss:$72 sps:$4 sm:$0xff]  }
 0x4b6   :  { %8294 = vmatpush1.bf16.msra.mxu1 %v15307_v42  ;;  %8123 = vmatprep.subr.bf16.mxu0 %v15312_v43  ;;  %v15391_v42 = vld [vmem:[#allocation2 + $0x10f8] ss:$72 sps:$4 sm:$0xff]   ;;  %v15396_v43 = vld [vmem:[#allocation2 + $0x1184] ss:$72 sps:$4 sm:$0xff]  }
 0x4b7   :  { %8295 = vmatprep.subr.bf16.mxu1 %v15315_v44  ;;  %8153 = vmatprep.mubr.bf16.mxu0 %v18346_v34  ;;  %v15399_v44 = vld [vmem:[#allocation2 + $0x118c] ss:$72 sps:$4 sm:$0xff]  }
 0x4b8   :  { %8325 = vmatprep.mubr.bf16.mxu1 %v18346_v34 }
 0x4b9   :  { %8124 = vmatpush1.bf16.msra.mxu0 %v15310_v45  ;;  %v15394_v45 = vld [vmem:[#allocation2 + $0x1180] ss:$72 sps:$4 sm:$0xff]  }
 0x4ba   :  { %8296 = vmatpush1.bf16.msra.mxu1 %v15313_v46  ;;  %8125 = vmatprep.subr.bf16.mxu0 %v15318_v47  ;;  %v15397_v46 = vld [vmem:[#allocation2 + $0x1188] ss:$72 sps:$4 sm:$0xff]   ;;  %v15402_v47 = vld [vmem:[#allocation2 + $0x1214] ss:$72 sps:$4 sm:$0xff]  }
 0x4bb   :  { %8297 = vmatprep.subr.bf16.mxu1 %v15321_v48  ;;  %v15405_v48 = vld [vmem:[#allocation2 + $0x121c] ss:$72 sps:$4 sm:$0xff]  }
 0x4bd   :  { %8126 = vmatpush1.bf16.msra.mxu0 %v15316_v49  ;;  %v15400_v49 = vld [vmem:[#allocation2 + $0x1210] ss:$72 sps:$4 sm:$0xff]  }
 0x4be   :  { %8298 = vmatpush1.bf16.msra.mxu1 %v15319_v51  ;;  %8127 = vmatprep.subr.bf16.mxu0 %v15324_v52  ;;  %v15403_v51 = vld [vmem:[#allocation2 + $0x1218] ss:$72 sps:$4 sm:$0xff]   ;;  %v15408_v52 = vld [vmem:[#allocation2 + $0x12a4] ss:$72 sps:$4 sm:$0xff]  }
 0x4bf   :  { %8299 = vmatprep.subr.bf16.mxu1 %v15327_v53  ;;  %v15411_v53 = vld [vmem:[#allocation2 + $0x12ac] ss:$72 sps:$4 sm:$0xff]  }
 0x4c1   :  { %8128 = vmatpush1.bf16.msra.mxu0 %v15322_v54  ;;  %v15406_v54 = vld [vmem:[#allocation2 + $0x12a0] ss:$72 sps:$4 sm:$0xff]  }
 0x4c2   :  { %8300 = vmatpush1.bf16.msra.mxu1 %v15325_v55  ;;  %8129 = vmatprep.subr.bf16.mxu0 %v15330_v56  ;;  %v15409_v55 = vld [vmem:[#allocation2 + $0x12a8] ss:$72 sps:$4 sm:$0xff]   ;;  %v15414_v56 = vld [vmem:[#allocation2 + $0x1334] ss:$72 sps:$4 sm:$0xff]  }
 0x4c3   :  { %8301 = vmatprep.subr.bf16.mxu1 %v15333_v57  ;;  %v15417_v57 = vld [vmem:[#allocation2 + $0x133c] ss:$72 sps:$4 sm:$0xff]  }
 0x4c5   :  { %8130 = vmatpush1.bf16.msra.mxu0 %v15328_v58  ;;  %v15412_v58 = vld [vmem:[#allocation2 + $0x1330] ss:$72 sps:$4 sm:$0xff]  }
 0x4c6   :  { %8302 = vmatpush1.bf16.msra.mxu1 %v15331_v59  ;;  %8131 = vmatprep.subr.bf16.mxu0 %v15336_v60  ;;  %v15415_v59 = vld [vmem:[#allocation2 + $0x1338] ss:$72 sps:$4 sm:$0xff]   ;;  %v15420_v60 = vld [vmem:[#allocation2 + $0x13c4] ss:$72 sps:$4 sm:$0xff]  }
 0x4c7   :  { %8303 = vmatprep.subr.bf16.mxu1 %v15339_v61  ;;  %v15423_v61 = vld [vmem:[#allocation2 + $0x13cc] ss:$72 sps:$4 sm:$0xff]  }
 0x4c9   :  { %8132 = vmatpush1.bf16.msra.mxu0 %v15334_v62  ;;  %v15418_v62 = vld [vmem:[#allocation2 + $0x13c0] ss:$72 sps:$4 sm:$0xff]  }
 0x4ca   :  { %8304 = vmatpush1.bf16.msra.mxu1 %v15337_v63  ;;  %8133 = vmatprep.subr.bf16.mxu0 %v15342_v0  ;;  %v15421_v63 = vld [vmem:[#allocation2 + $0x13c8] ss:$72 sps:$4 sm:$0xff]   ;;  %v15426_v0 = vld [vmem:[#allocation2 + $0x1454] ss:$72 sps:$4 sm:$0xff]  }
 0x4cb   :  { %8305 = vmatprep.subr.bf16.mxu1 %v15345_v1  ;;  %v15429_v1 = vld [vmem:[#allocation2 + $0x145c] ss:$72 sps:$4 sm:$0xff]  }
 0x4cd   :  { %8134 = vmatpush1.bf16.msra.mxu0 %v15340_v2  ;;  %v15424_v2 = vld [vmem:[#allocation2 + $0x1450] ss:$72 sps:$4 sm:$0xff]  }
 0x4ce   :  { %8306 = vmatpush1.bf16.msra.mxu1 %v15343_v3  ;;  %8135 = vmatprep.subr.bf16.mxu0 %v15348_v4  ;;  %v15427_v3 = vld [vmem:[#allocation2 + $0x1458] ss:$72 sps:$4 sm:$0xff]   ;;  %v15432_v4 = vld [vmem:[#allocation2 + $0x14e4] ss:$72 sps:$4 sm:$0xff]  }
 0x4cf   :  { %8307 = vmatprep.subr.bf16.mxu1 %v15351_v6  ;;  %v15435_v6 = vld [vmem:[#allocation2 + $0x14ec] ss:$72 sps:$4 sm:$0xff]  }
 0x4d1   :  { %8136 = vmatpush1.bf16.msra.mxu0 %v15346_v7  ;;  %v15430_v7 = vld [vmem:[#allocation2 + $0x14e0] ss:$72 sps:$4 sm:$0xff]  }
 0x4d2   :  { %8308 = vmatpush1.bf16.msra.mxu1 %v15349_v8  ;;  %8137 = vmatprep.subr.bf16.mxu0 %v15354_v9  ;;  %v15433_v8 = vld [vmem:[#allocation2 + $0x14e8] ss:$72 sps:$4 sm:$0xff]   ;;  %v15438_v9 = vld [vmem:[#allocation2 + $0x1574] ss:$72 sps:$4 sm:$0xff]  }
 0x4d3   :  { %8309 = vmatprep.subr.bf16.mxu1 %v15357_v10  ;;  %v15441_v10 = vld [vmem:[#allocation2 + $0x157c] ss:$72 sps:$4 sm:$0xff]  }
 0x4d5   :  { %8138 = vmatpush1.bf16.msra.mxu0 %v15352_v11  ;;  %v15436_v11 = vld [vmem:[#allocation2 + $0x1570] ss:$72 sps:$4 sm:$0xff]  }
 0x4d6   :  { %8310 = vmatpush1.bf16.msra.mxu1 %v15355_v12  ;;  %8139 = vmatprep.subr.bf16.mxu0 %v15360_v14  ;;  %v15439_v12 = vld [vmem:[#allocation2 + $0x1578] ss:$72 sps:$4 sm:$0xff]   ;;  %v15444_v14 = vld [vmem:[#allocation2 + $0x1604] ss:$72 sps:$4 sm:$0xff]  }
 0x4d7   :  { %8311 = vmatprep.subr.bf16.mxu1 %v15363_v15  ;;  %v15447_v15 = vld [vmem:[#allocation2 + $0x160c] ss:$72 sps:$4 sm:$0xff]  }
 0x4d9   :  { %8140 = vmatpush1.bf16.msra.mxu0 %v15358_v19  ;;  %v15442_v19 = vld [vmem:[#allocation2 + $0x1600] ss:$72 sps:$4 sm:$0xff]  }
 0x4da   :  { %8312 = vmatpush1.bf16.msra.mxu1 %v15361_v20  ;;  %8141 = vmatprep.subr.bf16.mxu0 %v15366_v21  ;;  %v15445_v20 = vld [vmem:[#allocation2 + $0x1608] ss:$72 sps:$4 sm:$0xff]   ;;  %v15450_v21 = vld [vmem:[#allocation2 + $0x1694] ss:$72 sps:$4 sm:$0xff]  }
 0x4db   :  { %8313 = vmatprep.subr.bf16.mxu1 %v15369_v22  ;;  %v15453_v22 = vld [vmem:[#allocation2 + $0x169c] ss:$72 sps:$4 sm:$0xff]  }
 0x4dd   :  { %8142 = vmatpush1.bf16.msra.mxu0 %v15364_v23  ;;  %v15448_v23 = vld [vmem:[#allocation2 + $0x1690] ss:$72 sps:$4 sm:$0xff]  }
 0x4de   :  { %8314 = vmatpush1.bf16.msra.mxu1 %v15367_v27  ;;  %8143 = vmatprep.subr.bf16.mxu0 %v15372_v28  ;;  %v15451_v27 = vld [vmem:[#allocation2 + $0x1698] ss:$72 sps:$4 sm:$0xff]   ;;  %v15456_v28 = vld [vmem:[#allocation2 + $0x1724] ss:$72 sps:$4 sm:$0xff]  }
 0x4df   :  { %8315 = vmatprep.subr.bf16.mxu1 %v15375_v16  ;;  %v15459_v16 = vld [vmem:[#allocation2 + $0x172c] ss:$72 sps:$4 sm:$0xff]  }
 0x4e1   :  { %8144 = vmatpush1.bf16.msra.mxu0 %v15370_v17  ;;  %v15454_v17 = vld [vmem:[#allocation2 + $0x1720] ss:$72 sps:$4 sm:$0xff]  }
 0x4e2   :  { %8316 = vmatpush1.bf16.msra.mxu1 %v15373_v30  ;;  %8145 = vmatprep.subr.bf16.mxu0 %v15378_v31  ;;  %v15457_v30 = vld [vmem:[#allocation2 + $0x1728] ss:$72 sps:$4 sm:$0xff]   ;;  %v15462_v31 = vld [vmem:[#allocation2 + $0x17b4] ss:$72 sps:$4 sm:$0xff]  }
 0x4e3   :  { %8317 = vmatprep.subr.bf16.mxu1 %v15381_v32  ;;  %v15465_v32 = vld [vmem:[#allocation2 + $0x17bc] ss:$72 sps:$4 sm:$0xff]  }
 0x4e5   :  { %8146 = vmatpush1.bf16.msra.mxu0 %v15376_v35  ;;  %v15460_v35 = vld [vmem:[#allocation2 + $0x17b0] ss:$72 sps:$4 sm:$0xff]  }
 0x4e6   :  { %8318 = vmatpush1.bf16.msra.mxu1 %v15379_v36  ;;  %8147 = vmatprep.subr.bf16.mxu0 %v15384_v37  ;;  %v15463_v36 = vld [vmem:[#allocation2 + $0x17b8] ss:$72 sps:$4 sm:$0xff]   ;;  %v15468_v37 = vld [vmem:[#allocation2 + $0x1844] ss:$72 sps:$4 sm:$0xff]  }
 0x4e7   :  { %8319 = vmatprep.subr.bf16.mxu1 %v15387_v38  ;;  %v15471_v38 = vld [vmem:[#allocation2 + $0x184c] ss:$72 sps:$4 sm:$0xff]  }
 0x4e9   :  { %8148 = vmatpush1.bf16.msra.mxu0 %v15382_v39  ;;  %v15466_v39 = vld [vmem:[#allocation2 + $0x1840] ss:$72 sps:$4 sm:$0xff]  }
 0x4ea   :  { %8320 = vmatpush1.bf16.msra.mxu1 %v15385_v40  ;;  %8149 = vmatprep.subr.bf16.mxu0 %v15390_v41  ;;  %v15469_v40 = vld [vmem:[#allocation2 + $0x1848] ss:$72 sps:$4 sm:$0xff]   ;;  %v15474_v41 = vld [vmem:[#allocation2 + $0x18d4] ss:$72 sps:$4 sm:$0xff]  }
 0x4eb   :  { %8321 = vmatprep.subr.bf16.mxu1 %v15393_v25  ;;  %v15477_v25 = vld [vmem:[#allocation2 + $0x18dc] ss:$72 sps:$4 sm:$0xff]  }
 0x4ed   :  { %8150 = vmatpush1.bf16.msra.mxu0 %v15388_v26  ;;  %v15472_v26 = vld [vmem:[#allocation2 + $0x18d0] ss:$72 sps:$4 sm:$0xff]  }
 0x4ee   :  { %8322 = vmatpush1.bf16.msra.mxu1 %v15391_v42  ;;  %8151 = vmatprep.subr.bf16.mxu0 %v15396_v43  ;;  %v15475_v42 = vld [vmem:[#allocation2 + $0x18d8] ss:$72 sps:$4 sm:$0xff]   ;;  %v15480_v43 = vld [vmem:[#allocation2 + $0x1964] ss:$72 sps:$4 sm:$0xff]  }
 0x4ef   :  { %8323 = vmatprep.subr.bf16.mxu1 %v15399_v44  ;;  %v15483_v44 = vld [vmem:[#allocation2 + $0x196c] ss:$72 sps:$4 sm:$0xff]  }
 0x4f1   :  { %8152 = vmatpush1.bf16.msra.mxu0 %v15394_v45  ;;  %v15478_v45 = vld [vmem:[#allocation2 + $0x1960] ss:$72 sps:$4 sm:$0xff]  }
 0x4f2   :  { %8324 = vmatpush1.bf16.msra.mxu1 %v15397_v46  ;;  %8164 = vmatprep.subr.bf16.mxu0 %v15402_v47  ;;  %v15481_v46 = vld [vmem:[#allocation2 + $0x1968] ss:$72 sps:$4 sm:$0xff]   ;;  %v15486_v47 = vld [vmem:[#allocation2 + $0x19f4] ss:$72 sps:$4 sm:$0xff]  }
 0x4f3   :  { %8336 = vmatprep.subr.bf16.mxu1 %v15405_v48  ;;  %v15489_v48 = vld [vmem:[#allocation2 + $0x19fc] ss:$72 sps:$4 sm:$0xff]  }
 0x4f4   :  { %8154 = vmatmul.mubr.bf16.vlgmr.msra.gmra.mrb[4].mxu0 %v18352_v13 }
 0x4f5   :  { %8326 = vmatmul.mubr.bf16.vlgmr.msra.gmra.mrb[4].mxu1 %v18352_v13  ;;  %8165 = vmatpush1.bf16.msra.mxu0 %v15400_v49  ;;  %v15484_v49 = vld [vmem:[#allocation2 + $0x19f0] ss:$72 sps:$4 sm:$0xff]  }
 0x4f6   :  { %8337 = vmatpush1.bf16.msra.mxu1 %v15403_v51  ;;  %8166 = vmatprep.subr.bf16.mxu0 %v15408_v52  ;;  %v15487_v51 = vld [vmem:[#allocation2 + $0x19f8] ss:$72 sps:$4 sm:$0xff]   ;;  %v15492_v52 = vld [vmem:[#allocation2 + $0x1a84] ss:$72 sps:$4 sm:$0xff]  }
 0x4f7   :  { %8338 = vmatprep.subr.bf16.mxu1 %v15411_v53  ;;  %8196 = vmatprep.mubr.bf16.mxu0 %v18362_v18  ;;  %v15495_v53 = vld [vmem:[#allocation2 + $0x1a8c] ss:$72 sps:$4 sm:$0xff]  }
 0x4f8   :  { %8368 = vmatprep.mubr.bf16.mxu1 %v18362_v18 }
 0x4f9   :  { %8167 = vmatpush1.bf16.msra.mxu0 %v15406_v54  ;;  %v15490_v54 = vld [vmem:[#allocation2 + $0x1a80] ss:$72 sps:$4 sm:$0xff]  }
 0x4fa   :  { %8339 = vmatpush1.bf16.msra.mxu1 %v15409_v55  ;;  %8168 = vmatprep.subr.bf16.mxu0 %v15414_v56  ;;  %v15493_v55 = vld [vmem:[#allocation2 + $0x1a88] ss:$72 sps:$4 sm:$0xff]   ;;  %v15498_v56 = vld [vmem:[#allocation2 + $0x1b14] ss:$72 sps:$4 sm:$0xff]  }
 0x4fb   :  { %8340 = vmatprep.subr.bf16.mxu1 %v15417_v57  ;;  %v15501_v57 = vld [vmem:[#allocation2 + $0x1b1c] ss:$72 sps:$4 sm:$0xff]  }
 0x4fd   :  { %8169 = vmatpush1.bf16.msra.mxu0 %v15412_v58  ;;  %v15496_v58 = vld [vmem:[#allocation2 + $0x1b10] ss:$72 sps:$4 sm:$0xff]  }
 0x4fe   :  { %8341 = vmatpush1.bf16.msra.mxu1 %v15415_v59  ;;  %8170 = vmatprep.subr.bf16.mxu0 %v15420_v60  ;;  %v15499_v59 = vld [vmem:[#allocation2 + $0x1b18] ss:$72 sps:$4 sm:$0xff]   ;;  %v15504_v60 = vld [vmem:[#allocation2 + $0x1ba4] ss:$72 sps:$4 sm:$0xff]  }
 0x4ff   :  { %8342 = vmatprep.subr.bf16.mxu1 %v15423_v61  ;;  %v15507_v61 = vld [vmem:[#allocation2 + $0x1bac] ss:$72 sps:$4 sm:$0xff]  }
 0x501   :  { %8171 = vmatpush1.bf16.msra.mxu0 %v15418_v62  ;;  %v15502_v62 = vld [vmem:[#allocation2 + $0x1ba0] ss:$72 sps:$4 sm:$0xff]  }
 0x502   :  { %8343 = vmatpush1.bf16.msra.mxu1 %v15421_v63  ;;  %8172 = vmatprep.subr.bf16.mxu0 %v15426_v0  ;;  %v15505_v63 = vld [vmem:[#allocation2 + $0x1ba8] ss:$72 sps:$4 sm:$0xff]   ;;  %v15510_v0 = vld [vmem:[#allocation2 + $0x1c34] ss:$72 sps:$4 sm:$0xff]  }
 0x503   :  { %8344 = vmatprep.subr.bf16.mxu1 %v15429_v1  ;;  %v15513_v1 = vld [vmem:[#allocation2 + $0x1c3c] ss:$72 sps:$4 sm:$0xff]  }
 0x505   :  { %8173 = vmatpush1.bf16.msra.mxu0 %v15424_v2  ;;  %v15508_v2 = vld [vmem:[#allocation2 + $0x1c30] ss:$72 sps:$4 sm:$0xff]  }
 0x506   :  { %8345 = vmatpush1.bf16.msra.mxu1 %v15427_v3  ;;  %8174 = vmatprep.subr.bf16.mxu0 %v15432_v4  ;;  %v1844_v3 = vlaneseq  ;;  %v15511_v4 = vld [vmem:[#allocation2 + $0x1c38] ss:$72 sps:$4 sm:$0xff]  }
 0x507   :  { %8346 = vmatprep.subr.bf16.mxu1 %v15435_v6  ;;  %v15516_v6 = vld [vmem:[#allocation2 + $0x1cc4] ss:$72 sps:$4 sm:$0xff]  }
 0x509   :  { %8175 = vmatpush1.bf16.msra.mxu0 %v15430_v7  ;;  %v15519_v7 = vld [vmem:[#allocation2 + $0x1ccc] ss:$72 sps:$4 sm:$0xff]  }
 0x50a   :  { %8347 = vmatpush1.bf16.msra.mxu1 %v15433_v8  ;;  %8176 = vmatprep.subr.bf16.mxu0 %v15438_v9  ;;  %v15514_v8 = vld [vmem:[#allocation2 + $0x1cc0] ss:$72 sps:$4 sm:$0xff]   ;;  %v18406_v9 = vshrl.u32 %v1844_v3, 7  ;;  %v15552_v3 = vld [vmem:[#allocation2 + $0x2024] ss:$72 sps:$4 sm:$0xff]  }
 0x50b   :  { %8348 = vmatprep.subr.bf16.mxu1 %v15441_v10  ;;  %v15517_v10 = vld [vmem:[#allocation2 + $0x1cc8] ss:$72 sps:$4 sm:$0xff]  }
 0x50d   :  { %8177 = vmatpush1.bf16.msra.mxu0 %v15436_v11  ;;  %v15522_v11 = vld [vmem:[#allocation2 + $0x1d54] ss:$72 sps:$4 sm:$0xff]  }
 0x50e   :  { %8349 = vmatpush1.bf16.msra.mxu1 %v15439_v12  ;;  %8178 = vmatprep.subr.bf16.mxu0 %v15444_v14  ;;  %v15525_v12 = vld [vmem:[#allocation2 + $0x1d5c] ss:$72 sps:$4 sm:$0xff]   ;;  %v15520_v14 = vld [vmem:[#allocation2 + $0x1d50] ss:$72 sps:$4 sm:$0xff]  }
 0x50f   :  { %8350 = vmatprep.subr.bf16.mxu1 %v15447_v15  ;;  %v15523_v15 = vld [vmem:[#allocation2 + $0x1d58] ss:$72 sps:$4 sm:$0xff]  }
 0x511   :  { %8179 = vmatpush1.bf16.msra.mxu0 %v15442_v19  ;;  %v1838_v19 = vld [vmem:[#allocation4] sm:$0xff] }
 0x512   :  { %8351 = vmatpush1.bf16.msra.mxu1 %v15445_v20  ;;  %8180 = vmatprep.subr.bf16.mxu0 %v15450_v21  ;;  %v18409_v20 = vsub.s32 0, %v18406_v9  ;;  %v18412_v21 = vsub.s32 2, %v18406_v9 }
 0x513   :  { %8352 = vmatprep.subr.bf16.mxu1 %v15453_v22  ;;  %v18415_v22 = vsub.s32 1, %v18406_v9 }
 0x515   :  { %8181 = vmatpush1.bf16.msra.mxu0 %v15448_v23  ;;  %v18418_v23 = vsub.s32 3, %v18406_v9 }
 0x516   :  { %8353 = vmatpush1.bf16.msra.mxu1 %v15451_v27  ;;  %8182 = vmatprep.subr.bf16.mxu0 %v15456_v28  ;;  %v15528_v27 = vld [vmem:[#allocation2 + $0x1de4] ss:$72 sps:$4 sm:$0xff]  }
 0x517   :  { %8354 = vmatprep.subr.bf16.mxu1 %v15459_v16  ;;  %v15531_v28 = vld [vmem:[#allocation2 + $0x1dec] ss:$72 sps:$4 sm:$0xff]   ;;  %v1847_v16 = vrot.slane %v1838_v19, %v18409_v20 }
 0x519   :  { %8183 = vmatpush1.bf16.msra.mxu0 %v15454_v17  ;;  %v1855_v17 = vrot.slane %v1838_v19, %v18412_v21 }
 0x51a   :  { %8355 = vmatpush1.bf16.msra.mxu1 %v15457_v30  ;;  %8184 = vmatprep.subr.bf16.mxu0 %v15462_v31  ;;  %v15526_v30 = vld [vmem:[#allocation2 + $0x1de0] ss:$72 sps:$4 sm:$0xff]   ;;  %v1851_v31 = vrot.slane %v1838_v19, %v18415_v22 }
 0x51b   :  { %8356 = vmatprep.subr.bf16.mxu1 %v15465_v32  ;;  %v1859_v32 = vrot.slane %v1838_v19, %v18418_v23  ;;  %v15562_v19 = vld [vmem:[#allocation2 + $0x2140] ss:$72 sps:$4 sm:$0xff]  }
 0x51d   :  { %8185 = vmatpush1.bf16.msra.mxu0 %v15460_v35  ;;  %v15529_v35 = vld [vmem:[#allocation2 + $0x1de8] ss:$72 sps:$4 sm:$0xff]  }
 0x51e   :  { %8357 = vmatpush1.bf16.msra.mxu1 %v15463_v36  ;;  %8186 = vmatprep.subr.bf16.mxu0 %v15468_v37  ;;  %v15534_v36 = vld [vmem:[#allocation2 + $0x1e74] ss:$72 sps:$4 sm:$0xff]  }
 0x51f   :  { %8358 = vmatprep.subr.bf16.mxu1 %v15471_v38  ;;  %v15537_v37 = vld [vmem:[#allocation2 + $0x1e7c] ss:$72 sps:$4 sm:$0xff]  }
 0x521   :  { %8187 = vmatpush1.bf16.msra.mxu0 %v15466_v39 }
 0x522   :  { %8359 = vmatpush1.bf16.msra.mxu1 %v15469_v40  ;;  %8188 = vmatprep.subr.bf16.mxu0 %v15474_v41 }
 0x523   :  { %8360 = vmatprep.subr.bf16.mxu1 %v15477_v25 }
 0x525   :  { %8189 = vmatpush1.bf16.msra.mxu0 %v15472_v26 }
 0x526   :  { %8361 = vmatpush1.bf16.msra.mxu1 %v15475_v42  ;;  %8190 = vmatprep.subr.bf16.mxu0 %v15480_v43  ;;  %v15532_v42 = vld [vmem:[#allocation2 + $0x1e70] ss:$72 sps:$4 sm:$0xff]  }
 0x527   :  { %8362 = vmatprep.subr.bf16.mxu1 %v15483_v44 }
 0x529   :  { %8191 = vmatpush1.bf16.msra.mxu0 %v15478_v45 }
 0x52a   :  { %8363 = vmatpush1.bf16.msra.mxu1 %v15481_v46  ;;  %8192 = vmatprep.subr.bf16.mxu0 %v15486_v47  ;;  %v15535_v47 = vld [vmem:[#allocation2 + $0x1e78] ss:$72 sps:$4 sm:$0xff]  }
 0x52b   :  { %8364 = vmatprep.subr.bf16.mxu1 %v15489_v48  ;;  %v15540_v48 = vld [vmem:[#allocation2 + $0x1f04] ss:$72 sps:$4 sm:$0xff]  }
 0x52d   :  { %8193 = vmatpush1.bf16.msra.mxu0 %v15484_v49 }
 0x52e   :  { %8365 = vmatpush1.bf16.msra.mxu1 %v15487_v51  ;;  %8194 = vmatprep.subr.bf16.mxu0 %v15492_v52 }
 0x52f   :  { %8366 = vmatprep.subr.bf16.mxu1 %v15495_v53 }
 0x531   :  { %8195 = vmatpush1.bf16.msra.mxu0 %v15490_v54 }
 0x532   :  { %8367 = vmatpush1.bf16.msra.mxu1 %v15493_v55  ;;  %8207 = vmatprep.subr.bf16.mxu0 %v15498_v56  ;;  %v15543_v55 = vld [vmem:[#allocation2 + $0x1f0c] ss:$72 sps:$4 sm:$0xff]  }
 0x533   :  { %8379 = vmatprep.subr.bf16.mxu1 %v15501_v57 }
 0x534   :  { %8197 = vmatmul.mubr.bf16.vlgmr.msra.gmra.mrb[4].mxu0 %v18370_v24 }
 0x535   :  { %8369 = vmatmul.mubr.bf16.vlgmr.msra.gmra.mrb[4].mxu1 %v18370_v24  ;;  %8208 = vmatpush1.bf16.msra.mxu0 %v15496_v58 }
 0x536   :  { %8380 = vmatpush1.bf16.msra.mxu1 %v15499_v59  ;;  %8209 = vmatprep.subr.bf16.mxu0 %v15504_v60  ;;  %v15538_v60 = vld [vmem:[#allocation2 + $0x1f00] ss:$72 sps:$4 sm:$0xff]  }
 0x537   :  { %8381 = vmatprep.subr.bf16.mxu1 %v15507_v61  ;;  %8239 = vmatprep.mubr.bf16.mxu0 %v18380_v29 }
 0x538   :  { %8411 = vmatprep.mubr.bf16.mxu1 %v18380_v29 }
 0x539   :  { %8210 = vmatpush1.bf16.msra.mxu0 %v15502_v62  ;;  %v15541_v62 = vld [vmem:[#allocation2 + $0x1f08] ss:$72 sps:$4 sm:$0xff]  }
 0x53a   :  { %8382 = vmatpush1.bf16.msra.mxu1 %v15505_v63  ;;  %8211 = vmatprep.subr.bf16.mxu0 %v15510_v0  ;;  %v15546_v63 = vld [vmem:[#allocation2 + $0x1f94] ss:$72 sps:$4 sm:$0xff]  }
 0x53b   :  { %8383 = vmatprep.subr.bf16.mxu1 %v15513_v1  ;;  %v15549_v0 = vld [vmem:[#allocation2 + $0x1f9c] ss:$72 sps:$4 sm:$0xff]   ;;  %v15544_v1 = vld [vmem:[#allocation2 + $0x1f90] ss:$72 sps:$4 sm:$0xff]  }
 0x53d   :  { %8212 = vmatpush1.bf16.msra.mxu0 %v15508_v2  ;;  %v15547_v2 = vld [vmem:[#allocation2 + $0x1f98] ss:$72 sps:$4 sm:$0xff]  }
 0x53e   :  { %8384 = vmatpush1.bf16.msra.mxu1 %v15511_v4  ;;  %8213 = vmatprep.subr.bf16.mxu0 %v15516_v6  ;;  %v15555_v4 = vld [vmem:[#allocation2 + $0x202c] ss:$72 sps:$4 sm:$0xff]   ;;  %v15550_v6 = vld [vmem:[#allocation2 + $0x2020] ss:$72 sps:$4 sm:$0xff]  }
 0x53f   :  { %8385 = vmatprep.subr.bf16.mxu1 %v15519_v7  ;;  %v15553_v7 = vld [vmem:[#allocation2 + $0x2028] ss:$72 sps:$4 sm:$0xff]  }
 0x541   :  { %8214 = vmatpush1.bf16.msra.mxu0 %v15514_v8  ;;  %v15558_v8 = vld [vmem:[#allocation2 + $0x20b4] ss:$72 sps:$4 sm:$0xff]  }
 0x542   :  { %8386 = vmatpush1.bf16.msra.mxu1 %v15517_v10  ;;  %8215 = vmatprep.subr.bf16.mxu0 %v15522_v11  ;;  %v15561_v10 = vld [vmem:[#allocation2 + $0x20bc] ss:$72 sps:$4 sm:$0xff]   ;;  %v15556_v11 = vld [vmem:[#allocation2 + $0x20b0] ss:$72 sps:$4 sm:$0xff]  }
 0x543   :  { %8387 = vmatprep.subr.bf16.mxu1 %v15525_v12  ;;  %v15559_v12 = vld [vmem:[#allocation2 + $0x20b8] ss:$72 sps:$4 sm:$0xff]  }
 0x545   :  { %8216 = vmatpush1.bf16.msra.mxu0 %v15520_v14  ;;  %v15564_v14 = vld [vmem:[#allocation2 + $0x2144] ss:$72 sps:$4 sm:$0xff]  }
 0x546   :  { %8388 = vmatpush1.bf16.msra.mxu1 %v15523_v15  ;;  %8217 = vmatprep.subr.bf16.mxu0 %v15528_v27  ;;  %v15567_v15 = vld [vmem:[#allocation2 + $0x214c] ss:$72 sps:$4 sm:$0xff]   ;;  %v15565_v27 = vld [vmem:[#allocation2 + $0x2148] ss:$72 sps:$4 sm:$0xff]  }
 0x547   :  { %8389 = vmatprep.subr.bf16.mxu1 %v15531_v28  ;;  %v7897_v38 = vpop.f32.mrb[0].mxu0  ;;  %v15570_v28 = vld [vmem:[#allocation2 + $0x21d4] ss:$72 sps:$4 sm:$0xff]  }
 0x548   :  { %v8069_v39 = vpop.f32.mrb[0].mxu1  ;;  %v18424_v40 = vadd.f32 %v7897_v38, %v1847_v16  ;;  %v7899_v25 = vpop.f32.mrb[1].mxu0  ;;  %v15585_v38 = vld [vmem:[#allocation2 + $0x22fc] ss:$72 sps:$4 sm:$0xff]  }
 0x549   :  { %v18426_v41 = vadd.f32 %v8069_v39, %v1855_v17  ;;  %v8071_v26 = vpop.f32.mrb[1].mxu1  ;;  %v18428_v43 = vadd.f32 %v7899_v25, %v1851_v31  ;;  %v7901_v45 = vpop.f32.mrb[2].mxu0  ;;  %8218 = vmatpush1.bf16.msra.mxu0 %v15526_v30  ;;  %v15571_v30 = vld [vmem:[#allocation2 + $0x21d8] ss:$72 sps:$4 sm:$0xff]  }
 0x54a   :  { %v18430_v44 = vadd.f32 %v8071_v26, %v1859_v32  ;;  %v8073_v46 = vpop.f32.mrb[2].mxu1  ;;  %8390 = vmatpush1.bf16.msra.mxu1 %v15529_v35  ;;  %v18434_v51 = vadd.f32 %v7901_v45, %v1847_v16  ;;  %v7903_v53 = vpop.f32.mrb[3].mxu0  ;;  %8219 = vmatprep.subr.bf16.mxu0 %v15534_v36  ;;  %v15573_v16 = vld [vmem:[#allocation2 + $0x21dc] ss:$72 sps:$4 sm:$0xff]   ;;  %v15574_v35 = vld [vmem:[#allocation2 + $0x2260] ss:$72 sps:$4 sm:$0xff]  }
 0x54b   :  { %v9282_v49 = vmax.f32 %v18424_v40, %v18426_v41  ;;  %v18436_v52 = vadd.f32 %v8073_v46, %v1855_v17  ;;  %v8075_v54 = vpop.f32.mrb[3].mxu1  ;;  %8391 = vmatprep.subr.bf16.mxu1 %v15537_v37  ;;  %v18440_v57 = vadd.f32 %v7903_v53, %v1851_v31  ;;  %v15568_v17 = vld [vmem:[#allocation2 + $0x21d0] ss:$72 sps:$4 sm:$0xff]   ;;  %v15576_v31 = vld [vmem:[#allocation2 + $0x2264] ss:$72 sps:$4 sm:$0xff]  }
 0x54c   :  { %v9283_v56 = vmax.f32 %v18428_v43, %v18430_v44  ;;  %v18442_v58 = vadd.f32 %v8075_v54, %v1859_v32  ;;  %v15579_v32 = vld [vmem:[#allocation2 + $0x226c] ss:$72 sps:$4 sm:$0xff]   ;;  %v15577_v36 = vld [vmem:[#allocation2 + $0x2268] ss:$72 sps:$4 sm:$0xff]   ;;  %v15583_v25 = vld [vmem:[#allocation2 + $0x22f8] ss:$72 sps:$4 sm:$0xff]  }
 0x54d   :  { %v9284_v59 = vmax.f32 %v18434_v51, %v18436_v52  ;;  %8220 = vmatpush1.bf16.msra.mxu0 %v15532_v42  ;;  %v15582_v37 = vld [vmem:[#allocation2 + $0x22f4] ss:$72 sps:$4 sm:$0xff]   ;;  %v15580_v39 = vld [vmem:[#allocation2 + $0x22f0] ss:$72 sps:$4 sm:$0xff]   ;;  %v15588_v26 = vld [vmem:[#allocation2 + $0x2384] ss:$72 sps:$4 sm:$0xff]  }
 0x54e   :  { %v9285_v61 = vmax.f32 %v18440_v57, %v18442_v58  ;;  %8392 = vmatpush1.bf16.msra.mxu1 %v15535_v47  ;;  %8221 = vmatprep.subr.bf16.mxu0 %v15540_v48  ;;  %v15591_v42 = vld [vmem:[#allocation2 + $0x238c] ss:$72 sps:$4 sm:$0xff]   ;;  %v15586_v45 = vld [vmem:[#allocation2 + $0x2380] ss:$72 sps:$4 sm:$0xff]  }
 0x54f   :  { %8393 = vmatprep.subr.bf16.mxu1 %v15543_v55  ;;  %v15589_v46 = vld [vmem:[#allocation2 + $0x2388] ss:$72 sps:$4 sm:$0xff]   ;;  %v15594_v47 = vld [vmem:[#allocation2 + $0x24] ss:$72 sps:$4 sm:$0xff]   ;;  %v15600_v55 = vld [vmem:[#allocation2 + $0xb4] ss:$72 sps:$4 sm:$0xff]  }
 0x550   :  { %v15597_v48 = vld [vmem:[#allocation2 + $0x2c] ss:$72 sps:$4 sm:$0xff]   ;;  %v15592_v53 = vld [vmem:[#allocation2 + $0x20] ss:$72 sps:$4 sm:$0xff]  }
 0x551   :  { %8222 = vmatpush1.bf16.msra.mxu0 %v15538_v60  ;;  %v15595_v54 = vld [vmem:[#allocation2 + $0x28] ss:$72 sps:$4 sm:$0xff]   ;;  %v15603_v60 = vld [vmem:[#allocation2 + $0xbc] ss:$72 sps:$4 sm:$0xff]   ;;  %v15925_v44 = vld [vmem:[#allocation2 + $0x1f18] ss:$72 sps:$4 sm:$0xff]  }
 0x552   :  { %8394 = vmatpush1.bf16.msra.mxu1 %v15541_v62  ;;  %8223 = vmatprep.subr.bf16.mxu0 %v15546_v63  ;;  %v15598_v62 = vld [vmem:[#allocation2 + $0xb0] ss:$72 sps:$4 sm:$0xff]   ;;  %v15936_v58 = vld [vmem:[#allocation2 + $0x2034] ss:$72 sps:$4 sm:$0xff]  }
 0x553   :  { %8395 = vmatprep.subr.bf16.mxu1 %v15549_v0  ;;  %v15601_v63 = vld [vmem:[#allocation2 + $0xb8] ss:$72 sps:$4 sm:$0xff]   ;;  %v15606_v0 = vld [vmem:[#allocation2 + $0x144] ss:$72 sps:$4 sm:$0xff]   ;;  %v15931_v57 = vld [vmem:[#allocation2 + $0x1fa8] ss:$72 sps:$4 sm:$0xff]  }
 0x555   :  { %8224 = vmatpush1.bf16.msra.mxu0 %v15544_v1  ;;  %v15609_v1 = vld [vmem:[#allocation2 + $0x14c] ss:$72 sps:$4 sm:$0xff]  }
 0x556   :  { %8396 = vmatpush1.bf16.msra.mxu1 %v15547_v2  ;;  %8225 = vmatprep.subr.bf16.mxu0 %v15552_v3  ;;  %v15604_v2 = vld [vmem:[#allocation2 + $0x140] ss:$72 sps:$4 sm:$0xff]  }
 0x557   :  { %8397 = vmatprep.subr.bf16.mxu1 %v15555_v4  ;;  %v15607_v3 = vld [vmem:[#allocation2 + $0x148] ss:$72 sps:$4 sm:$0xff]   ;;  %v15612_v4 = vld [vmem:[#allocation2 + $0x1d4] ss:$72 sps:$4 sm:$0xff]  }
 0x559   :  { %8226 = vmatpush1.bf16.msra.mxu0 %v15550_v6  ;;  %v15615_v6 = vld [vmem:[#allocation2 + $0x1dc] ss:$72 sps:$4 sm:$0xff]  }
 0x55a   :  { %8398 = vmatpush1.bf16.msra.mxu1 %v15553_v7  ;;  %8227 = vmatprep.subr.bf16.mxu0 %v15558_v8  ;;  %v15610_v7 = vld [vmem:[#allocation2 + $0x1d0] ss:$72 sps:$4 sm:$0xff]  }
 0x55b   :  { %8399 = vmatprep.subr.bf16.mxu1 %v15561_v10  ;;  %v15613_v8 = vld [vmem:[#allocation2 + $0x1d8] ss:$72 sps:$4 sm:$0xff]   ;;  %v15618_v10 = vld [vmem:[#allocation2 + $0x264] ss:$72 sps:$4 sm:$0xff]  }
 0x55d   :  { %8228 = vmatpush1.bf16.msra.mxu0 %v15556_v11  ;;  %v15621_v11 = vld [vmem:[#allocation2 + $0x26c] ss:$72 sps:$4 sm:$0xff]  }
 0x55e   :  { %8400 = vmatpush1.bf16.msra.mxu1 %v15559_v12  ;;  %8229 = vmatprep.subr.bf16.mxu0 %v15564_v14  ;;  %v15616_v12 = vld [vmem:[#allocation2 + $0x260] ss:$72 sps:$4 sm:$0xff]  }
 0x55f   :  { %8401 = vmatprep.subr.bf16.mxu1 %v15567_v15  ;;  %v15619_v14 = vld [vmem:[#allocation2 + $0x268] ss:$72 sps:$4 sm:$0xff]   ;;  %v15624_v15 = vld [vmem:[#allocation2 + $0x2f4] ss:$72 sps:$4 sm:$0xff]  }
 0x561   :  { %8230 = vmatpush1.bf16.msra.mxu0 %v15562_v19  ;;  %v15627_v19 = vld [vmem:[#allocation2 + $0x2fc] ss:$72 sps:$4 sm:$0xff]  }
 0x562   :  { %8402 = vmatpush1.bf16.msra.mxu1 %v15565_v27  ;;  %8231 = vmatprep.subr.bf16.mxu0 %v15570_v28  ;;  %v15622_v27 = vld [vmem:[#allocation2 + $0x2f0] ss:$72 sps:$4 sm:$0xff]  }
 0x563   :  { %8403 = vmatprep.subr.bf16.mxu1 %v15573_v16  ;;  %v15625_v28 = vld [vmem:[#allocation2 + $0x2f8] ss:$72 sps:$4 sm:$0xff]   ;;  %v15630_v16 = vld [vmem:[#allocation2 + $0x384] ss:$72 sps:$4 sm:$0xff]  }
 0x565   :  { %8232 = vmatpush1.bf16.msra.mxu0 %v15568_v17  ;;  %v15633_v17 = vld [vmem:[#allocation2 + $0x38c] ss:$72 sps:$4 sm:$0xff]  }
 0x566   :  { %8404 = vmatpush1.bf16.msra.mxu1 %v15571_v30  ;;  %8233 = vmatprep.subr.bf16.mxu0 %v15576_v31  ;;  %v15628_v30 = vld [vmem:[#allocation2 + $0x380] ss:$72 sps:$4 sm:$0xff]  }
 0x567   :  { %8405 = vmatprep.subr.bf16.mxu1 %v15579_v32  ;;  %v15631_v31 = vld [vmem:[#allocation2 + $0x388] ss:$72 sps:$4 sm:$0xff]   ;;  %v15636_v32 = vld [vmem:[#allocation2 + $0x414] ss:$72 sps:$4 sm:$0xff]  }
 0x569   :  { %8234 = vmatpush1.bf16.msra.mxu0 %v15574_v35  ;;  %v15639_v35 = vld [vmem:[#allocation2 + $0x41c] ss:$72 sps:$4 sm:$0xff]  }
 0x56a   :  { %8406 = vmatpush1.bf16.msra.mxu1 %v15577_v36  ;;  %8235 = vmatprep.subr.bf16.mxu0 %v15582_v37  ;;  %v15634_v36 = vld [vmem:[#allocation2 + $0x410] ss:$72 sps:$4 sm:$0xff]  }
 0x56b   :  { %8407 = vmatprep.subr.bf16.mxu1 %v15585_v38  ;;  %v15637_v37 = vld [vmem:[#allocation2 + $0x418] ss:$72 sps:$4 sm:$0xff]   ;;  %v15642_v38 = vld [vmem:[#allocation2 + $0x4a4] ss:$72 sps:$4 sm:$0xff]  }
 0x56d   :  { %8236 = vmatpush1.bf16.msra.mxu0 %v15580_v39  ;;  %v15645_v39 = vld [vmem:[#allocation2 + $0x4ac] ss:$72 sps:$4 sm:$0xff]  }
 0x56e   :  { %8408 = vmatpush1.bf16.msra.mxu1 %v15583_v25  ;;  %8237 = vmatprep.subr.bf16.mxu0 %v15588_v26  ;;  %v15640_v25 = vld [vmem:[#allocation2 + $0x4a0] ss:$72 sps:$4 sm:$0xff]  }
 0x56f   :  { %8409 = vmatprep.subr.bf16.mxu1 %v15591_v42  ;;  %v15643_v26 = vld [vmem:[#allocation2 + $0x4a8] ss:$72 sps:$4 sm:$0xff]   ;;  %v15648_v42 = vld [vmem:[#allocation2 + $0x534] ss:$72 sps:$4 sm:$0xff]  }
 0x571   :  { %8238 = vmatpush1.bf16.msra.mxu0 %v15586_v45  ;;  %v15651_v45 = vld [vmem:[#allocation2 + $0x53c] ss:$72 sps:$4 sm:$0xff]  }
 0x572   :  { %8410 = vmatpush1.bf16.msra.mxu1 %v15589_v46  ;;  %8422 = vmatprep.subr.bf16.mxu0 %v15594_v47  ;;  %v15646_v46 = vld [vmem:[#allocation2 + $0x530] ss:$72 sps:$4 sm:$0xff]  }
 0x573   :  { %8594 = vmatprep.subr.bf16.mxu1 %v15597_v48  ;;  %v15649_v47 = vld [vmem:[#allocation2 + $0x538] ss:$72 sps:$4 sm:$0xff]   ;;  %v15654_v48 = vld [vmem:[#allocation2 + $0x5c4] ss:$72 sps:$4 sm:$0xff]  }
 0x574   :  { %8240 = vmatmul.mubr.bf16.vlgmr.msra.gmra.mrb[4].mxu0 %v18388_v33 }
 0x575   :  { %8412 = vmatmul.mubr.bf16.vlgmr.msra.gmra.mrb[4].mxu1 %v18388_v33  ;;  %8423 = vmatpush1.bf16.msra.mxu0 %v15592_v53  ;;  %v15657_v53 = vld [vmem:[#allocation2 + $0x5cc] ss:$72 sps:$4 sm:$0xff]  }
 0x576   :  { %8595 = vmatpush1.bf16.msra.mxu1 %v15595_v54  ;;  %8424 = vmatprep.subr.bf16.mxu0 %v15600_v55  ;;  %v15652_v54 = vld [vmem:[#allocation2 + $0x5c0] ss:$72 sps:$4 sm:$0xff]  }
 0x577   :  { %8596 = vmatprep.subr.bf16.mxu1 %v15603_v60  ;;  %8454 = vmatprep.mubr.bf16.mxu0 %v18330_v50  ;;  %v15655_v55 = vld [vmem:[#allocation2 + $0x5c8] ss:$72 sps:$4 sm:$0xff]   ;;  %v15660_v60 = vld [vmem:[#allocation2 + $0x654] ss:$72 sps:$4 sm:$0xff]  }
 0x578   :  { %8626 = vmatprep.mubr.bf16.mxu1 %v18330_v50 }
 0x579   :  { %8425 = vmatpush1.bf16.msra.mxu0 %v15598_v62  ;;  %v15663_v62 = vld [vmem:[#allocation2 + $0x65c] ss:$72 sps:$4 sm:$0xff]  }
 0x57a   :  { %8597 = vmatpush1.bf16.msra.mxu1 %v15601_v63  ;;  %8426 = vmatprep.subr.bf16.mxu0 %v15606_v0  ;;  %v15658_v63 = vld [vmem:[#allocation2 + $0x650] ss:$72 sps:$4 sm:$0xff]  }
 0x57b   :  { %8598 = vmatprep.subr.bf16.mxu1 %v15609_v1  ;;  %v15661_v0 = vld [vmem:[#allocation2 + $0x658] ss:$72 sps:$4 sm:$0xff]   ;;  %v15666_v1 = vld [vmem:[#allocation2 + $0x6e4] ss:$72 sps:$4 sm:$0xff]  }
 0x57d   :  { %8427 = vmatpush1.bf16.msra.mxu0 %v15604_v2  ;;  %v15669_v2 = vld [vmem:[#allocation2 + $0x6ec] ss:$72 sps:$4 sm:$0xff]  }
 0x57e   :  { %8599 = vmatpush1.bf16.msra.mxu1 %v15607_v3  ;;  %8428 = vmatprep.subr.bf16.mxu0 %v15612_v4  ;;  %v15664_v3 = vld [vmem:[#allocation2 + $0x6e0] ss:$72 sps:$4 sm:$0xff]  }
 0x57f   :  { %8600 = vmatprep.subr.bf16.mxu1 %v15615_v6  ;;  %v15667_v4 = vld [vmem:[#allocation2 + $0x6e8] ss:$72 sps:$4 sm:$0xff]   ;;  %v15672_v6 = vld [vmem:[#allocation2 + $0x774] ss:$72 sps:$4 sm:$0xff]  }
 0x581   :  { %8429 = vmatpush1.bf16.msra.mxu0 %v15610_v7  ;;  %v15675_v7 = vld [vmem:[#allocation2 + $0x77c] ss:$72 sps:$4 sm:$0xff]  }
 0x582   :  { %8601 = vmatpush1.bf16.msra.mxu1 %v15613_v8  ;;  %8430 = vmatprep.subr.bf16.mxu0 %v15618_v10  ;;  %v15670_v8 = vld [vmem:[#allocation2 + $0x770] ss:$72 sps:$4 sm:$0xff]  }
 0x583   :  { %8602 = vmatprep.subr.bf16.mxu1 %v15621_v11  ;;  %v15673_v10 = vld [vmem:[#allocation2 + $0x778] ss:$72 sps:$4 sm:$0xff]   ;;  %v15678_v11 = vld [vmem:[#allocation2 + $0x804] ss:$72 sps:$4 sm:$0xff]  }
 0x585   :  { %8431 = vmatpush1.bf16.msra.mxu0 %v15616_v12  ;;  %v15681_v12 = vld [vmem:[#allocation2 + $0x80c] ss:$72 sps:$4 sm:$0xff]  }
 0x586   :  { %8603 = vmatpush1.bf16.msra.mxu1 %v15619_v14  ;;  %8432 = vmatprep.subr.bf16.mxu0 %v15624_v15  ;;  %v15676_v14 = vld [vmem:[#allocation2 + $0x800] ss:$72 sps:$4 sm:$0xff]  }
 0x587   :  { %8604 = vmatprep.subr.bf16.mxu1 %v15627_v19  ;;  %v15679_v15 = vld [vmem:[#allocation2 + $0x808] ss:$72 sps:$4 sm:$0xff]   ;;  %v15684_v19 = vld [vmem:[#allocation2 + $0x894] ss:$72 sps:$4 sm:$0xff]  }
 0x589   :  { %8433 = vmatpush1.bf16.msra.mxu0 %v15622_v27  ;;  %v15687_v27 = vld [vmem:[#allocation2 + $0x89c] ss:$72 sps:$4 sm:$0xff]  }
 0x58a   :  { %8605 = vmatpush1.bf16.msra.mxu1 %v15625_v28  ;;  %8434 = vmatprep.subr.bf16.mxu0 %v15630_v16  ;;  %v15682_v28 = vld [vmem:[#allocation2 + $0x890] ss:$72 sps:$4 sm:$0xff]  }
 0x58b   :  { %8606 = vmatprep.subr.bf16.mxu1 %v15633_v17  ;;  %v15685_v16 = vld [vmem:[#allocation2 + $0x898] ss:$72 sps:$4 sm:$0xff]   ;;  %v15690_v17 = vld [vmem:[#allocation2 + $0x924] ss:$72 sps:$4 sm:$0xff]  }
 0x58d   :  { %8435 = vmatpush1.bf16.msra.mxu0 %v15628_v30  ;;  %v15693_v30 = vld [vmem:[#allocation2 + $0x92c] ss:$72 sps:$4 sm:$0xff]  }
 0x58e   :  { %8607 = vmatpush1.bf16.msra.mxu1 %v15631_v31  ;;  %8436 = vmatprep.subr.bf16.mxu0 %v15636_v32  ;;  %v15688_v31 = vld [vmem:[#allocation2 + $0x920] ss:$72 sps:$4 sm:$0xff]  }
 0x58f   :  { %8608 = vmatprep.subr.bf16.mxu1 %v15639_v35  ;;  %v15691_v32 = vld [vmem:[#allocation2 + $0x928] ss:$72 sps:$4 sm:$0xff]   ;;  %v15696_v35 = vld [vmem:[#allocation2 + $0x9b4] ss:$72 sps:$4 sm:$0xff]  }
 0x591   :  { %8437 = vmatpush1.bf16.msra.mxu0 %v15634_v36  ;;  %v15699_v36 = vld [vmem:[#allocation2 + $0x9bc] ss:$72 sps:$4 sm:$0xff]  }
 0x592   :  { %8609 = vmatpush1.bf16.msra.mxu1 %v15637_v37  ;;  %8438 = vmatprep.subr.bf16.mxu0 %v15642_v38  ;;  %v15694_v37 = vld [vmem:[#allocation2 + $0x9b0] ss:$72 sps:$4 sm:$0xff]  }
 0x593   :  { %8610 = vmatprep.subr.bf16.mxu1 %v15645_v39  ;;  %v15697_v38 = vld [vmem:[#allocation2 + $0x9b8] ss:$72 sps:$4 sm:$0xff]   ;;  %v15702_v39 = vld [vmem:[#allocation2 + $0xa44] ss:$72 sps:$4 sm:$0xff]  }
 0x595   :  { %8439 = vmatpush1.bf16.msra.mxu0 %v15640_v25  ;;  %v15705_v25 = vld [vmem:[#allocation2 + $0xa4c] ss:$72 sps:$4 sm:$0xff]  }
 0x596   :  { %8611 = vmatpush1.bf16.msra.mxu1 %v15643_v26  ;;  %8440 = vmatprep.subr.bf16.mxu0 %v15648_v42  ;;  %v15700_v26 = vld [vmem:[#allocation2 + $0xa40] ss:$72 sps:$4 sm:$0xff]  }
 0x597   :  { %8612 = vmatprep.subr.bf16.mxu1 %v15651_v45  ;;  %v15703_v42 = vld [vmem:[#allocation2 + $0xa48] ss:$72 sps:$4 sm:$0xff]   ;;  %v15708_v45 = vld [vmem:[#allocation2 + $0xad4] ss:$72 sps:$4 sm:$0xff]  }
 0x599   :  { %8441 = vmatpush1.bf16.msra.mxu0 %v15646_v46  ;;  %v15711_v46 = vld [vmem:[#allocation2 + $0xadc] ss:$72 sps:$4 sm:$0xff]  }
 0x59a   :  { %8613 = vmatpush1.bf16.msra.mxu1 %v15649_v47  ;;  %8442 = vmatprep.subr.bf16.mxu0 %v15654_v48  ;;  %v15706_v47 = vld [vmem:[#allocation2 + $0xad0] ss:$72 sps:$4 sm:$0xff]  }
 0x59b   :  { %8614 = vmatprep.subr.bf16.mxu1 %v15657_v53  ;;  %v15709_v48 = vld [vmem:[#allocation2 + $0xad8] ss:$72 sps:$4 sm:$0xff]   ;;  %v15714_v53 = vld [vmem:[#allocation2 + $0xb64] ss:$72 sps:$4 sm:$0xff]  }
 0x59d   :  { %8443 = vmatpush1.bf16.msra.mxu0 %v15652_v54  ;;  %v15717_v54 = vld [vmem:[#allocation2 + $0xb6c] ss:$72 sps:$4 sm:$0xff]  }
 0x59e   :  { %8615 = vmatpush1.bf16.msra.mxu1 %v15655_v55  ;;  %8444 = vmatprep.subr.bf16.mxu0 %v15660_v60  ;;  %v15712_v55 = vld [vmem:[#allocation2 + $0xb60] ss:$72 sps:$4 sm:$0xff]  }
 0x59f   :  { %8616 = vmatprep.subr.bf16.mxu1 %v15663_v62  ;;  %v15715_v60 = vld [vmem:[#allocation2 + $0xb68] ss:$72 sps:$4 sm:$0xff]   ;;  %v15720_v62 = vld [vmem:[#allocation2 + $0xbf4] ss:$72 sps:$4 sm:$0xff]  }
 0x5a1   :  { %8445 = vmatpush1.bf16.msra.mxu0 %v15658_v63  ;;  %v15723_v63 = vld [vmem:[#allocation2 + $0xbfc] ss:$72 sps:$4 sm:$0xff]  }
 0x5a2   :  { %8617 = vmatpush1.bf16.msra.mxu1 %v15661_v0  ;;  %8446 = vmatprep.subr.bf16.mxu0 %v15666_v1  ;;  %v15718_v0 = vld [vmem:[#allocation2 + $0xbf0] ss:$72 sps:$4 sm:$0xff]  }
 0x5a3   :  { %8618 = vmatprep.subr.bf16.mxu1 %v15669_v2  ;;  %v15721_v1 = vld [vmem:[#allocation2 + $0xbf8] ss:$72 sps:$4 sm:$0xff]   ;;  %v15726_v2 = vld [vmem:[#allocation2 + $0xc84] ss:$72 sps:$4 sm:$0xff]  }
 0x5a5   :  { %8447 = vmatpush1.bf16.msra.mxu0 %v15664_v3  ;;  %v15729_v3 = vld [vmem:[#allocation2 + $0xc8c] ss:$72 sps:$4 sm:$0xff]  }
 0x5a6   :  { %8619 = vmatpush1.bf16.msra.mxu1 %v15667_v4  ;;  %8448 = vmatprep.subr.bf16.mxu0 %v15672_v6  ;;  %v15724_v4 = vld [vmem:[#allocation2 + $0xc80] ss:$72 sps:$4 sm:$0xff]  }
 0x5a7   :  { %8620 = vmatprep.subr.bf16.mxu1 %v15675_v7  ;;  %v15727_v6 = vld [vmem:[#allocation2 + $0xc88] ss:$72 sps:$4 sm:$0xff]   ;;  %v15732_v7 = vld [vmem:[#allocation2 + $0xd14] ss:$72 sps:$4 sm:$0xff]  }
 0x5a9   :  { %8449 = vmatpush1.bf16.msra.mxu0 %v15670_v8  ;;  %v15735_v8 = vld [vmem:[#allocation2 + $0xd1c] ss:$72 sps:$4 sm:$0xff]  }
 0x5aa   :  { %8621 = vmatpush1.bf16.msra.mxu1 %v15673_v10  ;;  %8450 = vmatprep.subr.bf16.mxu0 %v15678_v11  ;;  %v15730_v10 = vld [vmem:[#allocation2 + $0xd10] ss:$72 sps:$4 sm:$0xff]  }
 0x5ab   :  { %8622 = vmatprep.subr.bf16.mxu1 %v15681_v12  ;;  %v15733_v11 = vld [vmem:[#allocation2 + $0xd18] ss:$72 sps:$4 sm:$0xff]   ;;  %v15738_v12 = vld [vmem:[#allocation2 + $0xda4] ss:$72 sps:$4 sm:$0xff]  }
 0x5ad   :  { %8451 = vmatpush1.bf16.msra.mxu0 %v15676_v14  ;;  %v15741_v14 = vld [vmem:[#allocation2 + $0xdac] ss:$72 sps:$4 sm:$0xff]  }
 0x5ae   :  { %8623 = vmatpush1.bf16.msra.mxu1 %v15679_v15  ;;  %8452 = vmatprep.subr.bf16.mxu0 %v15684_v19  ;;  %v15736_v15 = vld [vmem:[#allocation2 + $0xda0] ss:$72 sps:$4 sm:$0xff]  }
 0x5af   :  { %8624 = vmatprep.subr.bf16.mxu1 %v15687_v27  ;;  %v15739_v19 = vld [vmem:[#allocation2 + $0xda8] ss:$72 sps:$4 sm:$0xff]   ;;  %v15744_v27 = vld [vmem:[#allocation2 + $0xe34] ss:$72 sps:$4 sm:$0xff]  }
 0x5b1   :  { %8453 = vmatpush1.bf16.msra.mxu0 %v15682_v28  ;;  %v15747_v28 = vld [vmem:[#allocation2 + $0xe3c] ss:$72 sps:$4 sm:$0xff]  }
 0x5b2   :  { %8625 = vmatpush1.bf16.msra.mxu1 %v15685_v16  ;;  %8465 = vmatprep.subr.bf16.mxu0 %v15690_v17  ;;  %v15742_v16 = vld [vmem:[#allocation2 + $0xe30] ss:$72 sps:$4 sm:$0xff]  }
 0x5b3   :  { %8637 = vmatprep.subr.bf16.mxu1 %v15693_v30  ;;  %v15745_v17 = vld [vmem:[#allocation2 + $0xe38] ss:$72 sps:$4 sm:$0xff]   ;;  %v15750_v30 = vld [vmem:[#allocation2 + $0xec4] ss:$72 sps:$4 sm:$0xff]  }
 0x5b4   :  { %8455 = vmatmul.mubr.bf16.vlgmr.msra.gmra.mrb[8].mxu0 %v18334_v5 }
 0x5b5   :  { %8627 = vmatmul.mubr.bf16.vlgmr.msra.gmra.mrb[8].mxu1 %v18334_v5  ;;  %8466 = vmatpush1.bf16.msra.mxu0 %v15688_v31  ;;  %v15753_v31 = vld [vmem:[#allocation2 + $0xecc] ss:$72 sps:$4 sm:$0xff]  }
 0x5b6   :  { %8638 = vmatpush1.bf16.msra.mxu1 %v15691_v32  ;;  %8467 = vmatprep.subr.bf16.mxu0 %v15696_v35  ;;  %v15748_v32 = vld [vmem:[#allocation2 + $0xec0] ss:$72 sps:$4 sm:$0xff]  }
 0x5b7   :  { %8639 = vmatprep.subr.bf16.mxu1 %v15699_v36  ;;  %8497 = vmatprep.mubr.bf16.mxu0 %v18346_v34  ;;  %v15751_v35 = vld [vmem:[#allocation2 + $0xec8] ss:$72 sps:$4 sm:$0xff]   ;;  %v15756_v36 = vld [vmem:[#allocation2 + $0xf54] ss:$72 sps:$4 sm:$0xff]  }
 0x5b8   :  { %8669 = vmatprep.mubr.bf16.mxu1 %v18346_v34 }
 0x5b9   :  { %8468 = vmatpush1.bf16.msra.mxu0 %v15694_v37  ;;  %v15759_v37 = vld [vmem:[#allocation2 + $0xf5c] ss:$72 sps:$4 sm:$0xff]  }
 0x5ba   :  { %8640 = vmatpush1.bf16.msra.mxu1 %v15697_v38  ;;  %8469 = vmatprep.subr.bf16.mxu0 %v15702_v39  ;;  %v15754_v38 = vld [vmem:[#allocation2 + $0xf50] ss:$72 sps:$4 sm:$0xff]  }
 0x5bb   :  { %8641 = vmatprep.subr.bf16.mxu1 %v15705_v25  ;;  %v15757_v39 = vld [vmem:[#allocation2 + $0xf58] ss:$72 sps:$4 sm:$0xff]   ;;  %v15762_v25 = vld [vmem:[#allocation2 + $0xfe4] ss:$72 sps:$4 sm:$0xff]  }
 0x5bd   :  { %8470 = vmatpush1.bf16.msra.mxu0 %v15700_v26  ;;  %v15765_v26 = vld [vmem:[#allocation2 + $0xfec] ss:$72 sps:$4 sm:$0xff]  }
 0x5be   :  { %8642 = vmatpush1.bf16.msra.mxu1 %v15703_v42  ;;  %8471 = vmatprep.subr.bf16.mxu0 %v15708_v45  ;;  %v15760_v42 = vld [vmem:[#allocation2 + $0xfe0] ss:$72 sps:$4 sm:$0xff]  }
 0x5bf   :  { %8643 = vmatprep.subr.bf16.mxu1 %v15711_v46  ;;  %v15763_v45 = vld [vmem:[#allocation2 + $0xfe8] ss:$72 sps:$4 sm:$0xff]   ;;  %v15768_v46 = vld [vmem:[#allocation2 + $0x1074] ss:$72 sps:$4 sm:$0xff]  }
 0x5c1   :  { %8472 = vmatpush1.bf16.msra.mxu0 %v15706_v47  ;;  %v15771_v47 = vld [vmem:[#allocation2 + $0x107c] ss:$72 sps:$4 sm:$0xff]  }
 0x5c2   :  { %8644 = vmatpush1.bf16.msra.mxu1 %v15709_v48  ;;  %8473 = vmatprep.subr.bf16.mxu0 %v15714_v53  ;;  %v15766_v48 = vld [vmem:[#allocation2 + $0x1070] ss:$72 sps:$4 sm:$0xff]  }
 0x5c3   :  { %8645 = vmatprep.subr.bf16.mxu1 %v15717_v54  ;;  %v15769_v53 = vld [vmem:[#allocation2 + $0x1078] ss:$72 sps:$4 sm:$0xff]   ;;  %v15774_v54 = vld [vmem:[#allocation2 + $0x1104] ss:$72 sps:$4 sm:$0xff]  }
 0x5c5   :  { %8474 = vmatpush1.bf16.msra.mxu0 %v15712_v55  ;;  %v15777_v55 = vld [vmem:[#allocation2 + $0x110c] ss:$72 sps:$4 sm:$0xff]  }
 0x5c6   :  { %8646 = vmatpush1.bf16.msra.mxu1 %v15715_v60  ;;  %8475 = vmatprep.subr.bf16.mxu0 %v15720_v62  ;;  %v15772_v60 = vld [vmem:[#allocation2 + $0x1100] ss:$72 sps:$4 sm:$0xff]  }
 0x5c7   :  { %8647 = vmatprep.subr.bf16.mxu1 %v15723_v63  ;;  %v15775_v62 = vld [vmem:[#allocation2 + $0x1108] ss:$72 sps:$4 sm:$0xff]   ;;  %v15780_v63 = vld [vmem:[#allocation2 + $0x1194] ss:$72 sps:$4 sm:$0xff]  }
 0x5c9   :  { %8476 = vmatpush1.bf16.msra.mxu0 %v15718_v0  ;;  %v15783_v0 = vld [vmem:[#allocation2 + $0x119c] ss:$72 sps:$4 sm:$0xff]  }
 0x5ca   :  { %8648 = vmatpush1.bf16.msra.mxu1 %v15721_v1  ;;  %8477 = vmatprep.subr.bf16.mxu0 %v15726_v2  ;;  %v15778_v1 = vld [vmem:[#allocation2 + $0x1190] ss:$72 sps:$4 sm:$0xff]  }
 0x5cb   :  { %8649 = vmatprep.subr.bf16.mxu1 %v15729_v3  ;;  %v15781_v2 = vld [vmem:[#allocation2 + $0x1198] ss:$72 sps:$4 sm:$0xff]   ;;  %v15786_v3 = vld [vmem:[#allocation2 + $0x1224] ss:$72 sps:$4 sm:$0xff]  }
 0x5cd   :  { %8478 = vmatpush1.bf16.msra.mxu0 %v15724_v4  ;;  %v15789_v4 = vld [vmem:[#allocation2 + $0x122c] ss:$72 sps:$4 sm:$0xff]  }
 0x5ce   :  { %8650 = vmatpush1.bf16.msra.mxu1 %v15727_v6  ;;  %8479 = vmatprep.subr.bf16.mxu0 %v15732_v7  ;;  %v15784_v6 = vld [vmem:[#allocation2 + $0x1220] ss:$72 sps:$4 sm:$0xff]  }
 0x5cf   :  { %8651 = vmatprep.subr.bf16.mxu1 %v15735_v8  ;;  %v15787_v7 = vld [vmem:[#allocation2 + $0x1228] ss:$72 sps:$4 sm:$0xff]   ;;  %v15792_v8 = vld [vmem:[#allocation2 + $0x12b4] ss:$72 sps:$4 sm:$0xff]  }
 0x5d1   :  { %8480 = vmatpush1.bf16.msra.mxu0 %v15730_v10  ;;  %v15795_v10 = vld [vmem:[#allocation2 + $0x12bc] ss:$72 sps:$4 sm:$0xff]  }
 0x5d2   :  { %8652 = vmatpush1.bf16.msra.mxu1 %v15733_v11  ;;  %8481 = vmatprep.subr.bf16.mxu0 %v15738_v12  ;;  %v15790_v11 = vld [vmem:[#allocation2 + $0x12b0] ss:$72 sps:$4 sm:$0xff]  }
 0x5d3   :  { %8653 = vmatprep.subr.bf16.mxu1 %v15741_v14  ;;  %v15793_v12 = vld [vmem:[#allocation2 + $0x12b8] ss:$72 sps:$4 sm:$0xff]   ;;  %v15798_v14 = vld [vmem:[#allocation2 + $0x1344] ss:$72 sps:$4 sm:$0xff]  }
 0x5d5   :  { %8482 = vmatpush1.bf16.msra.mxu0 %v15736_v15  ;;  %v15801_v15 = vld [vmem:[#allocation2 + $0x134c] ss:$72 sps:$4 sm:$0xff]  }
 0x5d6   :  { %8654 = vmatpush1.bf16.msra.mxu1 %v15739_v19  ;;  %8483 = vmatprep.subr.bf16.mxu0 %v15744_v27  ;;  %v15796_v19 = vld [vmem:[#allocation2 + $0x1340] ss:$72 sps:$4 sm:$0xff]  }
 0x5d7   :  { %8655 = vmatprep.subr.bf16.mxu1 %v15747_v28  ;;  %v15799_v27 = vld [vmem:[#allocation2 + $0x1348] ss:$72 sps:$4 sm:$0xff]   ;;  %v15804_v28 = vld [vmem:[#allocation2 + $0x13d4] ss:$72 sps:$4 sm:$0xff]  }
 0x5d9   :  { %8484 = vmatpush1.bf16.msra.mxu0 %v15742_v16  ;;  %v15807_v16 = vld [vmem:[#allocation2 + $0x13dc] ss:$72 sps:$4 sm:$0xff]  }
 0x5da   :  { %8656 = vmatpush1.bf16.msra.mxu1 %v15745_v17  ;;  %8485 = vmatprep.subr.bf16.mxu0 %v15750_v30  ;;  %v15802_v17 = vld [vmem:[#allocation2 + $0x13d0] ss:$72 sps:$4 sm:$0xff]  }
 0x5db   :  { %8657 = vmatprep.subr.bf16.mxu1 %v15753_v31  ;;  %v15805_v30 = vld [vmem:[#allocation2 + $0x13d8] ss:$72 sps:$4 sm:$0xff]   ;;  %v15810_v31 = vld [vmem:[#allocation2 + $0x1464] ss:$72 sps:$4 sm:$0xff]  }
 0x5dd   :  { %8486 = vmatpush1.bf16.msra.mxu0 %v15748_v32  ;;  %v15813_v32 = vld [vmem:[#allocation2 + $0x146c] ss:$72 sps:$4 sm:$0xff]  }
 0x5de   :  { %8658 = vmatpush1.bf16.msra.mxu1 %v15751_v35  ;;  %8487 = vmatprep.subr.bf16.mxu0 %v15756_v36  ;;  %v15808_v35 = vld [vmem:[#allocation2 + $0x1460] ss:$72 sps:$4 sm:$0xff]  }
 0x5df   :  { %8659 = vmatprep.subr.bf16.mxu1 %v15759_v37  ;;  %v15811_v36 = vld [vmem:[#allocation2 + $0x1468] ss:$72 sps:$4 sm:$0xff]   ;;  %v15816_v37 = vld [vmem:[#allocation2 + $0x14f4] ss:$72 sps:$4 sm:$0xff]  }
 0x5e1   :  { %8488 = vmatpush1.bf16.msra.mxu0 %v15754_v38  ;;  %v15819_v38 = vld [vmem:[#allocation2 + $0x14fc] ss:$72 sps:$4 sm:$0xff]  }
 0x5e2   :  { %8660 = vmatpush1.bf16.msra.mxu1 %v15757_v39  ;;  %8489 = vmatprep.subr.bf16.mxu0 %v15762_v25  ;;  %v15814_v39 = vld [vmem:[#allocation2 + $0x14f0] ss:$72 sps:$4 sm:$0xff]  }
 0x5e3   :  { %8661 = vmatprep.subr.bf16.mxu1 %v15765_v26  ;;  %v15817_v25 = vld [vmem:[#allocation2 + $0x14f8] ss:$72 sps:$4 sm:$0xff]   ;;  %v15822_v26 = vld [vmem:[#allocation2 + $0x1584] ss:$72 sps:$4 sm:$0xff]  }
 0x5e5   :  { %8490 = vmatpush1.bf16.msra.mxu0 %v15760_v42  ;;  %v15825_v42 = vld [vmem:[#allocation2 + $0x158c] ss:$72 sps:$4 sm:$0xff]  }
 0x5e6   :  { %8662 = vmatpush1.bf16.msra.mxu1 %v15763_v45  ;;  %8491 = vmatprep.subr.bf16.mxu0 %v15768_v46  ;;  %v15820_v45 = vld [vmem:[#allocation2 + $0x1580] ss:$72 sps:$4 sm:$0xff]  }
 0x5e7   :  { %8663 = vmatprep.subr.bf16.mxu1 %v15771_v47  ;;  %v15823_v46 = vld [vmem:[#allocation2 + $0x1588] ss:$72 sps:$4 sm:$0xff]   ;;  %v15828_v47 = vld [vmem:[#allocation2 + $0x1614] ss:$72 sps:$4 sm:$0xff]  }
 0x5e9   :  { %8492 = vmatpush1.bf16.msra.mxu0 %v15766_v48  ;;  %v15831_v48 = vld [vmem:[#allocation2 + $0x161c] ss:$72 sps:$4 sm:$0xff]  }
 0x5ea   :  { %8664 = vmatpush1.bf16.msra.mxu1 %v15769_v53  ;;  %8493 = vmatprep.subr.bf16.mxu0 %v15774_v54  ;;  %v15826_v53 = vld [vmem:[#allocation2 + $0x1610] ss:$72 sps:$4 sm:$0xff]  }
 0x5eb   :  { %8665 = vmatprep.subr.bf16.mxu1 %v15777_v55  ;;  %v15829_v54 = vld [vmem:[#allocation2 + $0x1618] ss:$72 sps:$4 sm:$0xff]   ;;  %v15834_v55 = vld [vmem:[#allocation2 + $0x16a4] ss:$72 sps:$4 sm:$0xff]  }
 0x5ed   :  { %8494 = vmatpush1.bf16.msra.mxu0 %v15772_v60  ;;  %v15837_v60 = vld [vmem:[#allocation2 + $0x16ac] ss:$72 sps:$4 sm:$0xff]  }
 0x5ee   :  { %8666 = vmatpush1.bf16.msra.mxu1 %v15775_v62  ;;  %8495 = vmatprep.subr.bf16.mxu0 %v15780_v63  ;;  %v15832_v62 = vld [vmem:[#allocation2 + $0x16a0] ss:$72 sps:$4 sm:$0xff]  }
 0x5ef   :  { %8667 = vmatprep.subr.bf16.mxu1 %v15783_v0  ;;  %v15835_v63 = vld [vmem:[#allocation2 + $0x16a8] ss:$72 sps:$4 sm:$0xff]   ;;  %v15840_v0 = vld [vmem:[#allocation2 + $0x1734] ss:$72 sps:$4 sm:$0xff]  }
 0x5f1   :  { %8496 = vmatpush1.bf16.msra.mxu0 %v15778_v1  ;;  %v15843_v1 = vld [vmem:[#allocation2 + $0x173c] ss:$72 sps:$4 sm:$0xff]  }
 0x5f2   :  { %8668 = vmatpush1.bf16.msra.mxu1 %v15781_v2  ;;  %8508 = vmatprep.subr.bf16.mxu0 %v15786_v3  ;;  %v15838_v2 = vld [vmem:[#allocation2 + $0x1730] ss:$72 sps:$4 sm:$0xff]  }
 0x5f3   :  { %8680 = vmatprep.subr.bf16.mxu1 %v15789_v4  ;;  %v15841_v3 = vld [vmem:[#allocation2 + $0x1738] ss:$72 sps:$4 sm:$0xff]   ;;  %v15846_v4 = vld [vmem:[#allocation2 + $0x17c4] ss:$72 sps:$4 sm:$0xff]  }
 0x5f4   :  { %8498 = vmatmul.mubr.bf16.vlgmr.msra.gmra.mrb[8].mxu0 %v18352_v13 }
 0x5f5   :  { %8670 = vmatmul.mubr.bf16.vlgmr.msra.gmra.mrb[8].mxu1 %v18352_v13  ;;  %8509 = vmatpush1.bf16.msra.mxu0 %v15784_v6  ;;  %v15849_v6 = vld [vmem:[#allocation2 + $0x17cc] ss:$72 sps:$4 sm:$0xff]  }
 0x5f6   :  { %8681 = vmatpush1.bf16.msra.mxu1 %v15787_v7  ;;  %8510 = vmatprep.subr.bf16.mxu0 %v15792_v8  ;;  %v15844_v7 = vld [vmem:[#allocation2 + $0x17c0] ss:$72 sps:$4 sm:$0xff]  }
 0x5f7   :  { %8682 = vmatprep.subr.bf16.mxu1 %v15795_v10  ;;  %8540 = vmatprep.mubr.bf16.mxu0 %v18362_v18  ;;  %v15847_v8 = vld [vmem:[#allocation2 + $0x17c8] ss:$72 sps:$4 sm:$0xff]   ;;  %v15852_v10 = vld [vmem:[#allocation2 + $0x1854] ss:$72 sps:$4 sm:$0xff]  }
 0x5f8   :  { %8712 = vmatprep.mubr.bf16.mxu1 %v18362_v18 }
 0x5f9   :  { %8511 = vmatpush1.bf16.msra.mxu0 %v15790_v11  ;;  %v15855_v11 = vld [vmem:[#allocation2 + $0x185c] ss:$72 sps:$4 sm:$0xff]  }
 0x5fa   :  { %8683 = vmatpush1.bf16.msra.mxu1 %v15793_v12  ;;  %8512 = vmatprep.subr.bf16.mxu0 %v15798_v14  ;;  %v15850_v12 = vld [vmem:[#allocation2 + $0x1850] ss:$72 sps:$4 sm:$0xff]  }
 0x5fb   :  { %8684 = vmatprep.subr.bf16.mxu1 %v15801_v15  ;;  %v15853_v14 = vld [vmem:[#allocation2 + $0x1858] ss:$72 sps:$4 sm:$0xff]   ;;  %v15858_v15 = vld [vmem:[#allocation2 + $0x18e4] ss:$72 sps:$4 sm:$0xff]  }
 0x5fd   :  { %8513 = vmatpush1.bf16.msra.mxu0 %v15796_v19  ;;  %v15861_v19 = vld [vmem:[#allocation2 + $0x18ec] ss:$72 sps:$4 sm:$0xff]  }
 0x5fe   :  { %8685 = vmatpush1.bf16.msra.mxu1 %v15799_v27  ;;  %8514 = vmatprep.subr.bf16.mxu0 %v15804_v28  ;;  %v15856_v27 = vld [vmem:[#allocation2 + $0x18e0] ss:$72 sps:$4 sm:$0xff]  }
 0x5ff   :  { %8686 = vmatprep.subr.bf16.mxu1 %v15807_v16  ;;  %v15859_v28 = vld [vmem:[#allocation2 + $0x18e8] ss:$72 sps:$4 sm:$0xff]   ;;  %v15864_v16 = vld [vmem:[#allocation2 + $0x1974] ss:$72 sps:$4 sm:$0xff]  }
 0x601   :  { %8515 = vmatpush1.bf16.msra.mxu0 %v15802_v17  ;;  %v15867_v17 = vld [vmem:[#allocation2 + $0x197c] ss:$72 sps:$4 sm:$0xff]  }
 0x602   :  { %8687 = vmatpush1.bf16.msra.mxu1 %v15805_v30  ;;  %8516 = vmatprep.subr.bf16.mxu0 %v15810_v31  ;;  %v15862_v30 = vld [vmem:[#allocation2 + $0x1970] ss:$72 sps:$4 sm:$0xff]  }
 0x603   :  { %8688 = vmatprep.subr.bf16.mxu1 %v15813_v32  ;;  %v15865_v31 = vld [vmem:[#allocation2 + $0x1978] ss:$72 sps:$4 sm:$0xff]   ;;  %v15870_v32 = vld [vmem:[#allocation2 + $0x1a04] ss:$72 sps:$4 sm:$0xff]  }
 0x605   :  { %8517 = vmatpush1.bf16.msra.mxu0 %v15808_v35  ;;  %v15873_v35 = vld [vmem:[#allocation2 + $0x1a0c] ss:$72 sps:$4 sm:$0xff]  }
 0x606   :  { %8689 = vmatpush1.bf16.msra.mxu1 %v15811_v36  ;;  %8518 = vmatprep.subr.bf16.mxu0 %v15816_v37  ;;  %v15868_v36 = vld [vmem:[#allocation2 + $0x1a00] ss:$72 sps:$4 sm:$0xff]  }
 0x607   :  { %8690 = vmatprep.subr.bf16.mxu1 %v15819_v38  ;;  %v15871_v37 = vld [vmem:[#allocation2 + $0x1a08] ss:$72 sps:$4 sm:$0xff]   ;;  %v15876_v38 = vld [vmem:[#allocation2 + $0x1a94] ss:$72 sps:$4 sm:$0xff]  }
 0x609   :  { %8519 = vmatpush1.bf16.msra.mxu0 %v15814_v39  ;;  %v15879_v39 = vld [vmem:[#allocation2 + $0x1a9c] ss:$72 sps:$4 sm:$0xff]  }
 0x60a   :  { %8691 = vmatpush1.bf16.msra.mxu1 %v15817_v25  ;;  %8520 = vmatprep.subr.bf16.mxu0 %v15822_v26  ;;  %v15874_v25 = vld [vmem:[#allocation2 + $0x1a90] ss:$72 sps:$4 sm:$0xff]  }
 0x60b   :  { %8692 = vmatprep.subr.bf16.mxu1 %v15825_v42  ;;  %v15877_v26 = vld [vmem:[#allocation2 + $0x1a98] ss:$72 sps:$4 sm:$0xff]   ;;  %v15882_v42 = vld [vmem:[#allocation2 + $0x1b24] ss:$72 sps:$4 sm:$0xff]  }
 0x60d   :  { %8521 = vmatpush1.bf16.msra.mxu0 %v15820_v45  ;;  %v15885_v45 = vld [vmem:[#allocation2 + $0x1b2c] ss:$72 sps:$4 sm:$0xff]  }
 0x60e   :  { %8693 = vmatpush1.bf16.msra.mxu1 %v15823_v46  ;;  %8522 = vmatprep.subr.bf16.mxu0 %v15828_v47  ;;  %v15880_v46 = vld [vmem:[#allocation2 + $0x1b20] ss:$72 sps:$4 sm:$0xff]  }
 0x60f   :  { %8694 = vmatprep.subr.bf16.mxu1 %v15831_v48  ;;  %v15883_v47 = vld [vmem:[#allocation2 + $0x1b28] ss:$72 sps:$4 sm:$0xff]   ;;  %v15888_v48 = vld [vmem:[#allocation2 + $0x1bb4] ss:$72 sps:$4 sm:$0xff]  }
 0x611   :  { %8523 = vmatpush1.bf16.msra.mxu0 %v15826_v53  ;;  %v15891_v53 = vld [vmem:[#allocation2 + $0x1bbc] ss:$72 sps:$4 sm:$0xff]  }
 0x612   :  { %8695 = vmatpush1.bf16.msra.mxu1 %v15829_v54  ;;  %8524 = vmatprep.subr.bf16.mxu0 %v15834_v55  ;;  %v15886_v54 = vld [vmem:[#allocation2 + $0x1bb0] ss:$72 sps:$4 sm:$0xff]  }
 0x613   :  { %8696 = vmatprep.subr.bf16.mxu1 %v15837_v60  ;;  %v15889_v55 = vld [vmem:[#allocation2 + $0x1bb8] ss:$72 sps:$4 sm:$0xff]   ;;  %v15894_v60 = vld [vmem:[#allocation2 + $0x1c44] ss:$72 sps:$4 sm:$0xff]  }
 0x615   :  { %8525 = vmatpush1.bf16.msra.mxu0 %v15832_v62  ;;  %v15897_v62 = vld [vmem:[#allocation2 + $0x1c4c] ss:$72 sps:$4 sm:$0xff]  }
 0x616   :  { %8697 = vmatpush1.bf16.msra.mxu1 %v15835_v63  ;;  %8526 = vmatprep.subr.bf16.mxu0 %v15840_v0  ;;  %v15892_v63 = vld [vmem:[#allocation2 + $0x1c40] ss:$72 sps:$4 sm:$0xff]  }
 0x617   :  { %8698 = vmatprep.subr.bf16.mxu1 %v15843_v1  ;;  %v15895_v0 = vld [vmem:[#allocation2 + $0x1c48] ss:$72 sps:$4 sm:$0xff]   ;;  %v15900_v1 = vld [vmem:[#allocation2 + $0x1cd4] ss:$72 sps:$4 sm:$0xff]  }
 0x619   :  { %8527 = vmatpush1.bf16.msra.mxu0 %v15838_v2  ;;  %v15903_v2 = vld [vmem:[#allocation2 + $0x1cdc] ss:$72 sps:$4 sm:$0xff]  }
 0x61a   :  { %8699 = vmatpush1.bf16.msra.mxu1 %v15841_v3  ;;  %8528 = vmatprep.subr.bf16.mxu0 %v15846_v4  ;;  %v15898_v3 = vld [vmem:[#allocation2 + $0x1cd0] ss:$72 sps:$4 sm:$0xff]  }
 0x61b   :  { %8700 = vmatprep.subr.bf16.mxu1 %v15849_v6  ;;  %v15901_v4 = vld [vmem:[#allocation2 + $0x1cd8] ss:$72 sps:$4 sm:$0xff]   ;;  %v15906_v6 = vld [vmem:[#allocation2 + $0x1d64] ss:$72 sps:$4 sm:$0xff]  }
 0x61d   :  { %8529 = vmatpush1.bf16.msra.mxu0 %v15844_v7  ;;  %v15909_v7 = vld [vmem:[#allocation2 + $0x1d6c] ss:$72 sps:$4 sm:$0xff]  }
 0x61e   :  { %8701 = vmatpush1.bf16.msra.mxu1 %v15847_v8  ;;  %8530 = vmatprep.subr.bf16.mxu0 %v15852_v10  ;;  %v15904_v8 = vld [vmem:[#allocation2 + $0x1d60] ss:$72 sps:$4 sm:$0xff]  }
 0x61f   :  { %8702 = vmatprep.subr.bf16.mxu1 %v15855_v11  ;;  %v15907_v10 = vld [vmem:[#allocation2 + $0x1d68] ss:$72 sps:$4 sm:$0xff]   ;;  %v18465_v11 = vsub.s32 4, %v18406_v9 }
 0x621   :  { %8531 = vmatpush1.bf16.msra.mxu0 %v15850_v12  ;;  %v18468_v12 = vsub.s32 6, %v18406_v9 }
 0x622   :  { %8703 = vmatpush1.bf16.msra.mxu1 %v15853_v14  ;;  %8532 = vmatprep.subr.bf16.mxu0 %v15858_v15  ;;  %v18471_v14 = vsub.s32 5, %v18406_v9  ;;  %v15912_v15 = vld [vmem:[#allocation2 + $0x1df4] ss:$72 sps:$4 sm:$0xff]  }
 0x623   :  { %8704 = vmatprep.subr.bf16.mxu1 %v15861_v19  ;;  %v18474_v19 = vsub.s32 7, %v18406_v9 }
 0x625   :  { %8533 = vmatpush1.bf16.msra.mxu0 %v15856_v27  ;;  %v15915_v27 = vld [vmem:[#allocation2 + $0x1dfc] ss:$72 sps:$4 sm:$0xff]  }
 0x626   :  { %8705 = vmatpush1.bf16.msra.mxu1 %v15859_v28  ;;  %8534 = vmatprep.subr.bf16.mxu0 %v15864_v16  ;;  %v16860_v28 = vld [vmem:[#allocation4] sm:$0xff] }
 0x627   :  { %8706 = vmatprep.subr.bf16.mxu1 %v15867_v17  ;;  %v1863_v16 = vrot.slane %v16860_v28, %v18465_v11  ;;  %v15910_v17 = vld [vmem:[#allocation2 + $0x1df0] ss:$72 sps:$4 sm:$0xff]  }
 0x629   :  { %8535 = vmatpush1.bf16.msra.mxu0 %v15862_v30  ;;  %v1871_v30 = vrot.slane %v16860_v28, %v18468_v12 }
 0x62a   :  { %8707 = vmatpush1.bf16.msra.mxu1 %v15865_v31  ;;  %8536 = vmatprep.subr.bf16.mxu0 %v15870_v32  ;;  %v1867_v31 = vrot.slane %v16860_v28, %v18471_v14  ;;  %v1875_v32 = vrot.slane %v16860_v28, %v18474_v19  ;;  %v15945_v28 = vld [vmem:[#allocation2 + $0x20cc] ss:$72 sps:$4 sm:$0xff]  }
 0x62b   :  { %8708 = vmatprep.subr.bf16.mxu1 %v15873_v35  ;;  %v15913_v35 = vld [vmem:[#allocation2 + $0x1df8] ss:$72 sps:$4 sm:$0xff]  }
 0x62d   :  { %8537 = vmatpush1.bf16.msra.mxu0 %v15868_v36  ;;  %v15918_v36 = vld [vmem:[#allocation2 + $0x1e84] ss:$72 sps:$4 sm:$0xff]  }
 0x62e   :  { %8709 = vmatpush1.bf16.msra.mxu1 %v15871_v37  ;;  %8538 = vmatprep.subr.bf16.mxu0 %v15876_v38  ;;  %v15921_v37 = vld [vmem:[#allocation2 + $0x1e8c] ss:$72 sps:$4 sm:$0xff]  }
 0x62f   :  { %8710 = vmatprep.subr.bf16.mxu1 %v15879_v39 }
 0x631   :  { %8539 = vmatpush1.bf16.msra.mxu0 %v15874_v25 }
 0x632   :  { %8711 = vmatpush1.bf16.msra.mxu1 %v15877_v26  ;;  %8551 = vmatprep.subr.bf16.mxu0 %v15882_v42 }
 0x633   :  { %8723 = vmatprep.subr.bf16.mxu1 %v15885_v45  ;;  %v15916_v45 = vld [vmem:[#allocation2 + $0x1e80] ss:$72 sps:$4 sm:$0xff]  }
 0x634   :  { %8541 = vmatmul.mubr.bf16.vlgmr.msra.gmra.mrb[8].mxu0 %v18370_v24 }
 0x635   :  { %8713 = vmatmul.mubr.bf16.vlgmr.msra.gmra.mrb[8].mxu1 %v18370_v24  ;;  %8552 = vmatpush1.bf16.msra.mxu0 %v15880_v46 }
 0x636   :  { %8724 = vmatpush1.bf16.msra.mxu1 %v15883_v47  ;;  %8553 = vmatprep.subr.bf16.mxu0 %v15888_v48 }
 0x637   :  { %8725 = vmatprep.subr.bf16.mxu1 %v15891_v53  ;;  %8583 = vmatprep.mubr.bf16.mxu0 %v18380_v29 }
 0x638   :  { %8755 = vmatprep.mubr.bf16.mxu1 %v18380_v29 }
 0x639   :  { %8554 = vmatpush1.bf16.msra.mxu0 %v15886_v54  ;;  %v15919_v54 = vld [vmem:[#allocation2 + $0x1e88] ss:$72 sps:$4 sm:$0xff]  }
 0x63a   :  { %8726 = vmatpush1.bf16.msra.mxu1 %v15889_v55  ;;  %8555 = vmatprep.subr.bf16.mxu0 %v15894_v60  ;;  %v15924_v55 = vld [vmem:[#allocation2 + $0x1f14] ss:$72 sps:$4 sm:$0xff]  }
 0x63b   :  { %8727 = vmatprep.subr.bf16.mxu1 %v15897_v62 }
 0x63d   :  { %8556 = vmatpush1.bf16.msra.mxu0 %v15892_v63 }
 0x63e   :  { %8728 = vmatpush1.bf16.msra.mxu1 %v15895_v0  ;;  %8557 = vmatprep.subr.bf16.mxu0 %v15900_v1 }
 0x63f   :  { %8729 = vmatprep.subr.bf16.mxu1 %v15903_v2  ;;  %v15927_v2 = vld [vmem:[#allocation2 + $0x1f1c] ss:$72 sps:$4 sm:$0xff]  }
 0x641   :  { %8558 = vmatpush1.bf16.msra.mxu0 %v15898_v3 }
 0x642   :  { %8730 = vmatpush1.bf16.msra.mxu1 %v15901_v4  ;;  %8559 = vmatprep.subr.bf16.mxu0 %v15906_v6 }
 0x643   :  { %8731 = vmatprep.subr.bf16.mxu1 %v15909_v7 }
 0x645   :  { %8560 = vmatpush1.bf16.msra.mxu0 %v15904_v8  ;;  %v15933_v8 = vld [vmem:[#allocation2 + $0x1fac] ss:$72 sps:$4 sm:$0xff]  }
 0x646   :  { %8732 = vmatpush1.bf16.msra.mxu1 %v15907_v10  ;;  %8561 = vmatprep.subr.bf16.mxu0 %v15912_v15  ;;  %v15934_v10 = vld [vmem:[#allocation2 + $0x2030] ss:$72 sps:$4 sm:$0xff]  }
 0x647   :  { %8733 = vmatprep.subr.bf16.mxu1 %v15915_v27  ;;  %v8241_v9 = vpop.f32.mrb[4].mxu0  ;;  %v15937_v15 = vld [vmem:[#allocation2 + $0x2038] ss:$72 sps:$4 sm:$0xff]   ;;  %v15942_v27 = vld [vmem:[#allocation2 + $0x20c4] ss:$72 sps:$4 sm:$0xff]  }
 0x648   :  { %v8413_v38 = vpop.f32.mrb[4].mxu1  ;;  %v14594_v39 = vadd.f32 %v8241_v9, %v1863_v16  ;;  %v8243_v25 = vpop.f32.mrb[5].mxu0  ;;  %v15952_v9 = vld [vmem:[#allocation2 + $0x21e0] ss:$72 sps:$4 sm:$0xff]  }
 0x649   :  { %v18480_v26 = vadd.f32 %v8413_v38, %v1871_v30  ;;  %v8415_v42 = vpop.f32.mrb[5].mxu1  ;;  %v14595_v46 = vadd.f32 %v8243_v25, %v1867_v31  ;;  %v8245_v47 = vpop.f32.mrb[6].mxu0  ;;  %8562 = vmatpush1.bf16.msra.mxu0 %v15910_v17  ;;  %v15943_v17 = vld [vmem:[#allocation2 + $0x20c8] ss:$72 sps:$4 sm:$0xff]   ;;  %v15963_v25 = vld [vmem:[#allocation2 + $0x227c] ss:$72 sps:$4 sm:$0xff]  }
 0x64a   :  { %v18482_v48 = vadd.f32 %v8415_v42, %v1875_v32  ;;  %v8417_v53 = vpop.f32.mrb[6].mxu1  ;;  %8734 = vmatpush1.bf16.msra.mxu1 %v15913_v35  ;;  %v18487_v60 = vmax.f32 %v9282_v49, %v14594_v39  ;;  %v14596_v62 = vadd.f32 %v8245_v47, %v1863_v16  ;;  %v8247_v63 = vpop.f32.mrb[7].mxu0  ;;  %8563 = vmatprep.subr.bf16.mxu0 %v15918_v36  ;;  %v15922_v49 = vld [vmem:[#allocation2 + $0x1f10] ss:$72 sps:$4 sm:$0xff]   ;;  %v15940_v16 = vld [vmem:[#allocation2 + $0x20c0] ss:$72 sps:$4 sm:$0xff]  }
 0x64b   :  { %v18489_v0 = vadd.f32 %v8417_v53, %v1871_v30  ;;  %v8419_v1 = vpop.f32.mrb[7].mxu1  ;;  %8735 = vmatprep.subr.bf16.mxu1 %v15921_v37  ;;  %v18494_v3 = vmax.f32 %v9283_v56, %v14595_v46  ;;  %v14597_v4 = vadd.f32 %v8247_v63, %v1867_v31  ;;  %v15930_v56 = vld [vmem:[#allocation2 + $0x1fa4] ss:$72 sps:$4 sm:$0xff]   ;;  %v15948_v30 = vld [vmem:[#allocation2 + $0x2154] ss:$72 sps:$4 sm:$0xff]  }
 0x64c   :  { %v18496_v6 = vadd.f32 %v8419_v1, %v1875_v32  ;;  %v18501_v40 = vmax.f32 %v9284_v59, %v14596_v62  ;;  %v9290_v41 = vmax.f32 %v18487_v60, %v18480_v26  ;;  %v15928_v59 = vld [vmem:[#allocation2 + $0x1fa0] ss:$72 sps:$4 sm:$0xff]   ;;  %v15951_v31 = vld [vmem:[#allocation2 + $0x215c] ss:$72 sps:$4 sm:$0xff]   ;;  %v15946_v32 = vld [vmem:[#allocation2 + $0x2150] ss:$72 sps:$4 sm:$0xff]  }
 0x64d   :  { %v18508_v7 = vmax.f32 %v9285_v61, %v14597_v4  ;;  %v9291_v43 = vmax.f32 %v18494_v3, %v18482_v48  ;;  %8564 = vmatpush1.bf16.msra.mxu0 %v15916_v45  ;;  %v15939_v61 = vld [vmem:[#allocation2 + $0x203c] ss:$72 sps:$4 sm:$0xff]   ;;  %v15949_v35 = vld [vmem:[#allocation2 + $0x2158] ss:$72 sps:$4 sm:$0xff]   ;;  %v15957_v37 = vld [vmem:[#allocation2 + $0x21ec] ss:$72 sps:$4 sm:$0xff]  }
 0x64e   :  { %8736 = vmatpush1.bf16.msra.mxu1 %v15919_v54  ;;  %v9292_v51 = vmax.f32 %v18501_v40, %v18489_v0  ;;  %8565 = vmatprep.subr.bf16.mxu0 %v15924_v55  ;;  %v15954_v36 = vld [vmem:[#allocation2 + $0x21e4] ss:$72 sps:$4 sm:$0xff]   ;;  %v15955_v38 = vld [vmem:[#allocation2 + $0x21e8] ss:$72 sps:$4 sm:$0xff]   ;;  %v15960_v39 = vld [vmem:[#allocation2 + $0x2274] ss:$72 sps:$4 sm:$0xff]  }
 0x64f   :  { %8737 = vmatprep.subr.bf16.mxu1 %v15927_v2  ;;  %v9293_v52 = vmax.f32 %v18508_v7, %v18496_v6  ;;  %v15958_v42 = vld [vmem:[#allocation2 + $0x2270] ss:$72 sps:$4 sm:$0xff]   ;;  %v15966_v46 = vld [vmem:[#allocation2 + $0x2304] ss:$72 sps:$4 sm:$0xff]   ;;  %v15964_v53 = vld [vmem:[#allocation2 + $0x2300] ss:$72 sps:$4 sm:$0xff]  }
 0x650   :  { %v15961_v45 = vld [vmem:[#allocation2 + $0x2278] ss:$72 sps:$4 sm:$0xff]   ;;  %v15969_v47 = vld [vmem:[#allocation2 + $0x230c] ss:$72 sps:$4 sm:$0xff]   ;;  %v15967_v54 = vld [vmem:[#allocation2 + $0x2308] ss:$72 sps:$4 sm:$0xff]  }
 0x651   :  { %8566 = vmatpush1.bf16.msra.mxu0 %v15922_v49  ;;  %v15972_v55 = vld [vmem:[#allocation2 + $0x2394] ss:$72 sps:$4 sm:$0xff]   ;;  %v15970_v63 = vld [vmem:[#allocation2 + $0x2390] ss:$72 sps:$4 sm:$0xff]   ;;  %v16306_v3 = vld [vmem:[#allocation2 + $0x1f20] ss:$72 sps:$4 sm:$0xff]  }
 0x652   :  { %8738 = vmatpush1.bf16.msra.mxu1 %v15925_v44  ;;  %8567 = vmatprep.subr.bf16.mxu0 %v15930_v56  ;;  %v15975_v62 = vld [vmem:[#allocation2 + $0x239c] ss:$72 sps:$4 sm:$0xff]   ;;  %v15973_v1 = vld [vmem:[#allocation2 + $0x2398] ss:$72 sps:$4 sm:$0xff]  }
 0x653   :  { %8739 = vmatprep.subr.bf16.mxu1 %v15933_v8  ;;  %v15978_v2 = vld [vmem:[#allocation2 + $0x34] ss:$72 sps:$4 sm:$0xff]   ;;  %v15976_v49 = vld [vmem:[#allocation2 + $0x30] ss:$72 sps:$4 sm:$0xff]   ;;  %v15984_v56 = vld [vmem:[#allocation2 + $0xc4] ss:$72 sps:$4 sm:$0xff]  }
 0x654   :  { %v15981_v4 = vld [vmem:[#allocation2 + $0x3c] ss:$72 sps:$4 sm:$0xff]   ;;  %v15979_v44 = vld [vmem:[#allocation2 + $0x38] ss:$72 sps:$4 sm:$0xff]   ;;  %v15987_v8 = vld [vmem:[#allocation2 + $0xcc] ss:$72 sps:$4 sm:$0xff]  }
 0x655   :  { %8568 = vmatpush1.bf16.msra.mxu0 %v15928_v59  ;;  %v15982_v59 = vld [vmem:[#allocation2 + $0xc0] ss:$72 sps:$4 sm:$0xff]   ;;  %v16314_v40 = vld [vmem:[#allocation2 + $0x1fb4] ss:$72 sps:$4 sm:$0xff]   ;;  %v16312_v6 = vld [vmem:[#allocation2 + $0x1fb0] ss:$72 sps:$4 sm:$0xff]  }
 0x656   :  { %8740 = vmatpush1.bf16.msra.mxu1 %v15931_v57  ;;  %8569 = vmatprep.subr.bf16.mxu0 %v15936_v58  ;;  %v15985_v57 = vld [vmem:[#allocation2 + $0xc8] ss:$72 sps:$4 sm:$0xff]   ;;  %v15990_v58 = vld [vmem:[#allocation2 + $0x154] ss:$72 sps:$4 sm:$0xff]   ;;  %v16315_v7 = vld [vmem:[#allocation2 + $0x1fb8] ss:$72 sps:$4 sm:$0xff]  }
 0x657   :  { %8741 = vmatprep.subr.bf16.mxu1 %v15939_v61  ;;  %v15993_v61 = vld [vmem:[#allocation2 + $0x15c] ss:$72 sps:$4 sm:$0xff]  }
 0x659   :  { %8570 = vmatpush1.bf16.msra.mxu0 %v15934_v10  ;;  %v15988_v10 = vld [vmem:[#allocation2 + $0x150] ss:$72 sps:$4 sm:$0xff]  }
 0x65a   :  { %8742 = vmatpush1.bf16.msra.mxu1 %v15937_v15  ;;  %8571 = vmatprep.subr.bf16.mxu0 %v15942_v27  ;;  %v15991_v15 = vld [vmem:[#allocation2 + $0x158] ss:$72 sps:$4 sm:$0xff]   ;;  %v15996_v27 = vld [vmem:[#allocation2 + $0x1e4] ss:$72 sps:$4 sm:$0xff]  }
 0x65b   :  { %8743 = vmatprep.subr.bf16.mxu1 %v15945_v28  ;;  %v15999_v28 = vld [vmem:[#allocation2 + $0x1ec] ss:$72 sps:$4 sm:$0xff]  }
 0x65d   :  { %8572 = vmatpush1.bf16.msra.mxu0 %v15940_v16  ;;  %v15994_v16 = vld [vmem:[#allocation2 + $0x1e0] ss:$72 sps:$4 sm:$0xff]  }
 0x65e   :  { %8744 = vmatpush1.bf16.msra.mxu1 %v15943_v17  ;;  %8573 = vmatprep.subr.bf16.mxu0 %v15948_v30  ;;  %v15997_v17 = vld [vmem:[#allocation2 + $0x1e8] ss:$72 sps:$4 sm:$0xff]   ;;  %v16002_v30 = vld [vmem:[#allocation2 + $0x274] ss:$72 sps:$4 sm:$0xff]  }
 0x65f   :  { %8745 = vmatprep.subr.bf16.mxu1 %v15951_v31  ;;  %v16005_v31 = vld [vmem:[#allocation2 + $0x27c] ss:$72 sps:$4 sm:$0xff]  }
 0x661   :  { %8574 = vmatpush1.bf16.msra.mxu0 %v15946_v32  ;;  %v16000_v32 = vld [vmem:[#allocation2 + $0x270] ss:$72 sps:$4 sm:$0xff]  }
 0x662   :  { %8746 = vmatpush1.bf16.msra.mxu1 %v15949_v35  ;;  %8575 = vmatprep.subr.bf16.mxu0 %v15954_v36  ;;  %v16003_v35 = vld [vmem:[#allocation2 + $0x278] ss:$72 sps:$4 sm:$0xff]   ;;  %v16008_v36 = vld [vmem:[#allocation2 + $0x304] ss:$72 sps:$4 sm:$0xff]  }
 0x663   :  { %8747 = vmatprep.subr.bf16.mxu1 %v15957_v37  ;;  %v16011_v37 = vld [vmem:[#allocation2 + $0x30c] ss:$72 sps:$4 sm:$0xff]  }
 0x665   :  { %8576 = vmatpush1.bf16.msra.mxu0 %v15952_v9  ;;  %v16006_v9 = vld [vmem:[#allocation2 + $0x300] ss:$72 sps:$4 sm:$0xff]  }
 0x666   :  { %8748 = vmatpush1.bf16.msra.mxu1 %v15955_v38  ;;  %8577 = vmatprep.subr.bf16.mxu0 %v15960_v39  ;;  %v16009_v38 = vld [vmem:[#allocation2 + $0x308] ss:$72 sps:$4 sm:$0xff]   ;;  %v16014_v39 = vld [vmem:[#allocation2 + $0x394] ss:$72 sps:$4 sm:$0xff]  }
 0x667   :  { %8749 = vmatprep.subr.bf16.mxu1 %v15963_v25  ;;  %v16017_v25 = vld [vmem:[#allocation2 + $0x39c] ss:$72 sps:$4 sm:$0xff]  }
 0x669   :  { %8578 = vmatpush1.bf16.msra.mxu0 %v15958_v42  ;;  %v16012_v42 = vld [vmem:[#allocation2 + $0x390] ss:$72 sps:$4 sm:$0xff]  }
 0x66a   :  { %8750 = vmatpush1.bf16.msra.mxu1 %v15961_v45  ;;  %8579 = vmatprep.subr.bf16.mxu0 %v15966_v46  ;;  %v16015_v45 = vld [vmem:[#allocation2 + $0x398] ss:$72 sps:$4 sm:$0xff]   ;;  %v16020_v46 = vld [vmem:[#allocation2 + $0x424] ss:$72 sps:$4 sm:$0xff]  }
 0x66b   :  { %8751 = vmatprep.subr.bf16.mxu1 %v15969_v47  ;;  %v16023_v47 = vld [vmem:[#allocation2 + $0x42c] ss:$72 sps:$4 sm:$0xff]  }
 0x66d   :  { %8580 = vmatpush1.bf16.msra.mxu0 %v15964_v53  ;;  %v16018_v53 = vld [vmem:[#allocation2 + $0x420] ss:$72 sps:$4 sm:$0xff]  }
 0x66e   :  { %8752 = vmatpush1.bf16.msra.mxu1 %v15967_v54  ;;  %8581 = vmatprep.subr.bf16.mxu0 %v15972_v55  ;;  %v16021_v54 = vld [vmem:[#allocation2 + $0x428] ss:$72 sps:$4 sm:$0xff]   ;;  %v16026_v55 = vld [vmem:[#allocation2 + $0x4b4] ss:$72 sps:$4 sm:$0xff]  }
 0x66f   :  { %8753 = vmatprep.subr.bf16.mxu1 %v15975_v62  ;;  %v16029_v62 = vld [vmem:[#allocation2 + $0x4bc] ss:$72 sps:$4 sm:$0xff]  }
 0x671   :  { %8582 = vmatpush1.bf16.msra.mxu0 %v15970_v63  ;;  %v16024_v63 = vld [vmem:[#allocation2 + $0x4b0] ss:$72 sps:$4 sm:$0xff]  }
 0x672   :  { %8754 = vmatpush1.bf16.msra.mxu1 %v15973_v1  ;;  %8766 = vmatprep.subr.bf16.mxu0 %v15978_v2  ;;  %v16027_v1 = vld [vmem:[#allocation2 + $0x4b8] ss:$72 sps:$4 sm:$0xff]   ;;  %v16032_v2 = vld [vmem:[#allocation2 + $0x544] ss:$72 sps:$4 sm:$0xff]  }
 0x673   :  { %8938 = vmatprep.subr.bf16.mxu1 %v15981_v4  ;;  %v16035_v4 = vld [vmem:[#allocation2 + $0x54c] ss:$72 sps:$4 sm:$0xff]  }
 0x674   :  { %8584 = vmatmul.mubr.bf16.vlgmr.msra.gmra.mrb[8].mxu0 %v18388_v33 }
 0x675   :  { %8756 = vmatmul.mubr.bf16.vlgmr.msra.gmra.mrb[8].mxu1 %v18388_v33  ;;  %8767 = vmatpush1.bf16.msra.mxu0 %v15976_v49  ;;  %v16030_v49 = vld [vmem:[#allocation2 + $0x540] ss:$72 sps:$4 sm:$0xff]  }
 0x676   :  { %8939 = vmatpush1.bf16.msra.mxu1 %v15979_v44  ;;  %8768 = vmatprep.subr.bf16.mxu0 %v15984_v56  ;;  %v16033_v44 = vld [vmem:[#allocation2 + $0x548] ss:$72 sps:$4 sm:$0xff]   ;;  %v16038_v56 = vld [vmem:[#allocation2 + $0x5d4] ss:$72 sps:$4 sm:$0xff]  }
 0x677   :  { %8940 = vmatprep.subr.bf16.mxu1 %v15987_v8  ;;  %8798 = vmatprep.mubr.bf16.mxu0 %v18330_v50  ;;  %v16041_v8 = vld [vmem:[#allocation2 + $0x5dc] ss:$72 sps:$4 sm:$0xff]  }
 0x678   :  { %8970 = vmatprep.mubr.bf16.mxu1 %v18330_v50 }
 0x679   :  { %8769 = vmatpush1.bf16.msra.mxu0 %v15982_v59  ;;  %v16036_v59 = vld [vmem:[#allocation2 + $0x5d0] ss:$72 sps:$4 sm:$0xff]  }
 0x67a   :  { %8941 = vmatpush1.bf16.msra.mxu1 %v15985_v57  ;;  %8770 = vmatprep.subr.bf16.mxu0 %v15990_v58  ;;  %v16039_v57 = vld [vmem:[#allocation2 + $0x5d8] ss:$72 sps:$4 sm:$0xff]   ;;  %v16044_v58 = vld [vmem:[#allocation2 + $0x664] ss:$72 sps:$4 sm:$0xff]  }
 0x67b   :  { %8942 = vmatprep.subr.bf16.mxu1 %v15993_v61  ;;  %v16047_v61 = vld [vmem:[#allocation2 + $0x66c] ss:$72 sps:$4 sm:$0xff]  }
 0x67d   :  { %8771 = vmatpush1.bf16.msra.mxu0 %v15988_v10  ;;  %v16042_v10 = vld [vmem:[#allocation2 + $0x660] ss:$72 sps:$4 sm:$0xff]  }
 0x67e   :  { %8943 = vmatpush1.bf16.msra.mxu1 %v15991_v15  ;;  %8772 = vmatprep.subr.bf16.mxu0 %v15996_v27  ;;  %v16045_v15 = vld [vmem:[#allocation2 + $0x668] ss:$72 sps:$4 sm:$0xff]   ;;  %v16050_v27 = vld [vmem:[#allocation2 + $0x6f4] ss:$72 sps:$4 sm:$0xff]  }
 0x67f   :  { %8944 = vmatprep.subr.bf16.mxu1 %v15999_v28  ;;  %v16053_v28 = vld [vmem:[#allocation2 + $0x6fc] ss:$72 sps:$4 sm:$0xff]  }
 0x681   :  { %8773 = vmatpush1.bf16.msra.mxu0 %v15994_v16  ;;  %v16048_v16 = vld [vmem:[#allocation2 + $0x6f0] ss:$72 sps:$4 sm:$0xff]  }
 0x682   :  { %8945 = vmatpush1.bf16.msra.mxu1 %v15997_v17  ;;  %8774 = vmatprep.subr.bf16.mxu0 %v16002_v30  ;;  %v16051_v17 = vld [vmem:[#allocation2 + $0x6f8] ss:$72 sps:$4 sm:$0xff]   ;;  %v16056_v30 = vld [vmem:[#allocation2 + $0x784] ss:$72 sps:$4 sm:$0xff]  }
 0x683   :  { %8946 = vmatprep.subr.bf16.mxu1 %v16005_v31  ;;  %v16059_v31 = vld [vmem:[#allocation2 + $0x78c] ss:$72 sps:$4 sm:$0xff]  }
 0x685   :  { %8775 = vmatpush1.bf16.msra.mxu0 %v16000_v32  ;;  %v16054_v32 = vld [vmem:[#allocation2 + $0x780] ss:$72 sps:$4 sm:$0xff]  }
 0x686   :  { %8947 = vmatpush1.bf16.msra.mxu1 %v16003_v35  ;;  %8776 = vmatprep.subr.bf16.mxu0 %v16008_v36  ;;  %v16057_v35 = vld [vmem:[#allocation2 + $0x788] ss:$72 sps:$4 sm:$0xff]   ;;  %v16062_v36 = vld [vmem:[#allocation2 + $0x814] ss:$72 sps:$4 sm:$0xff]  }
 0x687   :  { %8948 = vmatprep.subr.bf16.mxu1 %v16011_v37  ;;  %v16065_v37 = vld [vmem:[#allocation2 + $0x81c] ss:$72 sps:$4 sm:$0xff]  }
 0x689   :  { %8777 = vmatpush1.bf16.msra.mxu0 %v16006_v9  ;;  %v16060_v9 = vld [vmem:[#allocation2 + $0x810] ss:$72 sps:$4 sm:$0xff]  }
 0x68a   :  { %8949 = vmatpush1.bf16.msra.mxu1 %v16009_v38  ;;  %8778 = vmatprep.subr.bf16.mxu0 %v16014_v39  ;;  %v16063_v38 = vld [vmem:[#allocation2 + $0x818] ss:$72 sps:$4 sm:$0xff]   ;;  %v16068_v39 = vld [vmem:[#allocation2 + $0x8a4] ss:$72 sps:$4 sm:$0xff]  }
 0x68b   :  { %8950 = vmatprep.subr.bf16.mxu1 %v16017_v25  ;;  %v16071_v25 = vld [vmem:[#allocation2 + $0x8ac] ss:$72 sps:$4 sm:$0xff]  }
 0x68d   :  { %8779 = vmatpush1.bf16.msra.mxu0 %v16012_v42  ;;  %v16066_v42 = vld [vmem:[#allocation2 + $0x8a0] ss:$72 sps:$4 sm:$0xff]  }
 0x68e   :  { %8951 = vmatpush1.bf16.msra.mxu1 %v16015_v45  ;;  %8780 = vmatprep.subr.bf16.mxu0 %v16020_v46  ;;  %v16069_v45 = vld [vmem:[#allocation2 + $0x8a8] ss:$72 sps:$4 sm:$0xff]   ;;  %v16074_v46 = vld [vmem:[#allocation2 + $0x934] ss:$72 sps:$4 sm:$0xff]  }
 0x68f   :  { %8952 = vmatprep.subr.bf16.mxu1 %v16023_v47  ;;  %v16077_v47 = vld [vmem:[#allocation2 + $0x93c] ss:$72 sps:$4 sm:$0xff]  }
 0x691   :  { %8781 = vmatpush1.bf16.msra.mxu0 %v16018_v53  ;;  %v16072_v53 = vld [vmem:[#allocation2 + $0x930] ss:$72 sps:$4 sm:$0xff]  }
 0x692   :  { %8953 = vmatpush1.bf16.msra.mxu1 %v16021_v54  ;;  %8782 = vmatprep.subr.bf16.mxu0 %v16026_v55  ;;  %v16075_v54 = vld [vmem:[#allocation2 + $0x938] ss:$72 sps:$4 sm:$0xff]   ;;  %v16080_v55 = vld [vmem:[#allocation2 + $0x9c4] ss:$72 sps:$4 sm:$0xff]  }
 0x693   :  { %8954 = vmatprep.subr.bf16.mxu1 %v16029_v62  ;;  %v16083_v62 = vld [vmem:[#allocation2 + $0x9cc] ss:$72 sps:$4 sm:$0xff]  }
 0x695   :  { %8783 = vmatpush1.bf16.msra.mxu0 %v16024_v63  ;;  %v16078_v63 = vld [vmem:[#allocation2 + $0x9c0] ss:$72 sps:$4 sm:$0xff]  }
 0x696   :  { %8955 = vmatpush1.bf16.msra.mxu1 %v16027_v1  ;;  %8784 = vmatprep.subr.bf16.mxu0 %v16032_v2  ;;  %v16081_v1 = vld [vmem:[#allocation2 + $0x9c8] ss:$72 sps:$4 sm:$0xff]   ;;  %v16086_v2 = vld [vmem:[#allocation2 + $0xa54] ss:$72 sps:$4 sm:$0xff]  }
 0x697   :  { %8956 = vmatprep.subr.bf16.mxu1 %v16035_v4  ;;  %v16089_v4 = vld [vmem:[#allocation2 + $0xa5c] ss:$72 sps:$4 sm:$0xff]  }
 0x699   :  { %8785 = vmatpush1.bf16.msra.mxu0 %v16030_v49  ;;  %v16084_v49 = vld [vmem:[#allocation2 + $0xa50] ss:$72 sps:$4 sm:$0xff]  }
 0x69a   :  { %8957 = vmatpush1.bf16.msra.mxu1 %v16033_v44  ;;  %8786 = vmatprep.subr.bf16.mxu0 %v16038_v56  ;;  %v16087_v44 = vld [vmem:[#allocation2 + $0xa58] ss:$72 sps:$4 sm:$0xff]   ;;  %v16092_v56 = vld [vmem:[#allocation2 + $0xae4] ss:$72 sps:$4 sm:$0xff]  }
 0x69b   :  { %8958 = vmatprep.subr.bf16.mxu1 %v16041_v8  ;;  %v16095_v8 = vld [vmem:[#allocation2 + $0xaec] ss:$72 sps:$4 sm:$0xff]  }
 0x69d   :  { %8787 = vmatpush1.bf16.msra.mxu0 %v16036_v59  ;;  %v16090_v59 = vld [vmem:[#allocation2 + $0xae0] ss:$72 sps:$4 sm:$0xff]  }
 0x69e   :  { %8959 = vmatpush1.bf16.msra.mxu1 %v16039_v57  ;;  %8788 = vmatprep.subr.bf16.mxu0 %v16044_v58  ;;  %v16093_v57 = vld [vmem:[#allocation2 + $0xae8] ss:$72 sps:$4 sm:$0xff]   ;;  %v16098_v58 = vld [vmem:[#allocation2 + $0xb74] ss:$72 sps:$4 sm:$0xff]  }
 0x69f   :  { %8960 = vmatprep.subr.bf16.mxu1 %v16047_v61  ;;  %v16101_v61 = vld [vmem:[#allocation2 + $0xb7c] ss:$72 sps:$4 sm:$0xff]  }
 0x6a1   :  { %8789 = vmatpush1.bf16.msra.mxu0 %v16042_v10  ;;  %v16096_v10 = vld [vmem:[#allocation2 + $0xb70] ss:$72 sps:$4 sm:$0xff]  }
 0x6a2   :  { %8961 = vmatpush1.bf16.msra.mxu1 %v16045_v15  ;;  %8790 = vmatprep.subr.bf16.mxu0 %v16050_v27  ;;  %v16099_v15 = vld [vmem:[#allocation2 + $0xb78] ss:$72 sps:$4 sm:$0xff]   ;;  %v16104_v27 = vld [vmem:[#allocation2 + $0xc04] ss:$72 sps:$4 sm:$0xff]  }
 0x6a3   :  { %8962 = vmatprep.subr.bf16.mxu1 %v16053_v28  ;;  %v16107_v28 = vld [vmem:[#allocation2 + $0xc0c] ss:$72 sps:$4 sm:$0xff]  }
 0x6a5   :  { %8791 = vmatpush1.bf16.msra.mxu0 %v16048_v16  ;;  %v16102_v16 = vld [vmem:[#allocation2 + $0xc00] ss:$72 sps:$4 sm:$0xff]  }
 0x6a6   :  { %8963 = vmatpush1.bf16.msra.mxu1 %v16051_v17  ;;  %8792 = vmatprep.subr.bf16.mxu0 %v16056_v30  ;;  %v16105_v17 = vld [vmem:[#allocation2 + $0xc08] ss:$72 sps:$4 sm:$0xff]   ;;  %v16110_v30 = vld [vmem:[#allocation2 + $0xc94] ss:$72 sps:$4 sm:$0xff]  }
 0x6a7   :  { %8964 = vmatprep.subr.bf16.mxu1 %v16059_v31  ;;  %v16113_v31 = vld [vmem:[#allocation2 + $0xc9c] ss:$72 sps:$4 sm:$0xff]  }
 0x6a9   :  { %8793 = vmatpush1.bf16.msra.mxu0 %v16054_v32  ;;  %v16108_v32 = vld [vmem:[#allocation2 + $0xc90] ss:$72 sps:$4 sm:$0xff]  }
 0x6aa   :  { %8965 = vmatpush1.bf16.msra.mxu1 %v16057_v35  ;;  %8794 = vmatprep.subr.bf16.mxu0 %v16062_v36  ;;  %v16111_v35 = vld [vmem:[#allocation2 + $0xc98] ss:$72 sps:$4 sm:$0xff]   ;;  %v16116_v36 = vld [vmem:[#allocation2 + $0xd24] ss:$72 sps:$4 sm:$0xff]  }
 0x6ab   :  { %8966 = vmatprep.subr.bf16.mxu1 %v16065_v37  ;;  %v16119_v37 = vld [vmem:[#allocation2 + $0xd2c] ss:$72 sps:$4 sm:$0xff]  }
 0x6ad   :  { %8795 = vmatpush1.bf16.msra.mxu0 %v16060_v9  ;;  %v16114_v9 = vld [vmem:[#allocation2 + $0xd20] ss:$72 sps:$4 sm:$0xff]  }
 0x6ae   :  { %8967 = vmatpush1.bf16.msra.mxu1 %v16063_v38  ;;  %8796 = vmatprep.subr.bf16.mxu0 %v16068_v39  ;;  %v16117_v38 = vld [vmem:[#allocation2 + $0xd28] ss:$72 sps:$4 sm:$0xff]   ;;  %v16122_v39 = vld [vmem:[#allocation2 + $0xdb4] ss:$72 sps:$4 sm:$0xff]  }
 0x6af   :  { %8968 = vmatprep.subr.bf16.mxu1 %v16071_v25  ;;  %v16125_v25 = vld [vmem:[#allocation2 + $0xdbc] ss:$72 sps:$4 sm:$0xff]  }
 0x6b1   :  { %8797 = vmatpush1.bf16.msra.mxu0 %v16066_v42  ;;  %v16120_v42 = vld [vmem:[#allocation2 + $0xdb0] ss:$72 sps:$4 sm:$0xff]  }
 0x6b2   :  { %8969 = vmatpush1.bf16.msra.mxu1 %v16069_v45  ;;  %8809 = vmatprep.subr.bf16.mxu0 %v16074_v46  ;;  %v16123_v45 = vld [vmem:[#allocation2 + $0xdb8] ss:$72 sps:$4 sm:$0xff]   ;;  %v16128_v46 = vld [vmem:[#allocation2 + $0xe44] ss:$72 sps:$4 sm:$0xff]  }
 0x6b3   :  { %8981 = vmatprep.subr.bf16.mxu1 %v16077_v47  ;;  %v16131_v47 = vld [vmem:[#allocation2 + $0xe4c] ss:$72 sps:$4 sm:$0xff]  }
 0x6b4   :  { %8799 = vmatmul.mubr.bf16.vlgmr.msra.gmra.mrb[12].mxu0 %v18334_v5 }
 0x6b5   :  { %8971 = vmatmul.mubr.bf16.vlgmr.msra.gmra.mrb[12].mxu1 %v18334_v5  ;;  %8810 = vmatpush1.bf16.msra.mxu0 %v16072_v53  ;;  %v16126_v53 = vld [vmem:[#allocation2 + $0xe40] ss:$72 sps:$4 sm:$0xff]  }
 0x6b6   :  { %8982 = vmatpush1.bf16.msra.mxu1 %v16075_v54  ;;  %8811 = vmatprep.subr.bf16.mxu0 %v16080_v55  ;;  %v16129_v54 = vld [vmem:[#allocation2 + $0xe48] ss:$72 sps:$4 sm:$0xff]   ;;  %v16134_v55 = vld [vmem:[#allocation2 + $0xed4] ss:$72 sps:$4 sm:$0xff]  }
 0x6b7   :  { %8983 = vmatprep.subr.bf16.mxu1 %v16083_v62  ;;  %8841 = vmatprep.mubr.bf16.mxu0 %v18346_v34  ;;  %v16137_v62 = vld [vmem:[#allocation2 + $0xedc] ss:$72 sps:$4 sm:$0xff]  }
 0x6b8   :  { %9013 = vmatprep.mubr.bf16.mxu1 %v18346_v34 }
 0x6b9   :  { %8812 = vmatpush1.bf16.msra.mxu0 %v16078_v63  ;;  %v16132_v63 = vld [vmem:[#allocation2 + $0xed0] ss:$72 sps:$4 sm:$0xff]  }
 0x6ba   :  { %8984 = vmatpush1.bf16.msra.mxu1 %v16081_v1  ;;  %8813 = vmatprep.subr.bf16.mxu0 %v16086_v2  ;;  %v16135_v1 = vld [vmem:[#allocation2 + $0xed8] ss:$72 sps:$4 sm:$0xff]   ;;  %v16140_v2 = vld [vmem:[#allocation2 + $0xf64] ss:$72 sps:$4 sm:$0xff]  }
 0x6bb   :  { %8985 = vmatprep.subr.bf16.mxu1 %v16089_v4  ;;  %v16143_v4 = vld [vmem:[#allocation2 + $0xf6c] ss:$72 sps:$4 sm:$0xff]  }
 0x6bd   :  { %8814 = vmatpush1.bf16.msra.mxu0 %v16084_v49  ;;  %v16138_v49 = vld [vmem:[#allocation2 + $0xf60] ss:$72 sps:$4 sm:$0xff]  }
 0x6be   :  { %8986 = vmatpush1.bf16.msra.mxu1 %v16087_v44  ;;  %8815 = vmatprep.subr.bf16.mxu0 %v16092_v56  ;;  %v16141_v44 = vld [vmem:[#allocation2 + $0xf68] ss:$72 sps:$4 sm:$0xff]   ;;  %v16146_v56 = vld [vmem:[#allocation2 + $0xff4] ss:$72 sps:$4 sm:$0xff]  }
 0x6bf   :  { %8987 = vmatprep.subr.bf16.mxu1 %v16095_v8  ;;  %v16149_v8 = vld [vmem:[#allocation2 + $0xffc] ss:$72 sps:$4 sm:$0xff]  }
 0x6c1   :  { %8816 = vmatpush1.bf16.msra.mxu0 %v16090_v59  ;;  %v16144_v59 = vld [vmem:[#allocation2 + $0xff0] ss:$72 sps:$4 sm:$0xff]  }
 0x6c2   :  { %8988 = vmatpush1.bf16.msra.mxu1 %v16093_v57  ;;  %8817 = vmatprep.subr.bf16.mxu0 %v16098_v58  ;;  %v16147_v57 = vld [vmem:[#allocation2 + $0xff8] ss:$72 sps:$4 sm:$0xff]   ;;  %v16152_v58 = vld [vmem:[#allocation2 + $0x1084] ss:$72 sps:$4 sm:$0xff]  }
 0x6c3   :  { %8989 = vmatprep.subr.bf16.mxu1 %v16101_v61  ;;  %v16155_v61 = vld [vmem:[#allocation2 + $0x108c] ss:$72 sps:$4 sm:$0xff]  }
 0x6c5   :  { %8818 = vmatpush1.bf16.msra.mxu0 %v16096_v10  ;;  %v16150_v10 = vld [vmem:[#allocation2 + $0x1080] ss:$72 sps:$4 sm:$0xff]  }
 0x6c6   :  { %8990 = vmatpush1.bf16.msra.mxu1 %v16099_v15  ;;  %8819 = vmatprep.subr.bf16.mxu0 %v16104_v27  ;;  %v16153_v15 = vld [vmem:[#allocation2 + $0x1088] ss:$72 sps:$4 sm:$0xff]   ;;  %v16158_v27 = vld [vmem:[#allocation2 + $0x1114] ss:$72 sps:$4 sm:$0xff]  }
 0x6c7   :  { %8991 = vmatprep.subr.bf16.mxu1 %v16107_v28  ;;  %v16161_v28 = vld [vmem:[#allocation2 + $0x111c] ss:$72 sps:$4 sm:$0xff]  }
 0x6c9   :  { %8820 = vmatpush1.bf16.msra.mxu0 %v16102_v16  ;;  %v16156_v16 = vld [vmem:[#allocation2 + $0x1110] ss:$72 sps:$4 sm:$0xff]  }
 0x6ca   :  { %8992 = vmatpush1.bf16.msra.mxu1 %v16105_v17  ;;  %8821 = vmatprep.subr.bf16.mxu0 %v16110_v30  ;;  %v16159_v17 = vld [vmem:[#allocation2 + $0x1118] ss:$72 sps:$4 sm:$0xff]   ;;  %v16164_v30 = vld [vmem:[#allocation2 + $0x11a4] ss:$72 sps:$4 sm:$0xff]  }
 0x6cb   :  { %8993 = vmatprep.subr.bf16.mxu1 %v16113_v31  ;;  %v16167_v31 = vld [vmem:[#allocation2 + $0x11ac] ss:$72 sps:$4 sm:$0xff]  }
 0x6cd   :  { %8822 = vmatpush1.bf16.msra.mxu0 %v16108_v32  ;;  %v16162_v32 = vld [vmem:[#allocation2 + $0x11a0] ss:$72 sps:$4 sm:$0xff]  }
 0x6ce   :  { %8994 = vmatpush1.bf16.msra.mxu1 %v16111_v35  ;;  %8823 = vmatprep.subr.bf16.mxu0 %v16116_v36  ;;  %v16165_v35 = vld [vmem:[#allocation2 + $0x11a8] ss:$72 sps:$4 sm:$0xff]   ;;  %v16170_v36 = vld [vmem:[#allocation2 + $0x1234] ss:$72 sps:$4 sm:$0xff]  }
 0x6cf   :  { %8995 = vmatprep.subr.bf16.mxu1 %v16119_v37  ;;  %v16173_v37 = vld [vmem:[#allocation2 + $0x123c] ss:$72 sps:$4 sm:$0xff]  }
 0x6d1   :  { %8824 = vmatpush1.bf16.msra.mxu0 %v16114_v9  ;;  %v16168_v9 = vld [vmem:[#allocation2 + $0x1230] ss:$72 sps:$4 sm:$0xff]  }
 0x6d2   :  { %8996 = vmatpush1.bf16.msra.mxu1 %v16117_v38  ;;  %8825 = vmatprep.subr.bf16.mxu0 %v16122_v39  ;;  %v16171_v38 = vld [vmem:[#allocation2 + $0x1238] ss:$72 sps:$4 sm:$0xff]   ;;  %v16176_v39 = vld [vmem:[#allocation2 + $0x12c4] ss:$72 sps:$4 sm:$0xff]  }
 0x6d3   :  { %8997 = vmatprep.subr.bf16.mxu1 %v16125_v25  ;;  %v16179_v25 = vld [vmem:[#allocation2 + $0x12cc] ss:$72 sps:$4 sm:$0xff]  }
 0x6d5   :  { %8826 = vmatpush1.bf16.msra.mxu0 %v16120_v42  ;;  %v16174_v42 = vld [vmem:[#allocation2 + $0x12c0] ss:$72 sps:$4 sm:$0xff]  }
 0x6d6   :  { %8998 = vmatpush1.bf16.msra.mxu1 %v16123_v45  ;;  %8827 = vmatprep.subr.bf16.mxu0 %v16128_v46  ;;  %v16177_v45 = vld [vmem:[#allocation2 + $0x12c8] ss:$72 sps:$4 sm:$0xff]   ;;  %v16182_v46 = vld [vmem:[#allocation2 + $0x1354] ss:$72 sps:$4 sm:$0xff]  }
 0x6d7   :  { %8999 = vmatprep.subr.bf16.mxu1 %v16131_v47  ;;  %v16185_v47 = vld [vmem:[#allocation2 + $0x135c] ss:$72 sps:$4 sm:$0xff]  }
 0x6d9   :  { %8828 = vmatpush1.bf16.msra.mxu0 %v16126_v53  ;;  %v16180_v53 = vld [vmem:[#allocation2 + $0x1350] ss:$72 sps:$4 sm:$0xff]  }
 0x6da   :  { %9000 = vmatpush1.bf16.msra.mxu1 %v16129_v54  ;;  %8829 = vmatprep.subr.bf16.mxu0 %v16134_v55  ;;  %v16183_v54 = vld [vmem:[#allocation2 + $0x1358] ss:$72 sps:$4 sm:$0xff]   ;;  %v16188_v55 = vld [vmem:[#allocation2 + $0x13e4] ss:$72 sps:$4 sm:$0xff]  }
 0x6db   :  { %9001 = vmatprep.subr.bf16.mxu1 %v16137_v62  ;;  %v16191_v62 = vld [vmem:[#allocation2 + $0x13ec] ss:$72 sps:$4 sm:$0xff]  }
 0x6dd   :  { %8830 = vmatpush1.bf16.msra.mxu0 %v16132_v63  ;;  %v16186_v63 = vld [vmem:[#allocation2 + $0x13e0] ss:$72 sps:$4 sm:$0xff]  }
 0x6de   :  { %9002 = vmatpush1.bf16.msra.mxu1 %v16135_v1  ;;  %8831 = vmatprep.subr.bf16.mxu0 %v16140_v2  ;;  %v16189_v1 = vld [vmem:[#allocation2 + $0x13e8] ss:$72 sps:$4 sm:$0xff]   ;;  %v16194_v2 = vld [vmem:[#allocation2 + $0x1474] ss:$72 sps:$4 sm:$0xff]  }
 0x6df   :  { %9003 = vmatprep.subr.bf16.mxu1 %v16143_v4  ;;  %v16197_v4 = vld [vmem:[#allocation2 + $0x147c] ss:$72 sps:$4 sm:$0xff]  }
 0x6e1   :  { %8832 = vmatpush1.bf16.msra.mxu0 %v16138_v49  ;;  %v16192_v49 = vld [vmem:[#allocation2 + $0x1470] ss:$72 sps:$4 sm:$0xff]  }
 0x6e2   :  { %9004 = vmatpush1.bf16.msra.mxu1 %v16141_v44  ;;  %8833 = vmatprep.subr.bf16.mxu0 %v16146_v56  ;;  %v16195_v44 = vld [vmem:[#allocation2 + $0x1478] ss:$72 sps:$4 sm:$0xff]   ;;  %v16200_v56 = vld [vmem:[#allocation2 + $0x1504] ss:$72 sps:$4 sm:$0xff]  }
 0x6e3   :  { %9005 = vmatprep.subr.bf16.mxu1 %v16149_v8  ;;  %v16203_v8 = vld [vmem:[#allocation2 + $0x150c] ss:$72 sps:$4 sm:$0xff]  }
 0x6e5   :  { %8834 = vmatpush1.bf16.msra.mxu0 %v16144_v59  ;;  %v16198_v59 = vld [vmem:[#allocation2 + $0x1500] ss:$72 sps:$4 sm:$0xff]  }
 0x6e6   :  { %9006 = vmatpush1.bf16.msra.mxu1 %v16147_v57  ;;  %8835 = vmatprep.subr.bf16.mxu0 %v16152_v58  ;;  %v16201_v57 = vld [vmem:[#allocation2 + $0x1508] ss:$72 sps:$4 sm:$0xff]   ;;  %v16206_v58 = vld [vmem:[#allocation2 + $0x1594] ss:$72 sps:$4 sm:$0xff]  }
 0x6e7   :  { %9007 = vmatprep.subr.bf16.mxu1 %v16155_v61  ;;  %v16209_v61 = vld [vmem:[#allocation2 + $0x159c] ss:$72 sps:$4 sm:$0xff]  }
 0x6e9   :  { %8836 = vmatpush1.bf16.msra.mxu0 %v16150_v10  ;;  %v16204_v10 = vld [vmem:[#allocation2 + $0x1590] ss:$72 sps:$4 sm:$0xff]  }
 0x6ea   :  { %9008 = vmatpush1.bf16.msra.mxu1 %v16153_v15  ;;  %8837 = vmatprep.subr.bf16.mxu0 %v16158_v27  ;;  %v16207_v15 = vld [vmem:[#allocation2 + $0x1598] ss:$72 sps:$4 sm:$0xff]   ;;  %v16212_v27 = vld [vmem:[#allocation2 + $0x1624] ss:$72 sps:$4 sm:$0xff]  }
 0x6eb   :  { %9009 = vmatprep.subr.bf16.mxu1 %v16161_v28  ;;  %v16215_v28 = vld [vmem:[#allocation2 + $0x162c] ss:$72 sps:$4 sm:$0xff]  }
 0x6ed   :  { %8838 = vmatpush1.bf16.msra.mxu0 %v16156_v16  ;;  %v16210_v16 = vld [vmem:[#allocation2 + $0x1620] ss:$72 sps:$4 sm:$0xff]  }
 0x6ee   :  { %9010 = vmatpush1.bf16.msra.mxu1 %v16159_v17  ;;  %8839 = vmatprep.subr.bf16.mxu0 %v16164_v30  ;;  %v16213_v17 = vld [vmem:[#allocation2 + $0x1628] ss:$72 sps:$4 sm:$0xff]   ;;  %v16218_v30 = vld [vmem:[#allocation2 + $0x16b4] ss:$72 sps:$4 sm:$0xff]  }
 0x6ef   :  { %9011 = vmatprep.subr.bf16.mxu1 %v16167_v31  ;;  %v16221_v31 = vld [vmem:[#allocation2 + $0x16bc] ss:$72 sps:$4 sm:$0xff]  }
 0x6f1   :  { %8840 = vmatpush1.bf16.msra.mxu0 %v16162_v32  ;;  %v16216_v32 = vld [vmem:[#allocation2 + $0x16b0] ss:$72 sps:$4 sm:$0xff]  }
 0x6f2   :  { %9012 = vmatpush1.bf16.msra.mxu1 %v16165_v35  ;;  %8852 = vmatprep.subr.bf16.mxu0 %v16170_v36  ;;  %v16219_v35 = vld [vmem:[#allocation2 + $0x16b8] ss:$72 sps:$4 sm:$0xff]   ;;  %v16224_v36 = vld [vmem:[#allocation2 + $0x1744] ss:$72 sps:$4 sm:$0xff]  }
 0x6f3   :  { %9024 = vmatprep.subr.bf16.mxu1 %v16173_v37  ;;  %v16227_v37 = vld [vmem:[#allocation2 + $0x174c] ss:$72 sps:$4 sm:$0xff]  }
 0x6f4   :  { %8842 = vmatmul.mubr.bf16.vlgmr.msra.gmra.mrb[12].mxu0 %v18352_v13 }
 0x6f5   :  { %9014 = vmatmul.mubr.bf16.vlgmr.msra.gmra.mrb[12].mxu1 %v18352_v13  ;;  %8853 = vmatpush1.bf16.msra.mxu0 %v16168_v9  ;;  %v16222_v9 = vld [vmem:[#allocation2 + $0x1740] ss:$72 sps:$4 sm:$0xff]  }
 0x6f6   :  { %9025 = vmatpush1.bf16.msra.mxu1 %v16171_v38  ;;  %8854 = vmatprep.subr.bf16.mxu0 %v16176_v39  ;;  %v16225_v38 = vld [vmem:[#allocation2 + $0x1748] ss:$72 sps:$4 sm:$0xff]   ;;  %v16230_v39 = vld [vmem:[#allocation2 + $0x17d4] ss:$72 sps:$4 sm:$0xff]  }
 0x6f7   :  { %9026 = vmatprep.subr.bf16.mxu1 %v16179_v25  ;;  %8884 = vmatprep.mubr.bf16.mxu0 %v18362_v18  ;;  %v16233_v25 = vld [vmem:[#allocation2 + $0x17dc] ss:$72 sps:$4 sm:$0xff]  }
 0x6f8   :  { %9056 = vmatprep.mubr.bf16.mxu1 %v18362_v18 }
 0x6f9   :  { %8855 = vmatpush1.bf16.msra.mxu0 %v16174_v42  ;;  %v16228_v42 = vld [vmem:[#allocation2 + $0x17d0] ss:$72 sps:$4 sm:$0xff]  }
 0x6fa   :  { %9027 = vmatpush1.bf16.msra.mxu1 %v16177_v45  ;;  %8856 = vmatprep.subr.bf16.mxu0 %v16182_v46  ;;  %v16231_v45 = vld [vmem:[#allocation2 + $0x17d8] ss:$72 sps:$4 sm:$0xff]   ;;  %v16236_v46 = vld [vmem:[#allocation2 + $0x1864] ss:$72 sps:$4 sm:$0xff]  }
 0x6fb   :  { %9028 = vmatprep.subr.bf16.mxu1 %v16185_v47  ;;  %v16239_v47 = vld [vmem:[#allocation2 + $0x186c] ss:$72 sps:$4 sm:$0xff]  }
 0x6fd   :  { %8857 = vmatpush1.bf16.msra.mxu0 %v16180_v53  ;;  %v16234_v53 = vld [vmem:[#allocation2 + $0x1860] ss:$72 sps:$4 sm:$0xff]  }
 0x6fe   :  { %9029 = vmatpush1.bf16.msra.mxu1 %v16183_v54  ;;  %8858 = vmatprep.subr.bf16.mxu0 %v16188_v55  ;;  %v16237_v54 = vld [vmem:[#allocation2 + $0x1868] ss:$72 sps:$4 sm:$0xff]   ;;  %v16242_v55 = vld [vmem:[#allocation2 + $0x18f4] ss:$72 sps:$4 sm:$0xff]  }
 0x6ff   :  { %9030 = vmatprep.subr.bf16.mxu1 %v16191_v62  ;;  %v16245_v62 = vld [vmem:[#allocation2 + $0x18fc] ss:$72 sps:$4 sm:$0xff]  }
 0x701   :  { %8859 = vmatpush1.bf16.msra.mxu0 %v16186_v63  ;;  %v16240_v63 = vld [vmem:[#allocation2 + $0x18f0] ss:$72 sps:$4 sm:$0xff]  }
 0x702   :  { %9031 = vmatpush1.bf16.msra.mxu1 %v16189_v1  ;;  %8860 = vmatprep.subr.bf16.mxu0 %v16194_v2  ;;  %v16243_v1 = vld [vmem:[#allocation2 + $0x18f8] ss:$72 sps:$4 sm:$0xff]   ;;  %v16248_v2 = vld [vmem:[#allocation2 + $0x1984] ss:$72 sps:$4 sm:$0xff]  }
 0x703   :  { %9032 = vmatprep.subr.bf16.mxu1 %v16197_v4  ;;  %v16251_v4 = vld [vmem:[#allocation2 + $0x198c] ss:$72 sps:$4 sm:$0xff]  }
 0x705   :  { %8861 = vmatpush1.bf16.msra.mxu0 %v16192_v49  ;;  %v16246_v49 = vld [vmem:[#allocation2 + $0x1980] ss:$72 sps:$4 sm:$0xff]  }
 0x706   :  { %9033 = vmatpush1.bf16.msra.mxu1 %v16195_v44  ;;  %8862 = vmatprep.subr.bf16.mxu0 %v16200_v56  ;;  %v16249_v44 = vld [vmem:[#allocation2 + $0x1988] ss:$72 sps:$4 sm:$0xff]   ;;  %v16254_v56 = vld [vmem:[#allocation2 + $0x1a14] ss:$72 sps:$4 sm:$0xff]  }
 0x707   :  { %9034 = vmatprep.subr.bf16.mxu1 %v16203_v8  ;;  %v16257_v8 = vld [vmem:[#allocation2 + $0x1a1c] ss:$72 sps:$4 sm:$0xff]  }
 0x709   :  { %8863 = vmatpush1.bf16.msra.mxu0 %v16198_v59  ;;  %v16252_v59 = vld [vmem:[#allocation2 + $0x1a10] ss:$72 sps:$4 sm:$0xff]  }
 0x70a   :  { %9035 = vmatpush1.bf16.msra.mxu1 %v16201_v57  ;;  %8864 = vmatprep.subr.bf16.mxu0 %v16206_v58  ;;  %v16255_v57 = vld [vmem:[#allocation2 + $0x1a18] ss:$72 sps:$4 sm:$0xff]   ;;  %v16260_v58 = vld [vmem:[#allocation2 + $0x1aa4] ss:$72 sps:$4 sm:$0xff]  }
 0x70b   :  { %9036 = vmatprep.subr.bf16.mxu1 %v16209_v61  ;;  %v16263_v61 = vld [vmem:[#allocation2 + $0x1aac] ss:$72 sps:$4 sm:$0xff]  }
 0x70d   :  { %8865 = vmatpush1.bf16.msra.mxu0 %v16204_v10  ;;  %v16258_v10 = vld [vmem:[#allocation2 + $0x1aa0] ss:$72 sps:$4 sm:$0xff]  }
 0x70e   :  { %9037 = vmatpush1.bf16.msra.mxu1 %v16207_v15  ;;  %8866 = vmatprep.subr.bf16.mxu0 %v16212_v27  ;;  %v16261_v15 = vld [vmem:[#allocation2 + $0x1aa8] ss:$72 sps:$4 sm:$0xff]   ;;  %v16266_v27 = vld [vmem:[#allocation2 + $0x1b34] ss:$72 sps:$4 sm:$0xff]  }
 0x70f   :  { %9038 = vmatprep.subr.bf16.mxu1 %v16215_v28  ;;  %v16269_v28 = vld [vmem:[#allocation2 + $0x1b3c] ss:$72 sps:$4 sm:$0xff]  }
 0x711   :  { %8867 = vmatpush1.bf16.msra.mxu0 %v16210_v16  ;;  %v16264_v16 = vld [vmem:[#allocation2 + $0x1b30] ss:$72 sps:$4 sm:$0xff]  }
 0x712   :  { %9039 = vmatpush1.bf16.msra.mxu1 %v16213_v17  ;;  %8868 = vmatprep.subr.bf16.mxu0 %v16218_v30  ;;  %v16267_v17 = vld [vmem:[#allocation2 + $0x1b38] ss:$72 sps:$4 sm:$0xff]   ;;  %v16272_v30 = vld [vmem:[#allocation2 + $0x1bc4] ss:$72 sps:$4 sm:$0xff]  }
 0x713   :  { %9040 = vmatprep.subr.bf16.mxu1 %v16221_v31  ;;  %v16275_v31 = vld [vmem:[#allocation2 + $0x1bcc] ss:$72 sps:$4 sm:$0xff]  }
 0x715   :  { %8869 = vmatpush1.bf16.msra.mxu0 %v16216_v32  ;;  %v16270_v32 = vld [vmem:[#allocation2 + $0x1bc0] ss:$72 sps:$4 sm:$0xff]  }
 0x716   :  { %9041 = vmatpush1.bf16.msra.mxu1 %v16219_v35  ;;  %8870 = vmatprep.subr.bf16.mxu0 %v16224_v36  ;;  %v16273_v35 = vld [vmem:[#allocation2 + $0x1bc8] ss:$72 sps:$4 sm:$0xff]   ;;  %v16278_v36 = vld [vmem:[#allocation2 + $0x1c54] ss:$72 sps:$4 sm:$0xff]  }
 0x717   :  { %9042 = vmatprep.subr.bf16.mxu1 %v16227_v37  ;;  %v16281_v37 = vld [vmem:[#allocation2 + $0x1c5c] ss:$72 sps:$4 sm:$0xff]  }
 0x719   :  { %8871 = vmatpush1.bf16.msra.mxu0 %v16222_v9  ;;  %v16276_v9 = vld [vmem:[#allocation2 + $0x1c50] ss:$72 sps:$4 sm:$0xff]  }
 0x71a   :  { %9043 = vmatpush1.bf16.msra.mxu1 %v16225_v38  ;;  %8872 = vmatprep.subr.bf16.mxu0 %v16230_v39  ;;  %v16279_v38 = vld [vmem:[#allocation2 + $0x1c58] ss:$72 sps:$4 sm:$0xff]   ;;  %v16284_v39 = vld [vmem:[#allocation2 + $0x1ce4] ss:$72 sps:$4 sm:$0xff]  }
 0x71b   :  { %9044 = vmatprep.subr.bf16.mxu1 %v16233_v25  ;;  %v16287_v25 = vld [vmem:[#allocation2 + $0x1cec] ss:$72 sps:$4 sm:$0xff]  }
 0x71d   :  { %8873 = vmatpush1.bf16.msra.mxu0 %v16228_v42  ;;  %v16282_v42 = vld [vmem:[#allocation2 + $0x1ce0] ss:$72 sps:$4 sm:$0xff]  }
 0x71e   :  { %9045 = vmatpush1.bf16.msra.mxu1 %v16231_v45  ;;  %8874 = vmatprep.subr.bf16.mxu0 %v16236_v46  ;;  %v16285_v45 = vld [vmem:[#allocation2 + $0x1ce8] ss:$72 sps:$4 sm:$0xff]   ;;  %v16290_v46 = vld [vmem:[#allocation2 + $0x1d74] ss:$72 sps:$4 sm:$0xff]  }
 0x71f   :  { %9046 = vmatprep.subr.bf16.mxu1 %v16239_v47  ;;  %v16293_v47 = vld [vmem:[#allocation2 + $0x1d7c] ss:$72 sps:$4 sm:$0xff]  }
 0x721   :  { %8875 = vmatpush1.bf16.msra.mxu0 %v16234_v53  ;;  %v16288_v53 = vld [vmem:[#allocation2 + $0x1d70] ss:$72 sps:$4 sm:$0xff]  }
 0x722   :  { %9047 = vmatpush1.bf16.msra.mxu1 %v16237_v54  ;;  %8876 = vmatprep.subr.bf16.mxu0 %v16242_v55  ;;  %v16291_v54 = vld [vmem:[#allocation2 + $0x1d78] ss:$72 sps:$4 sm:$0xff]   ;;  %v18532_v55 = vld [vmem:[#allocation4 + $0x8] sm:$0xff] }
 0x723   :  { %9048 = vmatprep.subr.bf16.mxu1 %v16245_v62  ;;  %v16296_v62 = vld [vmem:[#allocation2 + $0x1e04] ss:$72 sps:$4 sm:$0xff]  }
 0x725   :  { %8877 = vmatpush1.bf16.msra.mxu0 %v16240_v63  ;;  %v16299_v63 = vld [vmem:[#allocation2 + $0x1e0c] ss:$72 sps:$4 sm:$0xff]  }
 0x726   :  { %9049 = vmatpush1.bf16.msra.mxu1 %v16243_v1  ;;  %8878 = vmatprep.subr.bf16.mxu0 %v16248_v2  ;;  %v1879_v1 = vrot.slane %v18532_v55, %v18409_v20  ;;  %v1887_v2 = vrot.slane %v18532_v55, %v18412_v21 }
 0x727   :  { %9050 = vmatprep.subr.bf16.mxu1 %v16251_v4  ;;  %v1883_v4 = vrot.slane %v18532_v55, %v18415_v22 }
 0x729   :  { %8879 = vmatpush1.bf16.msra.mxu0 %v16246_v49  ;;  %v16294_v49 = vld [vmem:[#allocation2 + $0x1e00] ss:$72 sps:$4 sm:$0xff]  }
 0x72a   :  { %9051 = vmatpush1.bf16.msra.mxu1 %v16249_v44  ;;  %8880 = vmatprep.subr.bf16.mxu0 %v16254_v56  ;;  %v1891_v44 = vrot.slane %v18532_v55, %v18418_v23  ;;  %v16297_v56 = vld [vmem:[#allocation2 + $0x1e08] ss:$72 sps:$4 sm:$0xff]  }
 0x72b   :  { %9052 = vmatprep.subr.bf16.mxu1 %v16257_v8  ;;  %v16302_v8 = vld [vmem:[#allocation2 + $0x1e94] ss:$72 sps:$4 sm:$0xff]  }
 0x72d   :  { %8881 = vmatpush1.bf16.msra.mxu0 %v16252_v59  ;;  %v16305_v59 = vld [vmem:[#allocation2 + $0x1e9c] ss:$72 sps:$4 sm:$0xff]  }
 0x72e   :  { %9053 = vmatpush1.bf16.msra.mxu1 %v16255_v57  ;;  %8882 = vmatprep.subr.bf16.mxu0 %v16260_v58 }
 0x72f   :  { %9054 = vmatprep.subr.bf16.mxu1 %v16263_v61 }
 0x731   :  { %8883 = vmatpush1.bf16.msra.mxu0 %v16258_v10 }
 0x732   :  { %9055 = vmatpush1.bf16.msra.mxu1 %v16261_v15  ;;  %8895 = vmatprep.subr.bf16.mxu0 %v16266_v27 }
 0x733   :  { %9067 = vmatprep.subr.bf16.mxu1 %v16269_v28 }
 0x734   :  { %8885 = vmatmul.mubr.bf16.vlgmr.msra.gmra.mrb[12].mxu0 %v18370_v24 }
 0x735   :  { %9057 = vmatmul.mubr.bf16.vlgmr.msra.gmra.mrb[12].mxu1 %v18370_v24  ;;  %8896 = vmatpush1.bf16.msra.mxu0 %v16264_v16 }
 0x736   :  { %9068 = vmatpush1.bf16.msra.mxu1 %v16267_v17  ;;  %8897 = vmatprep.subr.bf16.mxu0 %v16272_v30 }
 0x737   :  { %9069 = vmatprep.subr.bf16.mxu1 %v16275_v31  ;;  %8927 = vmatprep.mubr.bf16.mxu0 %v18380_v29  ;;  %v16300_v31 = vld [vmem:[#allocation2 + $0x1e90] ss:$72 sps:$4 sm:$0xff]  }
 0x738   :  { %9099 = vmatprep.mubr.bf16.mxu1 %v18380_v29 }
 0x739   :  { %8898 = vmatpush1.bf16.msra.mxu0 %v16270_v32  ;;  %v16303_v32 = vld [vmem:[#allocation2 + $0x1e98] ss:$72 sps:$4 sm:$0xff]  }
 0x73a   :  { %9070 = vmatpush1.bf16.msra.mxu1 %v16273_v35  ;;  %8899 = vmatprep.subr.bf16.mxu0 %v16278_v36 }
 0x73b   :  { %9071 = vmatprep.subr.bf16.mxu1 %v16281_v37 }
 0x73d   :  { %8900 = vmatpush1.bf16.msra.mxu0 %v16276_v9 }
 0x73e   :  { %9072 = vmatpush1.bf16.msra.mxu1 %v16279_v38  ;;  %8901 = vmatprep.subr.bf16.mxu0 %v16284_v39  ;;  %v16308_v39 = vld [vmem:[#allocation2 + $0x1f24] ss:$72 sps:$4 sm:$0xff]  }
 0x73f   :  { %9073 = vmatprep.subr.bf16.mxu1 %v16287_v25  ;;  %v16311_v25 = vld [vmem:[#allocation2 + $0x1f2c] ss:$72 sps:$4 sm:$0xff]  }
 0x741   :  { %8902 = vmatpush1.bf16.msra.mxu0 %v16282_v42 }
 0x742   :  { %9074 = vmatpush1.bf16.msra.mxu1 %v16285_v45  ;;  %8903 = vmatprep.subr.bf16.mxu0 %v16290_v46 }
 0x743   :  { %9075 = vmatprep.subr.bf16.mxu1 %v16293_v47 }
 0x745   :  { %8904 = vmatpush1.bf16.msra.mxu0 %v16288_v53  ;;  %v16323_v53 = vld [vmem:[#allocation2 + $0x204c] ss:$72 sps:$4 sm:$0xff]  }
 0x746   :  { %9076 = vmatpush1.bf16.msra.mxu1 %v16291_v54  ;;  %8905 = vmatprep.subr.bf16.mxu0 %v16296_v62  ;;  %v16318_v54 = vld [vmem:[#allocation2 + $0x2040] ss:$72 sps:$4 sm:$0xff]  }
 0x747   :  { %9077 = vmatprep.subr.bf16.mxu1 %v16299_v63  ;;  %v8585_v57 = vpop.f32.mrb[8].mxu0  ;;  %v16321_v62 = vld [vmem:[#allocation2 + $0x2048] ss:$72 sps:$4 sm:$0xff]   ;;  %v16326_v63 = vld [vmem:[#allocation2 + $0x20d4] ss:$72 sps:$4 sm:$0xff]  }
 0x748   :  { %v8757_v58 = vpop.f32.mrb[8].mxu1  ;;  %v14602_v61 = vadd.f32 %v8585_v57, %v1879_v1  ;;  %v8587_v10 = vpop.f32.mrb[9].mxu0  ;;  %v16341_v57 = vld [vmem:[#allocation2 + $0x21fc] ss:$72 sps:$4 sm:$0xff]  }
 0x749   :  { %v18542_v15 = vadd.f32 %v8757_v58, %v1887_v2  ;;  %v8759_v27 = vpop.f32.mrb[9].mxu1  ;;  %v14603_v28 = vadd.f32 %v8587_v10, %v1883_v4  ;;  %v8589_v16 = vpop.f32.mrb[10].mxu0  ;;  %8906 = vmatpush1.bf16.msra.mxu0 %v16294_v49  ;;  %v16332_v49 = vld [vmem:[#allocation2 + $0x2164] ss:$72 sps:$4 sm:$0xff]   ;;  %v16336_v58 = vld [vmem:[#allocation2 + $0x21f0] ss:$72 sps:$4 sm:$0xff]  }
 0x74a   :  { %v18544_v17 = vadd.f32 %v8759_v27, %v1891_v44  ;;  %v8761_v30 = vpop.f32.mrb[10].mxu1  ;;  %9078 = vmatpush1.bf16.msra.mxu1 %v16297_v56  ;;  %v18549_v35 = vmax.f32 %v9290_v41, %v14602_v61  ;;  %v14604_v36 = vadd.f32 %v8589_v16, %v1879_v1  ;;  %v8591_v37 = vpop.f32.mrb[11].mxu0  ;;  %8907 = vmatprep.subr.bf16.mxu0 %v16302_v8  ;;  %v16329_v1 = vld [vmem:[#allocation2 + $0x20dc] ss:$72 sps:$4 sm:$0xff]   ;;  %v16330_v56 = vld [vmem:[#allocation2 + $0x2160] ss:$72 sps:$4 sm:$0xff]  }
 0x74b   :  { %v18551_v9 = vadd.f32 %v8761_v30, %v1887_v2  ;;  %v8763_v38 = vpop.f32.mrb[11].mxu1  ;;  %9079 = vmatprep.subr.bf16.mxu1 %v16305_v59  ;;  %v18556_v42 = vmax.f32 %v9291_v43, %v14603_v28  ;;  %v14605_v45 = vadd.f32 %v8591_v37, %v1883_v4  ;;  %v16309_v43 = vld [vmem:[#allocation2 + $0x1f28] ss:$72 sps:$4 sm:$0xff]   ;;  %v16327_v4 = vld [vmem:[#allocation2 + $0x20d8] ss:$72 sps:$4 sm:$0xff]  }
 0x74c   :  { %v18558_v46 = vadd.f32 %v8763_v38, %v1891_v44  ;;  %v18563_v26 = vmax.f32 %v9292_v51, %v14604_v36  ;;  %v9298_v60 = vmax.f32 %v18549_v35, %v18542_v15  ;;  %v16317_v51 = vld [vmem:[#allocation2 + $0x1fbc] ss:$72 sps:$4 sm:$0xff]   ;;  %v16324_v2 = vld [vmem:[#allocation2 + $0x20d0] ss:$72 sps:$4 sm:$0xff]   ;;  %v16335_v44 = vld [vmem:[#allocation2 + $0x216c] ss:$72 sps:$4 sm:$0xff]  }
 0x74d   :  { %v18570_v41 = vmax.f32 %v9293_v52, %v14605_v45  ;;  %v9299_v48 = vmax.f32 %v18556_v42, %v18544_v17  ;;  %8908 = vmatpush1.bf16.msra.mxu0 %v16300_v31  ;;  %v16320_v52 = vld [vmem:[#allocation2 + $0x2044] ss:$72 sps:$4 sm:$0xff]   ;;  %v16333_v8 = vld [vmem:[#allocation2 + $0x2168] ss:$72 sps:$4 sm:$0xff]   ;;  %v16338_v59 = vld [vmem:[#allocation2 + $0x21f4] ss:$72 sps:$4 sm:$0xff]  }
 0x74e   :  { %9080 = vmatpush1.bf16.msra.mxu1 %v16303_v32  ;;  %v9300_v0 = vmax.f32 %v18563_v26, %v18551_v9  ;;  %8909 = vmatprep.subr.bf16.mxu0 %v16308_v39  ;;  %v16339_v61 = vld [vmem:[#allocation2 + $0x21f8] ss:$72 sps:$4 sm:$0xff]   ;;  %v16344_v10 = vld [vmem:[#allocation2 + $0x2284] ss:$72 sps:$4 sm:$0xff]   ;;  %v16345_v16 = vld [vmem:[#allocation2 + $0x2288] ss:$72 sps:$4 sm:$0xff]  }
 0x74f   :  { %9081 = vmatprep.subr.bf16.mxu1 %v16311_v25  ;;  %v9301_v47 = vmax.f32 %v18570_v41, %v18558_v46  ;;  %v16347_v27 = vld [vmem:[#allocation2 + $0x228c] ss:$72 sps:$4 sm:$0xff]   ;;  %v16342_v28 = vld [vmem:[#allocation2 + $0x2280] ss:$72 sps:$4 sm:$0xff]   ;;  %v16353_v31 = vld [vmem:[#allocation2 + $0x231c] ss:$72 sps:$4 sm:$0xff]  }
 0x750   :  { %v16350_v30 = vld [vmem:[#allocation2 + $0x2314] ss:$72 sps:$4 sm:$0xff]   ;;  %v16348_v32 = vld [vmem:[#allocation2 + $0x2310] ss:$72 sps:$4 sm:$0xff]   ;;  %v16356_v37 = vld [vmem:[#allocation2 + $0x23a4] ss:$72 sps:$4 sm:$0xff]  }
 0x751   :  { %8910 = vmatpush1.bf16.msra.mxu0 %v16306_v3  ;;  %v16351_v36 = vld [vmem:[#allocation2 + $0x2318] ss:$72 sps:$4 sm:$0xff]   ;;  %v16359_v38 = vld [vmem:[#allocation2 + $0x23ac] ss:$72 sps:$4 sm:$0xff]   ;;  %v16357_v25 = vld [vmem:[#allocation2 + $0x23a8] ss:$72 sps:$4 sm:$0xff]  }
 0x752   :  { %9082 = vmatpush1.bf16.msra.mxu1 %v16309_v43  ;;  %8911 = vmatprep.subr.bf16.mxu0 %v16314_v40  ;;  %v16354_v39 = vld [vmem:[#allocation2 + $0x23a0] ss:$72 sps:$4 sm:$0xff]   ;;  %v16362_v45 = vld [vmem:[#allocation2 + $0x44] ss:$72 sps:$4 sm:$0xff]   ;;  %v16365_v43 = vld [vmem:[#allocation2 + $0xd4] ss:$72 sps:$4 sm:$0xff]  }
 0x753   :  { %9083 = vmatprep.subr.bf16.mxu1 %v16317_v51  ;;  %v16360_v3 = vld [vmem:[#allocation2 + $0x40] ss:$72 sps:$4 sm:$0xff]   ;;  %v16363_v40 = vld [vmem:[#allocation2 + $0xd0] ss:$72 sps:$4 sm:$0xff]   ;;  %v16368_v51 = vld [vmem:[#allocation2 + $0x164] ss:$72 sps:$4 sm:$0xff]  }
 0x754   :  { %v16525_v42 = vld [vmem:[#allocation2 + $0x1f30] ss:$72 sps:$4 sm:$0xff]   ;;  %v16530_v9 = vld [vmem:[#allocation2 + $0x1fc4] ss:$72 sps:$4 sm:$0xff]  }
 0x755   :  { %8912 = vmatpush1.bf16.msra.mxu0 %v16312_v6  ;;  %v16366_v6 = vld [vmem:[#allocation2 + $0x160] ss:$72 sps:$4 sm:$0xff]   ;;  %v16531_v46 = vld [vmem:[#allocation2 + $0x2050] ss:$72 sps:$4 sm:$0xff]   ;;  %v16536_v41 = vld [vmem:[#allocation2 + $0x20e4] ss:$72 sps:$4 sm:$0xff]  }
 0x756   :  { %9084 = vmatpush1.bf16.msra.mxu1 %v16315_v7  ;;  %8913 = vmatprep.subr.bf16.mxu0 %v16320_v52  ;;  %v16371_v7 = vld [vmem:[#allocation2 + $0x1f4] ss:$72 sps:$4 sm:$0xff]   ;;  %v16369_v52 = vld [vmem:[#allocation2 + $0x1f0] ss:$72 sps:$4 sm:$0xff]  }
 0x757   :  { %9085 = vmatprep.subr.bf16.mxu1 %v16323_v53  ;;  %v16374_v53 = vld [vmem:[#allocation2 + $0x284] ss:$72 sps:$4 sm:$0xff]  }
 0x759   :  { %8914 = vmatpush1.bf16.msra.mxu0 %v16318_v54  ;;  %v16372_v54 = vld [vmem:[#allocation2 + $0x280] ss:$72 sps:$4 sm:$0xff]  }
 0x75a   :  { %9086 = vmatpush1.bf16.msra.mxu1 %v16321_v62  ;;  %8915 = vmatprep.subr.bf16.mxu0 %v16326_v63  ;;  %v16377_v62 = vld [vmem:[#allocation2 + $0x314] ss:$72 sps:$4 sm:$0xff]   ;;  %v16375_v63 = vld [vmem:[#allocation2 + $0x310] ss:$72 sps:$4 sm:$0xff]  }
 0x75b   :  { %9087 = vmatprep.subr.bf16.mxu1 %v16329_v1  ;;  %v16380_v1 = vld [vmem:[#allocation2 + $0x3a4] ss:$72 sps:$4 sm:$0xff]  }
 0x75d   :  { %8916 = vmatpush1.bf16.msra.mxu0 %v16324_v2  ;;  %v16383_v2 = vld [vmem:[#allocation2 + $0x434] ss:$72 sps:$4 sm:$0xff]  }
 0x75e   :  { %9088 = vmatpush1.bf16.msra.mxu1 %v16327_v4  ;;  %8917 = vmatprep.subr.bf16.mxu0 %v16332_v49  ;;  %v16381_v4 = vld [vmem:[#allocation2 + $0x430] ss:$72 sps:$4 sm:$0xff]   ;;  %v16386_v49 = vld [vmem:[#allocation2 + $0x4c4] ss:$72 sps:$4 sm:$0xff]  }
 0x75f   :  { %9089 = vmatprep.subr.bf16.mxu1 %v16335_v44  ;;  %v16384_v44 = vld [vmem:[#allocation2 + $0x4c0] ss:$72 sps:$4 sm:$0xff]  }
 0x761   :  { %8918 = vmatpush1.bf16.msra.mxu0 %v16330_v56  ;;  %v16389_v56 = vld [vmem:[#allocation2 + $0x554] ss:$72 sps:$4 sm:$0xff]  }
 0x762   :  { %9090 = vmatpush1.bf16.msra.mxu1 %v16333_v8  ;;  %8919 = vmatprep.subr.bf16.mxu0 %v16338_v59  ;;  %v16387_v8 = vld [vmem:[#allocation2 + $0x550] ss:$72 sps:$4 sm:$0xff]   ;;  %v16392_v59 = vld [vmem:[#allocation2 + $0x5e4] ss:$72 sps:$4 sm:$0xff]  }
 0x763   :  { %9091 = vmatprep.subr.bf16.mxu1 %v16341_v57  ;;  %v16390_v57 = vld [vmem:[#allocation2 + $0x5e0] ss:$72 sps:$4 sm:$0xff]  }
 0x765   :  { %8920 = vmatpush1.bf16.msra.mxu0 %v16336_v58  ;;  %v16395_v58 = vld [vmem:[#allocation2 + $0x674] ss:$72 sps:$4 sm:$0xff]  }
 0x766   :  { %9092 = vmatpush1.bf16.msra.mxu1 %v16339_v61  ;;  %8921 = vmatprep.subr.bf16.mxu0 %v16344_v10  ;;  %v16393_v61 = vld [vmem:[#allocation2 + $0x670] ss:$72 sps:$4 sm:$0xff]   ;;  %v16398_v10 = vld [vmem:[#allocation2 + $0x704] ss:$72 sps:$4 sm:$0xff]  }
 0x767   :  { %9093 = vmatprep.subr.bf16.mxu1 %v16347_v27  ;;  %v16396_v27 = vld [vmem:[#allocation2 + $0x700] ss:$72 sps:$4 sm:$0xff]  }
 0x769   :  { %8922 = vmatpush1.bf16.msra.mxu0 %v16342_v28  ;;  %v16401_v28 = vld [vmem:[#allocation2 + $0x794] ss:$72 sps:$4 sm:$0xff]  }
 0x76a   :  { %9094 = vmatpush1.bf16.msra.mxu1 %v16345_v16  ;;  %8923 = vmatprep.subr.bf16.mxu0 %v16350_v30  ;;  %v16399_v16 = vld [vmem:[#allocation2 + $0x790] ss:$72 sps:$4 sm:$0xff]   ;;  %v16404_v30 = vld [vmem:[#allocation2 + $0x824] ss:$72 sps:$4 sm:$0xff]  }
 0x76b   :  { %9095 = vmatprep.subr.bf16.mxu1 %v16353_v31  ;;  %v16402_v31 = vld [vmem:[#allocation2 + $0x820] ss:$72 sps:$4 sm:$0xff]  }
 0x76d   :  { %8924 = vmatpush1.bf16.msra.mxu0 %v16348_v32  ;;  %v16407_v32 = vld [vmem:[#allocation2 + $0x8b4] ss:$72 sps:$4 sm:$0xff]  }
 0x76e   :  { %9096 = vmatpush1.bf16.msra.mxu1 %v16351_v36  ;;  %8925 = vmatprep.subr.bf16.mxu0 %v16356_v37  ;;  %v16405_v36 = vld [vmem:[#allocation2 + $0x8b0] ss:$72 sps:$4 sm:$0xff]   ;;  %v16410_v37 = vld [vmem:[#allocation2 + $0x944] ss:$72 sps:$4 sm:$0xff]  }
 0x76f   :  { %9097 = vmatprep.subr.bf16.mxu1 %v16359_v38  ;;  %v16408_v38 = vld [vmem:[#allocation2 + $0x940] ss:$72 sps:$4 sm:$0xff]  }
 0x771   :  { %8926 = vmatpush1.bf16.msra.mxu0 %v16354_v39  ;;  %v16413_v39 = vld [vmem:[#allocation2 + $0x9d4] ss:$72 sps:$4 sm:$0xff]  }
 0x772   :  { %9098 = vmatpush1.bf16.msra.mxu1 %v16357_v25  ;;  %9110 = vmatprep.subr.bf16.mxu0 %v16362_v45  ;;  %v16411_v25 = vld [vmem:[#allocation2 + $0x9d0] ss:$72 sps:$4 sm:$0xff]   ;;  %v16416_v45 = vld [vmem:[#allocation2 + $0xa64] ss:$72 sps:$4 sm:$0xff]  }
 0x774   :  { %8928 = vmatmul.mubr.bf16.vlgmr.msra.gmra.mrb[12].mxu0 %v18388_v33 }
 0x775   :  { %9100 = vmatmul.mubr.bf16.vlgmr.msra.gmra.mrb[12].mxu1 %v18388_v33  ;;  %9111 = vmatpush1.bf16.msra.mxu0 %v16360_v3  ;;  %v16414_v3 = vld [vmem:[#allocation2 + $0xa60] ss:$72 sps:$4 sm:$0xff]  }
 0x776   :  { %9142 = vmatprep.mubr.bf16.mxu0 %v18330_v50  ;;  %9112 = vmatprep.subr.bf16.mxu0 %v16365_v43  ;;  %v16378_v50 = vld [vmem:[#allocation2 + $0x3a0] ss:$72 sps:$4 sm:$0xff]   ;;  %v16419_v43 = vld [vmem:[#allocation2 + $0xaf4] ss:$72 sps:$4 sm:$0xff]  }
 0x779   :  { %9113 = vmatpush1.bf16.msra.mxu0 %v16363_v40  ;;  %v16417_v40 = vld [vmem:[#allocation2 + $0xaf0] ss:$72 sps:$4 sm:$0xff]  }
 0x77a   :  { %9114 = vmatprep.subr.bf16.mxu0 %v16368_v51  ;;  %v16422_v51 = vld [vmem:[#allocation2 + $0xb84] ss:$72 sps:$4 sm:$0xff]  }
 0x77d   :  { %9115 = vmatpush1.bf16.msra.mxu0 %v16366_v6  ;;  %v16420_v6 = vld [vmem:[#allocation2 + $0xb80] ss:$72 sps:$4 sm:$0xff]  }
 0x77e   :  { %9116 = vmatprep.subr.bf16.mxu0 %v16371_v7  ;;  %v16425_v7 = vld [vmem:[#allocation2 + $0xc14] ss:$72 sps:$4 sm:$0xff]  }
 0x781   :  { %9117 = vmatpush1.bf16.msra.mxu0 %v16369_v52  ;;  %v16428_v52 = vld [vmem:[#allocation2 + $0xca4] ss:$72 sps:$4 sm:$0xff]  }
 0x782   :  { %9118 = vmatprep.subr.bf16.mxu0 %v16374_v53  ;;  %v16431_v53 = vld [vmem:[#allocation2 + $0xd34] ss:$72 sps:$4 sm:$0xff]  }
 0x785   :  { %9119 = vmatpush1.bf16.msra.mxu0 %v16372_v54  ;;  %v16429_v54 = vld [vmem:[#allocation2 + $0xd30] ss:$72 sps:$4 sm:$0xff]  }
 0x786   :  { %9120 = vmatprep.subr.bf16.mxu0 %v16377_v62  ;;  %v16434_v62 = vld [vmem:[#allocation2 + $0xdc4] ss:$72 sps:$4 sm:$0xff]  }
 0x789   :  { %9121 = vmatpush1.bf16.msra.mxu0 %v16375_v63  ;;  %v16432_v63 = vld [vmem:[#allocation2 + $0xdc0] ss:$72 sps:$4 sm:$0xff]  }
 0x78a   :  { %9122 = vmatprep.subr.bf16.mxu0 %v16380_v1  ;;  %v16437_v1 = vld [vmem:[#allocation2 + $0xe54] ss:$72 sps:$4 sm:$0xff]  }
 0x78d   :  { %9123 = vmatpush1.bf16.msra.mxu0 %v16378_v50  ;;  %v16435_v50 = vld [vmem:[#allocation2 + $0xe50] ss:$72 sps:$4 sm:$0xff]  }
 0x78e   :  { %9124 = vmatprep.subr.bf16.mxu0 %v16383_v2  ;;  %v16440_v2 = vld [vmem:[#allocation2 + $0xee4] ss:$72 sps:$4 sm:$0xff]  }
 0x791   :  { %9125 = vmatpush1.bf16.msra.mxu0 %v16381_v4  ;;  %v16438_v4 = vld [vmem:[#allocation2 + $0xee0] ss:$72 sps:$4 sm:$0xff]  }
 0x792   :  { %9126 = vmatprep.subr.bf16.mxu0 %v16386_v49  ;;  %v16443_v49 = vld [vmem:[#allocation2 + $0xf74] ss:$72 sps:$4 sm:$0xff]  }
 0x795   :  { %9127 = vmatpush1.bf16.msra.mxu0 %v16384_v44  ;;  %v16441_v44 = vld [vmem:[#allocation2 + $0xf70] ss:$72 sps:$4 sm:$0xff]  }
 0x796   :  { %9128 = vmatprep.subr.bf16.mxu0 %v16389_v56  ;;  %v16446_v56 = vld [vmem:[#allocation2 + $0x1004] ss:$72 sps:$4 sm:$0xff]  }
 0x799   :  { %9129 = vmatpush1.bf16.msra.mxu0 %v16387_v8  ;;  %v16444_v8 = vld [vmem:[#allocation2 + $0x1000] ss:$72 sps:$4 sm:$0xff]  }
 0x79a   :  { %9130 = vmatprep.subr.bf16.mxu0 %v16392_v59  ;;  %v16449_v59 = vld [vmem:[#allocation2 + $0x1094] ss:$72 sps:$4 sm:$0xff]  }
 0x79d   :  { %9131 = vmatpush1.bf16.msra.mxu0 %v16390_v57  ;;  %v16447_v57 = vld [vmem:[#allocation2 + $0x1090] ss:$72 sps:$4 sm:$0xff]  }
 0x79e   :  { %9132 = vmatprep.subr.bf16.mxu0 %v16395_v58  ;;  %v16452_v58 = vld [vmem:[#allocation2 + $0x1124] ss:$72 sps:$4 sm:$0xff]  }
 0x7a1   :  { %9133 = vmatpush1.bf16.msra.mxu0 %v16393_v61  ;;  %v16450_v61 = vld [vmem:[#allocation2 + $0x1120] ss:$72 sps:$4 sm:$0xff]  }
 0x7a2   :  { %9134 = vmatprep.subr.bf16.mxu0 %v16398_v10  ;;  %v16455_v10 = vld [vmem:[#allocation2 + $0x11b4] ss:$72 sps:$4 sm:$0xff]  }
 0x7a5   :  { %9135 = vmatpush1.bf16.msra.mxu0 %v16396_v27  ;;  %v16453_v27 = vld [vmem:[#allocation2 + $0x11b0] ss:$72 sps:$4 sm:$0xff]  }
 0x7a6   :  { %9136 = vmatprep.subr.bf16.mxu0 %v16401_v28  ;;  %v16458_v28 = vld [vmem:[#allocation2 + $0x1244] ss:$72 sps:$4 sm:$0xff]  }
 0x7a9   :  { %9137 = vmatpush1.bf16.msra.mxu0 %v16399_v16  ;;  %v16456_v16 = vld [vmem:[#allocation2 + $0x1240] ss:$72 sps:$4 sm:$0xff]  }
 0x7aa   :  { %9138 = vmatprep.subr.bf16.mxu0 %v16404_v30  ;;  %v16461_v30 = vld [vmem:[#allocation2 + $0x12d4] ss:$72 sps:$4 sm:$0xff]  }
 0x7ad   :  { %9139 = vmatpush1.bf16.msra.mxu0 %v16402_v31  ;;  %v16552_v31 = vld [vmem:[#allocation6] ss:$8 sps:$4 sm:$0xff]  }
 0x7ae   :  { %9140 = vmatprep.subr.bf16.mxu0 %v16407_v32  ;;  %v16554_v32 = vld [vmem:[#allocation6 + $0x4] ss:$8 sps:$4 sm:$0xff]  }
 0x7af   :  { %9524 = vmatprep.subr.bf16.mxu1 %v16554_v32  ;;  %v16582_v32 = vld [vmem:[#allocation6 + $0xa0] ss:$8 sps:$4 sm:$0xff]  }
 0x7b0   :  { %9525 = vmatpush1.bf16.msra.mxu1 %v16552_v31  ;;  %v16491_v31 = vld [vmem:[#allocation2 + $0x1874] ss:$72 sps:$4 sm:$0xff]  }
 0x7b1   :  { %9141 = vmatpush1.bf16.msra.mxu0 %v16405_v36  ;;  %v16459_v36 = vld [vmem:[#allocation2 + $0x12d0] ss:$72 sps:$4 sm:$0xff]  }
 0x7b2   :  { %9153 = vmatprep.subr.bf16.mxu0 %v16410_v37  ;;  %v16557_v37 = vld [vmem:[#allocation6 + $0x14] ss:$8 sps:$4 sm:$0xff]  }
 0x7b3   :  { %9526 = vmatprep.subr.bf16.mxu1 %v16557_v37  ;;  %v16489_v37 = vld [vmem:[#allocation2 + $0x1870] ss:$72 sps:$4 sm:$0xff]  }
 0x7b4   :  { %9143 = vmatmul.mubr.bf16.vlgmr.msra.gmra.mrb[16].mxu0 %v18334_v5  ;;  %v16423_v5 = vld [vmem:[#allocation2 + $0xc10] ss:$72 sps:$4 sm:$0xff]  }
 0x7b5   :  { %9154 = vmatpush1.bf16.msra.mxu0 %v16408_v38  ;;  %9185 = vmatprep.mubr.bf16.mxu0 %v18346_v34  ;;  %v16426_v34 = vld [vmem:[#allocation2 + $0xca0] ss:$72 sps:$4 sm:$0xff]   ;;  %v16464_v38 = vld [vmem:[#allocation2 + $0x1364] ss:$72 sps:$4 sm:$0xff]  }
 0x7b6   :  { %9155 = vmatprep.subr.bf16.mxu0 %v16413_v39  ;;  %v16555_v39 = vld [vmem:[#allocation6 + $0x10] ss:$8 sps:$4 sm:$0xff]  }
 0x7b7   :  { %9527 = vmatpush1.bf16.msra.mxu1 %v16555_v39  ;;  %v16585_v39 = vld [vmem:[#allocation6 + $0xb0] ss:$8 sps:$4 sm:$0xff]  }
 0x7b9   :  { %9156 = vmatpush1.bf16.msra.mxu0 %v16411_v25  ;;  %v16560_v25 = vld [vmem:[#allocation6 + $0x24] ss:$8 sps:$4 sm:$0xff]  }
 0x7ba   :  { %9157 = vmatprep.subr.bf16.mxu0 %v16416_v45  ;;  %v16462_v45 = vld [vmem:[#allocation2 + $0x1360] ss:$72 sps:$4 sm:$0xff]   ;;  %9528 = vmatprep.subr.bf16.mxu1 %v16560_v25 }
 0x7bb   :  { %v16590_v25 = vld [vmem:[#allocation6 + $0xc4] ss:$8 sps:$4 sm:$0xff]  }
 0x7bd   :  { %9158 = vmatpush1.bf16.msra.mxu0 %v16414_v3  ;;  %v16467_v3 = vld [vmem:[#allocation2 + $0x13f4] ss:$72 sps:$4 sm:$0xff]  }
 0x7be   :  { %9159 = vmatprep.subr.bf16.mxu0 %v16419_v43  ;;  %v16563_v43 = vld [vmem:[#allocation6 + $0x34] ss:$8 sps:$4 sm:$0xff]  }
 0x7c1   :  { %9160 = vmatpush1.bf16.msra.mxu0 %v16417_v40  ;;  %v16465_v40 = vld [vmem:[#allocation2 + $0x13f0] ss:$72 sps:$4 sm:$0xff]  }
 0x7c2   :  { %9161 = vmatprep.subr.bf16.mxu0 %v16422_v51  ;;  %v16561_v51 = vld [vmem:[#allocation6 + $0x30] ss:$8 sps:$4 sm:$0xff]  }
 0x7c5   :  { %9162 = vmatpush1.bf16.msra.mxu0 %v16420_v6  ;;  %v16566_v6 = vld [vmem:[#allocation6 + $0x44] ss:$8 sps:$4 sm:$0xff]  }
 0x7c6   :  { %9163 = vmatprep.subr.bf16.mxu0 %v16425_v7  ;;  %v16468_v7 = vld [vmem:[#allocation2 + $0x1480] ss:$72 sps:$4 sm:$0xff]  }
 0x7c9   :  { %9164 = vmatpush1.bf16.msra.mxu0 %v16423_v5  ;;  %v16473_v5 = vld [vmem:[#allocation2 + $0x1514] ss:$72 sps:$4 sm:$0xff]  }
 0x7ca   :  { %9165 = vmatprep.subr.bf16.mxu0 %v16428_v52  ;;  %v16564_v52 = vld [vmem:[#allocation6 + $0x40] ss:$8 sps:$4 sm:$0xff]  }
 0x7cd   :  { %9166 = vmatpush1.bf16.msra.mxu0 %v16426_v34  ;;  %v16569_v34 = vld [vmem:[#allocation6 + $0x54] ss:$8 sps:$4 sm:$0xff]  }
 0x7ce   :  { %9167 = vmatprep.subr.bf16.mxu0 %v16431_v53  ;;  %v16471_v53 = vld [vmem:[#allocation2 + $0x1510] ss:$72 sps:$4 sm:$0xff]  }
 0x7d1   :  { %9168 = vmatpush1.bf16.msra.mxu0 %v16429_v54  ;;  %v16476_v54 = vld [vmem:[#allocation2 + $0x15a4] ss:$72 sps:$4 sm:$0xff]  }
 0x7d2   :  { %9169 = vmatprep.subr.bf16.mxu0 %v16434_v62  ;;  %v16567_v62 = vld [vmem:[#allocation6 + $0x50] ss:$8 sps:$4 sm:$0xff]  }
 0x7d5   :  { %9170 = vmatpush1.bf16.msra.mxu0 %v16432_v63  ;;  %v16572_v63 = vld [vmem:[#allocation6 + $0x64] ss:$8 sps:$4 sm:$0xff]  }
 0x7d6   :  { %9171 = vmatprep.subr.bf16.mxu0 %v16437_v1  ;;  %v16474_v1 = vld [vmem:[#allocation2 + $0x15a0] ss:$72 sps:$4 sm:$0xff]  }
 0x7d9   :  { %9172 = vmatpush1.bf16.msra.mxu0 %v16435_v50  ;;  %v16479_v50 = vld [vmem:[#allocation2 + $0x1634] ss:$72 sps:$4 sm:$0xff]  }
 0x7da   :  { %9173 = vmatprep.subr.bf16.mxu0 %v16440_v2  ;;  %v16570_v2 = vld [vmem:[#allocation6 + $0x60] ss:$8 sps:$4 sm:$0xff]  }
 0x7dd   :  { %9174 = vmatpush1.bf16.msra.mxu0 %v16438_v4  ;;  %v16575_v4 = vld [vmem:[#allocation6 + $0x74] ss:$8 sps:$4 sm:$0xff]  }
 0x7de   :  { %9175 = vmatprep.subr.bf16.mxu0 %v16443_v49  ;;  %v16477_v49 = vld [vmem:[#allocation2 + $0x1630] ss:$72 sps:$4 sm:$0xff]  }
 0x7e1   :  { %9176 = vmatpush1.bf16.msra.mxu0 %v16441_v44  ;;  %v16482_v44 = vld [vmem:[#allocation2 + $0x16c4] ss:$72 sps:$4 sm:$0xff]  }
 0x7e2   :  { %9177 = vmatprep.subr.bf16.mxu0 %v16446_v56  ;;  %v16573_v56 = vld [vmem:[#allocation6 + $0x70] ss:$8 sps:$4 sm:$0xff]  }
 0x7e5   :  { %9178 = vmatpush1.bf16.msra.mxu0 %v16444_v8  ;;  %v16578_v8 = vld [vmem:[#allocation6 + $0x84] ss:$8 sps:$4 sm:$0xff]  }
 0x7e6   :  { %9179 = vmatprep.subr.bf16.mxu0 %v16449_v59  ;;  %v16480_v59 = vld [vmem:[#allocation2 + $0x16c0] ss:$72 sps:$4 sm:$0xff]  }
 0x7e9   :  { %9180 = vmatpush1.bf16.msra.mxu0 %v16447_v57  ;;  %v16485_v57 = vld [vmem:[#allocation2 + $0x1754] ss:$72 sps:$4 sm:$0xff]  }
 0x7ea   :  { %9181 = vmatprep.subr.bf16.mxu0 %v16452_v58  ;;  %v16576_v58 = vld [vmem:[#allocation6 + $0x80] ss:$8 sps:$4 sm:$0xff]  }
 0x7ed   :  { %9182 = vmatpush1.bf16.msra.mxu0 %v16450_v61  ;;  %v16581_v61 = vld [vmem:[#allocation6 + $0x94] ss:$8 sps:$4 sm:$0xff]  }
 0x7ee   :  { %9183 = vmatprep.subr.bf16.mxu0 %v16455_v10  ;;  %v16483_v10 = vld [vmem:[#allocation2 + $0x1750] ss:$72 sps:$4 sm:$0xff]  }
 0x7f1   :  { %9184 = vmatpush1.bf16.msra.mxu0 %v16453_v27  ;;  %v16488_v27 = vld [vmem:[#allocation2 + $0x17e4] ss:$72 sps:$4 sm:$0xff]  }
 0x7f2   :  { %9196 = vmatprep.subr.bf16.mxu0 %v16458_v28  ;;  %v16579_v28 = vld [vmem:[#allocation6 + $0x90] ss:$8 sps:$4 sm:$0xff]  }
 0x7f4   :  { %9186 = vmatmul.mubr.bf16.vlgmr.msra.gmra.mrb[16].mxu0 %v18352_v13  ;;  %v16558_v13 = vld [vmem:[#allocation6 + $0x20] ss:$8 sps:$4 sm:$0xff]  }
 0x7f5   :  { %9197 = vmatpush1.bf16.msra.mxu0 %v16456_v16  ;;  %9228 = vmatprep.mubr.bf16.mxu0 %v18362_v18  ;;  %v16470_v18 = vld [vmem:[#allocation2 + $0x1484] ss:$72 sps:$4 sm:$0xff]   ;;  %v16584_v16 = vld [vmem:[#allocation6 + $0xa4] ss:$8 sps:$4 sm:$0xff]  }
 0x7f6   :  { %9198 = vmatprep.subr.bf16.mxu0 %v16461_v30  ;;  %9529 = vmatpush1.bf16.msra.mxu1 %v16558_v13  ;;  %v16486_v30 = vld [vmem:[#allocation2 + $0x17e0] ss:$72 sps:$4 sm:$0xff]   ;;  %v16588_v13 = vld [vmem:[#allocation6 + $0xc0] ss:$8 sps:$4 sm:$0xff]  }
 0x7f7   :  { %9530 = vmatprep.subr.bf16.mxu1 %v16563_v43  ;;  %v16495_v43 = vld [vmem:[#allocation2 + $0x1990] ss:$72 sps:$4 sm:$0xff]  }
 0x7f9   :  { %9199 = vmatpush1.bf16.msra.mxu0 %v16459_v36  ;;  %v16587_v36 = vld [vmem:[#allocation6 + $0xb4] ss:$8 sps:$4 sm:$0xff]  }
 0x7fa   :  { %9200 = vmatprep.subr.bf16.mxu0 %v16464_v38  ;;  %9531 = vmatpush1.bf16.msra.mxu1 %v16561_v51  ;;  %v16494_v38 = vld [vmem:[#allocation2 + $0x1904] ss:$72 sps:$4 sm:$0xff]   ;;  %v16503_v51 = vld [vmem:[#allocation2 + $0x1ab4] ss:$72 sps:$4 sm:$0xff]  }
 0x7fb   :  { %9532 = vmatprep.subr.bf16.mxu1 %v16566_v6  ;;  %v16501_v6 = vld [vmem:[#allocation2 + $0x1ab0] ss:$72 sps:$4 sm:$0xff]  }
 0x7fd   :  { %9201 = vmatpush1.bf16.msra.mxu0 %v16462_v45  ;;  %v16492_v45 = vld [vmem:[#allocation2 + $0x1900] ss:$72 sps:$4 sm:$0xff]  }
 0x7fe   :  { %9202 = vmatprep.subr.bf16.mxu0 %v16467_v3  ;;  %9533 = vmatpush1.bf16.msra.mxu1 %v16564_v52  ;;  %v16497_v3 = vld [vmem:[#allocation2 + $0x1994] ss:$72 sps:$4 sm:$0xff]  }
 0x7ff   :  { %9534 = vmatprep.subr.bf16.mxu1 %v16569_v34  ;;  %v16509_v52 = vld [vmem:[#allocation2 + $0x1bd4] ss:$72 sps:$4 sm:$0xff]   ;;  %v16507_v34 = vld [vmem:[#allocation2 + $0x1bd0] ss:$72 sps:$4 sm:$0xff]  }
 0x801   :  { %9203 = vmatpush1.bf16.msra.mxu0 %v16465_v40  ;;  %v16500_v40 = vld [vmem:[#allocation2 + $0x1a24] ss:$72 sps:$4 sm:$0xff]  }
 0x802   :  { %9204 = vmatprep.subr.bf16.mxu0 %v16470_v18  ;;  %9535 = vmatpush1.bf16.msra.mxu1 %v16567_v62  ;;  %v16498_v18 = vld [vmem:[#allocation2 + $0x1a20] ss:$72 sps:$4 sm:$0xff]   ;;  %v16515_v62 = vld [vmem:[#allocation2 + $0x1cf4] ss:$72 sps:$4 sm:$0xff]  }
 0x803   :  { %9536 = vmatprep.subr.bf16.mxu1 %v16572_v63  ;;  %v16513_v63 = vld [vmem:[#allocation2 + $0x1cf0] ss:$72 sps:$4 sm:$0xff]  }
 0x805   :  { %9205 = vmatpush1.bf16.msra.mxu0 %v16468_v7  ;;  %v16506_v7 = vld [vmem:[#allocation2 + $0x1b44] ss:$72 sps:$4 sm:$0xff]  }
 0x806   :  { %9206 = vmatprep.subr.bf16.mxu0 %v16473_v5  ;;  %9537 = vmatpush1.bf16.msra.mxu1 %v16570_v2  ;;  %v16504_v5 = vld [vmem:[#allocation2 + $0x1b40] ss:$72 sps:$4 sm:$0xff]   ;;  %v16521_v2 = vld [vmem:[#allocation2 + $0x1e14] ss:$72 sps:$4 sm:$0xff]  }
 0x807   :  { %9538 = vmatprep.subr.bf16.mxu1 %v16575_v4  ;;  %v1899_v4 = vrot.slane %v18532_v55, %v18471_v14 }
 0x809   :  { %9207 = vmatpush1.bf16.msra.mxu0 %v16471_v53  ;;  %v16512_v53 = vld [vmem:[#allocation2 + $0x1c64] ss:$72 sps:$4 sm:$0xff]  }
 0x80a   :  { %9208 = vmatprep.subr.bf16.mxu0 %v16476_v54  ;;  %9539 = vmatpush1.bf16.msra.mxu1 %v16573_v56  ;;  %v16510_v54 = vld [vmem:[#allocation2 + $0x1c60] ss:$72 sps:$4 sm:$0xff]   ;;  %v16524_v56 = vld [vmem:[#allocation2 + $0x1ea4] ss:$72 sps:$4 sm:$0xff]  }
 0x80b   :  { %9540 = vmatprep.subr.bf16.mxu1 %v16578_v8 }
 0x80d   :  { %9209 = vmatpush1.bf16.msra.mxu0 %v16474_v1  ;;  %v16518_v1 = vld [vmem:[#allocation2 + $0x1d84] ss:$72 sps:$4 sm:$0xff]  }
 0x80e   :  { %9210 = vmatprep.subr.bf16.mxu0 %v16479_v50  ;;  %9541 = vmatpush1.bf16.msra.mxu1 %v16576_v58  ;;  %v16516_v50 = vld [vmem:[#allocation2 + $0x1d80] ss:$72 sps:$4 sm:$0xff]  }
 0x80f   :  { %9542 = vmatprep.subr.bf16.mxu1 %v16581_v61 }
 0x811   :  { %9211 = vmatpush1.bf16.msra.mxu0 %v16477_v49  ;;  %v16519_v49 = vld [vmem:[#allocation2 + $0x1e10] ss:$72 sps:$4 sm:$0xff]  }
 0x812   :  { %9212 = vmatprep.subr.bf16.mxu0 %v16482_v44  ;;  %9543 = vmatpush1.bf16.msra.mxu1 %v16579_v28  ;;  %v1907_v44 = vrot.slane %v18532_v55, %v18474_v19 }
 0x813   :  { %9544 = vmatprep.subr.bf16.mxu1 %v16584_v16 }
 0x815   :  { %9213 = vmatpush1.bf16.msra.mxu0 %v16480_v59 }
 0x816   :  { %9214 = vmatprep.subr.bf16.mxu0 %v16485_v57  ;;  %9545 = vmatpush1.bf16.msra.mxu1 %v16582_v32 }
 0x817   :  { %9546 = vmatprep.subr.bf16.mxu1 %v16587_v36 }
 0x819   :  { %9215 = vmatpush1.bf16.msra.mxu0 %v16483_v10 }
 0x81a   :  { %9216 = vmatprep.subr.bf16.mxu0 %v16488_v27  ;;  %9547 = vmatpush1.bf16.msra.mxu1 %v16585_v39  ;;  %v16527_v39 = vld [vmem:[#allocation2 + $0x1f34] ss:$72 sps:$4 sm:$0xff]  }
 0x81b   :  { %9548 = vmatprep.subr.bf16.mxu1 %v16590_v25 }
 0x81d   :  { %9217 = vmatpush1.bf16.msra.mxu0 %v16486_v30 }
 0x81e   :  { %9218 = vmatprep.subr.bf16.mxu0 %v16491_v31  ;;  %9549 = vmatpush1.bf16.msra.mxu1 %v16588_v13  ;;  %v16522_v31 = vld [vmem:[#allocation2 + $0x1ea0] ss:$72 sps:$4 sm:$0xff]   ;;  %v16533_v13 = vld [vmem:[#allocation2 + $0x2054] ss:$72 sps:$4 sm:$0xff]  }
 0x821   :  { %9219 = vmatpush1.bf16.msra.mxu0 %v16489_v37 }
 0x822   :  { %9220 = vmatprep.subr.bf16.mxu0 %v16494_v38 }
 0x825   :  { %9221 = vmatpush1.bf16.msra.mxu0 %v16492_v45 }
 0x826   :  { %9222 = vmatprep.subr.bf16.mxu0 %v16497_v3 }
 0x829   :  { %9223 = vmatpush1.bf16.msra.mxu0 %v16495_v43  ;;  %v16539_v43 = vld [vmem:[#allocation2 + $0x2174] ss:$72 sps:$4 sm:$0xff]  }
 0x82a   :  { %9224 = vmatprep.subr.bf16.mxu0 %v16500_v40  ;;  %v16537_v40 = vld [vmem:[#allocation2 + $0x2170] ss:$72 sps:$4 sm:$0xff]  }
 0x82d   :  { %9225 = vmatpush1.bf16.msra.mxu0 %v16498_v18  ;;  %v16542_v18 = vld [vmem:[#allocation2 + $0x2204] ss:$72 sps:$4 sm:$0xff]  }
 0x82e   :  { %9226 = vmatprep.subr.bf16.mxu0 %v16503_v51  ;;  %v16540_v51 = vld [vmem:[#allocation2 + $0x2200] ss:$72 sps:$4 sm:$0xff]  }
 0x831   :  { %9227 = vmatpush1.bf16.msra.mxu0 %v16501_v6  ;;  %v16545_v6 = vld [vmem:[#allocation2 + $0x2294] ss:$72 sps:$4 sm:$0xff]  }
 0x832   :  { %9239 = vmatprep.subr.bf16.mxu0 %v16506_v7  ;;  %v16543_v7 = vld [vmem:[#allocation2 + $0x2290] ss:$72 sps:$4 sm:$0xff]  }
 0x834   :  { %9229 = vmatmul.mubr.bf16.vlgmr.msra.gmra.mrb[16].mxu0 %v18370_v24  ;;  %v1895_v24 = vrot.slane %v18532_v55, %v18465_v11 }
 0x835   :  { %9240 = vmatpush1.bf16.msra.mxu0 %v16504_v5  ;;  %9271 = vmatprep.mubr.bf16.mxu0 %v18380_v29  ;;  %v1903_v29 = vrot.slane %v18532_v55, %v18468_v12  ;;  %v16548_v5 = vld [vmem:[#allocation2 + $0x2324] ss:$72 sps:$4 sm:$0xff]  }
 0x836   :  { %9241 = vmatprep.subr.bf16.mxu0 %v16509_v52  ;;  %v16546_v52 = vld [vmem:[#allocation2 + $0x2320] ss:$72 sps:$4 sm:$0xff]  }
 0x839   :  { %9242 = vmatpush1.bf16.msra.mxu0 %v16507_v34  ;;  %v16551_v34 = vld [vmem:[#allocation2 + $0x23b4] ss:$72 sps:$4 sm:$0xff]  }
 0x83a   :  { %9243 = vmatprep.subr.bf16.mxu0 %v16512_v53  ;;  %v16549_v53 = vld [vmem:[#allocation2 + $0x23b0] ss:$72 sps:$4 sm:$0xff]  }
 0x83d   :  { %9244 = vmatpush1.bf16.msra.mxu0 %v16510_v54  ;;  %v16593_v54 = vld [vmem:[#allocation6 + $0xd4] ss:$8 sps:$4 sm:$0xff]  }
 0x83e   :  { %9245 = vmatprep.subr.bf16.mxu0 %v16515_v62  ;;  %v16591_v62 = vld [vmem:[#allocation6 + $0xd0] ss:$8 sps:$4 sm:$0xff]   ;;  %9550 = vmatprep.subr.bf16.mxu1 %v16593_v54  ;;  %v16642_v54 = vld [vmem:[#allocation9 + $0xe0] ss:$8 sps:$4 sm:$0xff]  }
 0x83f   :  { %9551 = vmatpush1.bf16.msra.mxu1 %v16591_v62  ;;  %v16647_v62 = vld [vmem:[#allocation9 + $0xf4] ss:$8 sps:$4 sm:$0xff]  }
 0x841   :  { %9246 = vmatpush1.bf16.msra.mxu0 %v16513_v63  ;;  %v16596_v63 = vld [vmem:[#allocation6 + $0xe4] ss:$8 sps:$4 sm:$0xff]  }
 0x842   :  { %9247 = vmatprep.subr.bf16.mxu0 %v16518_v1  ;;  %v16594_v1 = vld [vmem:[#allocation6 + $0xe0] ss:$8 sps:$4 sm:$0xff]   ;;  %9552 = vmatprep.subr.bf16.mxu1 %v16596_v63  ;;  %v16645_v63 = vld [vmem:[#allocation9 + $0xf0] ss:$8 sps:$4 sm:$0xff]  }
 0x843   :  { %9553 = vmatpush1.bf16.msra.mxu1 %v16594_v1  ;;  %v16650_v1 = vld [vmem:[#allocation12 + $0x4] ss:$8 sps:$4 sm:$0xff]  }
 0x845   :  { %9248 = vmatpush1.bf16.msra.mxu0 %v16516_v50  ;;  %v16599_v50 = vld [vmem:[#allocation6 + $0xf4] ss:$8 sps:$4 sm:$0xff]  }
 0x846   :  { %9249 = vmatprep.subr.bf16.mxu0 %v16521_v2  ;;  %v16597_v2 = vld [vmem:[#allocation6 + $0xf0] ss:$8 sps:$4 sm:$0xff]   ;;  %9554 = vmatprep.subr.bf16.mxu1 %v16599_v50  ;;  %v9352_v50 = vld [vmem:[#allocation7] sm:$0x3] }
 0x847   :  { %v8929_v8 = vpop.f32.mrb[12].mxu0  ;;  %9555 = vmatpush1.bf16.msra.mxu1 %v16597_v2  ;;  %v9357_v2 = vrot.slane %v9352_v50, %v18409_v20 }
 0x848   :  { %v9101_v59 = vpop.f32.mrb[12].mxu1  ;;  %v14610_v57 = vadd.f32 %v8929_v8, %v1895_v24  ;;  %v8931_v58 = vpop.f32.mrb[13].mxu0 }
 0x849   :  { %v18595_v61 = vadd.f32 %v9101_v59, %v1903_v29  ;;  %v9103_v10 = vpop.f32.mrb[13].mxu1  ;;  %v14611_v27 = vadd.f32 %v8931_v58, %v1899_v4  ;;  %v8933_v28 = vpop.f32.mrb[14].mxu0  ;;  %9250 = vmatpush1.bf16.msra.mxu0 %v16519_v49 }
 0x84a   :  { %v18597_v16 = vadd.f32 %v9103_v10, %v1907_v44  ;;  %v9105_v30 = vpop.f32.mrb[14].mxu1  ;;  %v18602_v55 = vmax.f32 %v9298_v60, %v14610_v57  ;;  %v14612_v32 = vadd.f32 %v8933_v28, %v1895_v24  ;;  %v8935_v36 = vpop.f32.mrb[15].mxu0  ;;  %9251 = vmatprep.subr.bf16.mxu0 %v16524_v56  ;;  %v16602_v24 = vld [vmem:[#allocation9 + $0x4] ss:$8 sps:$4 sm:$0xff]  }
 0x84b   :  { %v18604_v37 = vadd.f32 %v9105_v30, %v1903_v29  ;;  %v9107_v38 = vpop.f32.mrb[15].mxu1  ;;  %v18609_v25 = vmax.f32 %v9299_v48, %v14611_v27  ;;  %v14613_v45 = vadd.f32 %v8935_v36, %v1899_v4  ;;  %9777 = vmatprep.subr.bf16.mxu1 %v16602_v24  ;;  %v1840_v29 = vld [vmem:[#allocation4 + $0x10] sm:$0x3]  ;;  %v9361_v24 = vrot.slane %v9352_v50, %v18415_v22  ;;  %v16698_v50 = vld [vmem:[#allocation15 + $0x4] ss:$8 sps:$4 sm:$0xff]  }
 0x84c   :  { %v18611_v3 = vadd.f32 %v9107_v38, %v1907_v44  ;;  %v18616_v15 = vmax.f32 %v9300_v0, %v14612_v32  ;;  %v9306_v35 = vmax.f32 %v18602_v55, %v18595_v61  ;;  %v16528_v0 = vld [vmem:[#allocation2 + $0x1fc0] ss:$72 sps:$4 sm:$0xff]   ;;  %v1911_v4 = vrot.slane %v1840_v29, %v18409_v20  ;;  %v16600_v38 = vld [vmem:[#allocation9] ss:$8 sps:$4 sm:$0xff]  }
 0x84d   :  { %v18623_v60 = vmax.f32 %v9301_v47, %v14613_v45  ;;  %v9307_v17 = vmax.f32 %v18609_v25, %v18597_v16  ;;  %9252 = vmatpush1.bf16.msra.mxu0 %v16522_v31  ;;  %v16534_v47 = vld [vmem:[#allocation2 + $0x20e0] ss:$72 sps:$4 sm:$0xff]   ;;  %v1915_v49 = vrot.slane %v1840_v29, %v18415_v22  ;;  %v16603_v25 = vld [vmem:[#allocation9 + $0x10] ss:$8 sps:$4 sm:$0xff]  }
 0x84e   :  { %v9308_v48 = vmax.f32 %v18616_v15, %v18604_v37  ;;  %9253 = vmatprep.subr.bf16.mxu0 %v16527_v39  ;;  %v16605_v39 = vld [vmem:[#allocation9 + $0x14] ss:$8 sps:$4 sm:$0xff]   ;;  %v16608_v45 = vld [vmem:[#allocation9 + $0x24] ss:$8 sps:$4 sm:$0xff]  }
 0x84f   :  { %v9309_v26 = vmax.f32 %v18623_v60, %v18611_v3  ;;  %v16606_v3 = vld [vmem:[#allocation9 + $0x20] ss:$8 sps:$4 sm:$0xff]   ;;  %v16611_v15 = vld [vmem:[#allocation9 + $0x34] ss:$8 sps:$4 sm:$0xff]   ;;  %v16614_v60 = vld [vmem:[#allocation9 + $0x44] ss:$8 sps:$4 sm:$0xff]  }
 0x851   :  { %9254 = vmatpush1.bf16.msra.mxu0 %v16525_v42  ;;  %v16617_v42 = vld [vmem:[#allocation9 + $0x54] ss:$8 sps:$4 sm:$0xff]  }
 0x852   :  { %9255 = vmatprep.subr.bf16.mxu0 %v16530_v9  ;;  %v16620_v9 = vld [vmem:[#allocation9 + $0x64] ss:$8 sps:$4 sm:$0xff]  }
 0x855   :  { %9256 = vmatpush1.bf16.msra.mxu0 %v16528_v0  ;;  %v16623_v0 = vld [vmem:[#allocation9 + $0x74] ss:$8 sps:$4 sm:$0xff]  }
 0x856   :  { %9257 = vmatprep.subr.bf16.mxu0 %v16533_v13  ;;  %v16621_v13 = vld [vmem:[#allocation9 + $0x70] ss:$8 sps:$4 sm:$0xff]  }
 0x859   :  { %9258 = vmatpush1.bf16.msra.mxu0 %v16531_v46  ;;  %v16626_v46 = vld [vmem:[#allocation9 + $0x84] ss:$8 sps:$4 sm:$0xff]  }
 0x85a   :  { %9259 = vmatprep.subr.bf16.mxu0 %v16536_v41  ;;  %v16624_v41 = vld [vmem:[#allocation9 + $0x80] ss:$8 sps:$4 sm:$0xff]  }
 0x85d   :  { %9260 = vmatpush1.bf16.msra.mxu0 %v16534_v47  ;;  %v16629_v47 = vld [vmem:[#allocation9 + $0x94] ss:$8 sps:$4 sm:$0xff]  }
 0x85e   :  { %9261 = vmatprep.subr.bf16.mxu0 %v16539_v43  ;;  %v16627_v43 = vld [vmem:[#allocation9 + $0x90] ss:$8 sps:$4 sm:$0xff]  }
 0x861   :  { %9262 = vmatpush1.bf16.msra.mxu0 %v16537_v40  ;;  %v16632_v40 = vld [vmem:[#allocation9 + $0xa4] ss:$8 sps:$4 sm:$0xff]  }
 0x862   :  { %9263 = vmatprep.subr.bf16.mxu0 %v16542_v18  ;;  %v16630_v18 = vld [vmem:[#allocation9 + $0xa0] ss:$8 sps:$4 sm:$0xff]  }
 0x865   :  { %9264 = vmatpush1.bf16.msra.mxu0 %v16540_v51  ;;  %v16635_v51 = vld [vmem:[#allocation9 + $0xb4] ss:$8 sps:$4 sm:$0xff]  }
 0x866   :  { %9265 = vmatprep.subr.bf16.mxu0 %v16545_v6  ;;  %v16633_v6 = vld [vmem:[#allocation9 + $0xb0] ss:$8 sps:$4 sm:$0xff]  }
 0x869   :  { %9266 = vmatpush1.bf16.msra.mxu0 %v16543_v7  ;;  %v16638_v7 = vld [vmem:[#allocation9 + $0xc4] ss:$8 sps:$4 sm:$0xff]  }
 0x86a   :  { %9267 = vmatprep.subr.bf16.mxu0 %v16548_v5  ;;  %v16636_v5 = vld [vmem:[#allocation9 + $0xc0] ss:$8 sps:$4 sm:$0xff]  }
 0x86d   :  { %9268 = vmatpush1.bf16.msra.mxu0 %v16546_v52  ;;  %v16641_v52 = vld [vmem:[#allocation9 + $0xd4] ss:$8 sps:$4 sm:$0xff]  }
 0x86e   :  { %9269 = vmatprep.subr.bf16.mxu0 %v16551_v34  ;;  %v16639_v34 = vld [vmem:[#allocation9 + $0xd0] ss:$8 sps:$4 sm:$0xff]  }
 0x871   :  { %9270 = vmatpush1.bf16.msra.mxu0 %v16549_v53  ;;  %v16644_v53 = vld [vmem:[#allocation9 + $0xe4] ss:$8 sps:$4 sm:$0xff]  }
 0x874   :  { %9272 = vmatmul.mubr.bf16.vlgmr.msra.gmra.mrb[16].mxu0 %v18388_v33 }
 0x947   :  { %v9273_v33 = vpop.f32.mrb[16].mxu0 }
 0x948   :  { %v14618_v44 = vadd.f32 %v9273_v33, %v1911_v4  ;;  %v9275_v56 = vpop.f32.mrb[17].mxu0 }
 0x949   :  { %v14619_v8 = vadd.f32 %v9275_v56, %v1915_v49  ;;  %v9277_v59 = vpop.f32.mrb[18].mxu0 }
 0x94a   :  { %v18637_v57 = vmax.f32 %v9306_v35, %v14618_v44  ;;  %v14620_v58 = vadd.f32 %v9277_v59, %v1911_v4  ;;  %v9279_v10 = vpop.f32.mrb[19].mxu0  ;;  %v16609_v35 = vld [vmem:[#allocation9 + $0x30] ss:$8 sps:$4 sm:$0xff]  }
 0x94b   :  { %v18642_v27 = vmax.f32 %v9307_v17, %v14619_v8  ;;  %v14621_v28 = vadd.f32 %v9279_v10, %v1915_v49  ;;  %v16612_v17 = vld [vmem:[#allocation9 + $0x40] ss:$8 sps:$4 sm:$0xff]  }
 0x94c   :  { %v18647_v30 = vmax.f32 %v9308_v48, %v14620_v58  ;;  %v9314_v36 = vmax.f32 %v18637_v57, 0.0  ;;  %v16615_v48 = vld [vmem:[#allocation9 + $0x50] ss:$8 sps:$4 sm:$0xff]  }
 0x94d   :  { %v18649_v31 = vmax.f32 %v9309_v26, %v14621_v28  ;;  %v9315_v61 = vmax.f32 %v18642_v27, 0.0  ;;  %v16618_v26 = vld [vmem:[#allocation9 + $0x60] ss:$8 sps:$4 sm:$0xff]  }
 0x94e   :  { %v9316_v32 = vmax.f32 %v18647_v30, 0.0  ;;  %v16696_v30 = vld [vmem:[#allocation15] ss:$8 sps:$4 sm:$0xff]  }
 0x94f   :  { %v9317_v55 = vmax.f32 %v18649_v31, 0.0 }
 0x950   :  { %v9318_v37 = vpack.c.bf16 %v9316_v32, %v9314_v36 }
 0x951   :  { %v9319_v16 = vpack.c.bf16 %v9317_v55, %v9315_v61 }
 0x953   :  { %9556 = vmatprep.mubr.bf16.mxu1 %v9319_v16 }
 0x954   :  { %9557 = vmatmul.mubr.bf16.vlgmr.msra.gmra.mrb[16].mxu1 %v9318_v37 }
 0x955   :  { %9778 = vmatpush1.bf16.msra.mxu1 %v16600_v38 }
 0x956   :  { %9779 = vmatprep.subr.bf16.mxu1 %v16605_v39  ;;  %v16648_v39 = vld [vmem:[#allocation12] ss:$8 sps:$4 sm:$0xff]  }
 0x959   :  { %9780 = vmatpush1.bf16.msra.mxu1 %v16603_v25  ;;  %v16653_v25 = vld [vmem:[#allocation12 + $0x14] ss:$8 sps:$4 sm:$0xff]  }
 0x95a   :  { %9781 = vmatprep.subr.bf16.mxu1 %v16608_v45  ;;  %v16651_v45 = vld [vmem:[#allocation12 + $0x10] ss:$8 sps:$4 sm:$0xff]  }
 0x95d   :  { %9782 = vmatpush1.bf16.msra.mxu1 %v16606_v3  ;;  %v16656_v3 = vld [vmem:[#allocation12 + $0x24] ss:$8 sps:$4 sm:$0xff]  }
 0x95e   :  { %9783 = vmatprep.subr.bf16.mxu1 %v16611_v15  ;;  %v16654_v15 = vld [vmem:[#allocation12 + $0x20] ss:$8 sps:$4 sm:$0xff]  }
 0x961   :  { %9784 = vmatpush1.bf16.msra.mxu1 %v16609_v35  ;;  %v16659_v35 = vld [vmem:[#allocation12 + $0x34] ss:$8 sps:$4 sm:$0xff]  }
 0x962   :  { %9785 = vmatprep.subr.bf16.mxu1 %v16614_v60  ;;  %v16657_v60 = vld [vmem:[#allocation12 + $0x30] ss:$8 sps:$4 sm:$0xff]  }
 0x965   :  { %9786 = vmatpush1.bf16.msra.mxu1 %v16612_v17  ;;  %v16662_v17 = vld [vmem:[#allocation12 + $0x44] ss:$8 sps:$4 sm:$0xff]  }
 0x966   :  { %9787 = vmatprep.subr.bf16.mxu1 %v16617_v42  ;;  %v16660_v42 = vld [vmem:[#allocation12 + $0x40] ss:$8 sps:$4 sm:$0xff]  }
 0x969   :  { %9788 = vmatpush1.bf16.msra.mxu1 %v16615_v48  ;;  %v16665_v48 = vld [vmem:[#allocation12 + $0x54] ss:$8 sps:$4 sm:$0xff]  }
 0x96a   :  { %9789 = vmatprep.subr.bf16.mxu1 %v16620_v9  ;;  %v16663_v9 = vld [vmem:[#allocation12 + $0x50] ss:$8 sps:$4 sm:$0xff]  }
 0x96d   :  { %9790 = vmatpush1.bf16.msra.mxu1 %v16618_v26  ;;  %v16668_v26 = vld [vmem:[#allocation12 + $0x64] ss:$8 sps:$4 sm:$0xff]  }
 0x96e   :  { %9791 = vmatprep.subr.bf16.mxu1 %v16623_v0  ;;  %v16666_v0 = vld [vmem:[#allocation12 + $0x60] ss:$8 sps:$4 sm:$0xff]  }
 0x971   :  { %9792 = vmatpush1.bf16.msra.mxu1 %v16621_v13  ;;  %v16671_v13 = vld [vmem:[#allocation12 + $0x74] ss:$8 sps:$4 sm:$0xff]  }
 0x972   :  { %9793 = vmatprep.subr.bf16.mxu1 %v16626_v46  ;;  %v16669_v46 = vld [vmem:[#allocation12 + $0x70] ss:$8 sps:$4 sm:$0xff]  }
 0x975   :  { %9794 = vmatpush1.bf16.msra.mxu1 %v16624_v41  ;;  %v16674_v41 = vld [vmem:[#allocation12 + $0x84] ss:$8 sps:$4 sm:$0xff]  }
 0x976   :  { %9795 = vmatprep.subr.bf16.mxu1 %v16629_v47  ;;  %v16672_v47 = vld [vmem:[#allocation12 + $0x80] ss:$8 sps:$4 sm:$0xff]  }
 0x979   :  { %9796 = vmatpush1.bf16.msra.mxu1 %v16627_v43  ;;  %v16677_v43 = vld [vmem:[#allocation12 + $0x94] ss:$8 sps:$4 sm:$0xff]  }
 0x97a   :  { %9797 = vmatprep.subr.bf16.mxu1 %v16632_v40  ;;  %v16675_v40 = vld [vmem:[#allocation12 + $0x90] ss:$8 sps:$4 sm:$0xff]  }
 0x97d   :  { %9798 = vmatpush1.bf16.msra.mxu1 %v16630_v18  ;;  %v16680_v18 = vld [vmem:[#allocation12 + $0xa4] ss:$8 sps:$4 sm:$0xff]  }
 0x97e   :  { %9799 = vmatprep.subr.bf16.mxu1 %v16635_v51  ;;  %v16678_v51 = vld [vmem:[#allocation12 + $0xa0] ss:$8 sps:$4 sm:$0xff]  }
 0x981   :  { %9800 = vmatpush1.bf16.msra.mxu1 %v16633_v6  ;;  %v16683_v6 = vld [vmem:[#allocation12 + $0xb4] ss:$8 sps:$4 sm:$0xff]  }
 0x982   :  { %9801 = vmatprep.subr.bf16.mxu1 %v16638_v7  ;;  %v16681_v7 = vld [vmem:[#allocation12 + $0xb0] ss:$8 sps:$4 sm:$0xff]  }
 0x985   :  { %9802 = vmatpush1.bf16.msra.mxu1 %v16636_v5  ;;  %v16686_v5 = vld [vmem:[#allocation12 + $0xc4] ss:$8 sps:$4 sm:$0xff]  }
 0x986   :  { %9803 = vmatprep.subr.bf16.mxu1 %v16641_v52  ;;  %v16684_v52 = vld [vmem:[#allocation12 + $0xc0] ss:$8 sps:$4 sm:$0xff]  }
 0x989   :  { %9804 = vmatpush1.bf16.msra.mxu1 %v16639_v34  ;;  %v16689_v34 = vld [vmem:[#allocation12 + $0xd4] ss:$8 sps:$4 sm:$0xff]  }
 0x98a   :  { %9805 = vmatprep.subr.bf16.mxu1 %v16644_v53  ;;  %v16687_v53 = vld [vmem:[#allocation12 + $0xd0] ss:$8 sps:$4 sm:$0xff]  }
 0x98d   :  { %9806 = vmatpush1.bf16.msra.mxu1 %v16642_v54  ;;  %v16692_v54 = vld [vmem:[#allocation12 + $0xe4] ss:$8 sps:$4 sm:$0xff]  }
 0x98e   :  { %9807 = vmatprep.subr.bf16.mxu1 %v16647_v62  ;;  %v16690_v62 = vld [vmem:[#allocation12 + $0xe0] ss:$8 sps:$4 sm:$0xff]  }
 0x991   :  { %9808 = vmatpush1.bf16.msra.mxu1 %v16645_v63  ;;  %v16695_v63 = vld [vmem:[#allocation12 + $0xf4] ss:$8 sps:$4 sm:$0xff]  }
 0x992   :  { %10034 = vmatprep.subr.bf16.mxu1 %v16650_v1  ;;  %v16693_v1 = vld [vmem:[#allocation12 + $0xf0] ss:$8 sps:$4 sm:$0xff]  }
 0xa27   :  { %v9558_v29 = vpop.f32.mrb[16].mxu1 }
 0xa28   :  { %v9559_v4 = vadd.f32 %v9558_v29, %v9357_v2  ;;  %v9560_v49 = vpop.f32.mrb[17].mxu1 }
 0xa29   :  { %v9561_v33 = vadd.f32 %v9560_v49, %v9361_v24  ;;  %v9562_v44 = vpop.f32.mrb[18].mxu1 }
 0xa2a   :  { %v9563_v56 = vadd.f32 %v9562_v44, %v9357_v2  ;;  %v9564_v8 = vpop.f32.mrb[19].mxu1  ;;  %v9567_v58 = vmax.f32 %v9559_v4, 0.0  ;;  %v9605_v2 = vld [vmem:[#allocation10] sm:$0x3] }
 0xa2b   :  { %v9565_v59 = vadd.f32 %v9564_v8, %v9361_v24  ;;  %v9568_v28 = vmax.f32 %v9561_v33, 0.0  ;;  %v9610_v24 = vrot.slane %v9605_v2, %v18409_v20  ;;  %v9614_v29 = vrot.slane %v9605_v2, %v18415_v22  ;;  %v16748_v2 = vld [vmem:[#allocation18 + $0x50] sm:$0xff]  }
 0xa2c   :  { %v9569_v10 = vmax.f32 %v9563_v56, 0.0 }
 0xa2d   :  { %v9570_v16 = vmax.f32 %v9565_v59, 0.0 }
 0xa2e   :  { %v9571_v38 = vpack.c.bf16 %v9569_v10, %v9567_v58 }
 0xa2f   :  { %v9572_v37 = vpack.c.bf16 %v9570_v16, %v9568_v28 }
 0xa31   :  { %9809 = vmatprep.mubr.bf16.mxu1 %v9572_v37 }
 0xa32   :  { %9810 = vmatmul.mubr.bf16.vlgmr.msra.gmra.mrb[20].mxu1 %v9571_v38 }
 0xa33   :  { %10035 = vmatpush1.bf16.msra.mxu1 %v16648_v39 }
 0xa34   :  { %10036 = vmatprep.subr.bf16.mxu1 %v16653_v25  ;;  %v16702_v25 = vld [vmem:[#allocation15 + $0x20] ss:$8 sps:$4 sm:$0xff]  }
 0xa37   :  { %10037 = vmatpush1.bf16.msra.mxu1 %v16651_v45  ;;  %v16707_v45 = vld [vmem:[#allocation15 + $0x34] ss:$8 sps:$4 sm:$0xff]  }
 0xa38   :  { %10038 = vmatprep.subr.bf16.mxu1 %v16656_v3  ;;  %v16705_v3 = vld [vmem:[#allocation15 + $0x30] ss:$8 sps:$4 sm:$0xff]  }
 0xa3b   :  { %10039 = vmatpush1.bf16.msra.mxu1 %v16654_v15  ;;  %v16710_v15 = vld [vmem:[#allocation15 + $0x44] ss:$8 sps:$4 sm:$0xff]  }
 0xa3c   :  { %10040 = vmatprep.subr.bf16.mxu1 %v16659_v35  ;;  %v16708_v35 = vld [vmem:[#allocation15 + $0x40] ss:$8 sps:$4 sm:$0xff]  }
 0xa3f   :  { %10041 = vmatpush1.bf16.msra.mxu1 %v16657_v60  ;;  %v16713_v60 = vld [vmem:[#allocation15 + $0x54] ss:$8 sps:$4 sm:$0xff]  }
 0xa40   :  { %10042 = vmatprep.subr.bf16.mxu1 %v16662_v17  ;;  %v16711_v17 = vld [vmem:[#allocation15 + $0x50] ss:$8 sps:$4 sm:$0xff]  }
 0xa43   :  { %10043 = vmatpush1.bf16.msra.mxu1 %v16660_v42  ;;  %v16716_v42 = vld [vmem:[#allocation15 + $0x64] ss:$8 sps:$4 sm:$0xff]  }
 0xa44   :  { %10044 = vmatprep.subr.bf16.mxu1 %v16665_v48  ;;  %v16714_v48 = vld [vmem:[#allocation15 + $0x60] ss:$8 sps:$4 sm:$0xff]  }
 0xa47   :  { %10045 = vmatpush1.bf16.msra.mxu1 %v16663_v9  ;;  %v16719_v9 = vld [vmem:[#allocation15 + $0x74] ss:$8 sps:$4 sm:$0xff]  }
 0xa48   :  { %10046 = vmatprep.subr.bf16.mxu1 %v16668_v26  ;;  %v16717_v26 = vld [vmem:[#allocation15 + $0x70] ss:$8 sps:$4 sm:$0xff]  }
 0xa4b   :  { %10047 = vmatpush1.bf16.msra.mxu1 %v16666_v0  ;;  %v16722_v0 = vld [vmem:[#allocation15 + $0x84] ss:$8 sps:$4 sm:$0xff]  }
 0xa4c   :  { %10048 = vmatprep.subr.bf16.mxu1 %v16671_v13  ;;  %v16720_v13 = vld [vmem:[#allocation15 + $0x80] ss:$8 sps:$4 sm:$0xff]  }
 0xa4f   :  { %10049 = vmatpush1.bf16.msra.mxu1 %v16669_v46  ;;  %v16725_v46 = vld [vmem:[#allocation15 + $0x94] ss:$8 sps:$4 sm:$0xff]  }
 0xa50   :  { %10050 = vmatprep.subr.bf16.mxu1 %v16674_v41  ;;  %v16723_v41 = vld [vmem:[#allocation15 + $0x90] ss:$8 sps:$4 sm:$0xff]  }
 0xa53   :  { %10051 = vmatpush1.bf16.msra.mxu1 %v16672_v47  ;;  %v16728_v47 = vld [vmem:[#allocation15 + $0xa4] ss:$8 sps:$4 sm:$0xff]  }
 0xa54   :  { %10052 = vmatprep.subr.bf16.mxu1 %v16677_v43  ;;  %v16726_v43 = vld [vmem:[#allocation15 + $0xa0] ss:$8 sps:$4 sm:$0xff]  }
 0xa57   :  { %10053 = vmatpush1.bf16.msra.mxu1 %v16675_v40  ;;  %v16731_v40 = vld [vmem:[#allocation15 + $0xb4] ss:$8 sps:$4 sm:$0xff]  }
 0xa58   :  { %10054 = vmatprep.subr.bf16.mxu1 %v16680_v18  ;;  %v16729_v18 = vld [vmem:[#allocation15 + $0xb0] ss:$8 sps:$4 sm:$0xff]  }
 0xa5b   :  { %10055 = vmatpush1.bf16.msra.mxu1 %v16678_v51  ;;  %v16734_v51 = vld [vmem:[#allocation15 + $0xc4] ss:$8 sps:$4 sm:$0xff]  }
 0xa5c   :  { %10056 = vmatprep.subr.bf16.mxu1 %v16683_v6  ;;  %v16732_v6 = vld [vmem:[#allocation15 + $0xc0] ss:$8 sps:$4 sm:$0xff]  }
 0xa5f   :  { %10057 = vmatpush1.bf16.msra.mxu1 %v16681_v7  ;;  %v16737_v7 = vld [vmem:[#allocation15 + $0xd4] ss:$8 sps:$4 sm:$0xff]  }
 0xa60   :  { %10058 = vmatprep.subr.bf16.mxu1 %v16686_v5  ;;  %v16735_v5 = vld [vmem:[#allocation15 + $0xd0] ss:$8 sps:$4 sm:$0xff]  }
 0xa63   :  { %10059 = vmatpush1.bf16.msra.mxu1 %v16684_v52  ;;  %v16740_v52 = vld [vmem:[#allocation15 + $0xe4] ss:$8 sps:$4 sm:$0xff]  }
 0xa64   :  { %10060 = vmatprep.subr.bf16.mxu1 %v16689_v34  ;;  %v16738_v34 = vld [vmem:[#allocation15 + $0xe0] ss:$8 sps:$4 sm:$0xff]  }
 0xa67   :  { %10061 = vmatpush1.bf16.msra.mxu1 %v16687_v53  ;;  %v16743_v53 = vld [vmem:[#allocation15 + $0xf4] ss:$8 sps:$4 sm:$0xff]  }
 0xa68   :  { %10062 = vmatprep.subr.bf16.mxu1 %v16692_v54  ;;  %v16741_v54 = vld [vmem:[#allocation15 + $0xf0] ss:$8 sps:$4 sm:$0xff]  }
 0xa6b   :  { %10063 = vmatpush1.bf16.msra.mxu1 %v16690_v62  ;;  %v16744_v62 = vld [vmem:[#allocation18 + $0x40] sm:$0xff]  }
 0xa6c   :  { %10064 = vmatprep.subr.bf16.mxu1 %v16695_v63  ;;  %v16745_v63 = vld [vmem:[#allocation18] sm:$0xff]   ;;  %14225 = vmatprep.subr.bf16.mxu0 %v16744_v62 }
 0xa6d   :  { %14226 = vmatpush3.bf16.msra.mxu0 %v16745_v63 }
 0xa6f   :  { %10065 = vmatpush1.bf16.msra.mxu1 %v16693_v1  ;;  %v16746_v1 = vld [vmem:[#allocation18 + $0x48] sm:$0xff]  }
 0xa70   :  { %10287 = vmatprep.subr.bf16.mxu1 %v16698_v50  ;;  %v16747_v50 = vld [vmem:[#allocation18 + $0x8] sm:$0xff]   ;;  %14227 = vmatprep.subr.bf16.mxu0 %v16746_v1 }
 0xa71   :  { %14228 = vmatpush3.bf16.msra.mxu0 %v16747_v50 }
 0xa72   :  { %14229 = vmatprep.subr.bf16.mxu0 %v16748_v2 }
 0xb05   :  { %v9811_v4 = vpop.f32.mrb[20].mxu1 }
 0xb06   :  { %v9812_v49 = vadd.f32 %v9811_v4, %v9610_v24  ;;  %v9813_v33 = vpop.f32.mrb[21].mxu1  ;;  %v16751_v4 = vld [vmem:[#allocation18 + $0x18] sm:$0xff]  }
 0xb07   :  { %v9814_v44 = vadd.f32 %v9813_v33, %v9614_v29  ;;  %v9815_v56 = vpop.f32.mrb[22].mxu1  ;;  %v16753_v33 = vld [vmem:[#allocation18 + $0x20] sm:$0xff]  }
 0xb08   :  { %v9816_v8 = vadd.f32 %v9815_v56, %v9610_v24  ;;  %v9817_v59 = vpop.f32.mrb[23].mxu1  ;;  %v18673_v28 = vadd.f32 %v9812_v49, %v9314_v36  ;;  %v16704_v36 = vld [vmem:[#allocation15 + $0x24] ss:$8 sps:$4 sm:$0xff]   ;;  %v16749_v24 = vld [vmem:[#allocation18 + $0x10] sm:$0xff]  }
 0xb09   :  { %v18669_v58 = vadd.f32 %v9814_v44, %v9315_v61  ;;  %v9818_v10 = vadd.f32 %v9817_v59, %v9614_v29  ;;  %v16750_v29 = vld [vmem:[#allocation18 + $0x58] sm:$0xff]   ;;  %14230 = vmatpush3.bf16.msra.mxu0 %v16749_v24  ;;  %v16752_v49 = vld [vmem:[#allocation18 + $0x60] sm:$0xff]  }
 0xb0a   :  { %v18677_v16 = vadd.f32 %v9816_v8, %v9316_v32  ;;  %v9824_v61 = vmax.f32 %v18673_v28, 0.0  ;;  %v16701_v32 = vld [vmem:[#allocation15 + $0x14] ss:$8 sps:$4 sm:$0xff]   ;;  %14231 = vmatprep.subr.bf16.mxu0 %v16750_v29  ;;  %v16761_v28 = vld [vmem:[#allocation24] sm:$0xff]  }
 0xb0b   :  { %v18681_v38 = vadd.f32 %v9818_v10, %v9317_v55  ;;  %v9825_v39 = vmax.f32 %v18669_v58, 0.0  ;;  %v16699_v55 = vld [vmem:[#allocation15 + $0x10] ss:$8 sps:$4 sm:$0xff]   ;;  %v9862_v44 = vld [vmem:[#allocation13] sm:$0x3] }
 0xb0c   :  { %v9826_v37 = vmax.f32 %v18677_v16, 0.0  ;;  %v9867_v56 = vrot.slane %v9862_v44, %v18409_v20  ;;  %v9871_v8 = vrot.slane %v9862_v44, %v18415_v22  ;;  %v16763_v58 = vld [vmem:[#allocation24 + $0x8] sm:$0xff]   ;;  %v16765_v16 = vld [vmem:[#allocation24 + $0x10] sm:$0xff]  }
 0xb0d   :  { %v9827_v27 = vmax.f32 %v18681_v38, 0.0  ;;  %14232 = vmatpush3.bf16.msra.mxu0 %v16751_v4  ;;  %v16766_v38 = vld [vmem:[#allocation24 + $0x58] sm:$0xff]  }
 0xb0e   :  { %v9828_v31 = vpack.c.bf16 %v9826_v37, %v9824_v61  ;;  %14233 = vmatprep.subr.bf16.mxu0 %v16752_v49 }
 0xb0f   :  { %v9829_v57 = vpack.c.bf16 %v9827_v27, %v9825_v39 }
 0xb11   :  { %10066 = vmatprep.mubr.bf16.mxu1 %v9829_v57  ;;  %14234 = vmatpush3.bf16.msra.mxu0 %v16753_v33 }
 0xb12   :  { %10067 = vmatmul.mubr.bf16.vlgmr.msra.gmra.mrb[24].mxu1 %v9828_v31 }
 0xb13   :  { %10288 = vmatpush1.bf16.msra.mxu1 %v16696_v30 }
 0xb14   :  { %10289 = vmatprep.subr.bf16.mxu1 %v16701_v32 }
 0xb17   :  { %10290 = vmatpush1.bf16.msra.mxu1 %v16699_v55 }
 0xb18   :  { %10291 = vmatprep.subr.bf16.mxu1 %v16704_v36 }
 0xb1b   :  { %10292 = vmatpush1.bf16.msra.mxu1 %v16702_v25 }
 0xb1c   :  { %10293 = vmatprep.subr.bf16.mxu1 %v16707_v45 }
 0xb1f   :  { %10294 = vmatpush1.bf16.msra.mxu1 %v16705_v3 }
 0xb20   :  { %10295 = vmatprep.subr.bf16.mxu1 %v16710_v15 }
 0xb23   :  { %10296 = vmatpush1.bf16.msra.mxu1 %v16708_v35 }
 0xb24   :  { %10297 = vmatprep.subr.bf16.mxu1 %v16713_v60 }
 0xb27   :  { %10298 = vmatpush1.bf16.msra.mxu1 %v16711_v17  ;;  %v16754_v17 = vld [vmem:[#allocation18 + $0x68] sm:$0xff]  }
 0xb28   :  { %10299 = vmatprep.subr.bf16.mxu1 %v16716_v42  ;;  %v16755_v42 = vld [vmem:[#allocation18 + $0x28] sm:$0xff]   ;;  %14235 = vmatprep.subr.bf16.mxu0 %v16754_v17 }
 0xb29   :  { %14236 = vmatpush3.bf16.msra.mxu0 %v16755_v42 }
 0xb2b   :  { %10300 = vmatpush1.bf16.msra.mxu1 %v16714_v48  ;;  %v16756_v48 = vld [vmem:[#allocation18 + $0x70] sm:$0xff]  }
 0xb2c   :  { %10301 = vmatprep.subr.bf16.mxu1 %v16719_v9  ;;  %v16757_v9 = vld [vmem:[#allocation18 + $0x30] sm:$0xff]   ;;  %14237 = vmatprep.subr.bf16.mxu0 %v16756_v48 }
 0xb2d   :  { %14238 = vmatpush3.bf16.msra.mxu0 %v16757_v9 }
 0xb2f   :  { %10302 = vmatpush1.bf16.msra.mxu1 %v16717_v26  ;;  %v16758_v26 = vld [vmem:[#allocation18 + $0x78] sm:$0xff]  }
 0xb30   :  { %10303 = vmatprep.subr.bf16.mxu1 %v16722_v0  ;;  %v16759_v0 = vld [vmem:[#allocation18 + $0x38] sm:$0xff]   ;;  %14239 = vmatprep.subr.bf16.mxu0 %v16758_v26 }
 0xb31   :  { %14240 = vmatpush3.bf16.msra.mxu0 %v16759_v0 }
 0xb33   :  { %10304 = vmatpush1.bf16.msra.mxu1 %v16720_v13  ;;  %v16760_v13 = vld [vmem:[#allocation24 + $0x40] sm:$0xff]  }
 0xb34   :  { %10305 = vmatprep.subr.bf16.mxu1 %v16725_v46  ;;  %14256 = vmatprep.subr.bf16.mxu0 %v16760_v13  ;;  %v16776_v46 = vld [vmem:[#allocation21] sm:$0xff]  }
 0xb37   :  { %10306 = vmatpush1.bf16.msra.mxu1 %v16723_v41  ;;  %v17874_v41 = vmov 0.0  }
 0xb38   :  { %10307 = vmatprep.subr.bf16.mxu1 %v16728_v47  ;;  %v16777_v47 = vld [vmem:[#allocation21 + $0x8] sm:$0xff]  }
 0xb3b   :  { %10308 = vmatpush1.bf16.msra.mxu1 %v16726_v43  ;;  %v16778_v43 = vld [vmem:[#allocation21 + $0x10] sm:$0xff]  }
 0xb3c   :  { %10309 = vmatprep.subr.bf16.mxu1 %v16731_v40  ;;  %v16779_v40 = vld [vmem:[#allocation21 + $0x18] sm:$0xff]  }
 0xb3f   :  { %10310 = vmatpush1.bf16.msra.mxu1 %v16729_v18  ;;  %v16780_v18 = vld [vmem:[#allocation21 + $0x20] sm:$0xff]  }
 0xb40   :  { %10311 = vmatprep.subr.bf16.mxu1 %v16734_v51  ;;  %v10115_v51 = vld [vmem:[#allocation16] sm:$0x3] }
 0xb43   :  { %10312 = vmatpush1.bf16.msra.mxu1 %v16732_v6  ;;  %v10120_v6 = vrot.slane %v10115_v51, %v18409_v20 }
 0xb44   :  { %10313 = vmatprep.subr.bf16.mxu1 %v16737_v7  ;;  %v10124_v7 = vrot.slane %v10115_v51, %v18415_v22  ;;  %v16788_v51 = vld [vmem:[#allocation27 + $0x20] sm:$0xff]  }
 0xb47   :  { %10314 = vmatpush1.bf16.msra.mxu1 %v16735_v5 }
 0xb48   :  { %10315 = vmatprep.subr.bf16.mxu1 %v16740_v52 }
 0xb4b   :  { %10316 = vmatpush1.bf16.msra.mxu1 %v16738_v34 }
 0xb4c   :  { %10317 = vmatprep.subr.bf16.mxu1 %v16743_v53 }
 0xb4f   :  { %10318 = vmatpush1.bf16.msra.mxu1 %v16741_v54 }
 0xb50   :  { %14366 = vmatprep.subr.bf16.mxu1 %v17874_v41 }
 0xbe5   :  { %v10068_v59 = vpop.f32.mrb[24].mxu1 }
 0xbe6   :  { %v10069_v10 = vadd.f32 %v10068_v59, %v9867_v56  ;;  %v10070_v57 = vpop.f32.mrb[25].mxu1  ;;  %v16769_v59 = vld [vmem:[#allocation24 + $0x20] sm:$0xff]  }
 0xbe7   :  { %v10071_v30 = vadd.f32 %v10070_v57, %v9871_v8  ;;  %v10072_v31 = vpop.f32.mrb[26].mxu1  ;;  %v16771_v57 = vld [vmem:[#allocation24 + $0x28] sm:$0xff]  }
 0xbe8   :  { %v10073_v32 = vadd.f32 %v10072_v31, %v9867_v56  ;;  %v10074_v55 = vpop.f32.mrb[27].mxu1  ;;  %v10077_v25 = vmax.f32 %v10069_v10, 0.0  ;;  %v16770_v10 = vld [vmem:[#allocation24 + $0x68] sm:$0xff]   ;;  %v16773_v31 = vld [vmem:[#allocation24 + $0x30] sm:$0xff]  }
 0xbe9   :  { %v10075_v36 = vadd.f32 %v10074_v55, %v9871_v8  ;;  %v10078_v3 = vmax.f32 %v10071_v30, 0.0  ;;  %v16772_v30 = vld [vmem:[#allocation24 + $0x70] sm:$0xff]   ;;  %v16775_v55 = vld [vmem:[#allocation24 + $0x38] sm:$0xff]  }
 0xbea   :  { %v10079_v45 = vmax.f32 %v10073_v32, 0.0  ;;  %v16774_v32 = vld [vmem:[#allocation24 + $0x78] sm:$0xff]  }
 0xbeb   :  { %v10080_v15 = vmax.f32 %v10075_v36, 0.0  ;;  %v16781_v36 = vld [vmem:[#allocation21 + $0x28] sm:$0xff]  }
 0xbec   :  { %v10081_v35 = vpack.c.bf16 %v10079_v45, %v10077_v25  ;;  %v16782_v25 = vld [vmem:[#allocation21 + $0x30] sm:$0xff]   ;;  %v16783_v45 = vld [vmem:[#allocation21 + $0x38] sm:$0xff]  }
 0xbed   :  { %v10082_v60 = vpack.c.bf16 %v10080_v15, %v10078_v3  ;;  %v14025_v15 = vld [vmem:[#allocation19] ss:$0 sm:$0xff] }
 0xbef   :  { %10319 = vmatprep.mubr.bf16.mxu1 %v10082_v60 }
 0xbf0   :  { %10320 = vmatmul.mubr.bf16.vlgmr.msra.gmra.mrb[28].mxu1 %v10081_v35 }
 0xbf1   :  { %14367 = vmatpush3.bf16.msra.mxu1 %v16776_v46  ;;  %14382 = vmatprep.mubr.msk.bf16.mxu1 %vm17875_vm0, %v17874_v41  ;;  %v16784_v46 = vld [vmem:[#allocation27] sm:$0xff]  }
 0xbf2   :  { %14368 = vmatprep.subr.bf16.mxu1 %v17874_v41 }
 0xbf5   :  { %14369 = vmatpush3.bf16.msra.mxu1 %v16777_v47 }
 0xbf6   :  { %14370 = vmatprep.subr.bf16.mxu1 %v17874_v41 }
 0xbf9   :  { %14371 = vmatpush3.bf16.msra.mxu1 %v16778_v43  ;;  %v16785_v43 = vld [vmem:[#allocation27 + $0x8] sm:$0xff]  }
 0xbfa   :  { %14372 = vmatprep.subr.bf16.mxu1 %v17874_v41 }
 0xbfd   :  { %14373 = vmatpush3.bf16.msra.mxu1 %v16779_v40  ;;  %v16786_v40 = vld [vmem:[#allocation27 + $0x10] sm:$0xff]  }
 0xbfe   :  { %14374 = vmatprep.subr.bf16.mxu1 %v17874_v41 }
 0xc01   :  { %14375 = vmatpush3.bf16.msra.mxu1 %v16780_v18  ;;  %v16787_v18 = vld [vmem:[#allocation27 + $0x18] sm:$0xff]  }
 0xc02   :  { %14376 = vmatprep.subr.bf16.mxu1 %v17874_v41 }
 0xc05   :  { %14377 = vmatpush3.bf16.msra.mxu1 %v16781_v36  ;;  %v16803_v36 = vld [vmem:[%s18976_s4 + $0x18] sm:$0xff]  }
 0xc06   :  { %14378 = vmatprep.subr.bf16.mxu1 %v17874_v41 }
 0xc09   :  { %14379 = vmatpush3.bf16.msra.mxu1 %v16782_v25  ;;  %v16804_v25 = vld [vmem:[%s18976_s4 + $0x20] sm:$0xff]  }
 0xc0a   :  { %14380 = vmatprep.subr.bf16.mxu1 %v17874_v41 }
 0xc0d   :  { %14381 = vmatpush3.bf16.msra.mxu1 %v16783_v45  ;;  %v16805_v45 = vld [vmem:[%s18976_s4 + $0x28] sm:$0xff]  }
 0xc0e   :  { %14386 = vmatprep.subr.bf16.mxu1 %v17874_v41 }
 0xcc3   :  { %v10321_v5 = vpop.f32.mrb[28].mxu1 }
 0xcc4   :  { %v10322_v52 = vadd.f32 %v10321_v5, %v10120_v6  ;;  %v10323_v34 = vpop.f32.mrb[29].mxu1 }
 0xcc5   :  { %v10324_v53 = vadd.f32 %v10323_v34, %v10124_v7  ;;  %v10325_v54 = vpop.f32.mrb[30].mxu1 }
 0xcc6   :  { %v10330_v62 = vadd.f32 %v10322_v52, %v9824_v61  ;;  %v10326_v63 = vadd.f32 %v10325_v54, %v10120_v6  ;;  %v10327_v1 = vpop.f32.mrb[31].mxu1  ;;  %v16762_v61 = vld [vmem:[#allocation24 + $0x48] sm:$0xff]  }
 0xcc7   :  { %v10331_v50 = vadd.f32 %v10324_v53, %v9825_v39  ;;  %v10328_v2 = vadd.f32 %v10327_v1, %v10124_v7  ;;  %v16764_v39 = vld [vmem:[#allocation24 + $0x50] sm:$0xff]   ;;  %v16792_v1 = vld [vmem:[#allocation30] sm:$0xff]  }
 0xcc8   :  { %v10332_v24 = vadd.f32 %v10326_v63, %v9826_v37  ;;  %v10334_v4 = vmax.f32 %v10330_v62, 0.0  ;;  %v16767_v37 = vld [vmem:[#allocation24 + $0x18] sm:$0xff]   ;;  %v16789_v54 = vld [vmem:[#allocation27 + $0x28] sm:$0xff]  }
 0xcc9   :  { %v10333_v29 = vadd.f32 %v10328_v2, %v9827_v27  ;;  %v10335_v33 = vmax.f32 %v10331_v50, 0.0  ;;  %v16768_v27 = vld [vmem:[#allocation24 + $0x60] sm:$0xff]   ;;  %v16790_v62 = vld [vmem:[#allocation27 + $0x30] sm:$0xff]  }
 0xcca   :  { %v10336_v49 = vmax.f32 %v10332_v24, 0.0  ;;  %v16791_v63 = vld [vmem:[#allocation27 + $0x38] sm:$0xff]   ;;  %v16793_v50 = vld [vmem:[#allocation30 + $0x8] sm:$0xff]  }
 0xccb   :  { %v10337_v44 = vmax.f32 %v10333_v29, 0.0  ;;  %v16794_v2 = vld [vmem:[#allocation30 + $0x10] sm:$0xff]   ;;  %v16795_v24 = vld [vmem:[#allocation30 + $0x18] sm:$0xff]   ;;  %v16796_v29 = vld [vmem:[#allocation30 + $0x20] sm:$0xff]  }
 0xccc   :  { %v10338_v56 = vpack.c.bf16 %v10336_v49, %v10334_v4  ;;  %v16797_v4 = vld [vmem:[#allocation30 + $0x28] sm:$0xff]   ;;  %v14042_v49 = vld [vmem:[#allocation22] ss:$0 sm:$0xff] }
 0xccd   :  { %v10339_v8 = vpack.c.bf16 %v10337_v44, %v10335_v33 }
 0xccf   :  { %10507 = vmatprep.mubr.bf16.mxu0 %v10339_v8 }
 0xcd0   :  { %10508 = vmatmul.mubr.bf16.vlgmr.msra.gmra.mrb[20].mxu0 %v10338_v56 }
 0xcd1   :  { %14257 = vmatpush3.bf16.msra.mxu0 %v16761_v28  ;;  %10791 = vmatprep.mubr.bf16.mxu0 %v10339_v8  ;;  %v14067_v8 = vld [vmem:[#allocation25] ss:$0 sm:$0xff] }
 0xcd2   :  { %14258 = vmatprep.subr.bf16.mxu0 %v16762_v61 }
 0xcd5   :  { %14259 = vmatpush3.bf16.msra.mxu0 %v16763_v58 }
 0xcd6   :  { %14260 = vmatprep.subr.bf16.mxu0 %v16764_v39 }
 0xcd9   :  { %14261 = vmatpush3.bf16.msra.mxu0 %v16765_v16 }
 0xcda   :  { %14262 = vmatprep.subr.bf16.mxu0 %v16766_v38 }
 0xcdd   :  { %14263 = vmatpush3.bf16.msra.mxu0 %v16767_v37 }
 0xcde   :  { %14264 = vmatprep.subr.bf16.mxu0 %v16768_v27 }
 0xce1   :  { %14265 = vmatpush3.bf16.msra.mxu0 %v16769_v59 }
 0xce2   :  { %14266 = vmatprep.subr.bf16.mxu0 %v16770_v10 }
 0xce5   :  { %14267 = vmatpush3.bf16.msra.mxu0 %v16771_v57  ;;  %v16798_v57 = vld [vmem:[#allocation30 + $0x30] sm:$0xff]  }
 0xce6   :  { %14268 = vmatprep.subr.bf16.mxu0 %v16772_v30  ;;  %v16799_v30 = vld [vmem:[#allocation30 + $0x38] sm:$0xff]  }
 0xce9   :  { %14269 = vmatpush3.bf16.msra.mxu0 %v16773_v31  ;;  %v16800_v31 = vld [vmem:[%s18976_s4] sm:$0xff]  }
 0xcea   :  { %14270 = vmatprep.subr.bf16.mxu0 %v16774_v32  ;;  %v16801_v32 = vld [vmem:[%s18976_s4 + $0x8] sm:$0xff]  }
 0xced   :  { %14271 = vmatpush3.bf16.msra.mxu0 %v16775_v55  ;;  %v16802_v55 = vld [vmem:[%s18976_s4 + $0x10] sm:$0xff]  }
 0xcee   :  { %14406 = vmatprep.subr.bf16.mxu0 %v17874_v41 }
 0xcf0   :  { %10792 = vmatmul.mubr.bf16.vlgmr.msra.gmra.mrb[24].mxu0 %v10338_v56 }
 0xcf1   :  { %14422 = vmatprep.mubr.msk.bf16.mxu0 %vm17875_vm0, %v17874_v41  ;;  %14407 = vmatpush3.bf16.msra.mxu0 %v16792_v1 }
 0xcf2   :  { %14408 = vmatprep.subr.bf16.mxu0 %v17874_v41 }
 0xcf5   :  { %14409 = vmatpush3.bf16.msra.mxu0 %v16793_v50  ;;  %v16809_v50 = vld [vmem:[%s18977_s19 + $0x8] sm:$0xff]  }
 0xcf6   :  { %14410 = vmatprep.subr.bf16.mxu0 %v17874_v41 }
 0xcf9   :  { %14411 = vmatpush3.bf16.msra.mxu0 %v16794_v2  ;;  %v16810_v2 = vld [vmem:[%s18977_s19 + $0x10] sm:$0xff]  }
 0xcfa   :  { %14412 = vmatprep.subr.bf16.mxu0 %v17874_v41 }
 0xcfd   :  { %14413 = vmatpush3.bf16.msra.mxu0 %v16795_v24  ;;  %v16811_v24 = vld [vmem:[%s18977_s19 + $0x18] sm:$0xff]  }
 0xcfe   :  { %14414 = vmatprep.subr.bf16.mxu0 %v17874_v41 }
 0xd01   :  { %14415 = vmatpush3.bf16.msra.mxu0 %v16796_v29  ;;  %v16812_v29 = vld [vmem:[%s18977_s19 + $0x20] sm:$0xff]  }
 0xd02   :  { %14416 = vmatprep.subr.bf16.mxu0 %v17874_v41 }
 0xd05   :  { %14417 = vmatpush3.bf16.msra.mxu0 %v16797_v4  ;;  %v16813_v4 = vld [vmem:[%s18977_s19 + $0x28] sm:$0xff]  }
 0xd06   :  { %14418 = vmatprep.subr.bf16.mxu0 %v17874_v41 }
 0xd09   :  { %14419 = vmatpush3.bf16.msra.mxu0 %v16798_v57 }
 0xd0a   :  { %14420 = vmatprep.subr.bf16.mxu0 %v17874_v41 }
 0xd0d   :  { %14421 = vmatpush3.bf16.msra.mxu0 %v16799_v30 }
 0xd0e   :  { %14446 = vmatprep.subr.bf16.mxu0 %v17874_v41 }
 0xda3   :  { %v14241_v3 = vpop.f32.mrb[20].mxu0 }
 0xda4   :  { %v14242_v35 = vpop.f32.mrb[21].mxu0 }
 0xda5   :  { %v14243_v60 = vadd.f32 %v14242_v35, %v14241_v3  ;;  %v14244_v17 = vpop.f32.mrb[22].mxu0  ;;  %v14068_v3 = vld [vmem:[#allocation28] ss:$0 sm:$0xff] }
 0xda6   :  { %v14245_v42 = vpop.f32.mrb[23].mxu0 }
 0xda7   :  { %v10510_v48 = vadd.f32 %v14243_v60, %v14025_v15  ;;  %v14246_v9 = vadd.f32 %v14245_v42, %v14244_v17 }
 0xda9   :  { %v10513_v26 = vadd.f32 %v14246_v9, %v14025_v15  ;;  %v10516_v0 = vmax.f32 %v10510_v48, 0.0 }
 0xdab   :  { %v10517_v13 = vmax.f32 %v10513_v26, 0.0 }
 0xdad   :  { %v10518_v47 = vpack.c.bf16 %v10517_v13, %v10516_v0  ;;  %v16806_v13 = vld [vmem:[%s18976_s4 + $0x30] sm:$0xff]  }
 0xdaf   :  { %14383 = vmatmul.mubr.bf16.vlgmr.msra.gmra.mrb[32].mxu1 %v10518_v47  ;;  %v16816_v47 = vld [vmem:[#allocation34] sm:$0xff]  }
 0xdb0   :  { %14387 = vmatpush3.bf16.msra.mxu1 %v16784_v46  ;;  %14402 = vmatprep.mubr.msk.bf16.mxu1 %vm17875_vm0, %v17874_v41  ;;  %v16807_v46 = vld [vmem:[%s18976_s4 + $0x38] sm:$0xff]  }
 0xdb1   :  { %14388 = vmatprep.subr.bf16.mxu1 %v17874_v41 }
 0xdb4   :  { %14389 = vmatpush3.bf16.msra.mxu1 %v16785_v43  ;;  %v16817_v43 = vld [vmem:[#allocation34 + $0x8] sm:$0xff]  }
 0xdb5   :  { %14390 = vmatprep.subr.bf16.mxu1 %v17874_v41 }
 0xdb8   :  { %14391 = vmatpush3.bf16.msra.mxu1 %v16786_v40  ;;  %v14077_v40 = vld [vmem:[#allocation31] ss:$0 sm:$0xff] }
 0xdb9   :  { %14392 = vmatprep.subr.bf16.mxu1 %v17874_v41 }
 0xdbc   :  { %14393 = vmatpush3.bf16.msra.mxu1 %v16787_v18 }
 0xdbd   :  { %14394 = vmatprep.subr.bf16.mxu1 %v17874_v41 }
 0xdc0   :  { %14395 = vmatpush3.bf16.msra.mxu1 %v16788_v51 }
 0xdc1   :  { %14396 = vmatprep.subr.bf16.mxu1 %v17874_v41 }
 0xdc3   :  { %v14272_v6 = vpop.f32.mrb[24].mxu0 }
 0xdc4   :  { %v14273_v7 = vpop.f32.mrb[25].mxu0  ;;  %14397 = vmatpush3.bf16.msra.mxu1 %v16789_v54 }
 0xdc5   :  { %v14274_v5 = vadd.f32 %v14273_v7, %v14272_v6  ;;  %v14275_v52 = vpop.f32.mrb[26].mxu0  ;;  %14398 = vmatprep.subr.bf16.mxu1 %v17874_v41 }
 0xdc6   :  { %v14276_v34 = vpop.f32.mrb[27].mxu0 }
 0xdc7   :  { %v14277_v53 = vadd.f32 %v14276_v34, %v14275_v52 }
 0xdc8   :  { %14399 = vmatpush3.bf16.msra.mxu1 %v16790_v62 }
 0xdc9   :  { %14400 = vmatprep.subr.bf16.mxu1 %v17874_v41 }
 0xdcc   :  { %14401 = vmatpush3.bf16.msra.mxu1 %v16791_v63  ;;  %v16808_v63 = vld [vmem:[%s18977_s19] sm:$0xff]  }
 0xdcd   :  { %14426 = vmatprep.subr.bf16.mxu1 %v17874_v41 }
 0xe82   :  { %v10624_v33 = vpop.f32.mrb[32].mxu1 }
 0xe83   :  { %v10625_v44 = vadd.f32 %v14042_v49, %v10624_v33  ;;  %v14384_v56 = vpop.f32.mrb[33].mxu1  ;;  %v16815_v33 = vld [vmem:[%s18977_s19 + $0x38] sm:$0xff]  }
 0xe84   :  { %v10627_v28 = vpop.f32.mrb[34].mxu1  ;;  %v16819_v56 = vld [vmem:[#allocation34 + $0x18] sm:$0xff]  }
 0xe85   :  { %v10800_v61 = vadd.f32 %v14274_v5, %v10625_v44  ;;  %v10628_v58 = vadd.f32 %v14042_v49, %v10627_v28  ;;  %v14385_v39 = vpop.f32.mrb[35].mxu1  ;;  %v16814_v49 = vld [vmem:[%s18977_s19 + $0x30] sm:$0xff]  }
 0xe86   :  { %v16818_v44 = vld [vmem:[#allocation34 + $0x10] sm:$0xff]  }
 0xe87   :  { %v10809_v16 = vadd.f32 %v14067_v8, %v10800_v61  ;;  %v10801_v38 = vadd.f32 %v14277_v53, %v10628_v58 }
 0xe89   :  { %v18737_v37 = vadd.f32 %v14067_v8, %v10801_v38  ;;  %v10811_v27 = vmax.f32 %v10809_v16, 0.0  ;;  %v14086_v8 = vld [vmem:[#allocation33] ss:$0 sm:$0xff] }
 0xe8b   :  { %v10812_v59 = vmax.f32 %v18737_v37, 0.0 }
 0xe8d   :  { %v10813_v10 = vpack.c.bf16 %v10812_v59, %v10811_v27 }
 0xe8f   :  { %14403 = vmatmul.mubr.bf16.vlgmr.msra.gmra.mrb[36].mxu1 %v10813_v10 }
 0xe90   :  { %14442 = vmatprep.mubr.msk.bf16.mxu1 %vm17875_vm0, %v17874_v41  ;;  %14427 = vmatpush3.bf16.msra.mxu1 %v16800_v31 }
 0xe91   :  { %14428 = vmatprep.subr.bf16.mxu1 %v17874_v41 }
 0xe94   :  { %14429 = vmatpush3.bf16.msra.mxu1 %v16801_v32 }
 0xe95   :  { %14430 = vmatprep.subr.bf16.mxu1 %v17874_v41 }
 0xe98   :  { %14431 = vmatpush3.bf16.msra.mxu1 %v16802_v55  ;;  %v16821_v55 = vld [vmem:[#allocation39 + $0x8] sm:$0xff]  }
 0xe99   :  { %14432 = vmatprep.subr.bf16.mxu1 %v17874_v41 }
 0xe9c   :  { %14433 = vmatpush3.bf16.msra.mxu1 %v16803_v36  ;;  %v16822_v36 = vld [vmem:[#allocation39 + $0x10] sm:$0xff]  }
 0xe9d   :  { %14434 = vmatprep.subr.bf16.mxu1 %v17874_v41 }
 0xea0   :  { %14435 = vmatpush3.bf16.msra.mxu1 %v16804_v25  ;;  %v16823_v25 = vld [vmem:[#allocation39 + $0x18] sm:$0xff]  }
 0xea1   :  { %14436 = vmatprep.subr.bf16.mxu1 %v17874_v41 }
 0xea4   :  { %14437 = vmatpush3.bf16.msra.mxu1 %v16805_v45  ;;  %v14095_v45 = vld [vmem:[#allocation36] ss:$0 sm:$0xff] }
 0xea5   :  { %14438 = vmatprep.subr.bf16.mxu1 %v17874_v41 }
 0xea8   :  { %14439 = vmatpush3.bf16.msra.mxu1 %v16806_v13 }
 0xea9   :  { %14440 = vmatprep.subr.bf16.mxu1 %v17874_v41 }
 0xeac   :  { %14441 = vmatpush3.bf16.msra.mxu1 %v16807_v46 }
 0xead   :  { %14458 = vmatprep.subr.bf16.mxu1 %v17874_v41 }
 0xf62   :  { %v10919_v15 = vpop.f32.mrb[36].mxu1 }
 0xf63   :  { %v10920_v35 = vadd.f32 %v14068_v3, %v10919_v15  ;;  %v14404_v60 = vpop.f32.mrb[37].mxu1 }
 0xf64   :  { %v10922_v17 = vpop.f32.mrb[38].mxu1  ;;  %v14109_v60 = vld [vmem:[#allocation37] ss:$0 sm:$0xff] }
 0xf65   :  { %v10923_v42 = vadd.f32 %v14068_v3, %v10922_v17  ;;  %v14405_v48 = vpop.f32.mrb[39].mxu1  ;;  %v10926_v9 = vmax.f32 %v10920_v35, 0.0 }
 0xf67   :  { %v10927_v26 = vmax.f32 %v10923_v42, 0.0 }
 0xf69   :  { %v10928_v0 = vpack.c.bf16 %v10927_v26, %v10926_v9 }
 0xf6b   :  { %14423 = vmatmul.mubr.bf16.vlgmr.msra.gmra.mrb[28].mxu0 %v10928_v0 }
 0xf6c   :  { %14454 = vmatprep.mubr.msk.bf16.mxu0 %vm17875_vm0, %v17874_v41  ;;  %14447 = vmatpush3.bf16.msra.mxu0 %v16816_v47 }
 0xf6d   :  { %14448 = vmatprep.subr.bf16.mxu0 %v17874_v41 }
 0xf70   :  { %14449 = vmatpush3.bf16.msra.mxu0 %v16817_v43  ;;  %v16824_v43 = vld [vmem:[#allocation42] sm:$0xff]  }
 0xf71   :  { %14450 = vmatprep.subr.bf16.mxu0 %v17874_v41 }
 0xf74   :  { %14451 = vmatpush3.bf16.msra.mxu0 %v16818_v44  ;;  %v16838_v44 = vld [vmem:[#allocation48 + $0x10] sm:$0xff]  }
 0xf75   :  { %14452 = vmatprep.subr.bf16.mxu0 %v17874_v41 }
 0xf78   :  { %14453 = vmatpush3.bf16.msra.mxu0 %v16819_v56  ;;  %v16839_v56 = vld [vmem:[#allocation48 + $0x18] sm:$0xff]  }
 0xf79   :  { %14478 = vmatprep.subr.bf16.mxu0 %v17874_v41 }
0x103e   :  { %v11034_v18 = vpop.f32.mrb[28].mxu0 }
0x103f   :  { %v11035_v51 = vadd.f32 %v14077_v40, %v11034_v18  ;;  %v14424_v6 = vpop.f32.mrb[29].mxu0  ;;  %v16825_v18 = vld [vmem:[#allocation42 + $0x8] sm:$0xff]  }
0x1040   :  { %v11037_v7 = vpop.f32.mrb[30].mxu0  ;;  %v16827_v6 = vld [vmem:[#allocation42 + $0x18] sm:$0xff]  }
0x1041   :  { %v11041_v5 = vadd.f32 %v11035_v51, %v10811_v27  ;;  %v11038_v52 = vadd.f32 %v14077_v40, %v11037_v7  ;;  %v14425_v34 = vpop.f32.mrb[31].mxu0  ;;  %v16826_v51 = vld [vmem:[#allocation42 + $0x10] sm:$0xff]   ;;  %v16828_v7 = vld [vmem:[#allocation45] sm:$0xff]  }
0x1043   :  { %v11042_v53 = vadd.f32 %v11038_v52, %v10812_v59  ;;  %v11043_v54 = vmax.f32 %v11041_v5, 0.0  ;;  %v16820_v59 = vld [vmem:[#allocation39] sm:$0xff]   ;;  %v16829_v5 = vld [vmem:[#allocation45 + $0x8] sm:$0xff]  }
0x1044   :  { %v14110_v52 = vld [vmem:[#allocation40] ss:$0 sm:$0xff] }
0x1045   :  { %v11044_v62 = vmax.f32 %v11042_v53, 0.0 }
0x1047   :  { %v11045_v1 = vpack.c.bf16 %v11044_v62, %v11043_v54 }
0x1049   :  { %14443 = vmatmul.mubr.bf16.vlgmr.msra.gmra.mrb[40].mxu1 %v11045_v1 }
0x104a   :  { %14459 = vmatpush3.bf16.msra.mxu1 %v16808_v63  ;;  %14474 = vmatprep.mubr.msk.bf16.mxu1 %vm17875_vm0, %v17874_v41 }
0x104b   :  { %14460 = vmatprep.subr.bf16.mxu1 %v17874_v41 }
0x104e   :  { %14461 = vmatpush3.bf16.msra.mxu1 %v16809_v50 }
0x104f   :  { %14462 = vmatprep.subr.bf16.mxu1 %v17874_v41 }
0x1052   :  { %14463 = vmatpush3.bf16.msra.mxu1 %v16810_v2 }
0x1053   :  { %14464 = vmatprep.subr.bf16.mxu1 %v17874_v41 }
0x1056   :  { %14465 = vmatpush3.bf16.msra.mxu1 %v16811_v24 }
0x1057   :  { %14466 = vmatprep.subr.bf16.mxu1 %v17874_v41 }
0x105a   :  { %14467 = vmatpush3.bf16.msra.mxu1 %v16812_v29  ;;  %v16830_v29 = vld [vmem:[#allocation45 + $0x10] sm:$0xff]  }
0x105b   :  { %14468 = vmatprep.subr.bf16.mxu1 %v17874_v41 }
0x105e   :  { %14469 = vmatpush3.bf16.msra.mxu1 %v16813_v4  ;;  %v16831_v4 = vld [vmem:[#allocation45 + $0x18] sm:$0xff]  }
0x105f   :  { %14470 = vmatprep.subr.bf16.mxu1 %v17874_v41 }
0x1062   :  { %14471 = vmatpush3.bf16.msra.mxu1 %v16814_v49  ;;  %v16836_v49 = vld [vmem:[#allocation48] sm:$0xff]  }
0x1063   :  { %14472 = vmatprep.subr.bf16.mxu1 %v17874_v41 }
0x1066   :  { %14473 = vmatpush3.bf16.msra.mxu1 %v16815_v33  ;;  %v16837_v33 = vld [vmem:[#allocation48 + $0x8] sm:$0xff]  }
0x1067   :  { %14502 = vmatprep.subr.bf16.mxu1 %v17874_v41 }
0x1069   :  { %14475 = vmatmul.mubr.bf16.vlgmr.msra.gmra.mrb[44].mxu1 %v11045_v1 }
0x106a   :  { %14510 = vmatprep.mubr.msk.bf16.mxu1 %vm17875_vm0, %v17874_v41  ;;  %14503 = vmatpush3.bf16.msra.mxu1 %v16828_v7 }
0x106b   :  { %14504 = vmatprep.subr.bf16.mxu1 %v17874_v41 }
0x106e   :  { %14505 = vmatpush3.bf16.msra.mxu1 %v16829_v5 }
0x106f   :  { %14506 = vmatprep.subr.bf16.mxu1 %v17874_v41 }
0x1072   :  { %14507 = vmatpush3.bf16.msra.mxu1 %v16830_v29 }
0x1073   :  { %14508 = vmatprep.subr.bf16.mxu1 %v17874_v41 }
0x1076   :  { %14509 = vmatpush3.bf16.msra.mxu1 %v16831_v4 }
0x1077   :  { %14534 = vmatprep.subr.bf16.mxu1 %v17874_v41 }
0x111c   :  { %v11151_v28 = vpop.f32.mrb[40].mxu1 }
0x111d   :  { %v11152_v61 = vadd.f32 %v14086_v8, %v11151_v28  ;;  %v14444_v58 = vpop.f32.mrb[41].mxu1  ;;  %v16841_v28 = vld [vmem:[#allocation48 + $0x28] sm:$0xff]  }
0x111e   :  { %v11154_v39 = vpop.f32.mrb[42].mxu1 }
0x111f   :  { %v11155_v16 = vadd.f32 %v14086_v8, %v11154_v39  ;;  %v14445_v38 = vpop.f32.mrb[43].mxu1  ;;  %v11158_v37 = vmax.f32 %v11152_v61, 0.0  ;;  %v16840_v8 = vld [vmem:[#allocation48 + $0x20] sm:$0xff]   ;;  %v14116_v61 = vld [vmem:[#allocation43] ss:$0 sm:$0xff] }
0x1121   :  { %v11159_v27 = vmax.f32 %v11155_v16, 0.0 }
0x1123   :  { %v11160_v10 = vpack.c.bf16 %v11159_v27, %v11158_v37 }
0x1125   :  { %14455 = vmatmul.mubr.msk.bf16.vlgmr.msra.gmra.mrb[32].mxu0 %vm11200_vm1, %v11160_v10 }
0x1126   :  { %14479 = vmatpush3.bf16.msra.mxu0 %v16820_v59  ;;  %14486 = vmatprep.mubr.msk.bf16.mxu0 %vm17875_vm0, %v17874_v41 }
0x1127   :  { %14480 = vmatprep.subr.bf16.mxu0 %v17874_v41 }
0x112a   :  { %14481 = vmatpush3.bf16.msra.mxu0 %v16821_v55  ;;  %v16833_v55 = vld [vmem:[#allocation51 + $0x8] sm:$0xff]  }
0x112b   :  { %14482 = vmatprep.subr.bf16.mxu0 %v17874_v41 }
0x112e   :  { %14483 = vmatpush3.bf16.msra.mxu0 %v16822_v36  ;;  %v16834_v36 = vld [vmem:[#allocation51 + $0x10] sm:$0xff]  }
0x112f   :  { %14484 = vmatprep.subr.bf16.mxu0 %v17874_v41 }
0x1132   :  { %14485 = vmatpush3.bf16.msra.mxu0 %v16823_v25  ;;  %v16835_v25 = vld [vmem:[#allocation51 + $0x18] sm:$0xff]  }
0x1133   :  { %14490 = vmatprep.subr.bf16.mxu0 %v17874_v41 }
0x113c   :  { %v11343_v57 = vpop.f32.mrb[44].mxu1 }
0x113d   :  { %v14476_v30 = vpop.f32.mrb[45].mxu1 }
0x113e   :  { %v11346_v31 = vpop.f32.mrb[46].mxu1 }
0x113f   :  { %v14477_v32 = vpop.f32.mrb[47].mxu1 }
0x11f8   :  { %v11238_v3 = vpop.f32.mrb[32].mxu0 }
0x11f9   :  { %v11239_v15 = vadd.f32 %v14095_v45, %v11238_v3  ;;  %v14456_v35 = vpop.f32.mrb[33].mxu0  ;;  %v16843_v3 = vld [vmem:[#allocation48 + $0x38] sm:$0xff]  }
0x11fa   :  { %v11241_v17 = vpop.f32.mrb[34].mxu0  ;;  %v16845_v35 = vld [vmem:[#allocation54 + $0x8] sm:$0xff]  }
0x11fb   :  { %v11350_v42 = vadd.f32 %v11343_v57, %v11239_v15  ;;  %v11242_v48 = vadd.f32 %v14095_v45, %v11241_v17  ;;  %v14457_v9 = vpop.f32.mrb[35].mxu0  ;;  %v16842_v45 = vld [vmem:[#allocation48 + $0x30] sm:$0xff]   ;;  %v16844_v15 = vld [vmem:[#allocation54] sm:$0xff]   ;;  %v16847_v17 = vld [vmem:[#allocation54 + $0x18] sm:$0xff]  }
0x11fd   :  { %v18793_v26 = vadd.f32 %v14109_v60, %v11350_v42  ;;  %v11351_v0 = vadd.f32 %v11346_v31, %v11242_v48  ;;  %v16832_v31 = vld [vmem:[#allocation51] sm:$0xff]   ;;  %v14122_v48 = vld [vmem:[#allocation46] ss:$0 sm:$0xff] }
0x11fe   :  { %v16848_v42 = vld [vmem:[#allocation54 + $0x20] sm:$0xff]  }
0x11ff   :  { %v18795_v13 = vadd.f32 %v14109_v60, %v11351_v0  ;;  %v11361_v46 = vmax.f32 %v18793_v26, 0.0  ;;  %v16846_v60 = vld [vmem:[#allocation54 + $0x10] sm:$0xff]  }
0x1201   :  { %v11362_v47 = vmax.f32 %v18795_v13, 0.0 }
0x1203   :  { %v11363_v40 = vpack.c.bf16 %v11362_v47, %v11361_v46 }
0x1205   :  { %14487 = vmatmul.mubr.msk.bf16.vlgmr.msra.gmra.mrb[36].mxu0 %vm11200_vm1, %v11363_v40 }
0x1206   :  { %14491 = vmatpush3.bf16.msra.mxu0 %v16824_v43  ;;  %14498 = vmatprep.mubr.msk.bf16.mxu0 %vm17875_vm0, %v17874_v41 }
0x1207   :  { %14492 = vmatprep.subr.bf16.mxu0 %v17874_v41 }
0x120a   :  { %14493 = vmatpush3.bf16.msra.mxu0 %v16825_v18 }
0x120b   :  { %14494 = vmatprep.subr.bf16.mxu0 %v17874_v41 }
0x120e   :  { %14495 = vmatpush3.bf16.msra.mxu0 %v16826_v51 }
0x120f   :  { %14496 = vmatprep.subr.bf16.mxu0 %v17874_v41 }
0x1212   :  { %14497 = vmatpush3.bf16.msra.mxu0 %v16827_v6 }
0x1213   :  { %14514 = vmatprep.subr.bf16.mxu0 %v17874_v41 }
0x12d8   :  { %v11440_v34 = vpop.f32.mrb[36].mxu0 }
0x12d9   :  { %v11441_v53 = vadd.f32 %v14110_v52, %v11440_v34  ;;  %v14488_v54 = vpop.f32.mrb[37].mxu0  ;;  %v16850_v34 = vld [vmem:[#allocation54 + $0x30] sm:$0xff]  }
0x12da   :  { %v11443_v62 = vpop.f32.mrb[38].mxu0  ;;  %v16852_v54 = vld [vmem:[#allocation57] sm:$0xff]  }
0x12db   :  { %v11444_v63 = vadd.f32 %v14110_v52, %v11443_v62  ;;  %v14489_v1 = vpop.f32.mrb[39].mxu0  ;;  %v11447_v50 = vmax.f32 %v11441_v53, 0.0  ;;  %v16849_v52 = vld [vmem:[#allocation54 + $0x28] sm:$0xff]   ;;  %v16851_v53 = vld [vmem:[#allocation54 + $0x38] sm:$0xff]  }
0x12dc   :  { %v16853_v62 = vld [vmem:[#allocation57 + $0x8] sm:$0xff]   ;;  %v16855_v1 = vld [vmem:[#allocation57 + $0x18] sm:$0xff]  }
0x12dd   :  { %v11448_v2 = vmax.f32 %v11444_v63, 0.0  ;;  %v16854_v63 = vld [vmem:[#allocation57 + $0x10] sm:$0xff]  }
0x12df   :  { %v11449_v24 = vpack.c.bf16 %v11448_v2, %v11447_v50  ;;  %v16856_v50 = vld [vmem:[#allocation57 + $0x20] sm:$0xff]   ;;  %v16857_v2 = vld [vmem:[#allocation57 + $0x28] sm:$0xff]  }
0x12e1   :  { %14499 = vmatmul.mubr.msk.bf16.vlgmr.msra.gmra.mrb[40].mxu0 %vm11200_vm1, %v11449_v24  ;;  %v14128_v24 = vld [vmem:[#allocation49] ss:$0 sm:$0xff] }
0x12e2   :  { %14530 = vmatprep.mubr.msk.bf16.mxu0 %vm17875_vm0, %v17874_v41  ;;  %14515 = vmatpush3.bf16.msra.mxu0 %v16836_v49 }
0x12e3   :  { %14516 = vmatprep.subr.bf16.mxu0 %v17874_v41 }
0x12e6   :  { %14517 = vmatpush3.bf16.msra.mxu0 %v16837_v33  ;;  %v14142_v33 = vld [vmem:[#allocation52] ss:$0 sm:$0xff] }
0x12e7   :  { %14518 = vmatprep.subr.bf16.mxu0 %v17874_v41 }
0x12ea   :  { %14519 = vmatpush3.bf16.msra.mxu0 %v16838_v44 }
0x12eb   :  { %14520 = vmatprep.subr.bf16.mxu0 %v17874_v41 }
0x12ee   :  { %14521 = vmatpush3.bf16.msra.mxu0 %v16839_v56 }
0x12ef   :  { %14522 = vmatprep.subr.bf16.mxu0 %v17874_v41 }
0x12f2   :  { %14523 = vmatpush3.bf16.msra.mxu0 %v16840_v8 }
0x12f3   :  { %14524 = vmatprep.subr.bf16.mxu0 %v17874_v41 }
0x12f6   :  { %14525 = vmatpush3.bf16.msra.mxu0 %v16841_v28 }
0x12f7   :  { %14526 = vmatprep.subr.bf16.mxu0 %v17874_v41 }
0x12fa   :  { %14527 = vmatpush3.bf16.msra.mxu0 %v16842_v45 }
0x12fb   :  { %14528 = vmatprep.subr.bf16.mxu0 %v17874_v41 }
0x12fe   :  { %14529 = vmatpush3.bf16.msra.mxu0 %v16843_v3 }
0x12ff   :  { %14566 = vmatprep.subr.bf16.mxu0 %v17874_v41 }
0x13b4   :  { %v11526_v58 = vpop.f32.mrb[40].mxu0 }
0x13b5   :  { %v11527_v39 = vadd.f32 %v14116_v61, %v11526_v58  ;;  %v14500_v16 = vpop.f32.mrb[41].mxu0 }
0x13b6   :  { %v11529_v38 = vpop.f32.mrb[42].mxu0 }
0x13b7   :  { %v11533_v37 = vadd.f32 %v11527_v39, %v11361_v46  ;;  %v11530_v27 = vadd.f32 %v14116_v61, %v11529_v38  ;;  %v14501_v59 = vpop.f32.mrb[43].mxu0 }
0x13b8   :  { %v16859_v59 = vld [vmem:[#allocation57 + $0x38] sm:$0xff]  }
0x13b9   :  { %v11534_v10 = vadd.f32 %v11530_v27, %v11362_v47  ;;  %v11535_v57 = vmax.f32 %v11533_v37, 0.0  ;;  %v16858_v27 = vld [vmem:[#allocation57 + $0x30] sm:$0xff]  }
0x13bb   :  { %v11536_v30 = vmax.f32 %v11534_v10, 0.0  ;;  %v12055_v10 = vld [vmem:[#allocation60] sm:$0xff] }
0x13bd   :  { %v11537_v32 = vpack.c.bf16 %v11536_v30, %v11535_v57  ;;  %v12059_v57 = vld [vmem:[#allocation60 + $0x20] sm:$0xff]  ;;  %v12056_v30 = vld [vmem:[#allocation60 + $0x8] sm:$0xff] }
0x13bf   :  { %14511 = vmatmul.mubr.msk.bf16.vlgmr.msra.gmra.mrb[48].mxu1 %vm11200_vm1, %v11537_v32 }
0x13c0   :  { %14535 = vmatpush3.bf16.msra.mxu1 %v16832_v31  ;;  %14542 = vmatprep.mubr.msk.bf16.mxu1 %vm17875_vm0, %v17874_v41  ;;  %v14161_v31 = vcombine.low %v12055_v10, %v12059_v57 }
0x13c1   :  { %14536 = vmatprep.subr.bf16.mxu1 %v17874_v41 }
0x13c4   :  { %14537 = vmatpush3.bf16.msra.mxu1 %v16833_v55  ;;  %v12060_v55 = vld [vmem:[#allocation60 + $0x28] sm:$0xff] }
0x13c5   :  { %14538 = vmatprep.subr.bf16.mxu1 %v17874_v41  ;;  %v14163_v45 = vcombine.low %v12056_v30, %v12060_v55  ;;  %v14164_v3 = vcombine.high %v12056_v30, %v12060_v55  ;;  %v12100_v30 = vld [vmem:[#allocation60 + $0x168] sm:$0xff] }
0x13c8   :  { %14539 = vmatpush3.bf16.msra.mxu1 %v16834_v36  ;;  %v12063_v36 = vld [vmem:[#allocation60 + $0x40] sm:$0xff] }
0x13c9   :  { %14540 = vmatprep.subr.bf16.mxu1 %v17874_v41 }
0x13cc   :  { %14541 = vmatpush3.bf16.msra.mxu1 %v16835_v25  ;;  %v12067_v25 = vld [vmem:[#allocation60 + $0x60] sm:$0xff] }
0x13cd   :  { %14546 = vmatprep.subr.bf16.mxu1 %v17874_v41 }
0x13cf   :  { %14543 = vmatmul.mubr.msk.bf16.vlgmr.msra.gmra.mrb[52].mxu1 %vm11200_vm1, %v11537_v32  ;;  %v14162_v32 = vcombine.high %v12055_v10, %v12059_v57  ;;  %v12096_v57 = vld [vmem:[#allocation60 + $0x148] sm:$0xff] }
0x13d0   :  { %14562 = vmatprep.mubr.msk.bf16.mxu1 %vm17875_vm0, %v17874_v41  ;;  %14547 = vmatpush3.bf16.msra.mxu1 %v16844_v15  ;;  %v14170_v15 = vcombine.high %v12063_v36, %v12067_v25  ;;  %v14203_v55 = vcombine.low %v12096_v57, %v12100_v30 }
0x13d1   :  { %14548 = vmatprep.subr.bf16.mxu1 %v17874_v41 }
0x13d4   :  { %14549 = vmatpush3.bf16.msra.mxu1 %v16845_v35  ;;  %v14169_v35 = vcombine.low %v12063_v36, %v12067_v25  ;;  %v12103_v36 = vld [vmem:[#allocation60 + $0x180] sm:$0xff] }
0x13d5   :  { %14550 = vmatprep.subr.bf16.mxu1 %v17874_v41  ;;  %v12107_v25 = vld [vmem:[#allocation60 + $0x1a0] sm:$0xff] }
0x13d8   :  { %14551 = vmatpush3.bf16.msra.mxu1 %v16846_v60  ;;  %v12071_v60 = vld [vmem:[#allocation60 + $0x80] sm:$0xff] }
0x13d9   :  { %14552 = vmatprep.subr.bf16.mxu1 %v17874_v41 }
0x13dc   :  { %14553 = vmatpush3.bf16.msra.mxu1 %v16847_v17 }
0x13dd   :  { %14554 = vmatprep.subr.bf16.mxu1 %v17874_v41 }
0x13e0   :  { %14555 = vmatpush3.bf16.msra.mxu1 %v16848_v42 }
0x13e1   :  { %14556 = vmatprep.subr.bf16.mxu1 %v17874_v41 }
0x13e4   :  { %14557 = vmatpush3.bf16.msra.mxu1 %v16849_v52 }
0x13e5   :  { %14558 = vmatprep.subr.bf16.mxu1 %v17874_v41 }
0x13e8   :  { %14559 = vmatpush3.bf16.msra.mxu1 %v16850_v34 }
0x13e9   :  { %14560 = vmatprep.subr.bf16.mxu1 %v17874_v41 }
0x13ec   :  { %14561 = vmatpush3.bf16.msra.mxu1 %v16851_v53 }
0x13ed   :  { %12481 = vmatprep.subr.bf16.mxu1 %v14162_v32  ;;  %v14204_v32 = vcombine.high %v12096_v57, %v12100_v30  ;;  %v12081_v57 = vld [vmem:[#allocation60 + $0xd0] sm:$0xff] }
0x13ee   :  { %v12085_v30 = vld [vmem:[#allocation60 + $0xf0] sm:$0xff] }
0x1492   :  { %v11614_v9 = vpop.f32.mrb[48].mxu1 }
0x1493   :  { %v11615_v26 = vadd.f32 %v14122_v48, %v11614_v9  ;;  %v14512_v0 = vpop.f32.mrb[49].mxu1  ;;  %v12083_v9 = vld [vmem:[#allocation60 + $0xe0] sm:$0xff] }
0x1494   :  { %v11617_v13 = vpop.f32.mrb[50].mxu1 }
0x1495   :  { %v11618_v46 = vadd.f32 %v14122_v48, %v11617_v13  ;;  %v14513_v47 = vpop.f32.mrb[51].mxu1  ;;  %v11621_v43 = vmax.f32 %v11615_v26, 0.0  ;;  %v12079_v48 = vld [vmem:[#allocation60 + $0xc0] sm:$0xff] }
0x1496   :  { %v14186_v26 = vcombine.high %v12079_v48, %v12083_v9  ;;  %v14185_v0 = vcombine.low %v12079_v48, %v12083_v9  ;;  %v12087_v13 = vld [vmem:[#allocation60 + $0x100] sm:$0xff]  ;;  %v12112_v48 = vld [vmem:[#allocation60 + $0x1c8] sm:$0xff] }
0x1497   :  { %v11622_v40 = vmax.f32 %v11618_v46, 0.0  ;;  %v12091_v46 = vld [vmem:[#allocation60 + $0x120] sm:$0xff] }
0x1498   :  { %v14194_v47 = vcombine.high %v12087_v13, %v12091_v46 }
0x1499   :  { %v11623_v18 = vpack.c.bf16 %v11622_v40, %v11621_v43  ;;  %v14193_v43 = vcombine.low %v12087_v13, %v12091_v46  ;;  %v12095_v40 = vld [vmem:[#allocation60 + $0x140] sm:$0xff] }
0x149b   :  { %14531 = vmatmul.mubr.bf16.vlgmr.msra.gmra.mrb[44].mxu0 %v11623_v18  ;;  %v12099_v18 = vld [vmem:[#allocation60 + $0x160] sm:$0xff] }
0x149c   :  { %14582 = vmatprep.mubr.msk.bf16.mxu0 %vm17875_vm0, %v17874_v41  ;;  %14567 = vmatpush3.bf16.msra.mxu0 %v16852_v54 }
0x149d   :  { %14568 = vmatprep.subr.bf16.mxu0 %v17874_v41 }
0x14a0   :  { %14569 = vmatpush3.bf16.msra.mxu0 %v16853_v62 }
0x14a1   :  { %14570 = vmatprep.subr.bf16.mxu0 %v17874_v41 }
0x14a2   :  { %v11802_v51 = vpop.f32.mrb[52].mxu1 }
0x14a3   :  { %v14544_v6 = vpop.f32.mrb[53].mxu1 }
0x14a4   :  { %v11805_v7 = vpop.f32.mrb[54].mxu1  ;;  %14571 = vmatpush3.bf16.msra.mxu0 %v16854_v63  ;;  %v14201_v6 = vcombine.low %v12095_v40, %v12099_v18  ;;  %v12064_v63 = vld [vmem:[#allocation60 + $0x48] sm:$0xff] }
0x14a5   :  { %v14545_v5 = vpop.f32.mrb[55].mxu1  ;;  %14572 = vmatprep.subr.bf16.mxu0 %v17874_v41 }
0x14a8   :  { %14573 = vmatpush3.bf16.msra.mxu0 %v16855_v1  ;;  %v12068_v1 = vld [vmem:[#allocation60 + $0x68] sm:$0xff] }
0x14a9   :  { %14574 = vmatprep.subr.bf16.mxu0 %v17874_v41 }
0x14ac   :  { %14575 = vmatpush3.bf16.msra.mxu0 %v16856_v50 }
0x14ad   :  { %14576 = vmatprep.subr.bf16.mxu0 %v17874_v41 }
0x14b0   :  { %14577 = vmatpush3.bf16.msra.mxu0 %v16857_v2 }
0x14b1   :  { %14578 = vmatprep.subr.bf16.mxu0 %v17874_v41 }
0x14b4   :  { %14579 = vmatpush3.bf16.msra.mxu0 %v16858_v27  ;;  %v12092_v27 = vld [vmem:[#allocation60 + $0x128] sm:$0xff] }
0x14b5   :  { %14580 = vmatprep.subr.bf16.mxu0 %v17874_v41  ;;  %v12075_v41 = vld [vmem:[#allocation60 + $0xa0] sm:$0xff] }
0x14b6   :  { %v14178_v17 = vcombine.high %v12071_v60, %v12075_v41  ;;  %v14177_v42 = vcombine.low %v12071_v60, %v12075_v41 }
0x14b8   :  { %14581 = vmatpush3.bf16.msra.mxu0 %v16859_v59 }
0x14b9   :  { %12524 = vmatprep.subr.bf16.mxu0 %v14164_v3  ;;  %v14210_v3 = vcombine.high %v12103_v36, %v12107_v25 }
0x156e   :  { %v11729_v29 = vpop.f32.mrb[44].mxu0 }
0x156f   :  { %v11730_v4 = vadd.f32 %v14128_v24, %v11729_v29  ;;  %v14532_v49 = vpop.f32.mrb[45].mxu0  ;;  %v14172_v29 = vcombine.high %v12064_v63, %v12068_v1 }
0x1570   :  { %v11732_v44 = vpop.f32.mrb[46].mxu0  ;;  %v12076_v49 = vld [vmem:[#allocation60 + $0xa8] sm:$0xff] }
0x1571   :  { %v11809_v56 = vadd.f32 %v11802_v51, %v11730_v4  ;;  %v11733_v8 = vadd.f32 %v14128_v24, %v11732_v44  ;;  %v14533_v28 = vpop.f32.mrb[47].mxu0  ;;  %v14202_v51 = vcombine.high %v12095_v40, %v12099_v18  ;;  %v12072_v4 = vld [vmem:[#allocation60 + $0x88] sm:$0xff]  ;;  %v12058_v40 = vld [vmem:[#allocation60 + $0x18] sm:$0xff] }
0x1572   :  { %v14180_v44 = vcombine.high %v12072_v4, %v12076_v49  ;;  %v14179_v28 = vcombine.low %v12072_v4, %v12076_v49  ;;  %v12069_v4 = vld [vmem:[#allocation60 + $0x70] sm:$0xff]  ;;  %v12066_v49 = vld [vmem:[#allocation60 + $0x58] sm:$0xff] }
0x1573   :  { %v18854_v61 = vadd.f32 %v14142_v33, %v11809_v56  ;;  %v11810_v58 = vadd.f32 %v11805_v7, %v11733_v8  ;;  %v14143_v7 = vld [vmem:[#allocation55] ss:$0 sm:$0xff]  ;;  %v12080_v56 = vld [vmem:[#allocation60 + $0xc8] sm:$0xff] }
0x1574   :  { %v12084_v8 = vld [vmem:[#allocation60 + $0xe8] sm:$0xff] }
0x1575   :  { %v18856_v39 = vadd.f32 %v14142_v33, %v11810_v58  ;;  %v11820_v16 = vmax.f32 %v18854_v61, 0.0  ;;  %v14171_v33 = vcombine.low %v12064_v63, %v12068_v1  ;;  %v14188_v58 = vcombine.high %v12080_v56, %v12084_v8  ;;  %v12078_v61 = vld [vmem:[#allocation60 + $0xb8] sm:$0xff] }
0x1576   :  { %v14187_v59 = vcombine.low %v12080_v56, %v12084_v8 }
0x1577   :  { %v11821_v38 = vmax.f32 %v18856_v39, 0.0 }
0x1579   :  { %v11822_v37 = vpack.c.bf16 %v11821_v38, %v11820_v16 }
0x157b   :  { %14563 = vmatmul.mubr.bf16.vlgmr.msra.gmra.mrb[56].mxu1 %v11822_v37  ;;  %v12088_v37 = vld [vmem:[#allocation60 + $0x108] sm:$0xff] }
0x157c   :  { %12482 = vmatpush1.bf16.msra.mxu1 %v14161_v31  ;;  %v14196_v10 = vcombine.high %v12088_v37, %v12092_v27  ;;  %v14195_v31 = vcombine.low %v12088_v37, %v12092_v27  ;;  %v12073_v37 = vld [vmem:[#allocation60 + $0x90] sm:$0xff] }
0x157d   :  { %12483 = vmatprep.subr.bf16.mxu1 %v14170_v15  ;;  %v12108_v15 = vld [vmem:[#allocation60 + $0x1a8] sm:$0xff]  ;;  %v12077_v27 = vld [vmem:[#allocation60 + $0xb0] sm:$0xff] }
0x1580   :  { %12484 = vmatpush1.bf16.msra.mxu1 %v14169_v35  ;;  %v14209_v35 = vcombine.low %v12103_v36, %v12107_v25  ;;  %v14190_v25 = vcombine.high %v12081_v57, %v12085_v30 }
0x1581   :  { %12485 = vmatprep.subr.bf16.mxu1 %v14178_v17  ;;  %v12111_v17 = vld [vmem:[#allocation60 + $0x1c0] sm:$0xff] }
0x1584   :  { %12486 = vmatpush1.bf16.msra.mxu1 %v14177_v42  ;;  %v12115_v42 = vld [vmem:[#allocation60 + $0x1e0] sm:$0xff] }
0x1585   :  { %12487 = vmatprep.subr.bf16.mxu1 %v14186_v26  ;;  %v14218_v9 = vcombine.high %v12111_v17, %v12115_v42  ;;  %v12116_v26 = vld [vmem:[#allocation60 + $0x1e8] sm:$0xff] }
0x1586   :  { %v14219_v13 = vcombine.low %v12112_v48, %v12116_v26  ;;  %v14220_v46 = vcombine.high %v12112_v48, %v12116_v26  ;;  %v12101_v26 = vld [vmem:[#allocation60 + $0x170] sm:$0xff] }
0x1588   :  { %12488 = vmatpush1.bf16.msra.mxu1 %v14185_v0  ;;  %v14217_v0 = vcombine.low %v12111_v17, %v12115_v42 }
0x1589   :  { %12489 = vmatprep.subr.bf16.mxu1 %v14194_v47  ;;  %v12057_v47 = vld [vmem:[#allocation60 + $0x10] sm:$0xff] }
0x158c   :  { %12490 = vmatpush1.bf16.msra.mxu1 %v14193_v43  ;;  %v12061_v43 = vld [vmem:[#allocation60 + $0x30] sm:$0xff] }
0x158d   :  { %12491 = vmatprep.subr.bf16.mxu1 %v14202_v51  ;;  %v14165_v18 = vcombine.low %v12057_v47, %v12061_v43  ;;  %v14166_v51 = vcombine.high %v12057_v47, %v12061_v43 }
0x1590   :  { %12492 = vmatpush1.bf16.msra.mxu1 %v14201_v6  ;;  %v12062_v6 = vld [vmem:[#allocation60 + $0x38] sm:$0xff] }
0x1591   :  { %12493 = vmatprep.subr.bf16.mxu1 %v14210_v3  ;;  %v12089_v3 = vld [vmem:[#allocation60 + $0x110] sm:$0xff] }
0x1594   :  { %12494 = vmatpush1.bf16.msra.mxu1 %v14209_v35  ;;  %v12090_v35 = vld [vmem:[#allocation60 + $0x118] sm:$0xff] }
0x1595   :  { %12495 = vmatprep.subr.bf16.mxu1 %v14218_v9  ;;  %v12097_v9 = vld [vmem:[#allocation60 + $0x150] sm:$0xff] }
0x1596   :  { %v14206_v43 = vcombine.high %v12097_v9, %v12101_v26 }
0x1598   :  { %12496 = vmatpush1.bf16.msra.mxu1 %v14217_v0  ;;  %v12098_v0 = vld [vmem:[#allocation60 + $0x158] sm:$0xff] }
0x1599   :  { %12567 = vmatprep.subr.bf16.mxu1 %v14166_v51  ;;  %v12109_v51 = vld [vmem:[#allocation60 + $0x1b0] sm:$0xff] }
0x164e   :  { %v11928_v5 = vpop.f32.mrb[56].mxu1 }
0x164f   :  { %v11929_v52 = vadd.f32 %v14143_v7, %v11928_v5  ;;  %v14564_v34 = vpop.f32.mrb[57].mxu1  ;;  %v14167_v5 = vcombine.low %v12058_v40, %v12062_v6 }
0x1650   :  { %v11931_v53 = vpop.f32.mrb[58].mxu1  ;;  %v14152_v34 = vld [vmem:[#allocation58] ss:$0 sm:$0xff] }
0x1651   :  { %v11932_v54 = vadd.f32 %v14143_v7, %v11931_v53  ;;  %v14565_v62 = vpop.f32.mrb[59].mxu1  ;;  %v11935_v50 = vmax.f32 %v11929_v52, 0.0  ;;  %v17876_v7 = vmov 0   ;;  %v14168_v52 = vcombine.high %v12058_v40, %v12062_v6  ;;  %v12106_v6 = vld [vmem:[#allocation60 + $0x198] sm:$0xff] }
0x1652   :  { %12513 = vmatprep.mubr.bf16.mxu1 %v17876_v7 }
0x1653   :  { %v11936_v2 = vmax.f32 %v11932_v54, 0.0 }
0x1655   :  { %v11937_v24 = vpack.c.bf16 %v11936_v2, %v11935_v50 }
0x1657   :  { %14583 = vmatmul.mubr.bf16.vlgmr.msra.gmra.mrb[48].mxu0 %v11937_v24 }
0x1658   :  { %12525 = vmatpush1.bf16.msra.mxu0 %v14163_v45  ;;  %v12104_v45 = vld [vmem:[#allocation60 + $0x188] sm:$0xff]  ;;  %12556 = vmatprep.mubr.bf16.mxu0 %v17876_v7 }
0x1659   :  { %12526 = vmatprep.subr.bf16.mxu0 %v14172_v29  ;;  %v14211_v60 = vcombine.low %v12104_v45, %v12108_v15  ;;  %v14212_v41 = vcombine.high %v12104_v45, %v12108_v15  ;;  %v12065_v29 = vld [vmem:[#allocation60 + $0x50] sm:$0xff] }
0x165a   :  { %v14173_v39 = vcombine.low %v12065_v29, %v12069_v4  ;;  %v12093_v15 = vld [vmem:[#allocation60 + $0x130] sm:$0xff] }
0x165b   :  { %v14198_v42 = vcombine.high %v12089_v3, %v12093_v15 }
0x165c   :  { %12527 = vmatpush1.bf16.msra.mxu0 %v14171_v33  ;;  %v12070_v33 = vld [vmem:[#allocation60 + $0x78] sm:$0xff] }
0x165d   :  { %12528 = vmatprep.subr.bf16.mxu0 %v14180_v44 }
0x1660   :  { %12529 = vmatpush1.bf16.msra.mxu0 %v14179_v28  ;;  %v14174_v28 = vcombine.high %v12065_v29, %v12069_v4 }
0x1661   :  { %12530 = vmatprep.subr.bf16.mxu0 %v14188_v58  ;;  %v14176_v58 = vcombine.high %v12066_v49, %v12070_v33 }
0x1664   :  { %12531 = vmatpush1.bf16.msra.mxu0 %v14187_v59  ;;  %v12074_v59 = vld [vmem:[#allocation60 + $0x98] sm:$0xff] }
0x1665   :  { %12532 = vmatprep.subr.bf16.mxu0 %v14196_v10  ;;  %v14184_v10 = vcombine.high %v12074_v59, %v12078_v61  ;;  %v14183_v36 = vcombine.low %v12074_v59, %v12078_v61 }
0x1668   :  { %12533 = vmatpush1.bf16.msra.mxu0 %v14195_v31  ;;  %v12082_v31 = vld [vmem:[#allocation60 + $0xd8] sm:$0xff] }
0x1669   :  { %12534 = vmatprep.subr.bf16.mxu0 %v14204_v32  ;;  %v12086_v32 = vld [vmem:[#allocation60 + $0xf8] sm:$0xff] }
0x166a   :  { %v14192_v45 = vcombine.high %v12082_v31, %v12086_v32  ;;  %v14191_v17 = vcombine.low %v12082_v31, %v12086_v32 }
0x166c   :  { %12535 = vmatpush1.bf16.msra.mxu0 %v14203_v55  ;;  %v14181_v55 = vcombine.low %v12073_v37, %v12077_v27 }
0x166d   :  { %12536 = vmatprep.subr.bf16.mxu0 %v14212_v41  ;;  %v14189_v41 = vcombine.low %v12081_v57, %v12085_v30 }
0x1670   :  { %12537 = vmatpush1.bf16.msra.mxu0 %v14211_v60  ;;  %v12094_v60 = vld [vmem:[#allocation60 + $0x138] sm:$0xff] }
0x1671   :  { %12538 = vmatprep.subr.bf16.mxu0 %v14220_v46  ;;  %v14200_v48 = vcombine.high %v12090_v35, %v12094_v60  ;;  %v14197_v46 = vcombine.low %v12089_v3, %v12093_v15  ;;  %v14199_v47 = vcombine.low %v12090_v35, %v12094_v60 }
0x1674   :  { %12539 = vmatpush1.bf16.msra.mxu0 %v14219_v13  ;;  %v12102_v13 = vld [vmem:[#allocation60 + $0x178] sm:$0xff] }
0x1675   :  { %12610 = vmatprep.subr.bf16.mxu0 %v14168_v52  ;;  %v14208_v40 = vcombine.high %v12098_v0, %v12102_v13  ;;  %v14207_v52 = vcombine.low %v12098_v0, %v12102_v13 }
0x172a   :  { %v12043_v53 = vpop.f32.mrb[48].mxu0 }
0x172b   :  { %v12044_v54 = vadd.f32 %v14152_v34, %v12043_v53  ;;  %v14584_v62 = vpop.f32.mrb[49].mxu0 }
0x172c   :  { %v12046_v63 = vpop.f32.mrb[50].mxu0  ;;  %v12117_v62 = vld [vmem:[#allocation60 + $0x1f0] sm:$0xff] }
0x172d   :  { %v12050_v1 = vadd.f32 %v12044_v54, %v11820_v16  ;;  %v12047_v50 = vadd.f32 %v14152_v34, %v12046_v63  ;;  %v14585_v2 = vpop.f32.mrb[51].mxu0  ;;  %v14175_v16 = vcombine.low %v12066_v49, %v12070_v33  ;;  %v12113_v54 = vld [vmem:[#allocation60 + $0x1d0] sm:$0xff]  ;;  %v12114_v63 = vld [vmem:[#allocation60 + $0x1d8] sm:$0xff]  ;;  %v12119_v33 = vld [vmem:[#allocation61] sm:$0xff] }
0x172e   :  { %v14221_v4 = vcombine.low %v12113_v54, %v12117_v62  ;;  %v12140_v32 = vrot.slane %v12119_v33, %v18465_v11 }
0x172f   :  { %v12051_v24 = vadd.f32 %v12047_v50, %v11821_v38  ;;  %v12052_v44 = vmax.f32 %v12050_v1, 0.0  ;;  %v14182_v38 = vcombine.high %v12073_v37, %v12077_v27  ;;  %v12118_v1 = vld [vmem:[#allocation60 + $0x1f8] sm:$0xff] }
0x1730   :  { %v14224_v29 = vcombine.high %v12114_v63, %v12118_v1  ;;  %v14223_v49 = vcombine.low %v12114_v63, %v12118_v1 }
0x1731   :  { %v12053_v56 = vmax.f32 %v12051_v24, 0.0  ;;  %v14222_v24 = vcombine.high %v12113_v54, %v12117_v62 }
0x1733   :  { %v18869_v8 = vpack.c.bf16 %v12053_v56, %v12052_v44  ;;  %v12124_v44 = vrot.slane %v12119_v33, %v18409_v20  ;;  %v12132_v56 = vrot.slane %v12119_v33, %v18412_v21 }
0x1735   :  { %12514 = vmatmul.mubr.bf16.vlgmr.msra.gmra.mrb[60].mxu1 %v18869_v8  ;;  %12557 = vmatmul.mubr.bf16.vlgmr.msra.gmra.mrb[52].mxu0 %v18869_v8 }
0x1736   :  { %12568 = vmatpush1.bf16.msra.mxu1 %v14165_v18  ;;  %12611 = vmatpush1.bf16.msra.mxu0 %v14167_v5  ;;  %v12105_v18 = vld [vmem:[#allocation60 + $0x190] sm:$0xff]  ;;  %v14205_v5 = vcombine.low %v12097_v9, %v12101_v26 }
0x1737   :  { %12569 = vmatprep.subr.bf16.mxu1 %v14174_v28  ;;  %12612 = vmatprep.subr.bf16.mxu0 %v14176_v58  ;;  %v14214_v34 = vcombine.high %v12105_v18, %v12109_v51  ;;  %v14213_v50 = vcombine.low %v12105_v18, %v12109_v51  ;;  %v12128_v28 = vrot.slane %v12119_v33, %v18415_v22 }
0x1738   :  { %12599 = vmatprep.mubr.bf16.mxu1 %v17876_v7  ;;  %12642 = vmatprep.mubr.bf16.mxu0 %v17876_v7  ;;  %v12110_v7 = vld [vmem:[#allocation60 + $0x1b8] sm:$0xff]  ;;  %v12136_v58 = vrot.slane %v12119_v33, %v18418_v23 }
0x1739   :  { %v14216_v53 = vcombine.high %v12106_v6, %v12110_v7  ;;  %v14215_v2 = vcombine.low %v12106_v6, %v12110_v7 }
0x173a   :  { %12570 = vmatpush1.bf16.msra.mxu1 %v14173_v39  ;;  %12613 = vmatpush1.bf16.msra.mxu0 %v14175_v16 }
0x173b   :  { %12571 = vmatprep.subr.bf16.mxu1 %v14182_v38  ;;  %12614 = vmatprep.subr.bf16.mxu0 %v14184_v10 }
0x173e   :  { %12572 = vmatpush1.bf16.msra.mxu1 %v14181_v55  ;;  %12615 = vmatpush1.bf16.msra.mxu0 %v14183_v36  ;;  %v12148_v55 = vrot.slane %v12119_v33, %v18468_v12  ;;  %v12144_v36 = vrot.slane %v12119_v33, %v18471_v14 }
0x173f   :  { %12573 = vmatprep.subr.bf16.mxu1 %v14190_v25  ;;  %12616 = vmatprep.subr.bf16.mxu0 %v14192_v45  ;;  %v12152_v25 = vrot.slane %v12119_v33, %v18474_v19 }
0x1742   :  { %12574 = vmatpush1.bf16.msra.mxu1 %v14189_v41  ;;  %12617 = vmatpush1.bf16.msra.mxu0 %v14191_v17 }
0x1743   :  { %12575 = vmatprep.subr.bf16.mxu1 %v14198_v42  ;;  %12618 = vmatprep.subr.bf16.mxu0 %v14200_v48 }
0x1746   :  { %12576 = vmatpush1.bf16.msra.mxu1 %v14197_v46  ;;  %12619 = vmatpush1.bf16.msra.mxu0 %v14199_v47 }
0x1747   :  { %12577 = vmatprep.subr.bf16.mxu1 %v14206_v43  ;;  %12620 = vmatprep.subr.bf16.mxu0 %v14208_v40 }
0x174a   :  { %12578 = vmatpush1.bf16.msra.mxu1 %v14205_v5  ;;  %12621 = vmatpush1.bf16.msra.mxu0 %v14207_v52 }
0x174b   :  { %12579 = vmatprep.subr.bf16.mxu1 %v14214_v34  ;;  %12622 = vmatprep.subr.bf16.mxu0 %v14216_v53 }
0x174e   :  { %12580 = vmatpush1.bf16.msra.mxu1 %v14213_v50  ;;  %12623 = vmatpush1.bf16.msra.mxu0 %v14215_v2 }
0x174f   :  { %12581 = vmatprep.subr.bf16.mxu1 %v14222_v24  ;;  %12624 = vmatprep.subr.bf16.mxu0 %v14224_v29 }
0x1752   :  { %12582 = vmatpush1.bf16.msra.mxu1 %v14221_v4  ;;  %12625 = vmatpush1.bf16.msra.mxu0 %v14223_v49 }
0x1755   :  { %12600 = vmatmul.mubr.bf16.vlgmr.msra.gmra.mrb[64].mxu1 %v18869_v8  ;;  %12643 = vmatmul.mubr.bf16.vlgmr.msra.gmra.mrb[56].mxu0 %v18869_v8 }
0x1808   :  { %v12515_v37 = vpop.f32.mrb[60].mxu1  ;;  %v12558_v27 = vpop.f32.mrb[52].mxu0 }
0x1809   :  { %v12516_v59 = vadd.f32 %v12515_v37, %v12124_v44  ;;  %v12559_v61 = vadd.f32 %v12558_v27, %v12132_v56  ;;  %v12517_v39 = vpop.f32.mrb[61].mxu1  ;;  %v12560_v8 = vpop.f32.mrb[53].mxu0 }
0x180a   :  { %v12518_v16 = vadd.f32 %v12517_v39, %v12128_v28  ;;  %v12561_v38 = vadd.f32 %v12560_v8, %v12136_v58  ;;  %v12519_v20 = vpop.f32.mrb[62].mxu1  ;;  %v12562_v21 = vpop.f32.mrb[54].mxu0 }
0x180b   :  { %12653 = vst [vmem:[%s18100_s3] sm:$0xff] %v12516_v59  ;;  %12655 = vst [vmem:[%s18100_s3 + $0x10] sm:$0xff] %v12559_v61  ;;  %v12520_v22 = vadd.f32 %v12519_v20, %v12124_v44  ;;  %v12563_v23 = vadd.f32 %v12562_v21, %v12132_v56  ;;  %v12521_v10 = vpop.f32.mrb[63].mxu1  ;;  %v12564_v57 = vpop.f32.mrb[55].mxu0 }
0x180c   :  { %12654 = vst [vmem:[%s18100_s3 + $0x8] sm:$0xff] %v12518_v16  ;;  %12656 = vst [vmem:[%s18100_s3 + $0x18] sm:$0xff] %v12561_v38  ;;  %v12522_v30 = vadd.f32 %v12521_v10, %v12128_v28  ;;  %v12565_v31 = vadd.f32 %v12564_v57, %v12136_v58 }
0x180d   :  { %12661 = vst [vmem:[%s18100_s3 + $0x40] sm:$0xff] %v12520_v22  ;;  %12663 = vst [vmem:[%s18100_s3 + $0x50] sm:$0xff] %v12563_v23 }
0x180e   :  { %12662 = vst [vmem:[%s18100_s3 + $0x48] sm:$0xff] %v12522_v30  ;;  %12664 = vst [vmem:[%s18100_s3 + $0x58] sm:$0xff] %v12565_v31 }
0x1828   :  { %v12601_v45 = vpop.f32.mrb[64].mxu1  ;;  %v12644_v3 = vpop.f32.mrb[56].mxu0 }
0x1829   :  { %v12602_v15 = vadd.f32 %v12601_v45, %v12140_v32  ;;  %v12645_v35 = vadd.f32 %v12644_v3, %v12148_v55  ;;  %v12603_v60 = vpop.f32.mrb[65].mxu1  ;;  %v12646_v41 = vpop.f32.mrb[57].mxu0 }
0x182a   :  { %v12604_v17 = vadd.f32 %v12603_v60, %v12144_v36  ;;  %v12647_v42 = vadd.f32 %v12646_v41, %v12152_v25  ;;  %v12605_v11 = vpop.f32.mrb[66].mxu1  ;;  %v12648_v12 = vpop.f32.mrb[58].mxu0 }
0x182b   :  { %12657 = vst [vmem:[%s18100_s3 + $0x20] sm:$0xff] %v12602_v15  ;;  %12659 = vst [vmem:[%s18100_s3 + $0x30] sm:$0xff] %v12645_v35  ;;  %v12606_v14 = vadd.f32 %v12605_v11, %v12140_v32  ;;  %v12649_v19 = vadd.f32 %v12648_v12, %v12148_v55  ;;  %v12607_v48 = vpop.f32.mrb[67].mxu1  ;;  %v12650_v9 = vpop.f32.mrb[59].mxu0 }
0x182c   :  { %12658 = vst [vmem:[%s18100_s3 + $0x28] sm:$0xff] %v12604_v17  ;;  %12660 = vst [vmem:[%s18100_s3 + $0x38] sm:$0xff] %v12647_v42  ;;  %v12608_v26 = vadd.f32 %v12607_v48, %v12144_v36  ;;  %v12651_v0 = vadd.f32 %v12650_v9, %v12152_v25 }
0x182d   :  { %12665 = vst [vmem:[%s18100_s3 + $0x60] sm:$0xff] %v12606_v14  ;;  %12667 = vst [vmem:[%s18100_s3 + $0x70] sm:$0xff] %v12649_v19 }
0x182e   :  { %12666 = vst [vmem:[%s18100_s3 + $0x68] sm:$0xff] %v12608_v26  ;;  %12668 = vst [vmem:[%s18100_s3 + $0x78] sm:$0xff] %v12651_v0 }
0x182f   :  { %12673 = vsyncpa [#allocation3], 1 }
0x1830   :  { %12674 = vsyncpa [#allocation5], 1 }
0x1831   :  { %12675 = vsyncpa [#allocation8], 1 }
0x1832   :  { %12676 = vsyncpa [#allocation11], 1 }
0x1833   :  { %12677 = vsyncpa [#allocation14], 1 }
0x1834   :  { %12678 = vsyncpa [#allocation17], 1 }
0x1835   :  { %12679 = vsyncpa [#allocation20], 1 }
0x1836   :  { %12680 = vsyncpa [#allocation23], 1 }
0x1837   :  { %12681 = vsyncpa [#allocation26], 1 }
0x1838   :  { %12682 = vsyncpa [#allocation29], 1 }
0x1839   :  { %12683 = vsyncpa [#allocation32], 1 }
0x183a   :  { %12684 = vsyncpa [#allocation35], 1 }
0x183b   :  { %12685 = vsyncpa [#allocation38], 1 }
0x183c   :  { %12686 = vsyncpa [#allocation41], 1 }
0x183d   :  { %12687 = vsyncpa [#allocation44], 1 }
0x183e   :  { %12688 = vsyncpa [#allocation47], 1 }
0x183f   :  { %12689 = vsyncpa [#allocation50], 1 }
0x1840   :  { %12690 = vsyncpa [#allocation53], 1 }
0x1841   :  { %12691 = vsyncpa [#allocation56], 1 }
0x1842   :  { %12692 = vsyncpa [#allocation59], 1 }
0x1843   :  { %12693 = vsyncpa [#allocation62], 1 }

</bundles_post_ra>
